<compile_context>
chip_gen: v5e
topology: v5e:2x2
jax: 0.10.0
libtpu: 0.0.40
codegen_flags: <defaults>
</compile_context>

<pallas_src>
import functools

import numpy as np
import jax
import jax.numpy as jnp
from jax.experimental import pallas as pl
from jax.experimental.pallas import tpu as pltpu

BN_EPS = 1e-5

# network hyper-parameters implied by the module / params dict
BOARD_SIZE = 3
EMBD_SIZE = 3
HIDDEN_SIZE = 64
NUM_BLOCKS = 4
KH = KW = 3            # kernel_size=3, padding=1 (same conv)
NPOS = BOARD_SIZE * BOARD_SIZE

CIN_PAD = 8            # start-conv input channels padded 3 -> 8
HEAD_PAD = 8           # concatenated head-conv channels padded 3+3=6 -> 8
OUT_PAD = 128          # fused head output lanes (cols 0..8 policy, col 9 reward)


def _round_up(n, m):
    return (n + m - 1) // m * m


def _vmem():
    return pl.BlockSpec(memory_space=pltpu.MemorySpace.VMEM)


# --------------------------------------------------------------------------
# The single fused Pallas kernel
# --------------------------------------------------------------------------
def _fused_resnet_kernel(x_ref, a_ref,
                         w0_ref, g0_ref, b0_ref,
                         wb_ref, gb_ref, bb_ref,
                         wh_ref, gh_ref, bh_ref,
                         s_ref, l_ref, lb_ref,
                         out_ref, *, num_blocks, inv_n):
    """Whole ResNet forward on one VMEM-resident feature matrix.

    Feature layout: (ROWS_PAD, C) f32; row = flattened (batch, i, j) board
    position (rows >= B*9 stay zero), col = channel.
    """

    def conv_bn(x, w_at, gamma, beta, *, relu, residual=None):
        # 3x3 same-conv as 9 accumulated matmuls over shifted/masked rows.
        xb = x.astype(jnp.bfloat16)
        acc = None
        for k in range(KH * KW):
            # A_k is 0/1 and picks at most one source row per output row, so
            # p holds exact (bf16-representable) feature values.
            p = jnp.dot(a_ref[k], xb, preferred_element_type=jnp.float32)
            t = jnp.dot(p.astype(jnp.bfloat16), w_at(k),
                        preferred_element_type=jnp.float32)
            acc = t if acc is None else acc + t
        # Train-mode BatchNorm over the B*H*W real rows (padded rows are zero
        # and do not perturb the sums).  One-pass biased variance, f32 math.
        mean = jnp.sum(acc, axis=0, keepdims=True) * inv_n
        msq = jnp.sum(acc * acc, axis=0, keepdims=True) * inv_n
        var = jnp.maximum(msq - mean * mean, 0.0)
        y = (acc - mean) * jax.lax.rsqrt(var + BN_EPS) * gamma + beta
        if residual is not None:
            y = y + residual
        if relu:
            y = jnp.maximum(y, 0.0)
        return y

    # start block: conv -> BN -> ReLU
    feat = conv_bn(x_ref[...], lambda k: w0_ref[k],
                   g0_ref[...], b0_ref[...], relu=True)

    # residual blocks: out = relu(x + BN(conv2(relu(BN(conv1(x))))))
    for blk in range(num_blocks):
        i1, i2 = 2 * blk, 2 * blk + 1
        h1 = conv_bn(feat, lambda k, i=i1: wb_ref[i * 9 + k],
                     gb_ref[i1:i1 + 1, :], bb_ref[i1:i1 + 1, :], relu=True)
        feat = conv_bn(h1, lambda k, i=i2: wb_ref[i * 9 + k],
                       gb_ref[i2:i2 + 1, :], bb_ref[i2:i2 + 1, :],
                       relu=True, residual=feat)

    # both heads' convs as one concatenated width-8 conv (+BN+ReLU)
    hd = conv_bn(feat, lambda k: wh_ref[k],
                 gh_ref[...], bh_ref[...], relu=True)

    # NCHW Flatten + both Linear heads folded into 9 per-position matmuls:
    #   out[b, n] = sum_p (S_p @ hd)[b, :] @ L_p[:, n] + bias[n]
    acc = None
    for pos in range(NPOS):
        r = jnp.dot(s_ref[pos], hd, preferred_element_type=jnp.float32)
        t = jnp.dot(r, l_ref[pos], preferred_element_type=jnp.float32)
        acc = t if acc is None else acc + t
    y = acc + lb_ref[...]
    # tanh only on the reward column (index 9); policy logits stay linear.
    col = jax.lax.broadcasted_iota(jnp.int32, y.shape, 1)
    y = jnp.where(col == NPOS, jnp.tanh(y), y)
    out_ref[...] = y.astype(out_ref.dtype)


# --------------------------------------------------------------------------
# Host-side constants (built once per batch size, at trace time under jit)
# --------------------------------------------------------------------------
def _shift_matrices(batch, rows_pad):
    """A_k[r_out, r_in] = 1 iff the 3x3 same-conv output at flattened board
    position r_out reads input position r_in for kernel tap k = kh*3+kw."""
    a = np.zeros((KH * KW, rows_pad, rows_pad), np.float32)
    for kh in range(KH):
        for kw in range(KW):
            k = kh * KW + kw
            dh, dw = kh - 1, kw - 1
            for b in range(batch):
                for i in range(BOARD_SIZE):
                    for j in range(BOARD_SIZE):
                        si, sj = i + dh, j + dw
                        if 0 <= si < BOARD_SIZE and 0 <= sj < BOARD_SIZE:
                            a[k, b * NPOS + i * BOARD_SIZE + j,
                              b * NPOS + si * BOARD_SIZE + sj] = 1.0
    return jnp.asarray(a, jnp.bfloat16)


def _select_matrices(batch, b_pad, rows_pad):
    """S_p[b, b*9 + p] = 1 : picks board position p of sample b."""
    s = np.zeros((NPOS, b_pad, rows_pad), np.float32)
    for p in range(NPOS):
        for b in range(batch):
            s[p, b, b * NPOS + p] = 1.0
    return jnp.asarray(s, jnp.float32)


def _conv_w_to_taps(w_oihw, cin_pad=None):
    """(Cout,Cin,KH,KW) -> (KH*KW, Cin[_pad], Cout) bf16 tap matrices."""
    w = jnp.transpose(w_oihw, (2, 3, 1, 0))          # (KH, KW, Cin, Cout)
    kh, kw, cin, cout = w.shape
    w = w.reshape(kh * kw, cin, cout)
    if cin_pad is not None and cin_pad > cin:
        w = jnp.pad(w, ((0, 0), (0, cin_pad - cin), (0, 0)))
    return w.astype(jnp.bfloat16)


def init_params(key):
    def conv_w(k, cin, cout):
        return 0.1 * jax.random.normal(k, (cout, cin, KH, KW), jnp.float32)

    def linear_p(k, din, dout):
        kw_, kb_ = jax.random.split(k)
        return (0.1 * jax.random.normal(kw_, (dout, din), jnp.float32),
                0.1 * jax.random.normal(kb_, (dout,), jnp.float32))

    keys = jax.random.split(key, 1 + 2 * NUM_BLOCKS + 2 + 2)
    ki = iter(keys)
    p = {}

    # NOTE: conv biases are omitted on purpose -- train-mode BatchNorm subtracts
    # the batch mean, which cancels any per-channel conv bias exactly.
    p["w0"] = _conv_w_to_taps(conv_w(next(ki), EMBD_SIZE, HIDDEN_SIZE), CIN_PAD)
    p["g0"] = jnp.ones((1, HIDDEN_SIZE), jnp.float32)     # BatchNorm default init
    p["b0"] = jnp.zeros((1, HIDDEN_SIZE), jnp.float32)

    wb = [_conv_w_to_taps(conv_w(next(ki), HIDDEN_SIZE, HIDDEN_SIZE))
          for _ in range(2 * NUM_BLOCKS)]
    p["wb"] = jnp.concatenate(wb, axis=0)                  # (2*NUM_BLOCKS*9, 64, 64)
    p["gb"] = jnp.ones((2 * NUM_BLOCKS, HIDDEN_SIZE), jnp.float32)
    p["bb"] = jnp.zeros((2 * NUM_BLOCKS, HIDDEN_SIZE), jnp.float32)

    # policy + reward head convs concatenated along output channels (3+3=6),
    # padded to HEAD_PAD lanes (padded channels: weight=0, gamma=0 -> output 0).
    w_pol = conv_w(next(ki), HIDDEN_SIZE, EMBD_SIZE)
    w_rew = conv_w(next(ki), HIDDEN_SIZE, EMBD_SIZE)
    wh = jnp.concatenate([_conv_w_to_taps(w_pol), _conv_w_to_taps(w_rew)], axis=-1)
    p["wh"] = jnp.pad(wh, ((0, 0), (0, 0), (0, HEAD_PAD - 2 * EMBD_SIZE)))
    gh = np.zeros((1, HEAD_PAD), np.float32)
    gh[0, :2 * EMBD_SIZE] = 1.0
    p["gh"] = jnp.asarray(gh)
    p["bh"] = jnp.zeros((1, HEAD_PAD), jnp.float32)

    # Flatten (NCHW, channels-major) + both Linears folded into 9 per-position
    # matrices L_p[head_channel, output_unit]; cols 0..8 policy, col 9 reward.
    flat_dim = EMBD_SIZE * NPOS
    wl_pol, bl_pol = linear_p(next(ki), flat_dim, NPOS)    # (9, 27), (9,)
    wl_rew, bl_rew = linear_p(next(ki), flat_dim, 1)       # (1, 27), (1,)
    wl_pol_np, wl_rew_np = np.asarray(wl_pol), np.asarray(wl_rew)
    l = np.zeros((NPOS, HEAD_PAD, OUT_PAD), np.float32)
    for pos in range(NPOS):
        for c in range(EMBD_SIZE):
            l[pos, c, :NPOS] = wl_pol_np[:, c * NPOS + pos]
            l[pos, EMBD_SIZE + c, NPOS] = wl_rew_np[0, c * NPOS + pos]
    p["l"] = jnp.asarray(l)
    lb = np.zeros((1, OUT_PAD), np.float32)
    lb[0, :NPOS] = np.asarray(bl_pol)
    lb[0, NPOS] = np.asarray(bl_rew)[0]
    p["lb"] = jnp.asarray(lb)
    return p


# --------------------------------------------------------------------------
# Forward pass wrapper (single fused pallas_call)
# --------------------------------------------------------------------------
def resnet_forward(x_nchw, params):
    b, c, h, w = x_nchw.shape
    assert c == EMBD_SIZE and h == BOARD_SIZE and w == BOARD_SIZE
    rows = b * h * w
    rows_pad = _round_up(rows, 8)
    b_pad = _round_up(b, 8)

    # rows = flattened (batch, i, j), channels last; pad rows / channels.
    xm = jnp.transpose(x_nchw, (0, 2, 3, 1)).reshape(rows, c)
    xm = jnp.pad(xm, ((0, rows_pad - rows), (0, CIN_PAD - c)))

    a = _shift_matrices(b, rows_pad)
    s = _select_matrices(b, b_pad, rows_pad)

    kernel = functools.partial(_fused_resnet_kernel,
                               num_blocks=NUM_BLOCKS, inv_n=1.0 / rows)
    out = pl.pallas_call(
        kernel,
        out_shape=jax.ShapeDtypeStruct((b_pad, OUT_PAD), jnp.float32),
        in_specs=[_vmem()] * 14,
        out_specs=_vmem(),
        compiler_params=pltpu.CompilerParams(
            vmem_limit_bytes=32 * 1024 * 1024),
    )(xm, a,
      params["w0"], params["g0"], params["b0"],
      params["wb"], params["gb"], params["bb"],
      params["wh"], params["gh"], params["bh"],
      s, params["l"], params["lb"])

    policy_logit = out[:b, :NPOS]             # (B, 9)
    reward = out[:b, NPOS:NPOS + 1]           # (B, 1)
    return policy_logit, reward


if __name__ == "__main__":
    key = jax.random.PRNGKey(0)
    kparams, kx = jax.random.split(key)
    params = init_params(kparams)
    # input consistent with the module: (batch, embd_size, board, board)
    x = jax.random.normal(kx, (2, EMBD_SIZE, BOARD_SIZE, BOARD_SIZE), jnp.float32)

    fwd = jax.jit(resnet_forward)
    policy_logit, reward = fwd(x, params)
    jax.block_until_ready((policy_logit, reward))

    assert policy_logit.shape == (2, NPOS)
    assert reward.shape == (2, 1)
    assert bool(jnp.all(jnp.isfinite(policy_logit)))
    assert bool(jnp.all(jnp.abs(reward) <= 1.0))
    print("KERNEL_OK")
</pallas_src>

<mosaic_0001>
module attributes {stable_mosaic.version = 11 : i64} {
  func.func @_fused_resnet_kernel(%arg0: memref<24x8xf32, #tpu.memory_space<vmem>>, %arg1: memref<9x24x24xbf16, #tpu.memory_space<vmem>>, %arg2: memref<9x8x64xbf16, #tpu.memory_space<vmem>>, %arg3: memref<1x64xf32, #tpu.memory_space<vmem>>, %arg4: memref<1x64xf32, #tpu.memory_space<vmem>>, %arg5: memref<72x64x64xbf16, #tpu.memory_space<vmem>>, %arg6: memref<8x64xf32, #tpu.memory_space<vmem>>, %arg7: memref<8x64xf32, #tpu.memory_space<vmem>>, %arg8: memref<9x64x8xbf16, #tpu.memory_space<vmem>>, %arg9: memref<1x8xf32, #tpu.memory_space<vmem>>, %arg10: memref<1x8xf32, #tpu.memory_space<vmem>>, %arg11: memref<9x8x24xf32, #tpu.memory_space<vmem>>, %arg12: memref<9x8x128xf32, #tpu.memory_space<vmem>>, %arg13: memref<1x128xf32, #tpu.memory_space<vmem>>, %arg14: memref<8x128xf32, #tpu.memory_space<vmem>>) attributes {dimension_semantics = [], scalar_prefetch = 0 : i64, scratch_operands = 0 : i64, tpu.core_type = #tpu.core_type<tc>} {
    %c0 = arith.constant 0 : index
    %c0_0 = arith.constant 0 : index
    %0 = vector.load %arg0[%c0, %c0_0] : memref<24x8xf32, #tpu.memory_space<vmem>>, vector<24x8xf32>
    %c0_1 = arith.constant 0 : index
    %c0_2 = arith.constant 0 : index
    %1 = vector.load %arg3[%c0_1, %c0_2] : memref<1x64xf32, #tpu.memory_space<vmem>>, vector<1x64xf32>
    %c0_3 = arith.constant 0 : index
    %c0_4 = arith.constant 0 : index
    %2 = vector.load %arg4[%c0_3, %c0_4] : memref<1x64xf32, #tpu.memory_space<vmem>>, vector<1x64xf32>
    %3 = arith.truncf %0 : vector<24x8xf32> to vector<24x8xbf16>
    %c0_5 = arith.constant 0 : index
    %c0_6 = arith.constant 0 : index
    %c0_7 = arith.constant 0 : index
    %4 = vector.load %arg1[%c0_5, %c0_6, %c0_7] : memref<9x24x24xbf16, #tpu.memory_space<vmem>>, vector<1x24x24xbf16>
    %5 = vector.shape_cast %4 : vector<1x24x24xbf16> to vector<24x24xbf16>
    %cst = arith.constant dense<0.000000e+00> : vector<24x8xf32>
    %6 = tpu.matmul %5, %3, %cst {dimension_numbers = #tpu.dot_dimension_numbers<[1], [0], [0], [1], [0, 0, 1, 1], [], []>} : vector<24x24xbf16>, vector<24x8xbf16>, vector<24x8xf32> -> vector<24x8xf32>
    %7 = arith.truncf %6 : vector<24x8xf32> to vector<24x8xbf16>
    %c0_8 = arith.constant 0 : index
    %c0_9 = arith.constant 0 : index
    %c0_10 = arith.constant 0 : index
    %8 = vector.load %arg2[%c0_8, %c0_9, %c0_10] : memref<9x8x64xbf16, #tpu.memory_space<vmem>>, vector<1x8x64xbf16>
    %9 = vector.shape_cast %8 : vector<1x8x64xbf16> to vector<8x64xbf16>
    %cst_11 = arith.constant dense<0.000000e+00> : vector<24x64xf32>
    %10 = tpu.matmul %7, %9, %cst_11 {dimension_numbers = #tpu.dot_dimension_numbers<[1], [0], [0], [1], [0, 0, 1, 1], [], []>} : vector<24x8xbf16>, vector<8x64xbf16>, vector<24x64xf32> -> vector<24x64xf32>
    %c1 = arith.constant 1 : index
    %c0_12 = arith.constant 0 : index
    %c0_13 = arith.constant 0 : index
    %11 = vector.load %arg1[%c1, %c0_12, %c0_13] : memref<9x24x24xbf16, #tpu.memory_space<vmem>>, vector<1x24x24xbf16>
    %12 = vector.shape_cast %11 : vector<1x24x24xbf16> to vector<24x24xbf16>
    %cst_14 = arith.constant dense<0.000000e+00> : vector<24x8xf32>
    %13 = tpu.matmul %12, %3, %cst_14 {dimension_numbers = #tpu.dot_dimension_numbers<[1], [0], [0], [1], [0, 0, 1, 1], [], []>} : vector<24x24xbf16>, vector<24x8xbf16>, vector<24x8xf32> -> vector<24x8xf32>
    %14 = arith.truncf %13 : vector<24x8xf32> to vector<24x8xbf16>
    %c1_15 = arith.constant 1 : index
    %c0_16 = arith.constant 0 : index
    %c0_17 = arith.constant 0 : index
    %15 = vector.load %arg2[%c1_15, %c0_16, %c0_17] : memref<9x8x64xbf16, #tpu.memory_space<vmem>>, vector<1x8x64xbf16>
    %16 = vector.shape_cast %15 : vector<1x8x64xbf16> to vector<8x64xbf16>
    %cst_18 = arith.constant dense<0.000000e+00> : vector<24x64xf32>
    %17 = tpu.matmul %14, %16, %cst_18 {dimension_numbers = #tpu.dot_dimension_numbers<[1], [0], [0], [1], [0, 0, 1, 1], [], []>} : vector<24x8xbf16>, vector<8x64xbf16>, vector<24x64xf32> -> vector<24x64xf32>
    %18 = arith.addf %10, %17 : vector<24x64xf32>
    %c2 = arith.constant 2 : index
    %c0_19 = arith.constant 0 : index
    %c0_20 = arith.constant 0 : index
    %19 = vector.load %arg1[%c2, %c0_19, %c0_20] : memref<9x24x24xbf16, #tpu.memory_space<vmem>>, vector<1x24x24xbf16>
    %20 = vector.shape_cast %19 : vector<1x24x24xbf16> to vector<24x24xbf16>
    %cst_21 = arith.constant dense<0.000000e+00> : vector<24x8xf32>
    %21 = tpu.matmul %20, %3, %cst_21 {dimension_numbers = #tpu.dot_dimension_numbers<[1], [0], [0], [1], [0, 0, 1, 1], [], []>} : vector<24x24xbf16>, vector<24x8xbf16>, vector<24x8xf32> -> vector<24x8xf32>
    %22 = arith.truncf %21 : vector<24x8xf32> to vector<24x8xbf16>
    %c2_22 = arith.constant 2 : index
    %c0_23 = arith.constant 0 : index
    %c0_24 = arith.constant 0 : index
    %23 = vector.load %arg2[%c2_22, %c0_23, %c0_24] : memref<9x8x64xbf16, #tpu.memory_space<vmem>>, vector<1x8x64xbf16>
    %24 = vector.shape_cast %23 : vector<1x8x64xbf16> to vector<8x64xbf16>
    %cst_25 = arith.constant dense<0.000000e+00> : vector<24x64xf32>
    %25 = tpu.matmul %22, %24, %cst_25 {dimension_numbers = #tpu.dot_dimension_numbers<[1], [0], [0], [1], [0, 0, 1, 1], [], []>} : vector<24x8xbf16>, vector<8x64xbf16>, vector<24x64xf32> -> vector<24x64xf32>
    %26 = arith.addf %18, %25 : vector<24x64xf32>
    %c3 = arith.constant 3 : index
    %c0_26 = arith.constant 0 : index
    %c0_27 = arith.constant 0 : index
    %27 = vector.load %arg1[%c3, %c0_26, %c0_27] : memref<9x24x24xbf16, #tpu.memory_space<vmem>>, vector<1x24x24xbf16>
    %28 = vector.shape_cast %27 : vector<1x24x24xbf16> to vector<24x24xbf16>
    %cst_28 = arith.constant dense<0.000000e+00> : vector<24x8xf32>
    %29 = tpu.matmul %28, %3, %cst_28 {dimension_numbers = #tpu.dot_dimension_numbers<[1], [0], [0], [1], [0, 0, 1, 1], [], []>} : vector<24x24xbf16>, vector<24x8xbf16>, vector<24x8xf32> -> vector<24x8xf32>
    %30 = arith.truncf %29 : vector<24x8xf32> to vector<24x8xbf16>
    %c3_29 = arith.constant 3 : index
    %c0_30 = arith.constant 0 : index
    %c0_31 = arith.constant 0 : index
    %31 = vector.load %arg2[%c3_29, %c0_30, %c0_31] : memref<9x8x64xbf16, #tpu.memory_space<vmem>>, vector<1x8x64xbf16>
    %32 = vector.shape_cast %31 : vector<1x8x64xbf16> to vector<8x64xbf16>
    %cst_32 = arith.constant dense<0.000000e+00> : vector<24x64xf32>
    %33 = tpu.matmul %30, %32, %cst_32 {dimension_numbers = #tpu.dot_dimension_numbers<[1], [0], [0], [1], [0, 0, 1, 1], [], []>} : vector<24x8xbf16>, vector<8x64xbf16>, vector<24x64xf32> -> vector<24x64xf32>
    %34 = arith.addf %26, %33 : vector<24x64xf32>
    %c4 = arith.constant 4 : index
    %c0_33 = arith.constant 0 : index
    %c0_34 = arith.constant 0 : index
    %35 = vector.load %arg1[%c4, %c0_33, %c0_34] : memref<9x24x24xbf16, #tpu.memory_space<vmem>>, vector<1x24x24xbf16>
    %36 = vector.shape_cast %35 : vector<1x24x24xbf16> to vector<24x24xbf16>
    %cst_35 = arith.constant dense<0.000000e+00> : vector<24x8xf32>
    %37 = tpu.matmul %36, %3, %cst_35 {dimension_numbers = #tpu.dot_dimension_numbers<[1], [0], [0], [1], [0, 0, 1, 1], [], []>} : vector<24x24xbf16>, vector<24x8xbf16>, vector<24x8xf32> -> vector<24x8xf32>
    %38 = arith.truncf %37 : vector<24x8xf32> to vector<24x8xbf16>
    %c4_36 = arith.constant 4 : index
    %c0_37 = arith.constant 0 : index
    %c0_38 = arith.constant 0 : index
    %39 = vector.load %arg2[%c4_36, %c0_37, %c0_38] : memref<9x8x64xbf16, #tpu.memory_space<vmem>>, vector<1x8x64xbf16>
    %40 = vector.shape_cast %39 : vector<1x8x64xbf16> to vector<8x64xbf16>
    %cst_39 = arith.constant dense<0.000000e+00> : vector<24x64xf32>
    %41 = tpu.matmul %38, %40, %cst_39 {dimension_numbers = #tpu.dot_dimension_numbers<[1], [0], [0], [1], [0, 0, 1, 1], [], []>} : vector<24x8xbf16>, vector<8x64xbf16>, vector<24x64xf32> -> vector<24x64xf32>
    %42 = arith.addf %34, %41 : vector<24x64xf32>
    %c5 = arith.constant 5 : index
    %c0_40 = arith.constant 0 : index
    %c0_41 = arith.constant 0 : index
    %43 = vector.load %arg1[%c5, %c0_40, %c0_41] : memref<9x24x24xbf16, #tpu.memory_space<vmem>>, vector<1x24x24xbf16>
    %44 = vector.shape_cast %43 : vector<1x24x24xbf16> to vector<24x24xbf16>
    %cst_42 = arith.constant dense<0.000000e+00> : vector<24x8xf32>
    %45 = tpu.matmul %44, %3, %cst_42 {dimension_numbers = #tpu.dot_dimension_numbers<[1], [0], [0], [1], [0, 0, 1, 1], [], []>} : vector<24x24xbf16>, vector<24x8xbf16>, vector<24x8xf32> -> vector<24x8xf32>
    %46 = arith.truncf %45 : vector<24x8xf32> to vector<24x8xbf16>
    %c5_43 = arith.constant 5 : index
    %c0_44 = arith.constant 0 : index
    %c0_45 = arith.constant 0 : index
    %47 = vector.load %arg2[%c5_43, %c0_44, %c0_45] : memref<9x8x64xbf16, #tpu.memory_space<vmem>>, vector<1x8x64xbf16>
    %48 = vector.shape_cast %47 : vector<1x8x64xbf16> to vector<8x64xbf16>
    %cst_46 = arith.constant dense<0.000000e+00> : vector<24x64xf32>
    %49 = tpu.matmul %46, %48, %cst_46 {dimension_numbers = #tpu.dot_dimension_numbers<[1], [0], [0], [1], [0, 0, 1, 1], [], []>} : vector<24x8xbf16>, vector<8x64xbf16>, vector<24x64xf32> -> vector<24x64xf32>
    %50 = arith.addf %42, %49 : vector<24x64xf32>
    %c6 = arith.constant 6 : index
    %c0_47 = arith.constant 0 : index
    %c0_48 = arith.constant 0 : index
    %51 = vector.load %arg1[%c6, %c0_47, %c0_48] : memref<9x24x24xbf16, #tpu.memory_space<vmem>>, vector<1x24x24xbf16>
    %52 = vector.shape_cast %51 : vector<1x24x24xbf16> to vector<24x24xbf16>
    %cst_49 = arith.constant dense<0.000000e+00> : vector<24x8xf32>
    %53 = tpu.matmul %52, %3, %cst_49 {dimension_numbers = #tpu.dot_dimension_numbers<[1], [0], [0], [1], [0, 0, 1, 1], [], []>} : vector<24x24xbf16>, vector<24x8xbf16>, vector<24x8xf32> -> vector<24x8xf32>
    %54 = arith.truncf %53 : vector<24x8xf32> to vector<24x8xbf16>
    %c6_50 = arith.constant 6 : index
    %c0_51 = arith.constant 0 : index
    %c0_52 = arith.constant 0 : index
    %55 = vector.load %arg2[%c6_50, %c0_51, %c0_52] : memref<9x8x64xbf16, #tpu.memory_space<vmem>>, vector<1x8x64xbf16>
    %56 = vector.shape_cast %55 : vector<1x8x64xbf16> to vector<8x64xbf16>
    %cst_53 = arith.constant dense<0.000000e+00> : vector<24x64xf32>
    %57 = tpu.matmul %54, %56, %cst_53 {dimension_numbers = #tpu.dot_dimension_numbers<[1], [0], [0], [1], [0, 0, 1, 1], [], []>} : vector<24x8xbf16>, vector<8x64xbf16>, vector<24x64xf32> -> vector<24x64xf32>
    %58 = arith.addf %50, %57 : vector<24x64xf32>
    %c7 = arith.constant 7 : index
    %c0_54 = arith.constant 0 : index
    %c0_55 = arith.constant 0 : index
    %59 = vector.load %arg1[%c7, %c0_54, %c0_55] : memref<9x24x24xbf16, #tpu.memory_space<vmem>>, vector<1x24x24xbf16>
    %60 = vector.shape_cast %59 : vector<1x24x24xbf16> to vector<24x24xbf16>
    %cst_56 = arith.constant dense<0.000000e+00> : vector<24x8xf32>
    %61 = tpu.matmul %60, %3, %cst_56 {dimension_numbers = #tpu.dot_dimension_numbers<[1], [0], [0], [1], [0, 0, 1, 1], [], []>} : vector<24x24xbf16>, vector<24x8xbf16>, vector<24x8xf32> -> vector<24x8xf32>
    %62 = arith.truncf %61 : vector<24x8xf32> to vector<24x8xbf16>
    %c7_57 = arith.constant 7 : index
    %c0_58 = arith.constant 0 : index
    %c0_59 = arith.constant 0 : index
    %63 = vector.load %arg2[%c7_57, %c0_58, %c0_59] : memref<9x8x64xbf16, #tpu.memory_space<vmem>>, vector<1x8x64xbf16>
    %64 = vector.shape_cast %63 : vector<1x8x64xbf16> to vector<8x64xbf16>
    %cst_60 = arith.constant dense<0.000000e+00> : vector<24x64xf32>
    %65 = tpu.matmul %62, %64, %cst_60 {dimension_numbers = #tpu.dot_dimension_numbers<[1], [0], [0], [1], [0, 0, 1, 1], [], []>} : vector<24x8xbf16>, vector<8x64xbf16>, vector<24x64xf32> -> vector<24x64xf32>
    %66 = arith.addf %58, %65 : vector<24x64xf32>
    %c8 = arith.constant 8 : index
    %c0_61 = arith.constant 0 : index
    %c0_62 = arith.constant 0 : index
    %67 = vector.load %arg1[%c8, %c0_61, %c0_62] : memref<9x24x24xbf16, #tpu.memory_space<vmem>>, vector<1x24x24xbf16>
    %68 = vector.shape_cast %67 : vector<1x24x24xbf16> to vector<24x24xbf16>
    %cst_63 = arith.constant dense<0.000000e+00> : vector<24x8xf32>
    %69 = tpu.matmul %68, %3, %cst_63 {dimension_numbers = #tpu.dot_dimension_numbers<[1], [0], [0], [1], [0, 0, 1, 1], [], []>} : vector<24x24xbf16>, vector<24x8xbf16>, vector<24x8xf32> -> vector<24x8xf32>
    %70 = arith.truncf %69 : vector<24x8xf32> to vector<24x8xbf16>
    %c8_64 = arith.constant 8 : index
    %c0_65 = arith.constant 0 : index
    %c0_66 = arith.constant 0 : index
    %71 = vector.load %arg2[%c8_64, %c0_65, %c0_66] : memref<9x8x64xbf16, #tpu.memory_space<vmem>>, vector<1x8x64xbf16>
    %72 = vector.shape_cast %71 : vector<1x8x64xbf16> to vector<8x64xbf16>
    %cst_67 = arith.constant dense<0.000000e+00> : vector<24x64xf32>
    %73 = tpu.matmul %70, %72, %cst_67 {dimension_numbers = #tpu.dot_dimension_numbers<[1], [0], [0], [1], [0, 0, 1, 1], [], []>} : vector<24x8xbf16>, vector<8x64xbf16>, vector<24x64xf32> -> vector<24x64xf32>
    %74 = arith.addf %66, %73 : vector<24x64xf32>
    %cst_68 = arith.constant dense<0.000000e+00> : vector<64xf32>
    %75 = vector.multi_reduction <add>, %74, %cst_68 [0] : vector<24x64xf32> to vector<64xf32>
    %76 = vector.shape_cast %75 : vector<64xf32> to vector<1x64xf32>
    %cst_69 = arith.constant 0.055555556 : f32
    %77 = vector.broadcast %cst_69 : f32 to vector<1x64xf32>
    %78 = arith.mulf %76, %77 : vector<1x64xf32>
    %79 = arith.mulf %74, %74 : vector<24x64xf32>
    %cst_70 = arith.constant dense<0.000000e+00> : vector<64xf32>
    %80 = vector.multi_reduction <add>, %79, %cst_70 [0] : vector<24x64xf32> to vector<64xf32>
    %81 = vector.shape_cast %80 : vector<64xf32> to vector<1x64xf32>
    %cst_71 = arith.constant 0.055555556 : f32
    %82 = vector.broadcast %cst_71 : f32 to vector<1x64xf32>
    %83 = arith.mulf %81, %82 : vector<1x64xf32>
    %84 = arith.mulf %78, %78 : vector<1x64xf32>
    %85 = arith.subf %83, %84 : vector<1x64xf32>
    %cst_72 = arith.constant 0.000000e+00 : f32
    %86 = vector.broadcast %cst_72 : f32 to vector<1x64xf32>
    %87 = arith.maximumf %85, %86 : vector<1x64xf32>
    %88 = vector.broadcast %78 : vector<1x64xf32> to vector<24x64xf32>
    %89 = arith.subf %74, %88 : vector<24x64xf32>
    %cst_73 = arith.constant 9.99999974E-6 : f32
    %90 = vector.broadcast %cst_73 : f32 to vector<1x64xf32>
    %91 = arith.addf %87, %90 : vector<1x64xf32>
    %92 = math.rsqrt %91 : vector<1x64xf32>
    %93 = vector.broadcast %92 : vector<1x64xf32> to vector<24x64xf32>
    %94 = arith.mulf %89, %93 : vector<24x64xf32>
    %95 = vector.broadcast %1 : vector<1x64xf32> to vector<24x64xf32>
    %96 = arith.mulf %94, %95 : vector<24x64xf32>
    %97 = vector.broadcast %2 : vector<1x64xf32> to vector<24x64xf32>
    %98 = arith.addf %96, %97 : vector<24x64xf32>
    %cst_74 = arith.constant 0.000000e+00 : f32
    %99 = vector.broadcast %cst_74 : f32 to vector<24x64xf32>
    %100 = arith.maximumf %98, %99 : vector<24x64xf32>
    %c0_75 = arith.constant 0 : index
    %c0_76 = arith.constant 0 : index
    %101 = vector.load %arg6[%c0_75, %c0_76] : memref<8x64xf32, #tpu.memory_space<vmem>>, vector<1x64xf32>
    %c0_77 = arith.constant 0 : index
    %c0_78 = arith.constant 0 : index
    %102 = vector.load %arg7[%c0_77, %c0_78] : memref<8x64xf32, #tpu.memory_space<vmem>>, vector<1x64xf32>
    %103 = arith.truncf %100 : vector<24x64xf32> to vector<24x64xbf16>
    %c0_79 = arith.constant 0 : index
    %c0_80 = arith.constant 0 : index
    %c0_81 = arith.constant 0 : index
    %104 = vector.load %arg1[%c0_79, %c0_80, %c0_81] : memref<9x24x24xbf16, #tpu.memory_space<vmem>>, vector<1x24x24xbf16>
    %105 = vector.shape_cast %104 : vector<1x24x24xbf16> to vector<24x24xbf16>
    %cst_82 = arith.constant dense<0.000000e+00> : vector<24x64xf32>
    %106 = tpu.matmul %105, %103, %cst_82 {dimension_numbers = #tpu.dot_dimension_numbers<[1], [0], [0], [1], [0, 0, 1, 1], [], []>} : vector<24x24xbf16>, vector<24x64xbf16>, vector<24x64xf32> -> vector<24x64xf32>
    %107 = arith.truncf %106 : vector<24x64xf32> to vector<24x64xbf16>
    %c0_83 = arith.constant 0 : index
    %c0_84 = arith.constant 0 : index
    %c0_85 = arith.constant 0 : index
    %108 = vector.load %arg5[%c0_83, %c0_84, %c0_85] : memref<72x64x64xbf16, #tpu.memory_space<vmem>>, vector<1x64x64xbf16>
    %109 = vector.shape_cast %108 : vector<1x64x64xbf16> to vector<64x64xbf16>
    %cst_86 = arith.constant dense<0.000000e+00> : vector<24x64xf32>
    %110 = tpu.matmul %107, %109, %cst_86 {dimension_numbers = #tpu.dot_dimension_numbers<[1], [0], [0], [1], [0, 0, 1, 1], [], []>} : vector<24x64xbf16>, vector<64x64xbf16>, vector<24x64xf32> -> vector<24x64xf32>
    %c1_87 = arith.constant 1 : index
    %c0_88 = arith.constant 0 : index
    %c0_89 = arith.constant 0 : index
    %111 = vector.load %arg1[%c1_87, %c0_88, %c0_89] : memref<9x24x24xbf16, #tpu.memory_space<vmem>>, vector<1x24x24xbf16>
    %112 = vector.shape_cast %111 : vector<1x24x24xbf16> to vector<24x24xbf16>
    %cst_90 = arith.constant dense<0.000000e+00> : vector<24x64xf32>
    %113 = tpu.matmul %112, %103, %cst_90 {dimension_numbers = #tpu.dot_dimension_numbers<[1], [0], [0], [1], [0, 0, 1, 1], [], []>} : vector<24x24xbf16>, vector<24x64xbf16>, vector<24x64xf32> -> vector<24x64xf32>
    %114 = arith.truncf %113 : vector<24x64xf32> to vector<24x64xbf16>
    %c1_91 = arith.constant 1 : index
    %c0_92 = arith.constant 0 : index
    %c0_93 = arith.constant 0 : index
    %115 = vector.load %arg5[%c1_91, %c0_92, %c0_93] : memref<72x64x64xbf16, #tpu.memory_space<vmem>>, vector<1x64x64xbf16>
    %116 = vector.shape_cast %115 : vector<1x64x64xbf16> to vector<64x64xbf16>
    %cst_94 = arith.constant dense<0.000000e+00> : vector<24x64xf32>
    %117 = tpu.matmul %114, %116, %cst_94 {dimension_numbers = #tpu.dot_dimension_numbers<[1], [0], [0], [1], [0, 0, 1, 1], [], []>} : vector<24x64xbf16>, vector<64x64xbf16>, vector<24x64xf32> -> vector<24x64xf32>
    %118 = arith.addf %110, %117 : vector<24x64xf32>
    %c2_95 = arith.constant 2 : index
    %c0_96 = arith.constant 0 : index
    %c0_97 = arith.constant 0 : index
    %119 = vector.load %arg1[%c2_95, %c0_96, %c0_97] : memref<9x24x24xbf16, #tpu.memory_space<vmem>>, vector<1x24x24xbf16>
    %120 = vector.shape_cast %119 : vector<1x24x24xbf16> to vector<24x24xbf16>
    %cst_98 = arith.constant dense<0.000000e+00> : vector<24x64xf32>
    %121 = tpu.matmul %120, %103, %cst_98 {dimension_numbers = #tpu.dot_dimension_numbers<[1], [0], [0], [1], [0, 0, 1, 1], [], []>} : vector<24x24xbf16>, vector<24x64xbf16>, vector<24x64xf32> -> vector<24x64xf32>
    %122 = arith.truncf %121 : vector<24x64xf32> to vector<24x64xbf16>
    %c2_99 = arith.constant 2 : index
    %c0_100 = arith.constant 0 : index
    %c0_101 = arith.constant 0 : index
    %123 = vector.load %arg5[%c2_99, %c0_100, %c0_101] : memref<72x64x64xbf16, #tpu.memory_space<vmem>>, vector<1x64x64xbf16>
    %124 = vector.shape_cast %123 : vector<1x64x64xbf16> to vector<64x64xbf16>
    %cst_102 = arith.constant dense<0.000000e+00> : vector<24x64xf32>
    %125 = tpu.matmul %122, %124, %cst_102 {dimension_numbers = #tpu.dot_dimension_numbers<[1], [0], [0], [1], [0, 0, 1, 1], [], []>} : vector<24x64xbf16>, vector<64x64xbf16>, vector<24x64xf32> -> vector<24x64xf32>
    %126 = arith.addf %118, %125 : vector<24x64xf32>
    %c3_103 = arith.constant 3 : index
    %c0_104 = arith.constant 0 : index
    %c0_105 = arith.constant 0 : index
    %127 = vector.load %arg1[%c3_103, %c0_104, %c0_105] : memref<9x24x24xbf16, #tpu.memory_space<vmem>>, vector<1x24x24xbf16>
    %128 = vector.shape_cast %127 : vector<1x24x24xbf16> to vector<24x24xbf16>
    %cst_106 = arith.constant dense<0.000000e+00> : vector<24x64xf32>
    %129 = tpu.matmul %128, %103, %cst_106 {dimension_numbers = #tpu.dot_dimension_numbers<[1], [0], [0], [1], [0, 0, 1, 1], [], []>} : vector<24x24xbf16>, vector<24x64xbf16>, vector<24x64xf32> -> vector<24x64xf32>
    %130 = arith.truncf %129 : vector<24x64xf32> to vector<24x64xbf16>
    %c3_107 = arith.constant 3 : index
    %c0_108 = arith.constant 0 : index
    %c0_109 = arith.constant 0 : index
    %131 = vector.load %arg5[%c3_107, %c0_108, %c0_109] : memref<72x64x64xbf16, #tpu.memory_space<vmem>>, vector<1x64x64xbf16>
    %132 = vector.shape_cast %131 : vector<1x64x64xbf16> to vector<64x64xbf16>
    %cst_110 = arith.constant dense<0.000000e+00> : vector<24x64xf32>
    %133 = tpu.matmul %130, %132, %cst_110 {dimension_numbers = #tpu.dot_dimension_numbers<[1], [0], [0], [1], [0, 0, 1, 1], [], []>} : vector<24x64xbf16>, vector<64x64xbf16>, vector<24x64xf32> -> vector<24x64xf32>
    %134 = arith.addf %126, %133 : vector<24x64xf32>
    %c4_111 = arith.constant 4 : index
    %c0_112 = arith.constant 0 : index
    %c0_113 = arith.constant 0 : index
    %135 = vector.load %arg1[%c4_111, %c0_112, %c0_113] : memref<9x24x24xbf16, #tpu.memory_space<vmem>>, vector<1x24x24xbf16>
    %136 = vector.shape_cast %135 : vector<1x24x24xbf16> to vector<24x24xbf16>
    %cst_114 = arith.constant dense<0.000000e+00> : vector<24x64xf32>
    %137 = tpu.matmul %136, %103, %cst_114 {dimension_numbers = #tpu.dot_dimension_numbers<[1], [0], [0], [1], [0, 0, 1, 1], [], []>} : vector<24x24xbf16>, vector<24x64xbf16>, vector<24x64xf32> -> vector<24x64xf32>
    %138 = arith.truncf %137 : vector<24x64xf32> to vector<24x64xbf16>
    %c4_115 = arith.constant 4 : index
    %c0_116 = arith.constant 0 : index
    %c0_117 = arith.constant 0 : index
    %139 = vector.load %arg5[%c4_115, %c0_116, %c0_117] : memref<72x64x64xbf16, #tpu.memory_space<vmem>>, vector<1x64x64xbf16>
    %140 = vector.shape_cast %139 : vector<1x64x64xbf16> to vector<64x64xbf16>
    %cst_118 = arith.constant dense<0.000000e+00> : vector<24x64xf32>
    %141 = tpu.matmul %138, %140, %cst_118 {dimension_numbers = #tpu.dot_dimension_numbers<[1], [0], [0], [1], [0, 0, 1, 1], [], []>} : vector<24x64xbf16>, vector<64x64xbf16>, vector<24x64xf32> -> vector<24x64xf32>
    %142 = arith.addf %134, %141 : vector<24x64xf32>
    %c5_119 = arith.constant 5 : index
    %c0_120 = arith.constant 0 : index
    %c0_121 = arith.constant 0 : index
    %143 = vector.load %arg1[%c5_119, %c0_120, %c0_121] : memref<9x24x24xbf16, #tpu.memory_space<vmem>>, vector<1x24x24xbf16>
    %144 = vector.shape_cast %143 : vector<1x24x24xbf16> to vector<24x24xbf16>
    %cst_122 = arith.constant dense<0.000000e+00> : vector<24x64xf32>
    %145 = tpu.matmul %144, %103, %cst_122 {dimension_numbers = #tpu.dot_dimension_numbers<[1], [0], [0], [1], [0, 0, 1, 1], [], []>} : vector<24x24xbf16>, vector<24x64xbf16>, vector<24x64xf32> -> vector<24x64xf32>
    %146 = arith.truncf %145 : vector<24x64xf32> to vector<24x64xbf16>
    %c5_123 = arith.constant 5 : index
    %c0_124 = arith.constant 0 : index
    %c0_125 = arith.constant 0 : index
    %147 = vector.load %arg5[%c5_123, %c0_124, %c0_125] : memref<72x64x64xbf16, #tpu.memory_space<vmem>>, vector<1x64x64xbf16>
    %148 = vector.shape_cast %147 : vector<1x64x64xbf16> to vector<64x64xbf16>
    %cst_126 = arith.constant dense<0.000000e+00> : vector<24x64xf32>
    %149 = tpu.matmul %146, %148, %cst_126 {dimension_numbers = #tpu.dot_dimension_numbers<[1], [0], [0], [1], [0, 0, 1, 1], [], []>} : vector<24x64xbf16>, vector<64x64xbf16>, vector<24x64xf32> -> vector<24x64xf32>
    %150 = arith.addf %142, %149 : vector<24x64xf32>
    %c6_127 = arith.constant 6 : index
    %c0_128 = arith.constant 0 : index
    %c0_129 = arith.constant 0 : index
    %151 = vector.load %arg1[%c6_127, %c0_128, %c0_129] : memref<9x24x24xbf16, #tpu.memory_space<vmem>>, vector<1x24x24xbf16>
    %152 = vector.shape_cast %151 : vector<1x24x24xbf16> to vector<24x24xbf16>
    %cst_130 = arith.constant dense<0.000000e+00> : vector<24x64xf32>
    %153 = tpu.matmul %152, %103, %cst_130 {dimension_numbers = #tpu.dot_dimension_numbers<[1], [0], [0], [1], [0, 0, 1, 1], [], []>} : vector<24x24xbf16>, vector<24x64xbf16>, vector<24x64xf32> -> vector<24x64xf32>
    %154 = arith.truncf %153 : vector<24x64xf32> to vector<24x64xbf16>
    %c6_131 = arith.constant 6 : index
    %c0_132 = arith.constant 0 : index
    %c0_133 = arith.constant 0 : index
    %155 = vector.load %arg5[%c6_131, %c0_132, %c0_133] : memref<72x64x64xbf16, #tpu.memory_space<vmem>>, vector<1x64x64xbf16>
    %156 = vector.shape_cast %155 : vector<1x64x64xbf16> to vector<64x64xbf16>
    %cst_134 = arith.constant dense<0.000000e+00> : vector<24x64xf32>
    %157 = tpu.matmul %154, %156, %cst_134 {dimension_numbers = #tpu.dot_dimension_numbers<[1], [0], [0], [1], [0, 0, 1, 1], [], []>} : vector<24x64xbf16>, vector<64x64xbf16>, vector<24x64xf32> -> vector<24x64xf32>
    %158 = arith.addf %150, %157 : vector<24x64xf32>
    %c7_135 = arith.constant 7 : index
    %c0_136 = arith.constant 0 : index
    %c0_137 = arith.constant 0 : index
    %159 = vector.load %arg1[%c7_135, %c0_136, %c0_137] : memref<9x24x24xbf16, #tpu.memory_space<vmem>>, vector<1x24x24xbf16>
    %160 = vector.shape_cast %159 : vector<1x24x24xbf16> to vector<24x24xbf16>
    %cst_138 = arith.constant dense<0.000000e+00> : vector<24x64xf32>
    %161 = tpu.matmul %160, %103, %cst_138 {dimension_numbers = #tpu.dot_dimension_numbers<[1], [0], [0], [1], [0, 0, 1, 1], [], []>} : vector<24x24xbf16>, vector<24x64xbf16>, vector<24x64xf32> -> vector<24x64xf32>
    %162 = arith.truncf %161 : vector<24x64xf32> to vector<24x64xbf16>
    %c7_139 = arith.constant 7 : index
    %c0_140 = arith.constant 0 : index
    %c0_141 = arith.constant 0 : index
    %163 = vector.load %arg5[%c7_139, %c0_140, %c0_141] : memref<72x64x64xbf16, #tpu.memory_space<vmem>>, vector<1x64x64xbf16>
    %164 = vector.shape_cast %163 : vector<1x64x64xbf16> to vector<64x64xbf16>
    %cst_142 = arith.constant dense<0.000000e+00> : vector<24x64xf32>
    %165 = tpu.matmul %162, %164, %cst_142 {dimension_numbers = #tpu.dot_dimension_numbers<[1], [0], [0], [1], [0, 0, 1, 1], [], []>} : vector<24x64xbf16>, vector<64x64xbf16>, vector<24x64xf32> -> vector<24x64xf32>
    %166 = arith.addf %158, %165 : vector<24x64xf32>
    %c8_143 = arith.constant 8 : index
    %c0_144 = arith.constant 0 : index
    %c0_145 = arith.constant 0 : index
    %167 = vector.load %arg1[%c8_143, %c0_144, %c0_145] : memref<9x24x24xbf16, #tpu.memory_space<vmem>>, vector<1x24x24xbf16>
    %168 = vector.shape_cast %167 : vector<1x24x24xbf16> to vector<24x24xbf16>
    %cst_146 = arith.constant dense<0.000000e+00> : vector<24x64xf32>
    %169 = tpu.matmul %168, %103, %cst_146 {dimension_numbers = #tpu.dot_dimension_numbers<[1], [0], [0], [1], [0, 0, 1, 1], [], []>} : vector<24x24xbf16>, vector<24x64xbf16>, vector<24x64xf32> -> vector<24x64xf32>
    %170 = arith.truncf %169 : vector<24x64xf32> to vector<24x64xbf16>
    %c8_147 = arith.constant 8 : index
    %c0_148 = arith.constant 0 : index
    %c0_149 = arith.constant 0 : index
    %171 = vector.load %arg5[%c8_147, %c0_148, %c0_149] : memref<72x64x64xbf16, #tpu.memory_space<vmem>>, vector<1x64x64xbf16>
    %172 = vector.shape_cast %171 : vector<1x64x64xbf16> to vector<64x64xbf16>
    %cst_150 = arith.constant dense<0.000000e+00> : vector<24x64xf32>
    %173 = tpu.matmul %170, %172, %cst_150 {dimension_numbers = #tpu.dot_dimension_numbers<[1], [0], [0], [1], [0, 0, 1, 1], [], []>} : vector<24x64xbf16>, vector<64x64xbf16>, vector<24x64xf32> -> vector<24x64xf32>
    %174 = arith.addf %166, %173 : vector<24x64xf32>
    %cst_151 = arith.constant dense<0.000000e+00> : vector<64xf32>
    %175 = vector.multi_reduction <add>, %174, %cst_151 [0] : vector<24x64xf32> to vector<64xf32>
    %176 = vector.shape_cast %175 : vector<64xf32> to vector<1x64xf32>
    %cst_152 = arith.constant 0.055555556 : f32
    %177 = vector.broadcast %cst_152 : f32 to vector<1x64xf32>
    %178 = arith.mulf %176, %177 : vector<1x64xf32>
    %179 = arith.mulf %174, %174 : vector<24x64xf32>
    %cst_153 = arith.constant dense<0.000000e+00> : vector<64xf32>
    %180 = vector.multi_reduction <add>, %179, %cst_153 [0] : vector<24x64xf32> to vector<64xf32>
    %181 = vector.shape_cast %180 : vector<64xf32> to vector<1x64xf32>
    %cst_154 = arith.constant 0.055555556 : f32
    %182 = vector.broadcast %cst_154 : f32 to vector<1x64xf32>
    %183 = arith.mulf %181, %182 : vector<1x64xf32>
    %184 = arith.mulf %178, %178 : vector<1x64xf32>
    %185 = arith.subf %183, %184 : vector<1x64xf32>
    %cst_155 = arith.constant 0.000000e+00 : f32
    %186 = vector.broadcast %cst_155 : f32 to vector<1x64xf32>
    %187 = arith.maximumf %185, %186 : vector<1x64xf32>
    %188 = vector.broadcast %178 : vector<1x64xf32> to vector<24x64xf32>
    %189 = arith.subf %174, %188 : vector<24x64xf32>
    %cst_156 = arith.constant 9.99999974E-6 : f32
    %190 = vector.broadcast %cst_156 : f32 to vector<1x64xf32>
    %191 = arith.addf %187, %190 : vector<1x64xf32>
    %192 = math.rsqrt %191 : vector<1x64xf32>
    %193 = vector.broadcast %192 : vector<1x64xf32> to vector<24x64xf32>
    %194 = arith.mulf %189, %193 : vector<24x64xf32>
    %195 = vector.broadcast %101 : vector<1x64xf32> to vector<24x64xf32>
    %196 = arith.mulf %194, %195 : vector<24x64xf32>
    %197 = vector.broadcast %102 : vector<1x64xf32> to vector<24x64xf32>
    %198 = arith.addf %196, %197 : vector<24x64xf32>
    %cst_157 = arith.constant 0.000000e+00 : f32
    %199 = vector.broadcast %cst_157 : f32 to vector<24x64xf32>
    %200 = arith.maximumf %198, %199 : vector<24x64xf32>
    %c1_158 = arith.constant 1 : index
    %c0_159 = arith.constant 0 : index
    %201 = vector.load %arg6[%c1_158, %c0_159] : memref<8x64xf32, #tpu.memory_space<vmem>>, vector<1x64xf32>
    %c1_160 = arith.constant 1 : index
    %c0_161 = arith.constant 0 : index
    %202 = vector.load %arg7[%c1_160, %c0_161] : memref<8x64xf32, #tpu.memory_space<vmem>>, vector<1x64xf32>
    %203 = arith.truncf %200 : vector<24x64xf32> to vector<24x64xbf16>
    %c0_162 = arith.constant 0 : index
    %c0_163 = arith.constant 0 : index
    %c0_164 = arith.constant 0 : index
    %204 = vector.load %arg1[%c0_162, %c0_163, %c0_164] : memref<9x24x24xbf16, #tpu.memory_space<vmem>>, vector<1x24x24xbf16>
    %205 = vector.shape_cast %204 : vector<1x24x24xbf16> to vector<24x24xbf16>
    %cst_165 = arith.constant dense<0.000000e+00> : vector<24x64xf32>
    %206 = tpu.matmul %205, %203, %cst_165 {dimension_numbers = #tpu.dot_dimension_numbers<[1], [0], [0], [1], [0, 0, 1, 1], [], []>} : vector<24x24xbf16>, vector<24x64xbf16>, vector<24x64xf32> -> vector<24x64xf32>
    %207 = arith.truncf %206 : vector<24x64xf32> to vector<24x64xbf16>
    %c9 = arith.constant 9 : index
    %c0_166 = arith.constant 0 : index
    %c0_167 = arith.constant 0 : index
    %208 = vector.load %arg5[%c9, %c0_166, %c0_167] : memref<72x64x64xbf16, #tpu.memory_space<vmem>>, vector<1x64x64xbf16>
    %209 = vector.shape_cast %208 : vector<1x64x64xbf16> to vector<64x64xbf16>
    %cst_168 = arith.constant dense<0.000000e+00> : vector<24x64xf32>
    %210 = tpu.matmul %207, %209, %cst_168 {dimension_numbers = #tpu.dot_dimension_numbers<[1], [0], [0], [1], [0, 0, 1, 1], [], []>} : vector<24x64xbf16>, vector<64x64xbf16>, vector<24x64xf32> -> vector<24x64xf32>
    %c1_169 = arith.constant 1 : index
    %c0_170 = arith.constant 0 : index
    %c0_171 = arith.constant 0 : index
    %211 = vector.load %arg1[%c1_169, %c0_170, %c0_171] : memref<9x24x24xbf16, #tpu.memory_space<vmem>>, vector<1x24x24xbf16>
    %212 = vector.shape_cast %211 : vector<1x24x24xbf16> to vector<24x24xbf16>
    %cst_172 = arith.constant dense<0.000000e+00> : vector<24x64xf32>
    %213 = tpu.matmul %212, %203, %cst_172 {dimension_numbers = #tpu.dot_dimension_numbers<[1], [0], [0], [1], [0, 0, 1, 1], [], []>} : vector<24x24xbf16>, vector<24x64xbf16>, vector<24x64xf32> -> vector<24x64xf32>
    %214 = arith.truncf %213 : vector<24x64xf32> to vector<24x64xbf16>
    %c10 = arith.constant 10 : index
    %c0_173 = arith.constant 0 : index
    %c0_174 = arith.constant 0 : index
    %215 = vector.load %arg5[%c10, %c0_173, %c0_174] : memref<72x64x64xbf16, #tpu.memory_space<vmem>>, vector<1x64x64xbf16>
    %216 = vector.shape_cast %215 : vector<1x64x64xbf16> to vector<64x64xbf16>
    %cst_175 = arith.constant dense<0.000000e+00> : vector<24x64xf32>
    %217 = tpu.matmul %214, %216, %cst_175 {dimension_numbers = #tpu.dot_dimension_numbers<[1], [0], [0], [1], [0, 0, 1, 1], [], []>} : vector<24x64xbf16>, vector<64x64xbf16>, vector<24x64xf32> -> vector<24x64xf32>
    %218 = arith.addf %210, %217 : vector<24x64xf32>
    %c2_176 = arith.constant 2 : index
    %c0_177 = arith.constant 0 : index
    %c0_178 = arith.constant 0 : index
    %219 = vector.load %arg1[%c2_176, %c0_177, %c0_178] : memref<9x24x24xbf16, #tpu.memory_space<vmem>>, vector<1x24x24xbf16>
    %220 = vector.shape_cast %219 : vector<1x24x24xbf16> to vector<24x24xbf16>
    %cst_179 = arith.constant dense<0.000000e+00> : vector<24x64xf32>
    %221 = tpu.matmul %220, %203, %cst_179 {dimension_numbers = #tpu.dot_dimension_numbers<[1], [0], [0], [1], [0, 0, 1, 1], [], []>} : vector<24x24xbf16>, vector<24x64xbf16>, vector<24x64xf32> -> vector<24x64xf32>
    %222 = arith.truncf %221 : vector<24x64xf32> to vector<24x64xbf16>
    %c11 = arith.constant 11 : index
    %c0_180 = arith.constant 0 : index
    %c0_181 = arith.constant 0 : index
    %223 = vector.load %arg5[%c11, %c0_180, %c0_181] : memref<72x64x64xbf16, #tpu.memory_space<vmem>>, vector<1x64x64xbf16>
    %224 = vector.shape_cast %223 : vector<1x64x64xbf16> to vector<64x64xbf16>
    %cst_182 = arith.constant dense<0.000000e+00> : vector<24x64xf32>
    %225 = tpu.matmul %222, %224, %cst_182 {dimension_numbers = #tpu.dot_dimension_numbers<[1], [0], [0], [1], [0, 0, 1, 1], [], []>} : vector<24x64xbf16>, vector<64x64xbf16>, vector<24x64xf32> -> vector<24x64xf32>
    %226 = arith.addf %218, %225 : vector<24x64xf32>
    %c3_183 = arith.constant 3 : index
    %c0_184 = arith.constant 0 : index
    %c0_185 = arith.constant 0 : index
    %227 = vector.load %arg1[%c3_183, %c0_184, %c0_185] : memref<9x24x24xbf16, #tpu.memory_space<vmem>>, vector<1x24x24xbf16>
    %228 = vector.shape_cast %227 : vector<1x24x24xbf16> to vector<24x24xbf16>
    %cst_186 = arith.constant dense<0.000000e+00> : vector<24x64xf32>
    %229 = tpu.matmul %228, %203, %cst_186 {dimension_numbers = #tpu.dot_dimension_numbers<[1], [0], [0], [1], [0, 0, 1, 1], [], []>} : vector<24x24xbf16>, vector<24x64xbf16>, vector<24x64xf32> -> vector<24x64xf32>
    %230 = arith.truncf %229 : vector<24x64xf32> to vector<24x64xbf16>
    %c12 = arith.constant 12 : index
    %c0_187 = arith.constant 0 : index
    %c0_188 = arith.constant 0 : index
    %231 = vector.load %arg5[%c12, %c0_187, %c0_188] : memref<72x64x64xbf16, #tpu.memory_space<vmem>>, vector<1x64x64xbf16>
    %232 = vector.shape_cast %231 : vector<1x64x64xbf16> to vector<64x64xbf16>
    %cst_189 = arith.constant dense<0.000000e+00> : vector<24x64xf32>
    %233 = tpu.matmul %230, %232, %cst_189 {dimension_numbers = #tpu.dot_dimension_numbers<[1], [0], [0], [1], [0, 0, 1, 1], [], []>} : vector<24x64xbf16>, vector<64x64xbf16>, vector<24x64xf32> -> vector<24x64xf32>
    %234 = arith.addf %226, %233 : vector<24x64xf32>
    %c4_190 = arith.constant 4 : index
    %c0_191 = arith.constant 0 : index
    %c0_192 = arith.constant 0 : index
    %235 = vector.load %arg1[%c4_190, %c0_191, %c0_192] : memref<9x24x24xbf16, #tpu.memory_space<vmem>>, vector<1x24x24xbf16>
    %236 = vector.shape_cast %235 : vector<1x24x24xbf16> to vector<24x24xbf16>
    %cst_193 = arith.constant dense<0.000000e+00> : vector<24x64xf32>
    %237 = tpu.matmul %236, %203, %cst_193 {dimension_numbers = #tpu.dot_dimension_numbers<[1], [0], [0], [1], [0, 0, 1, 1], [], []>} : vector<24x24xbf16>, vector<24x64xbf16>, vector<24x64xf32> -> vector<24x64xf32>
    %238 = arith.truncf %237 : vector<24x64xf32> to vector<24x64xbf16>
    %c13 = arith.constant 13 : index
    %c0_194 = arith.constant 0 : index
    %c0_195 = arith.constant 0 : index
    %239 = vector.load %arg5[%c13, %c0_194, %c0_195] : memref<72x64x64xbf16, #tpu.memory_space<vmem>>, vector<1x64x64xbf16>
    %240 = vector.shape_cast %239 : vector<1x64x64xbf16> to vector<64x64xbf16>
    %cst_196 = arith.constant dense<0.000000e+00> : vector<24x64xf32>
    %241 = tpu.matmul %238, %240, %cst_196 {dimension_numbers = #tpu.dot_dimension_numbers<[1], [0], [0], [1], [0, 0, 1, 1], [], []>} : vector<24x64xbf16>, vector<64x64xbf16>, vector<24x64xf32> -> vector<24x64xf32>
    %242 = arith.addf %234, %241 : vector<24x64xf32>
    %c5_197 = arith.constant 5 : index
    %c0_198 = arith.constant 0 : index
    %c0_199 = arith.constant 0 : index
    %243 = vector.load %arg1[%c5_197, %c0_198, %c0_199] : memref<9x24x24xbf16, #tpu.memory_space<vmem>>, vector<1x24x24xbf16>
    %244 = vector.shape_cast %243 : vector<1x24x24xbf16> to vector<24x24xbf16>
    %cst_200 = arith.constant dense<0.000000e+00> : vector<24x64xf32>
    %245 = tpu.matmul %244, %203, %cst_200 {dimension_numbers = #tpu.dot_dimension_numbers<[1], [0], [0], [1], [0, 0, 1, 1], [], []>} : vector<24x24xbf16>, vector<24x64xbf16>, vector<24x64xf32> -> vector<24x64xf32>
    %246 = arith.truncf %245 : vector<24x64xf32> to vector<24x64xbf16>
    %c14 = arith.constant 14 : index
    %c0_201 = arith.constant 0 : index
    %c0_202 = arith.constant 0 : index
    %247 = vector.load %arg5[%c14, %c0_201, %c0_202] : memref<72x64x64xbf16, #tpu.memory_space<vmem>>, vector<1x64x64xbf16>
    %248 = vector.shape_cast %247 : vector<1x64x64xbf16> to vector<64x64xbf16>
    %cst_203 = arith.constant dense<0.000000e+00> : vector<24x64xf32>
    %249 = tpu.matmul %246, %248, %cst_203 {dimension_numbers = #tpu.dot_dimension_numbers<[1], [0], [0], [1], [0, 0, 1, 1], [], []>} : vector<24x64xbf16>, vector<64x64xbf16>, vector<24x64xf32> -> vector<24x64xf32>
    %250 = arith.addf %242, %249 : vector<24x64xf32>
    %c6_204 = arith.constant 6 : index
    %c0_205 = arith.constant 0 : index
    %c0_206 = arith.constant 0 : index
    %251 = vector.load %arg1[%c6_204, %c0_205, %c0_206] : memref<9x24x24xbf16, #tpu.memory_space<vmem>>, vector<1x24x24xbf16>
    %252 = vector.shape_cast %251 : vector<1x24x24xbf16> to vector<24x24xbf16>
    %cst_207 = arith.constant dense<0.000000e+00> : vector<24x64xf32>
    %253 = tpu.matmul %252, %203, %cst_207 {dimension_numbers = #tpu.dot_dimension_numbers<[1], [0], [0], [1], [0, 0, 1, 1], [], []>} : vector<24x24xbf16>, vector<24x64xbf16>, vector<24x64xf32> -> vector<24x64xf32>
    %254 = arith.truncf %253 : vector<24x64xf32> to vector<24x64xbf16>
    %c15 = arith.constant 15 : index
    %c0_208 = arith.constant 0 : index
    %c0_209 = arith.constant 0 : index
    %255 = vector.load %arg5[%c15, %c0_208, %c0_209] : memref<72x64x64xbf16, #tpu.memory_space<vmem>>, vector<1x64x64xbf16>
    %256 = vector.shape_cast %255 : vector<1x64x64xbf16> to vector<64x64xbf16>
    %cst_210 = arith.constant dense<0.000000e+00> : vector<24x64xf32>
    %257 = tpu.matmul %254, %256, %cst_210 {dimension_numbers = #tpu.dot_dimension_numbers<[1], [0], [0], [1], [0, 0, 1, 1], [], []>} : vector<24x64xbf16>, vector<64x64xbf16>, vector<24x64xf32> -> vector<24x64xf32>
    %258 = arith.addf %250, %257 : vector<24x64xf32>
    %c7_211 = arith.constant 7 : index
    %c0_212 = arith.constant 0 : index
    %c0_213 = arith.constant 0 : index
    %259 = vector.load %arg1[%c7_211, %c0_212, %c0_213] : memref<9x24x24xbf16, #tpu.memory_space<vmem>>, vector<1x24x24xbf16>
    %260 = vector.shape_cast %259 : vector<1x24x24xbf16> to vector<24x24xbf16>
    %cst_214 = arith.constant dense<0.000000e+00> : vector<24x64xf32>
    %261 = tpu.matmul %260, %203, %cst_214 {dimension_numbers = #tpu.dot_dimension_numbers<[1], [0], [0], [1], [0, 0, 1, 1], [], []>} : vector<24x24xbf16>, vector<24x64xbf16>, vector<24x64xf32> -> vector<24x64xf32>
    %262 = arith.truncf %261 : vector<24x64xf32> to vector<24x64xbf16>
    %c16 = arith.constant 16 : index
    %c0_215 = arith.constant 0 : index
    %c0_216 = arith.constant 0 : index
    %263 = vector.load %arg5[%c16, %c0_215, %c0_216] : memref<72x64x64xbf16, #tpu.memory_space<vmem>>, vector<1x64x64xbf16>
    %264 = vector.shape_cast %263 : vector<1x64x64xbf16> to vector<64x64xbf16>
    %cst_217 = arith.constant dense<0.000000e+00> : vector<24x64xf32>
    %265 = tpu.matmul %262, %264, %cst_217 {dimension_numbers = #tpu.dot_dimension_numbers<[1], [0], [0], [1], [0, 0, 1, 1], [], []>} : vector<24x64xbf16>, vector<64x64xbf16>, vector<24x64xf32> -> vector<24x64xf32>
    %266 = arith.addf %258, %265 : vector<24x64xf32>
    %c8_218 = arith.constant 8 : index
    %c0_219 = arith.constant 0 : index
    %c0_220 = arith.constant 0 : index
    %267 = vector.load %arg1[%c8_218, %c0_219, %c0_220] : memref<9x24x24xbf16, #tpu.memory_space<vmem>>, vector<1x24x24xbf16>
    %268 = vector.shape_cast %267 : vector<1x24x24xbf16> to vector<24x24xbf16>
    %cst_221 = arith.constant dense<0.000000e+00> : vector<24x64xf32>
    %269 = tpu.matmul %268, %203, %cst_221 {dimension_numbers = #tpu.dot_dimension_numbers<[1], [0], [0], [1], [0, 0, 1, 1], [], []>} : vector<24x24xbf16>, vector<24x64xbf16>, vector<24x64xf32> -> vector<24x64xf32>
    %270 = arith.truncf %269 : vector<24x64xf32> to vector<24x64xbf16>
    %c17 = arith.constant 17 : index
    %c0_222 = arith.constant 0 : index
    %c0_223 = arith.constant 0 : index
    %271 = vector.load %arg5[%c17, %c0_222, %c0_223] : memref<72x64x64xbf16, #tpu.memory_space<vmem>>, vector<1x64x64xbf16>
    %272 = vector.shape_cast %271 : vector<1x64x64xbf16> to vector<64x64xbf16>
    %cst_224 = arith.constant dense<0.000000e+00> : vector<24x64xf32>
    %273 = tpu.matmul %270, %272, %cst_224 {dimension_numbers = #tpu.dot_dimension_numbers<[1], [0], [0], [1], [0, 0, 1, 1], [], []>} : vector<24x64xbf16>, vector<64x64xbf16>, vector<24x64xf32> -> vector<24x64xf32>
    %274 = arith.addf %266, %273 : vector<24x64xf32>
    %cst_225 = arith.constant dense<0.000000e+00> : vector<64xf32>
    %275 = vector.multi_reduction <add>, %274, %cst_225 [0] : vector<24x64xf32> to vector<64xf32>
    %276 = vector.shape_cast %275 : vector<64xf32> to vector<1x64xf32>
    %cst_226 = arith.constant 0.055555556 : f32
    %277 = vector.broadcast %cst_226 : f32 to vector<1x64xf32>
    %278 = arith.mulf %276, %277 : vector<1x64xf32>
    %279 = arith.mulf %274, %274 : vector<24x64xf32>
    %cst_227 = arith.constant dense<0.000000e+00> : vector<64xf32>
    %280 = vector.multi_reduction <add>, %279, %cst_227 [0] : vector<24x64xf32> to vector<64xf32>
    %281 = vector.shape_cast %280 : vector<64xf32> to vector<1x64xf32>
    %cst_228 = arith.constant 0.055555556 : f32
    %282 = vector.broadcast %cst_228 : f32 to vector<1x64xf32>
    %283 = arith.mulf %281, %282 : vector<1x64xf32>
    %284 = arith.mulf %278, %278 : vector<1x64xf32>
    %285 = arith.subf %283, %284 : vector<1x64xf32>
    %cst_229 = arith.constant 0.000000e+00 : f32
    %286 = vector.broadcast %cst_229 : f32 to vector<1x64xf32>
    %287 = arith.maximumf %285, %286 : vector<1x64xf32>
    %288 = vector.broadcast %278 : vector<1x64xf32> to vector<24x64xf32>
    %289 = arith.subf %274, %288 : vector<24x64xf32>
    %cst_230 = arith.constant 9.99999974E-6 : f32
    %290 = vector.broadcast %cst_230 : f32 to vector<1x64xf32>
    %291 = arith.addf %287, %290 : vector<1x64xf32>
    %292 = math.rsqrt %291 : vector<1x64xf32>
    %293 = vector.broadcast %292 : vector<1x64xf32> to vector<24x64xf32>
    %294 = arith.mulf %289, %293 : vector<24x64xf32>
    %295 = vector.broadcast %201 : vector<1x64xf32> to vector<24x64xf32>
    %296 = arith.mulf %294, %295 : vector<24x64xf32>
    %297 = vector.broadcast %202 : vector<1x64xf32> to vector<24x64xf32>
    %298 = arith.addf %296, %297 : vector<24x64xf32>
    %299 = arith.addf %298, %100 : vector<24x64xf32>
    %cst_231 = arith.constant 0.000000e+00 : f32
    %300 = vector.broadcast %cst_231 : f32 to vector<24x64xf32>
    %301 = arith.maximumf %299, %300 : vector<24x64xf32>
    %c2_232 = arith.constant 2 : index
    %c0_233 = arith.constant 0 : index
    %302 = vector.load %arg6[%c2_232, %c0_233] : memref<8x64xf32, #tpu.memory_space<vmem>>, vector<1x64xf32>
    %c2_234 = arith.constant 2 : index
    %c0_235 = arith.constant 0 : index
    %303 = vector.load %arg7[%c2_234, %c0_235] : memref<8x64xf32, #tpu.memory_space<vmem>>, vector<1x64xf32>
    %304 = arith.truncf %301 : vector<24x64xf32> to vector<24x64xbf16>
    %c0_236 = arith.constant 0 : index
    %c0_237 = arith.constant 0 : index
    %c0_238 = arith.constant 0 : index
    %305 = vector.load %arg1[%c0_236, %c0_237, %c0_238] : memref<9x24x24xbf16, #tpu.memory_space<vmem>>, vector<1x24x24xbf16>
    %306 = vector.shape_cast %305 : vector<1x24x24xbf16> to vector<24x24xbf16>
    %cst_239 = arith.constant dense<0.000000e+00> : vector<24x64xf32>
    %307 = tpu.matmul %306, %304, %cst_239 {dimension_numbers = #tpu.dot_dimension_numbers<[1], [0], [0], [1], [0, 0, 1, 1], [], []>} : vector<24x24xbf16>, vector<24x64xbf16>, vector<24x64xf32> -> vector<24x64xf32>
    %308 = arith.truncf %307 : vector<24x64xf32> to vector<24x64xbf16>
    %c18 = arith.constant 18 : index
    %c0_240 = arith.constant 0 : index
    %c0_241 = arith.constant 0 : index
    %309 = vector.load %arg5[%c18, %c0_240, %c0_241] : memref<72x64x64xbf16, #tpu.memory_space<vmem>>, vector<1x64x64xbf16>
    %310 = vector.shape_cast %309 : vector<1x64x64xbf16> to vector<64x64xbf16>
    %cst_242 = arith.constant dense<0.000000e+00> : vector<24x64xf32>
    %311 = tpu.matmul %308, %310, %cst_242 {dimension_numbers = #tpu.dot_dimension_numbers<[1], [0], [0], [1], [0, 0, 1, 1], [], []>} : vector<24x64xbf16>, vector<64x64xbf16>, vector<24x64xf32> -> vector<24x64xf32>
    %c1_243 = arith.constant 1 : index
    %c0_244 = arith.constant 0 : index
    %c0_245 = arith.constant 0 : index
    %312 = vector.load %arg1[%c1_243, %c0_244, %c0_245] : memref<9x24x24xbf16, #tpu.memory_space<vmem>>, vector<1x24x24xbf16>
    %313 = vector.shape_cast %312 : vector<1x24x24xbf16> to vector<24x24xbf16>
    %cst_246 = arith.constant dense<0.000000e+00> : vector<24x64xf32>
    %314 = tpu.matmul %313, %304, %cst_246 {dimension_numbers = #tpu.dot_dimension_numbers<[1], [0], [0], [1], [0, 0, 1, 1], [], []>} : vector<24x24xbf16>, vector<24x64xbf16>, vector<24x64xf32> -> vector<24x64xf32>
    %315 = arith.truncf %314 : vector<24x64xf32> to vector<24x64xbf16>
    %c19 = arith.constant 19 : index
    %c0_247 = arith.constant 0 : index
    %c0_248 = arith.constant 0 : index
    %316 = vector.load %arg5[%c19, %c0_247, %c0_248] : memref<72x64x64xbf16, #tpu.memory_space<vmem>>, vector<1x64x64xbf16>
    %317 = vector.shape_cast %316 : vector<1x64x64xbf16> to vector<64x64xbf16>
    %cst_249 = arith.constant dense<0.000000e+00> : vector<24x64xf32>
    %318 = tpu.matmul %315, %317, %cst_249 {dimension_numbers = #tpu.dot_dimension_numbers<[1], [0], [0], [1], [0, 0, 1, 1], [], []>} : vector<24x64xbf16>, vector<64x64xbf16>, vector<24x64xf32> -> vector<24x64xf32>
    %319 = arith.addf %311, %318 : vector<24x64xf32>
    %c2_250 = arith.constant 2 : index
    %c0_251 = arith.constant 0 : index
    %c0_252 = arith.constant 0 : index
    %320 = vector.load %arg1[%c2_250, %c0_251, %c0_252] : memref<9x24x24xbf16, #tpu.memory_space<vmem>>, vector<1x24x24xbf16>
    %321 = vector.shape_cast %320 : vector<1x24x24xbf16> to vector<24x24xbf16>
    %cst_253 = arith.constant dense<0.000000e+00> : vector<24x64xf32>
    %322 = tpu.matmul %321, %304, %cst_253 {dimension_numbers = #tpu.dot_dimension_numbers<[1], [0], [0], [1], [0, 0, 1, 1], [], []>} : vector<24x24xbf16>, vector<24x64xbf16>, vector<24x64xf32> -> vector<24x64xf32>
    %323 = arith.truncf %322 : vector<24x64xf32> to vector<24x64xbf16>
    %c20 = arith.constant 20 : index
    %c0_254 = arith.constant 0 : index
    %c0_255 = arith.constant 0 : index
    %324 = vector.load %arg5[%c20, %c0_254, %c0_255] : memref<72x64x64xbf16, #tpu.memory_space<vmem>>, vector<1x64x64xbf16>
    %325 = vector.shape_cast %324 : vector<1x64x64xbf16> to vector<64x64xbf16>
    %cst_256 = arith.constant dense<0.000000e+00> : vector<24x64xf32>
    %326 = tpu.matmul %323, %325, %cst_256 {dimension_numbers = #tpu.dot_dimension_numbers<[1], [0], [0], [1], [0, 0, 1, 1], [], []>} : vector<24x64xbf16>, vector<64x64xbf16>, vector<24x64xf32> -> vector<24x64xf32>
    %327 = arith.addf %319, %326 : vector<24x64xf32>
    %c3_257 = arith.constant 3 : index
    %c0_258 = arith.constant 0 : index
    %c0_259 = arith.constant 0 : index
    %328 = vector.load %arg1[%c3_257, %c0_258, %c0_259] : memref<9x24x24xbf16, #tpu.memory_space<vmem>>, vector<1x24x24xbf16>
    %329 = vector.shape_cast %328 : vector<1x24x24xbf16> to vector<24x24xbf16>
    %cst_260 = arith.constant dense<0.000000e+00> : vector<24x64xf32>
    %330 = tpu.matmul %329, %304, %cst_260 {dimension_numbers = #tpu.dot_dimension_numbers<[1], [0], [0], [1], [0, 0, 1, 1], [], []>} : vector<24x24xbf16>, vector<24x64xbf16>, vector<24x64xf32> -> vector<24x64xf32>
    %331 = arith.truncf %330 : vector<24x64xf32> to vector<24x64xbf16>
    %c21 = arith.constant 21 : index
    %c0_261 = arith.constant 0 : index
    %c0_262 = arith.constant 0 : index
    %332 = vector.load %arg5[%c21, %c0_261, %c0_262] : memref<72x64x64xbf16, #tpu.memory_space<vmem>>, vector<1x64x64xbf16>
    %333 = vector.shape_cast %332 : vector<1x64x64xbf16> to vector<64x64xbf16>
    %cst_263 = arith.constant dense<0.000000e+00> : vector<24x64xf32>
    %334 = tpu.matmul %331, %333, %cst_263 {dimension_numbers = #tpu.dot_dimension_numbers<[1], [0], [0], [1], [0, 0, 1, 1], [], []>} : vector<24x64xbf16>, vector<64x64xbf16>, vector<24x64xf32> -> vector<24x64xf32>
    %335 = arith.addf %327, %334 : vector<24x64xf32>
    %c4_264 = arith.constant 4 : index
    %c0_265 = arith.constant 0 : index
    %c0_266 = arith.constant 0 : index
    %336 = vector.load %arg1[%c4_264, %c0_265, %c0_266] : memref<9x24x24xbf16, #tpu.memory_space<vmem>>, vector<1x24x24xbf16>
    %337 = vector.shape_cast %336 : vector<1x24x24xbf16> to vector<24x24xbf16>
    %cst_267 = arith.constant dense<0.000000e+00> : vector<24x64xf32>
    %338 = tpu.matmul %337, %304, %cst_267 {dimension_numbers = #tpu.dot_dimension_numbers<[1], [0], [0], [1], [0, 0, 1, 1], [], []>} : vector<24x24xbf16>, vector<24x64xbf16>, vector<24x64xf32> -> vector<24x64xf32>
    %339 = arith.truncf %338 : vector<24x64xf32> to vector<24x64xbf16>
    %c22 = arith.constant 22 : index
    %c0_268 = arith.constant 0 : index
    %c0_269 = arith.constant 0 : index
    %340 = vector.load %arg5[%c22, %c0_268, %c0_269] : memref<72x64x64xbf16, #tpu.memory_space<vmem>>, vector<1x64x64xbf16>
    %341 = vector.shape_cast %340 : vector<1x64x64xbf16> to vector<64x64xbf16>
    %cst_270 = arith.constant dense<0.000000e+00> : vector<24x64xf32>
    %342 = tpu.matmul %339, %341, %cst_270 {dimension_numbers = #tpu.dot_dimension_numbers<[1], [0], [0], [1], [0, 0, 1, 1], [], []>} : vector<24x64xbf16>, vector<64x64xbf16>, vector<24x64xf32> -> vector<24x64xf32>
    %343 = arith.addf %335, %342 : vector<24x64xf32>
    %c5_271 = arith.constant 5 : index
    %c0_272 = arith.constant 0 : index
    %c0_273 = arith.constant 0 : index
    %344 = vector.load %arg1[%c5_271, %c0_272, %c0_273] : memref<9x24x24xbf16, #tpu.memory_space<vmem>>, vector<1x24x24xbf16>
    %345 = vector.shape_cast %344 : vector<1x24x24xbf16> to vector<24x24xbf16>
    %cst_274 = arith.constant dense<0.000000e+00> : vector<24x64xf32>
    %346 = tpu.matmul %345, %304, %cst_274 {dimension_numbers = #tpu.dot_dimension_numbers<[1], [0], [0], [1], [0, 0, 1, 1], [], []>} : vector<24x24xbf16>, vector<24x64xbf16>, vector<24x64xf32> -> vector<24x64xf32>
    %347 = arith.truncf %346 : vector<24x64xf32> to vector<24x64xbf16>
    %c23 = arith.constant 23 : index
    %c0_275 = arith.constant 0 : index
    %c0_276 = arith.constant 0 : index
    %348 = vector.load %arg5[%c23, %c0_275, %c0_276] : memref<72x64x64xbf16, #tpu.memory_space<vmem>>, vector<1x64x64xbf16>
    %349 = vector.shape_cast %348 : vector<1x64x64xbf16> to vector<64x64xbf16>
    %cst_277 = arith.constant dense<0.000000e+00> : vector<24x64xf32>
    %350 = tpu.matmul %347, %349, %cst_277 {dimension_numbers = #tpu.dot_dimension_numbers<[1], [0], [0], [1], [0, 0, 1, 1], [], []>} : vector<24x64xbf16>, vector<64x64xbf16>, vector<24x64xf32> -> vector<24x64xf32>
    %351 = arith.addf %343, %350 : vector<24x64xf32>
    %c6_278 = arith.constant 6 : index
    %c0_279 = arith.constant 0 : index
    %c0_280 = arith.constant 0 : index
    %352 = vector.load %arg1[%c6_278, %c0_279, %c0_280] : memref<9x24x24xbf16, #tpu.memory_space<vmem>>, vector<1x24x24xbf16>
    %353 = vector.shape_cast %352 : vector<1x24x24xbf16> to vector<24x24xbf16>
    %cst_281 = arith.constant dense<0.000000e+00> : vector<24x64xf32>
    %354 = tpu.matmul %353, %304, %cst_281 {dimension_numbers = #tpu.dot_dimension_numbers<[1], [0], [0], [1], [0, 0, 1, 1], [], []>} : vector<24x24xbf16>, vector<24x64xbf16>, vector<24x64xf32> -> vector<24x64xf32>
    %355 = arith.truncf %354 : vector<24x64xf32> to vector<24x64xbf16>
    %c24 = arith.constant 24 : index
    %c0_282 = arith.constant 0 : index
    %c0_283 = arith.constant 0 : index
    %356 = vector.load %arg5[%c24, %c0_282, %c0_283] : memref<72x64x64xbf16, #tpu.memory_space<vmem>>, vector<1x64x64xbf16>
    %357 = vector.shape_cast %356 : vector<1x64x64xbf16> to vector<64x64xbf16>
    %cst_284 = arith.constant dense<0.000000e+00> : vector<24x64xf32>
    %358 = tpu.matmul %355, %357, %cst_284 {dimension_numbers = #tpu.dot_dimension_numbers<[1], [0], [0], [1], [0, 0, 1, 1], [], []>} : vector<24x64xbf16>, vector<64x64xbf16>, vector<24x64xf32> -> vector<24x64xf32>
    %359 = arith.addf %351, %358 : vector<24x64xf32>
    %c7_285 = arith.constant 7 : index
    %c0_286 = arith.constant 0 : index
    %c0_287 = arith.constant 0 : index
    %360 = vector.load %arg1[%c7_285, %c0_286, %c0_287] : memref<9x24x24xbf16, #tpu.memory_space<vmem>>, vector<1x24x24xbf16>
    %361 = vector.shape_cast %360 : vector<1x24x24xbf16> to vector<24x24xbf16>
    %cst_288 = arith.constant dense<0.000000e+00> : vector<24x64xf32>
    %362 = tpu.matmul %361, %304, %cst_288 {dimension_numbers = #tpu.dot_dimension_numbers<[1], [0], [0], [1], [0, 0, 1, 1], [], []>} : vector<24x24xbf16>, vector<24x64xbf16>, vector<24x64xf32> -> vector<24x64xf32>
    %363 = arith.truncf %362 : vector<24x64xf32> to vector<24x64xbf16>
    %c25 = arith.constant 25 : index
    %c0_289 = arith.constant 0 : index
    %c0_290 = arith.constant 0 : index
    %364 = vector.load %arg5[%c25, %c0_289, %c0_290] : memref<72x64x64xbf16, #tpu.memory_space<vmem>>, vector<1x64x64xbf16>
    %365 = vector.shape_cast %364 : vector<1x64x64xbf16> to vector<64x64xbf16>
    %cst_291 = arith.constant dense<0.000000e+00> : vector<24x64xf32>
    %366 = tpu.matmul %363, %365, %cst_291 {dimension_numbers = #tpu.dot_dimension_numbers<[1], [0], [0], [1], [0, 0, 1, 1], [], []>} : vector<24x64xbf16>, vector<64x64xbf16>, vector<24x64xf32> -> vector<24x64xf32>
    %367 = arith.addf %359, %366 : vector<24x64xf32>
    %c8_292 = arith.constant 8 : index
    %c0_293 = arith.constant 0 : index
    %c0_294 = arith.constant 0 : index
    %368 = vector.load %arg1[%c8_292, %c0_293, %c0_294] : memref<9x24x24xbf16, #tpu.memory_space<vmem>>, vector<1x24x24xbf16>
    %369 = vector.shape_cast %368 : vector<1x24x24xbf16> to vector<24x24xbf16>
    %cst_295 = arith.constant dense<0.000000e+00> : vector<24x64xf32>
    %370 = tpu.matmul %369, %304, %cst_295 {dimension_numbers = #tpu.dot_dimension_numbers<[1], [0], [0], [1], [0, 0, 1, 1], [], []>} : vector<24x24xbf16>, vector<24x64xbf16>, vector<24x64xf32> -> vector<24x64xf32>
    %371 = arith.truncf %370 : vector<24x64xf32> to vector<24x64xbf16>
    %c26 = arith.constant 26 : index
    %c0_296 = arith.constant 0 : index
    %c0_297 = arith.constant 0 : index
    %372 = vector.load %arg5[%c26, %c0_296, %c0_297] : memref<72x64x64xbf16, #tpu.memory_space<vmem>>, vector<1x64x64xbf16>
    %373 = vector.shape_cast %372 : vector<1x64x64xbf16> to vector<64x64xbf16>
    %cst_298 = arith.constant dense<0.000000e+00> : vector<24x64xf32>
    %374 = tpu.matmul %371, %373, %cst_298 {dimension_numbers = #tpu.dot_dimension_numbers<[1], [0], [0], [1], [0, 0, 1, 1], [], []>} : vector<24x64xbf16>, vector<64x64xbf16>, vector<24x64xf32> -> vector<24x64xf32>
    %375 = arith.addf %367, %374 : vector<24x64xf32>
    %cst_299 = arith.constant dense<0.000000e+00> : vector<64xf32>
    %376 = vector.multi_reduction <add>, %375, %cst_299 [0] : vector<24x64xf32> to vector<64xf32>
    %377 = vector.shape_cast %376 : vector<64xf32> to vector<1x64xf32>
    %cst_300 = arith.constant 0.055555556 : f32
    %378 = vector.broadcast %cst_300 : f32 to vector<1x64xf32>
    %379 = arith.mulf %377, %378 : vector<1x64xf32>
    %380 = arith.mulf %375, %375 : vector<24x64xf32>
    %cst_301 = arith.constant dense<0.000000e+00> : vector<64xf32>
    %381 = vector.multi_reduction <add>, %380, %cst_301 [0] : vector<24x64xf32> to vector<64xf32>
    %382 = vector.shape_cast %381 : vector<64xf32> to vector<1x64xf32>
    %cst_302 = arith.constant 0.055555556 : f32
    %383 = vector.broadcast %cst_302 : f32 to vector<1x64xf32>
    %384 = arith.mulf %382, %383 : vector<1x64xf32>
    %385 = arith.mulf %379, %379 : vector<1x64xf32>
    %386 = arith.subf %384, %385 : vector<1x64xf32>
    %cst_303 = arith.constant 0.000000e+00 : f32
    %387 = vector.broadcast %cst_303 : f32 to vector<1x64xf32>
    %388 = arith.maximumf %386, %387 : vector<1x64xf32>
    %389 = vector.broadcast %379 : vector<1x64xf32> to vector<24x64xf32>
    %390 = arith.subf %375, %389 : vector<24x64xf32>
    %cst_304 = arith.constant 9.99999974E-6 : f32
    %391 = vector.broadcast %cst_304 : f32 to vector<1x64xf32>
    %392 = arith.addf %388, %391 : vector<1x64xf32>
    %393 = math.rsqrt %392 : vector<1x64xf32>
    %394 = vector.broadcast %393 : vector<1x64xf32> to vector<24x64xf32>
    %395 = arith.mulf %390, %394 : vector<24x64xf32>
    %396 = vector.broadcast %302 : vector<1x64xf32> to vector<24x64xf32>
    %397 = arith.mulf %395, %396 : vector<24x64xf32>
    %398 = vector.broadcast %303 : vector<1x64xf32> to vector<24x64xf32>
    %399 = arith.addf %397, %398 : vector<24x64xf32>
    %cst_305 = arith.constant 0.000000e+00 : f32
    %400 = vector.broadcast %cst_305 : f32 to vector<24x64xf32>
    %401 = arith.maximumf %399, %400 : vector<24x64xf32>
    %c3_306 = arith.constant 3 : index
    %c0_307 = arith.constant 0 : index
    %402 = vector.load %arg6[%c3_306, %c0_307] : memref<8x64xf32, #tpu.memory_space<vmem>>, vector<1x64xf32>
    %c3_308 = arith.constant 3 : index
    %c0_309 = arith.constant 0 : index
    %403 = vector.load %arg7[%c3_308, %c0_309] : memref<8x64xf32, #tpu.memory_space<vmem>>, vector<1x64xf32>
    %404 = arith.truncf %401 : vector<24x64xf32> to vector<24x64xbf16>
    %c0_310 = arith.constant 0 : index
    %c0_311 = arith.constant 0 : index
    %c0_312 = arith.constant 0 : index
    %405 = vector.load %arg1[%c0_310, %c0_311, %c0_312] : memref<9x24x24xbf16, #tpu.memory_space<vmem>>, vector<1x24x24xbf16>
    %406 = vector.shape_cast %405 : vector<1x24x24xbf16> to vector<24x24xbf16>
    %cst_313 = arith.constant dense<0.000000e+00> : vector<24x64xf32>
    %407 = tpu.matmul %406, %404, %cst_313 {dimension_numbers = #tpu.dot_dimension_numbers<[1], [0], [0], [1], [0, 0, 1, 1], [], []>} : vector<24x24xbf16>, vector<24x64xbf16>, vector<24x64xf32> -> vector<24x64xf32>
    %408 = arith.truncf %407 : vector<24x64xf32> to vector<24x64xbf16>
    %c27 = arith.constant 27 : index
    %c0_314 = arith.constant 0 : index
    %c0_315 = arith.constant 0 : index
    %409 = vector.load %arg5[%c27, %c0_314, %c0_315] : memref<72x64x64xbf16, #tpu.memory_space<vmem>>, vector<1x64x64xbf16>
    %410 = vector.shape_cast %409 : vector<1x64x64xbf16> to vector<64x64xbf16>
    %cst_316 = arith.constant dense<0.000000e+00> : vector<24x64xf32>
    %411 = tpu.matmul %408, %410, %cst_316 {dimension_numbers = #tpu.dot_dimension_numbers<[1], [0], [0], [1], [0, 0, 1, 1], [], []>} : vector<24x64xbf16>, vector<64x64xbf16>, vector<24x64xf32> -> vector<24x64xf32>
    %c1_317 = arith.constant 1 : index
    %c0_318 = arith.constant 0 : index
    %c0_319 = arith.constant 0 : index
    %412 = vector.load %arg1[%c1_317, %c0_318, %c0_319] : memref<9x24x24xbf16, #tpu.memory_space<vmem>>, vector<1x24x24xbf16>
    %413 = vector.shape_cast %412 : vector<1x24x24xbf16> to vector<24x24xbf16>
    %cst_320 = arith.constant dense<0.000000e+00> : vector<24x64xf32>
    %414 = tpu.matmul %413, %404, %cst_320 {dimension_numbers = #tpu.dot_dimension_numbers<[1], [0], [0], [1], [0, 0, 1, 1], [], []>} : vector<24x24xbf16>, vector<24x64xbf16>, vector<24x64xf32> -> vector<24x64xf32>
    %415 = arith.truncf %414 : vector<24x64xf32> to vector<24x64xbf16>
    %c28 = arith.constant 28 : index
    %c0_321 = arith.constant 0 : index
    %c0_322 = arith.constant 0 : index
    %416 = vector.load %arg5[%c28, %c0_321, %c0_322] : memref<72x64x64xbf16, #tpu.memory_space<vmem>>, vector<1x64x64xbf16>
    %417 = vector.shape_cast %416 : vector<1x64x64xbf16> to vector<64x64xbf16>
    %cst_323 = arith.constant dense<0.000000e+00> : vector<24x64xf32>
    %418 = tpu.matmul %415, %417, %cst_323 {dimension_numbers = #tpu.dot_dimension_numbers<[1], [0], [0], [1], [0, 0, 1, 1], [], []>} : vector<24x64xbf16>, vector<64x64xbf16>, vector<24x64xf32> -> vector<24x64xf32>
    %419 = arith.addf %411, %418 : vector<24x64xf32>
    %c2_324 = arith.constant 2 : index
    %c0_325 = arith.constant 0 : index
    %c0_326 = arith.constant 0 : index
    %420 = vector.load %arg1[%c2_324, %c0_325, %c0_326] : memref<9x24x24xbf16, #tpu.memory_space<vmem>>, vector<1x24x24xbf16>
    %421 = vector.shape_cast %420 : vector<1x24x24xbf16> to vector<24x24xbf16>
    %cst_327 = arith.constant dense<0.000000e+00> : vector<24x64xf32>
    %422 = tpu.matmul %421, %404, %cst_327 {dimension_numbers = #tpu.dot_dimension_numbers<[1], [0], [0], [1], [0, 0, 1, 1], [], []>} : vector<24x24xbf16>, vector<24x64xbf16>, vector<24x64xf32> -> vector<24x64xf32>
    %423 = arith.truncf %422 : vector<24x64xf32> to vector<24x64xbf16>
    %c29 = arith.constant 29 : index
    %c0_328 = arith.constant 0 : index
    %c0_329 = arith.constant 0 : index
    %424 = vector.load %arg5[%c29, %c0_328, %c0_329] : memref<72x64x64xbf16, #tpu.memory_space<vmem>>, vector<1x64x64xbf16>
    %425 = vector.shape_cast %424 : vector<1x64x64xbf16> to vector<64x64xbf16>
    %cst_330 = arith.constant dense<0.000000e+00> : vector<24x64xf32>
    %426 = tpu.matmul %423, %425, %cst_330 {dimension_numbers = #tpu.dot_dimension_numbers<[1], [0], [0], [1], [0, 0, 1, 1], [], []>} : vector<24x64xbf16>, vector<64x64xbf16>, vector<24x64xf32> -> vector<24x64xf32>
    %427 = arith.addf %419, %426 : vector<24x64xf32>
    %c3_331 = arith.constant 3 : index
    %c0_332 = arith.constant 0 : index
    %c0_333 = arith.constant 0 : index
    %428 = vector.load %arg1[%c3_331, %c0_332, %c0_333] : memref<9x24x24xbf16, #tpu.memory_space<vmem>>, vector<1x24x24xbf16>
    %429 = vector.shape_cast %428 : vector<1x24x24xbf16> to vector<24x24xbf16>
    %cst_334 = arith.constant dense<0.000000e+00> : vector<24x64xf32>
    %430 = tpu.matmul %429, %404, %cst_334 {dimension_numbers = #tpu.dot_dimension_numbers<[1], [0], [0], [1], [0, 0, 1, 1], [], []>} : vector<24x24xbf16>, vector<24x64xbf16>, vector<24x64xf32> -> vector<24x64xf32>
    %431 = arith.truncf %430 : vector<24x64xf32> to vector<24x64xbf16>
    %c30 = arith.constant 30 : index
    %c0_335 = arith.constant 0 : index
    %c0_336 = arith.constant 0 : index
    %432 = vector.load %arg5[%c30, %c0_335, %c0_336] : memref<72x64x64xbf16, #tpu.memory_space<vmem>>, vector<1x64x64xbf16>
    %433 = vector.shape_cast %432 : vector<1x64x64xbf16> to vector<64x64xbf16>
    %cst_337 = arith.constant dense<0.000000e+00> : vector<24x64xf32>
    %434 = tpu.matmul %431, %433, %cst_337 {dimension_numbers = #tpu.dot_dimension_numbers<[1], [0], [0], [1], [0, 0, 1, 1], [], []>} : vector<24x64xbf16>, vector<64x64xbf16>, vector<24x64xf32> -> vector<24x64xf32>
    %435 = arith.addf %427, %434 : vector<24x64xf32>
    %c4_338 = arith.constant 4 : index
    %c0_339 = arith.constant 0 : index
    %c0_340 = arith.constant 0 : index
    %436 = vector.load %arg1[%c4_338, %c0_339, %c0_340] : memref<9x24x24xbf16, #tpu.memory_space<vmem>>, vector<1x24x24xbf16>
    %437 = vector.shape_cast %436 : vector<1x24x24xbf16> to vector<24x24xbf16>
    %cst_341 = arith.constant dense<0.000000e+00> : vector<24x64xf32>
    %438 = tpu.matmul %437, %404, %cst_341 {dimension_numbers = #tpu.dot_dimension_numbers<[1], [0], [0], [1], [0, 0, 1, 1], [], []>} : vector<24x24xbf16>, vector<24x64xbf16>, vector<24x64xf32> -> vector<24x64xf32>
    %439 = arith.truncf %438 : vector<24x64xf32> to vector<24x64xbf16>
    %c31 = arith.constant 31 : index
    %c0_342 = arith.constant 0 : index
    %c0_343 = arith.constant 0 : index
    %440 = vector.load %arg5[%c31, %c0_342, %c0_343] : memref<72x64x64xbf16, #tpu.memory_space<vmem>>, vector<1x64x64xbf16>
    %441 = vector.shape_cast %440 : vector<1x64x64xbf16> to vector<64x64xbf16>
    %cst_344 = arith.constant dense<0.000000e+00> : vector<24x64xf32>
    %442 = tpu.matmul %439, %441, %cst_344 {dimension_numbers = #tpu.dot_dimension_numbers<[1], [0], [0], [1], [0, 0, 1, 1], [], []>} : vector<24x64xbf16>, vector<64x64xbf16>, vector<24x64xf32> -> vector<24x64xf32>
    %443 = arith.addf %435, %442 : vector<24x64xf32>
    %c5_345 = arith.constant 5 : index
    %c0_346 = arith.constant 0 : index
    %c0_347 = arith.constant 0 : index
    %444 = vector.load %arg1[%c5_345, %c0_346, %c0_347] : memref<9x24x24xbf16, #tpu.memory_space<vmem>>, vector<1x24x24xbf16>
    %445 = vector.shape_cast %444 : vector<1x24x24xbf16> to vector<24x24xbf16>
    %cst_348 = arith.constant dense<0.000000e+00> : vector<24x64xf32>
    %446 = tpu.matmul %445, %404, %cst_348 {dimension_numbers = #tpu.dot_dimension_numbers<[1], [0], [0], [1], [0, 0, 1, 1], [], []>} : vector<24x24xbf16>, vector<24x64xbf16>, vector<24x64xf32> -> vector<24x64xf32>
    %447 = arith.truncf %446 : vector<24x64xf32> to vector<24x64xbf16>
    %c32 = arith.constant 32 : index
    %c0_349 = arith.constant 0 : index
    %c0_350 = arith.constant 0 : index
    %448 = vector.load %arg5[%c32, %c0_349, %c0_350] : memref<72x64x64xbf16, #tpu.memory_space<vmem>>, vector<1x64x64xbf16>
    %449 = vector.shape_cast %448 : vector<1x64x64xbf16> to vector<64x64xbf16>
    %cst_351 = arith.constant dense<0.000000e+00> : vector<24x64xf32>
    %450 = tpu.matmul %447, %449, %cst_351 {dimension_numbers = #tpu.dot_dimension_numbers<[1], [0], [0], [1], [0, 0, 1, 1], [], []>} : vector<24x64xbf16>, vector<64x64xbf16>, vector<24x64xf32> -> vector<24x64xf32>
    %451 = arith.addf %443, %450 : vector<24x64xf32>
    %c6_352 = arith.constant 6 : index
    %c0_353 = arith.constant 0 : index
    %c0_354 = arith.constant 0 : index
    %452 = vector.load %arg1[%c6_352, %c0_353, %c0_354] : memref<9x24x24xbf16, #tpu.memory_space<vmem>>, vector<1x24x24xbf16>
    %453 = vector.shape_cast %452 : vector<1x24x24xbf16> to vector<24x24xbf16>
    %cst_355 = arith.constant dense<0.000000e+00> : vector<24x64xf32>
    %454 = tpu.matmul %453, %404, %cst_355 {dimension_numbers = #tpu.dot_dimension_numbers<[1], [0], [0], [1], [0, 0, 1, 1], [], []>} : vector<24x24xbf16>, vector<24x64xbf16>, vector<24x64xf32> -> vector<24x64xf32>
    %455 = arith.truncf %454 : vector<24x64xf32> to vector<24x64xbf16>
    %c33 = arith.constant 33 : index
    %c0_356 = arith.constant 0 : index
    %c0_357 = arith.constant 0 : index
    %456 = vector.load %arg5[%c33, %c0_356, %c0_357] : memref<72x64x64xbf16, #tpu.memory_space<vmem>>, vector<1x64x64xbf16>
    %457 = vector.shape_cast %456 : vector<1x64x64xbf16> to vector<64x64xbf16>
    %cst_358 = arith.constant dense<0.000000e+00> : vector<24x64xf32>
    %458 = tpu.matmul %455, %457, %cst_358 {dimension_numbers = #tpu.dot_dimension_numbers<[1], [0], [0], [1], [0, 0, 1, 1], [], []>} : vector<24x64xbf16>, vector<64x64xbf16>, vector<24x64xf32> -> vector<24x64xf32>
    %459 = arith.addf %451, %458 : vector<24x64xf32>
    %c7_359 = arith.constant 7 : index
    %c0_360 = arith.constant 0 : index
    %c0_361 = arith.constant 0 : index
    %460 = vector.load %arg1[%c7_359, %c0_360, %c0_361] : memref<9x24x24xbf16, #tpu.memory_space<vmem>>, vector<1x24x24xbf16>
    %461 = vector.shape_cast %460 : vector<1x24x24xbf16> to vector<24x24xbf16>
    %cst_362 = arith.constant dense<0.000000e+00> : vector<24x64xf32>
    %462 = tpu.matmul %461, %404, %cst_362 {dimension_numbers = #tpu.dot_dimension_numbers<[1], [0], [0], [1], [0, 0, 1, 1], [], []>} : vector<24x24xbf16>, vector<24x64xbf16>, vector<24x64xf32> -> vector<24x64xf32>
    %463 = arith.truncf %462 : vector<24x64xf32> to vector<24x64xbf16>
    %c34 = arith.constant 34 : index
    %c0_363 = arith.constant 0 : index
    %c0_364 = arith.constant 0 : index
    %464 = vector.load %arg5[%c34, %c0_363, %c0_364] : memref<72x64x64xbf16, #tpu.memory_space<vmem>>, vector<1x64x64xbf16>
    %465 = vector.shape_cast %464 : vector<1x64x64xbf16> to vector<64x64xbf16>
    %cst_365 = arith.constant dense<0.000000e+00> : vector<24x64xf32>
    %466 = tpu.matmul %463, %465, %cst_365 {dimension_numbers = #tpu.dot_dimension_numbers<[1], [0], [0], [1], [0, 0, 1, 1], [], []>} : vector<24x64xbf16>, vector<64x64xbf16>, vector<24x64xf32> -> vector<24x64xf32>
    %467 = arith.addf %459, %466 : vector<24x64xf32>
    %c8_366 = arith.constant 8 : index
    %c0_367 = arith.constant 0 : index
    %c0_368 = arith.constant 0 : index
    %468 = vector.load %arg1[%c8_366, %c0_367, %c0_368] : memref<9x24x24xbf16, #tpu.memory_space<vmem>>, vector<1x24x24xbf16>
    %469 = vector.shape_cast %468 : vector<1x24x24xbf16> to vector<24x24xbf16>
    %cst_369 = arith.constant dense<0.000000e+00> : vector<24x64xf32>
    %470 = tpu.matmul %469, %404, %cst_369 {dimension_numbers = #tpu.dot_dimension_numbers<[1], [0], [0], [1], [0, 0, 1, 1], [], []>} : vector<24x24xbf16>, vector<24x64xbf16>, vector<24x64xf32> -> vector<24x64xf32>
    %471 = arith.truncf %470 : vector<24x64xf32> to vector<24x64xbf16>
    %c35 = arith.constant 35 : index
    %c0_370 = arith.constant 0 : index
    %c0_371 = arith.constant 0 : index
    %472 = vector.load %arg5[%c35, %c0_370, %c0_371] : memref<72x64x64xbf16, #tpu.memory_space<vmem>>, vector<1x64x64xbf16>
    %473 = vector.shape_cast %472 : vector<1x64x64xbf16> to vector<64x64xbf16>
    %cst_372 = arith.constant dense<0.000000e+00> : vector<24x64xf32>
    %474 = tpu.matmul %471, %473, %cst_372 {dimension_numbers = #tpu.dot_dimension_numbers<[1], [0], [0], [1], [0, 0, 1, 1], [], []>} : vector<24x64xbf16>, vector<64x64xbf16>, vector<24x64xf32> -> vector<24x64xf32>
    %475 = arith.addf %467, %474 : vector<24x64xf32>
    %cst_373 = arith.constant dense<0.000000e+00> : vector<64xf32>
    %476 = vector.multi_reduction <add>, %475, %cst_373 [0] : vector<24x64xf32> to vector<64xf32>
    %477 = vector.shape_cast %476 : vector<64xf32> to vector<1x64xf32>
    %cst_374 = arith.constant 0.055555556 : f32
    %478 = vector.broadcast %cst_374 : f32 to vector<1x64xf32>
    %479 = arith.mulf %477, %478 : vector<1x64xf32>
    %480 = arith.mulf %475, %475 : vector<24x64xf32>
    %cst_375 = arith.constant dense<0.000000e+00> : vector<64xf32>
    %481 = vector.multi_reduction <add>, %480, %cst_375 [0] : vector<24x64xf32> to vector<64xf32>
    %482 = vector.shape_cast %481 : vector<64xf32> to vector<1x64xf32>
    %cst_376 = arith.constant 0.055555556 : f32
    %483 = vector.broadcast %cst_376 : f32 to vector<1x64xf32>
    %484 = arith.mulf %482, %483 : vector<1x64xf32>
    %485 = arith.mulf %479, %479 : vector<1x64xf32>
    %486 = arith.subf %484, %485 : vector<1x64xf32>
    %cst_377 = arith.constant 0.000000e+00 : f32
    %487 = vector.broadcast %cst_377 : f32 to vector<1x64xf32>
    %488 = arith.maximumf %486, %487 : vector<1x64xf32>
    %489 = vector.broadcast %479 : vector<1x64xf32> to vector<24x64xf32>
    %490 = arith.subf %475, %489 : vector<24x64xf32>
    %cst_378 = arith.constant 9.99999974E-6 : f32
    %491 = vector.broadcast %cst_378 : f32 to vector<1x64xf32>
    %492 = arith.addf %488, %491 : vector<1x64xf32>
    %493 = math.rsqrt %492 : vector<1x64xf32>
    %494 = vector.broadcast %493 : vector<1x64xf32> to vector<24x64xf32>
    %495 = arith.mulf %490, %494 : vector<24x64xf32>
    %496 = vector.broadcast %402 : vector<1x64xf32> to vector<24x64xf32>
    %497 = arith.mulf %495, %496 : vector<24x64xf32>
    %498 = vector.broadcast %403 : vector<1x64xf32> to vector<24x64xf32>
    %499 = arith.addf %497, %498 : vector<24x64xf32>
    %500 = arith.addf %499, %301 : vector<24x64xf32>
    %cst_379 = arith.constant 0.000000e+00 : f32
    %501 = vector.broadcast %cst_379 : f32 to vector<24x64xf32>
    %502 = arith.maximumf %500, %501 : vector<24x64xf32>
    %c4_380 = arith.constant 4 : index
    %c0_381 = arith.constant 0 : index
    %503 = vector.load %arg6[%c4_380, %c0_381] : memref<8x64xf32, #tpu.memory_space<vmem>>, vector<1x64xf32>
    %c4_382 = arith.constant 4 : index
    %c0_383 = arith.constant 0 : index
    %504 = vector.load %arg7[%c4_382, %c0_383] : memref<8x64xf32, #tpu.memory_space<vmem>>, vector<1x64xf32>
    %505 = arith.truncf %502 : vector<24x64xf32> to vector<24x64xbf16>
    %c0_384 = arith.constant 0 : index
    %c0_385 = arith.constant 0 : index
    %c0_386 = arith.constant 0 : index
    %506 = vector.load %arg1[%c0_384, %c0_385, %c0_386] : memref<9x24x24xbf16, #tpu.memory_space<vmem>>, vector<1x24x24xbf16>
    %507 = vector.shape_cast %506 : vector<1x24x24xbf16> to vector<24x24xbf16>
    %cst_387 = arith.constant dense<0.000000e+00> : vector<24x64xf32>
    %508 = tpu.matmul %507, %505, %cst_387 {dimension_numbers = #tpu.dot_dimension_numbers<[1], [0], [0], [1], [0, 0, 1, 1], [], []>} : vector<24x24xbf16>, vector<24x64xbf16>, vector<24x64xf32> -> vector<24x64xf32>
    %509 = arith.truncf %508 : vector<24x64xf32> to vector<24x64xbf16>
    %c36 = arith.constant 36 : index
    %c0_388 = arith.constant 0 : index
    %c0_389 = arith.constant 0 : index
    %510 = vector.load %arg5[%c36, %c0_388, %c0_389] : memref<72x64x64xbf16, #tpu.memory_space<vmem>>, vector<1x64x64xbf16>
    %511 = vector.shape_cast %510 : vector<1x64x64xbf16> to vector<64x64xbf16>
    %cst_390 = arith.constant dense<0.000000e+00> : vector<24x64xf32>
    %512 = tpu.matmul %509, %511, %cst_390 {dimension_numbers = #tpu.dot_dimension_numbers<[1], [0], [0], [1], [0, 0, 1, 1], [], []>} : vector<24x64xbf16>, vector<64x64xbf16>, vector<24x64xf32> -> vector<24x64xf32>
    %c1_391 = arith.constant 1 : index
    %c0_392 = arith.constant 0 : index
    %c0_393 = arith.constant 0 : index
    %513 = vector.load %arg1[%c1_391, %c0_392, %c0_393] : memref<9x24x24xbf16, #tpu.memory_space<vmem>>, vector<1x24x24xbf16>
    %514 = vector.shape_cast %513 : vector<1x24x24xbf16> to vector<24x24xbf16>
    %cst_394 = arith.constant dense<0.000000e+00> : vector<24x64xf32>
    %515 = tpu.matmul %514, %505, %cst_394 {dimension_numbers = #tpu.dot_dimension_numbers<[1], [0], [0], [1], [0, 0, 1, 1], [], []>} : vector<24x24xbf16>, vector<24x64xbf16>, vector<24x64xf32> -> vector<24x64xf32>
    %516 = arith.truncf %515 : vector<24x64xf32> to vector<24x64xbf16>
    %c37 = arith.constant 37 : index
    %c0_395 = arith.constant 0 : index
    %c0_396 = arith.constant 0 : index
    %517 = vector.load %arg5[%c37, %c0_395, %c0_396] : memref<72x64x64xbf16, #tpu.memory_space<vmem>>, vector<1x64x64xbf16>
    %518 = vector.shape_cast %517 : vector<1x64x64xbf16> to vector<64x64xbf16>
    %cst_397 = arith.constant dense<0.000000e+00> : vector<24x64xf32>
    %519 = tpu.matmul %516, %518, %cst_397 {dimension_numbers = #tpu.dot_dimension_numbers<[1], [0], [0], [1], [0, 0, 1, 1], [], []>} : vector<24x64xbf16>, vector<64x64xbf16>, vector<24x64xf32> -> vector<24x64xf32>
    %520 = arith.addf %512, %519 : vector<24x64xf32>
    %c2_398 = arith.constant 2 : index
    %c0_399 = arith.constant 0 : index
    %c0_400 = arith.constant 0 : index
    %521 = vector.load %arg1[%c2_398, %c0_399, %c0_400] : memref<9x24x24xbf16, #tpu.memory_space<vmem>>, vector<1x24x24xbf16>
    %522 = vector.shape_cast %521 : vector<1x24x24xbf16> to vector<24x24xbf16>
    %cst_401 = arith.constant dense<0.000000e+00> : vector<24x64xf32>
    %523 = tpu.matmul %522, %505, %cst_401 {dimension_numbers = #tpu.dot_dimension_numbers<[1], [0], [0], [1], [0, 0, 1, 1], [], []>} : vector<24x24xbf16>, vector<24x64xbf16>, vector<24x64xf32> -> vector<24x64xf32>
    %524 = arith.truncf %523 : vector<24x64xf32> to vector<24x64xbf16>
    %c38 = arith.constant 38 : index
    %c0_402 = arith.constant 0 : index
    %c0_403 = arith.constant 0 : index
    %525 = vector.load %arg5[%c38, %c0_402, %c0_403] : memref<72x64x64xbf16, #tpu.memory_space<vmem>>, vector<1x64x64xbf16>
    %526 = vector.shape_cast %525 : vector<1x64x64xbf16> to vector<64x64xbf16>
    %cst_404 = arith.constant dense<0.000000e+00> : vector<24x64xf32>
    %527 = tpu.matmul %524, %526, %cst_404 {dimension_numbers = #tpu.dot_dimension_numbers<[1], [0], [0], [1], [0, 0, 1, 1], [], []>} : vector<24x64xbf16>, vector<64x64xbf16>, vector<24x64xf32> -> vector<24x64xf32>
    %528 = arith.addf %520, %527 : vector<24x64xf32>
    %c3_405 = arith.constant 3 : index
    %c0_406 = arith.constant 0 : index
    %c0_407 = arith.constant 0 : index
    %529 = vector.load %arg1[%c3_405, %c0_406, %c0_407] : memref<9x24x24xbf16, #tpu.memory_space<vmem>>, vector<1x24x24xbf16>
    %530 = vector.shape_cast %529 : vector<1x24x24xbf16> to vector<24x24xbf16>
    %cst_408 = arith.constant dense<0.000000e+00> : vector<24x64xf32>
    %531 = tpu.matmul %530, %505, %cst_408 {dimension_numbers = #tpu.dot_dimension_numbers<[1], [0], [0], [1], [0, 0, 1, 1], [], []>} : vector<24x24xbf16>, vector<24x64xbf16>, vector<24x64xf32> -> vector<24x64xf32>
    %532 = arith.truncf %531 : vector<24x64xf32> to vector<24x64xbf16>
    %c39 = arith.constant 39 : index
    %c0_409 = arith.constant 0 : index
    %c0_410 = arith.constant 0 : index
    %533 = vector.load %arg5[%c39, %c0_409, %c0_410] : memref<72x64x64xbf16, #tpu.memory_space<vmem>>, vector<1x64x64xbf16>
    %534 = vector.shape_cast %533 : vector<1x64x64xbf16> to vector<64x64xbf16>
    %cst_411 = arith.constant dense<0.000000e+00> : vector<24x64xf32>
    %535 = tpu.matmul %532, %534, %cst_411 {dimension_numbers = #tpu.dot_dimension_numbers<[1], [0], [0], [1], [0, 0, 1, 1], [], []>} : vector<24x64xbf16>, vector<64x64xbf16>, vector<24x64xf32> -> vector<24x64xf32>
    %536 = arith.addf %528, %535 : vector<24x64xf32>
    %c4_412 = arith.constant 4 : index
    %c0_413 = arith.constant 0 : index
    %c0_414 = arith.constant 0 : index
    %537 = vector.load %arg1[%c4_412, %c0_413, %c0_414] : memref<9x24x24xbf16, #tpu.memory_space<vmem>>, vector<1x24x24xbf16>
    %538 = vector.shape_cast %537 : vector<1x24x24xbf16> to vector<24x24xbf16>
    %cst_415 = arith.constant dense<0.000000e+00> : vector<24x64xf32>
    %539 = tpu.matmul %538, %505, %cst_415 {dimension_numbers = #tpu.dot_dimension_numbers<[1], [0], [0], [1], [0, 0, 1, 1], [], []>} : vector<24x24xbf16>, vector<24x64xbf16>, vector<24x64xf32> -> vector<24x64xf32>
    %540 = arith.truncf %539 : vector<24x64xf32> to vector<24x64xbf16>
    %c40 = arith.constant 40 : index
    %c0_416 = arith.constant 0 : index
    %c0_417 = arith.constant 0 : index
    %541 = vector.load %arg5[%c40, %c0_416, %c0_417] : memref<72x64x64xbf16, #tpu.memory_space<vmem>>, vector<1x64x64xbf16>
    %542 = vector.shape_cast %541 : vector<1x64x64xbf16> to vector<64x64xbf16>
    %cst_418 = arith.constant dense<0.000000e+00> : vector<24x64xf32>
    %543 = tpu.matmul %540, %542, %cst_418 {dimension_numbers = #tpu.dot_dimension_numbers<[1], [0], [0], [1], [0, 0, 1, 1], [], []>} : vector<24x64xbf16>, vector<64x64xbf16>, vector<24x64xf32> -> vector<24x64xf32>
    %544 = arith.addf %536, %543 : vector<24x64xf32>
    %c5_419 = arith.constant 5 : index
    %c0_420 = arith.constant 0 : index
    %c0_421 = arith.constant 0 : index
    %545 = vector.load %arg1[%c5_419, %c0_420, %c0_421] : memref<9x24x24xbf16, #tpu.memory_space<vmem>>, vector<1x24x24xbf16>
    %546 = vector.shape_cast %545 : vector<1x24x24xbf16> to vector<24x24xbf16>
    %cst_422 = arith.constant dense<0.000000e+00> : vector<24x64xf32>
    %547 = tpu.matmul %546, %505, %cst_422 {dimension_numbers = #tpu.dot_dimension_numbers<[1], [0], [0], [1], [0, 0, 1, 1], [], []>} : vector<24x24xbf16>, vector<24x64xbf16>, vector<24x64xf32> -> vector<24x64xf32>
    %548 = arith.truncf %547 : vector<24x64xf32> to vector<24x64xbf16>
    %c41 = arith.constant 41 : index
    %c0_423 = arith.constant 0 : index
    %c0_424 = arith.constant 0 : index
    %549 = vector.load %arg5[%c41, %c0_423, %c0_424] : memref<72x64x64xbf16, #tpu.memory_space<vmem>>, vector<1x64x64xbf16>
    %550 = vector.shape_cast %549 : vector<1x64x64xbf16> to vector<64x64xbf16>
    %cst_425 = arith.constant dense<0.000000e+00> : vector<24x64xf32>
    %551 = tpu.matmul %548, %550, %cst_425 {dimension_numbers = #tpu.dot_dimension_numbers<[1], [0], [0], [1], [0, 0, 1, 1], [], []>} : vector<24x64xbf16>, vector<64x64xbf16>, vector<24x64xf32> -> vector<24x64xf32>
    %552 = arith.addf %544, %551 : vector<24x64xf32>
    %c6_426 = arith.constant 6 : index
    %c0_427 = arith.constant 0 : index
    %c0_428 = arith.constant 0 : index
    %553 = vector.load %arg1[%c6_426, %c0_427, %c0_428] : memref<9x24x24xbf16, #tpu.memory_space<vmem>>, vector<1x24x24xbf16>
    %554 = vector.shape_cast %553 : vector<1x24x24xbf16> to vector<24x24xbf16>
    %cst_429 = arith.constant dense<0.000000e+00> : vector<24x64xf32>
    %555 = tpu.matmul %554, %505, %cst_429 {dimension_numbers = #tpu.dot_dimension_numbers<[1], [0], [0], [1], [0, 0, 1, 1], [], []>} : vector<24x24xbf16>, vector<24x64xbf16>, vector<24x64xf32> -> vector<24x64xf32>
    %556 = arith.truncf %555 : vector<24x64xf32> to vector<24x64xbf16>
    %c42 = arith.constant 42 : index
    %c0_430 = arith.constant 0 : index
    %c0_431 = arith.constant 0 : index
    %557 = vector.load %arg5[%c42, %c0_430, %c0_431] : memref<72x64x64xbf16, #tpu.memory_space<vmem>>, vector<1x64x64xbf16>
    %558 = vector.shape_cast %557 : vector<1x64x64xbf16> to vector<64x64xbf16>
    %cst_432 = arith.constant dense<0.000000e+00> : vector<24x64xf32>
    %559 = tpu.matmul %556, %558, %cst_432 {dimension_numbers = #tpu.dot_dimension_numbers<[1], [0], [0], [1], [0, 0, 1, 1], [], []>} : vector<24x64xbf16>, vector<64x64xbf16>, vector<24x64xf32> -> vector<24x64xf32>
    %560 = arith.addf %552, %559 : vector<24x64xf32>
    %c7_433 = arith.constant 7 : index
    %c0_434 = arith.constant 0 : index
    %c0_435 = arith.constant 0 : index
    %561 = vector.load %arg1[%c7_433, %c0_434, %c0_435] : memref<9x24x24xbf16, #tpu.memory_space<vmem>>, vector<1x24x24xbf16>
    %562 = vector.shape_cast %561 : vector<1x24x24xbf16> to vector<24x24xbf16>
    %cst_436 = arith.constant dense<0.000000e+00> : vector<24x64xf32>
    %563 = tpu.matmul %562, %505, %cst_436 {dimension_numbers = #tpu.dot_dimension_numbers<[1], [0], [0], [1], [0, 0, 1, 1], [], []>} : vector<24x24xbf16>, vector<24x64xbf16>, vector<24x64xf32> -> vector<24x64xf32>
    %564 = arith.truncf %563 : vector<24x64xf32> to vector<24x64xbf16>
    %c43 = arith.constant 43 : index
    %c0_437 = arith.constant 0 : index
    %c0_438 = arith.constant 0 : index
    %565 = vector.load %arg5[%c43, %c0_437, %c0_438] : memref<72x64x64xbf16, #tpu.memory_space<vmem>>, vector<1x64x64xbf16>
    %566 = vector.shape_cast %565 : vector<1x64x64xbf16> to vector<64x64xbf16>
    %cst_439 = arith.constant dense<0.000000e+00> : vector<24x64xf32>
    %567 = tpu.matmul %564, %566, %cst_439 {dimension_numbers = #tpu.dot_dimension_numbers<[1], [0], [0], [1], [0, 0, 1, 1], [], []>} : vector<24x64xbf16>, vector<64x64xbf16>, vector<24x64xf32> -> vector<24x64xf32>
    %568 = arith.addf %560, %567 : vector<24x64xf32>
    %c8_440 = arith.constant 8 : index
    %c0_441 = arith.constant 0 : index
    %c0_442 = arith.constant 0 : index
    %569 = vector.load %arg1[%c8_440, %c0_441, %c0_442] : memref<9x24x24xbf16, #tpu.memory_space<vmem>>, vector<1x24x24xbf16>
    %570 = vector.shape_cast %569 : vector<1x24x24xbf16> to vector<24x24xbf16>
    %cst_443 = arith.constant dense<0.000000e+00> : vector<24x64xf32>
    %571 = tpu.matmul %570, %505, %cst_443 {dimension_numbers = #tpu.dot_dimension_numbers<[1], [0], [0], [1], [0, 0, 1, 1], [], []>} : vector<24x24xbf16>, vector<24x64xbf16>, vector<24x64xf32> -> vector<24x64xf32>
    %572 = arith.truncf %571 : vector<24x64xf32> to vector<24x64xbf16>
    %c44 = arith.constant 44 : index
    %c0_444 = arith.constant 0 : index
    %c0_445 = arith.constant 0 : index
    %573 = vector.load %arg5[%c44, %c0_444, %c0_445] : memref<72x64x64xbf16, #tpu.memory_space<vmem>>, vector<1x64x64xbf16>
    %574 = vector.shape_cast %573 : vector<1x64x64xbf16> to vector<64x64xbf16>
    %cst_446 = arith.constant dense<0.000000e+00> : vector<24x64xf32>
    %575 = tpu.matmul %572, %574, %cst_446 {dimension_numbers = #tpu.dot_dimension_numbers<[1], [0], [0], [1], [0, 0, 1, 1], [], []>} : vector<24x64xbf16>, vector<64x64xbf16>, vector<24x64xf32> -> vector<24x64xf32>
    %576 = arith.addf %568, %575 : vector<24x64xf32>
    %cst_447 = arith.constant dense<0.000000e+00> : vector<64xf32>
    %577 = vector.multi_reduction <add>, %576, %cst_447 [0] : vector<24x64xf32> to vector<64xf32>
    %578 = vector.shape_cast %577 : vector<64xf32> to vector<1x64xf32>
    %cst_448 = arith.constant 0.055555556 : f32
    %579 = vector.broadcast %cst_448 : f32 to vector<1x64xf32>
    %580 = arith.mulf %578, %579 : vector<1x64xf32>
    %581 = arith.mulf %576, %576 : vector<24x64xf32>
    %cst_449 = arith.constant dense<0.000000e+00> : vector<64xf32>
    %582 = vector.multi_reduction <add>, %581, %cst_449 [0] : vector<24x64xf32> to vector<64xf32>
    %583 = vector.shape_cast %582 : vector<64xf32> to vector<1x64xf32>
    %cst_450 = arith.constant 0.055555556 : f32
    %584 = vector.broadcast %cst_450 : f32 to vector<1x64xf32>
    %585 = arith.mulf %583, %584 : vector<1x64xf32>
    %586 = arith.mulf %580, %580 : vector<1x64xf32>
    %587 = arith.subf %585, %586 : vector<1x64xf32>
    %cst_451 = arith.constant 0.000000e+00 : f32
    %588 = vector.broadcast %cst_451 : f32 to vector<1x64xf32>
    %589 = arith.maximumf %587, %588 : vector<1x64xf32>
    %590 = vector.broadcast %580 : vector<1x64xf32> to vector<24x64xf32>
    %591 = arith.subf %576, %590 : vector<24x64xf32>
    %cst_452 = arith.constant 9.99999974E-6 : f32
    %592 = vector.broadcast %cst_452 : f32 to vector<1x64xf32>
    %593 = arith.addf %589, %592 : vector<1x64xf32>
    %594 = math.rsqrt %593 : vector<1x64xf32>
    %595 = vector.broadcast %594 : vector<1x64xf32> to vector<24x64xf32>
    %596 = arith.mulf %591, %595 : vector<24x64xf32>
    %597 = vector.broadcast %503 : vector<1x64xf32> to vector<24x64xf32>
    %598 = arith.mulf %596, %597 : vector<24x64xf32>
    %599 = vector.broadcast %504 : vector<1x64xf32> to vector<24x64xf32>
    %600 = arith.addf %598, %599 : vector<24x64xf32>
    %cst_453 = arith.constant 0.000000e+00 : f32
    %601 = vector.broadcast %cst_453 : f32 to vector<24x64xf32>
    %602 = arith.maximumf %600, %601 : vector<24x64xf32>
    %c5_454 = arith.constant 5 : index
    %c0_455 = arith.constant 0 : index
    %603 = vector.load %arg6[%c5_454, %c0_455] : memref<8x64xf32, #tpu.memory_space<vmem>>, vector<1x64xf32>
    %c5_456 = arith.constant 5 : index
    %c0_457 = arith.constant 0 : index
    %604 = vector.load %arg7[%c5_456, %c0_457] : memref<8x64xf32, #tpu.memory_space<vmem>>, vector<1x64xf32>
    %605 = arith.truncf %602 : vector<24x64xf32> to vector<24x64xbf16>
    %c0_458 = arith.constant 0 : index
    %c0_459 = arith.constant 0 : index
    %c0_460 = arith.constant 0 : index
    %606 = vector.load %arg1[%c0_458, %c0_459, %c0_460] : memref<9x24x24xbf16, #tpu.memory_space<vmem>>, vector<1x24x24xbf16>
    %607 = vector.shape_cast %606 : vector<1x24x24xbf16> to vector<24x24xbf16>
    %cst_461 = arith.constant dense<0.000000e+00> : vector<24x64xf32>
    %608 = tpu.matmul %607, %605, %cst_461 {dimension_numbers = #tpu.dot_dimension_numbers<[1], [0], [0], [1], [0, 0, 1, 1], [], []>} : vector<24x24xbf16>, vector<24x64xbf16>, vector<24x64xf32> -> vector<24x64xf32>
    %609 = arith.truncf %608 : vector<24x64xf32> to vector<24x64xbf16>
    %c45 = arith.constant 45 : index
    %c0_462 = arith.constant 0 : index
    %c0_463 = arith.constant 0 : index
    %610 = vector.load %arg5[%c45, %c0_462, %c0_463] : memref<72x64x64xbf16, #tpu.memory_space<vmem>>, vector<1x64x64xbf16>
    %611 = vector.shape_cast %610 : vector<1x64x64xbf16> to vector<64x64xbf16>
    %cst_464 = arith.constant dense<0.000000e+00> : vector<24x64xf32>
    %612 = tpu.matmul %609, %611, %cst_464 {dimension_numbers = #tpu.dot_dimension_numbers<[1], [0], [0], [1], [0, 0, 1, 1], [], []>} : vector<24x64xbf16>, vector<64x64xbf16>, vector<24x64xf32> -> vector<24x64xf32>
    %c1_465 = arith.constant 1 : index
    %c0_466 = arith.constant 0 : index
    %c0_467 = arith.constant 0 : index
    %613 = vector.load %arg1[%c1_465, %c0_466, %c0_467] : memref<9x24x24xbf16, #tpu.memory_space<vmem>>, vector<1x24x24xbf16>
    %614 = vector.shape_cast %613 : vector<1x24x24xbf16> to vector<24x24xbf16>
    %cst_468 = arith.constant dense<0.000000e+00> : vector<24x64xf32>
    %615 = tpu.matmul %614, %605, %cst_468 {dimension_numbers = #tpu.dot_dimension_numbers<[1], [0], [0], [1], [0, 0, 1, 1], [], []>} : vector<24x24xbf16>, vector<24x64xbf16>, vector<24x64xf32> -> vector<24x64xf32>
    %616 = arith.truncf %615 : vector<24x64xf32> to vector<24x64xbf16>
    %c46 = arith.constant 46 : index
    %c0_469 = arith.constant 0 : index
    %c0_470 = arith.constant 0 : index
    %617 = vector.load %arg5[%c46, %c0_469, %c0_470] : memref<72x64x64xbf16, #tpu.memory_space<vmem>>, vector<1x64x64xbf16>
    %618 = vector.shape_cast %617 : vector<1x64x64xbf16> to vector<64x64xbf16>
    %cst_471 = arith.constant dense<0.000000e+00> : vector<24x64xf32>
    %619 = tpu.matmul %616, %618, %cst_471 {dimension_numbers = #tpu.dot_dimension_numbers<[1], [0], [0], [1], [0, 0, 1, 1], [], []>} : vector<24x64xbf16>, vector<64x64xbf16>, vector<24x64xf32> -> vector<24x64xf32>
    %620 = arith.addf %612, %619 : vector<24x64xf32>
    %c2_472 = arith.constant 2 : index
    %c0_473 = arith.constant 0 : index
    %c0_474 = arith.constant 0 : index
    %621 = vector.load %arg1[%c2_472, %c0_473, %c0_474] : memref<9x24x24xbf16, #tpu.memory_space<vmem>>, vector<1x24x24xbf16>
    %622 = vector.shape_cast %621 : vector<1x24x24xbf16> to vector<24x24xbf16>
    %cst_475 = arith.constant dense<0.000000e+00> : vector<24x64xf32>
    %623 = tpu.matmul %622, %605, %cst_475 {dimension_numbers = #tpu.dot_dimension_numbers<[1], [0], [0], [1], [0, 0, 1, 1], [], []>} : vector<24x24xbf16>, vector<24x64xbf16>, vector<24x64xf32> -> vector<24x64xf32>
    %624 = arith.truncf %623 : vector<24x64xf32> to vector<24x64xbf16>
    %c47 = arith.constant 47 : index
    %c0_476 = arith.constant 0 : index
    %c0_477 = arith.constant 0 : index
    %625 = vector.load %arg5[%c47, %c0_476, %c0_477] : memref<72x64x64xbf16, #tpu.memory_space<vmem>>, vector<1x64x64xbf16>
    %626 = vector.shape_cast %625 : vector<1x64x64xbf16> to vector<64x64xbf16>
    %cst_478 = arith.constant dense<0.000000e+00> : vector<24x64xf32>
    %627 = tpu.matmul %624, %626, %cst_478 {dimension_numbers = #tpu.dot_dimension_numbers<[1], [0], [0], [1], [0, 0, 1, 1], [], []>} : vector<24x64xbf16>, vector<64x64xbf16>, vector<24x64xf32> -> vector<24x64xf32>
    %628 = arith.addf %620, %627 : vector<24x64xf32>
    %c3_479 = arith.constant 3 : index
    %c0_480 = arith.constant 0 : index
    %c0_481 = arith.constant 0 : index
    %629 = vector.load %arg1[%c3_479, %c0_480, %c0_481] : memref<9x24x24xbf16, #tpu.memory_space<vmem>>, vector<1x24x24xbf16>
    %630 = vector.shape_cast %629 : vector<1x24x24xbf16> to vector<24x24xbf16>
    %cst_482 = arith.constant dense<0.000000e+00> : vector<24x64xf32>
    %631 = tpu.matmul %630, %605, %cst_482 {dimension_numbers = #tpu.dot_dimension_numbers<[1], [0], [0], [1], [0, 0, 1, 1], [], []>} : vector<24x24xbf16>, vector<24x64xbf16>, vector<24x64xf32> -> vector<24x64xf32>
    %632 = arith.truncf %631 : vector<24x64xf32> to vector<24x64xbf16>
    %c48 = arith.constant 48 : index
    %c0_483 = arith.constant 0 : index
    %c0_484 = arith.constant 0 : index
    %633 = vector.load %arg5[%c48, %c0_483, %c0_484] : memref<72x64x64xbf16, #tpu.memory_space<vmem>>, vector<1x64x64xbf16>
    %634 = vector.shape_cast %633 : vector<1x64x64xbf16> to vector<64x64xbf16>
    %cst_485 = arith.constant dense<0.000000e+00> : vector<24x64xf32>
    %635 = tpu.matmul %632, %634, %cst_485 {dimension_numbers = #tpu.dot_dimension_numbers<[1], [0], [0], [1], [0, 0, 1, 1], [], []>} : vector<24x64xbf16>, vector<64x64xbf16>, vector<24x64xf32> -> vector<24x64xf32>
    %636 = arith.addf %628, %635 : vector<24x64xf32>
    %c4_486 = arith.constant 4 : index
    %c0_487 = arith.constant 0 : index
    %c0_488 = arith.constant 0 : index
    %637 = vector.load %arg1[%c4_486, %c0_487, %c0_488] : memref<9x24x24xbf16, #tpu.memory_space<vmem>>, vector<1x24x24xbf16>
    %638 = vector.shape_cast %637 : vector<1x24x24xbf16> to vector<24x24xbf16>
    %cst_489 = arith.constant dense<0.000000e+00> : vector<24x64xf32>
    %639 = tpu.matmul %638, %605, %cst_489 {dimension_numbers = #tpu.dot_dimension_numbers<[1], [0], [0], [1], [0, 0, 1, 1], [], []>} : vector<24x24xbf16>, vector<24x64xbf16>, vector<24x64xf32> -> vector<24x64xf32>
    %640 = arith.truncf %639 : vector<24x64xf32> to vector<24x64xbf16>
    %c49 = arith.constant 49 : index
    %c0_490 = arith.constant 0 : index
    %c0_491 = arith.constant 0 : index
    %641 = vector.load %arg5[%c49, %c0_490, %c0_491] : memref<72x64x64xbf16, #tpu.memory_space<vmem>>, vector<1x64x64xbf16>
    %642 = vector.shape_cast %641 : vector<1x64x64xbf16> to vector<64x64xbf16>
    %cst_492 = arith.constant dense<0.000000e+00> : vector<24x64xf32>
    %643 = tpu.matmul %640, %642, %cst_492 {dimension_numbers = #tpu.dot_dimension_numbers<[1], [0], [0], [1], [0, 0, 1, 1], [], []>} : vector<24x64xbf16>, vector<64x64xbf16>, vector<24x64xf32> -> vector<24x64xf32>
    %644 = arith.addf %636, %643 : vector<24x64xf32>
    %c5_493 = arith.constant 5 : index
    %c0_494 = arith.constant 0 : index
    %c0_495 = arith.constant 0 : index
    %645 = vector.load %arg1[%c5_493, %c0_494, %c0_495] : memref<9x24x24xbf16, #tpu.memory_space<vmem>>, vector<1x24x24xbf16>
    %646 = vector.shape_cast %645 : vector<1x24x24xbf16> to vector<24x24xbf16>
    %cst_496 = arith.constant dense<0.000000e+00> : vector<24x64xf32>
    %647 = tpu.matmul %646, %605, %cst_496 {dimension_numbers = #tpu.dot_dimension_numbers<[1], [0], [0], [1], [0, 0, 1, 1], [], []>} : vector<24x24xbf16>, vector<24x64xbf16>, vector<24x64xf32> -> vector<24x64xf32>
    %648 = arith.truncf %647 : vector<24x64xf32> to vector<24x64xbf16>
    %c50 = arith.constant 50 : index
    %c0_497 = arith.constant 0 : index
    %c0_498 = arith.constant 0 : index
    %649 = vector.load %arg5[%c50, %c0_497, %c0_498] : memref<72x64x64xbf16, #tpu.memory_space<vmem>>, vector<1x64x64xbf16>
    %650 = vector.shape_cast %649 : vector<1x64x64xbf16> to vector<64x64xbf16>
    %cst_499 = arith.constant dense<0.000000e+00> : vector<24x64xf32>
    %651 = tpu.matmul %648, %650, %cst_499 {dimension_numbers = #tpu.dot_dimension_numbers<[1], [0], [0], [1], [0, 0, 1, 1], [], []>} : vector<24x64xbf16>, vector<64x64xbf16>, vector<24x64xf32> -> vector<24x64xf32>
    %652 = arith.addf %644, %651 : vector<24x64xf32>
    %c6_500 = arith.constant 6 : index
    %c0_501 = arith.constant 0 : index
    %c0_502 = arith.constant 0 : index
    %653 = vector.load %arg1[%c6_500, %c0_501, %c0_502] : memref<9x24x24xbf16, #tpu.memory_space<vmem>>, vector<1x24x24xbf16>
    %654 = vector.shape_cast %653 : vector<1x24x24xbf16> to vector<24x24xbf16>
    %cst_503 = arith.constant dense<0.000000e+00> : vector<24x64xf32>
    %655 = tpu.matmul %654, %605, %cst_503 {dimension_numbers = #tpu.dot_dimension_numbers<[1], [0], [0], [1], [0, 0, 1, 1], [], []>} : vector<24x24xbf16>, vector<24x64xbf16>, vector<24x64xf32> -> vector<24x64xf32>
    %656 = arith.truncf %655 : vector<24x64xf32> to vector<24x64xbf16>
    %c51 = arith.constant 51 : index
    %c0_504 = arith.constant 0 : index
    %c0_505 = arith.constant 0 : index
    %657 = vector.load %arg5[%c51, %c0_504, %c0_505] : memref<72x64x64xbf16, #tpu.memory_space<vmem>>, vector<1x64x64xbf16>
    %658 = vector.shape_cast %657 : vector<1x64x64xbf16> to vector<64x64xbf16>
    %cst_506 = arith.constant dense<0.000000e+00> : vector<24x64xf32>
    %659 = tpu.matmul %656, %658, %cst_506 {dimension_numbers = #tpu.dot_dimension_numbers<[1], [0], [0], [1], [0, 0, 1, 1], [], []>} : vector<24x64xbf16>, vector<64x64xbf16>, vector<24x64xf32> -> vector<24x64xf32>
    %660 = arith.addf %652, %659 : vector<24x64xf32>
    %c7_507 = arith.constant 7 : index
    %c0_508 = arith.constant 0 : index
    %c0_509 = arith.constant 0 : index
    %661 = vector.load %arg1[%c7_507, %c0_508, %c0_509] : memref<9x24x24xbf16, #tpu.memory_space<vmem>>, vector<1x24x24xbf16>
    %662 = vector.shape_cast %661 : vector<1x24x24xbf16> to vector<24x24xbf16>
    %cst_510 = arith.constant dense<0.000000e+00> : vector<24x64xf32>
    %663 = tpu.matmul %662, %605, %cst_510 {dimension_numbers = #tpu.dot_dimension_numbers<[1], [0], [0], [1], [0, 0, 1, 1], [], []>} : vector<24x24xbf16>, vector<24x64xbf16>, vector<24x64xf32> -> vector<24x64xf32>
    %664 = arith.truncf %663 : vector<24x64xf32> to vector<24x64xbf16>
    %c52 = arith.constant 52 : index
    %c0_511 = arith.constant 0 : index
    %c0_512 = arith.constant 0 : index
    %665 = vector.load %arg5[%c52, %c0_511, %c0_512] : memref<72x64x64xbf16, #tpu.memory_space<vmem>>, vector<1x64x64xbf16>
    %666 = vector.shape_cast %665 : vector<1x64x64xbf16> to vector<64x64xbf16>
    %cst_513 = arith.constant dense<0.000000e+00> : vector<24x64xf32>
    %667 = tpu.matmul %664, %666, %cst_513 {dimension_numbers = #tpu.dot_dimension_numbers<[1], [0], [0], [1], [0, 0, 1, 1], [], []>} : vector<24x64xbf16>, vector<64x64xbf16>, vector<24x64xf32> -> vector<24x64xf32>
    %668 = arith.addf %660, %667 : vector<24x64xf32>
    %c8_514 = arith.constant 8 : index
    %c0_515 = arith.constant 0 : index
    %c0_516 = arith.constant 0 : index
    %669 = vector.load %arg1[%c8_514, %c0_515, %c0_516] : memref<9x24x24xbf16, #tpu.memory_space<vmem>>, vector<1x24x24xbf16>
    %670 = vector.shape_cast %669 : vector<1x24x24xbf16> to vector<24x24xbf16>
    %cst_517 = arith.constant dense<0.000000e+00> : vector<24x64xf32>
    %671 = tpu.matmul %670, %605, %cst_517 {dimension_numbers = #tpu.dot_dimension_numbers<[1], [0], [0], [1], [0, 0, 1, 1], [], []>} : vector<24x24xbf16>, vector<24x64xbf16>, vector<24x64xf32> -> vector<24x64xf32>
    %672 = arith.truncf %671 : vector<24x64xf32> to vector<24x64xbf16>
    %c53 = arith.constant 53 : index
    %c0_518 = arith.constant 0 : index
    %c0_519 = arith.constant 0 : index
    %673 = vector.load %arg5[%c53, %c0_518, %c0_519] : memref<72x64x64xbf16, #tpu.memory_space<vmem>>, vector<1x64x64xbf16>
    %674 = vector.shape_cast %673 : vector<1x64x64xbf16> to vector<64x64xbf16>
    %cst_520 = arith.constant dense<0.000000e+00> : vector<24x64xf32>
    %675 = tpu.matmul %672, %674, %cst_520 {dimension_numbers = #tpu.dot_dimension_numbers<[1], [0], [0], [1], [0, 0, 1, 1], [], []>} : vector<24x64xbf16>, vector<64x64xbf16>, vector<24x64xf32> -> vector<24x64xf32>
    %676 = arith.addf %668, %675 : vector<24x64xf32>
    %cst_521 = arith.constant dense<0.000000e+00> : vector<64xf32>
    %677 = vector.multi_reduction <add>, %676, %cst_521 [0] : vector<24x64xf32> to vector<64xf32>
    %678 = vector.shape_cast %677 : vector<64xf32> to vector<1x64xf32>
    %cst_522 = arith.constant 0.055555556 : f32
    %679 = vector.broadcast %cst_522 : f32 to vector<1x64xf32>
    %680 = arith.mulf %678, %679 : vector<1x64xf32>
    %681 = arith.mulf %676, %676 : vector<24x64xf32>
    %cst_523 = arith.constant dense<0.000000e+00> : vector<64xf32>
    %682 = vector.multi_reduction <add>, %681, %cst_523 [0] : vector<24x64xf32> to vector<64xf32>
    %683 = vector.shape_cast %682 : vector<64xf32> to vector<1x64xf32>
    %cst_524 = arith.constant 0.055555556 : f32
    %684 = vector.broadcast %cst_524 : f32 to vector<1x64xf32>
    %685 = arith.mulf %683, %684 : vector<1x64xf32>
    %686 = arith.mulf %680, %680 : vector<1x64xf32>
    %687 = arith.subf %685, %686 : vector<1x64xf32>
    %cst_525 = arith.constant 0.000000e+00 : f32
    %688 = vector.broadcast %cst_525 : f32 to vector<1x64xf32>
    %689 = arith.maximumf %687, %688 : vector<1x64xf32>
    %690 = vector.broadcast %680 : vector<1x64xf32> to vector<24x64xf32>
    %691 = arith.subf %676, %690 : vector<24x64xf32>
    %cst_526 = arith.constant 9.99999974E-6 : f32
    %692 = vector.broadcast %cst_526 : f32 to vector<1x64xf32>
    %693 = arith.addf %689, %692 : vector<1x64xf32>
    %694 = math.rsqrt %693 : vector<1x64xf32>
    %695 = vector.broadcast %694 : vector<1x64xf32> to vector<24x64xf32>
    %696 = arith.mulf %691, %695 : vector<24x64xf32>
    %697 = vector.broadcast %603 : vector<1x64xf32> to vector<24x64xf32>
    %698 = arith.mulf %696, %697 : vector<24x64xf32>
    %699 = vector.broadcast %604 : vector<1x64xf32> to vector<24x64xf32>
    %700 = arith.addf %698, %699 : vector<24x64xf32>
    %701 = arith.addf %700, %502 : vector<24x64xf32>
    %cst_527 = arith.constant 0.000000e+00 : f32
    %702 = vector.broadcast %cst_527 : f32 to vector<24x64xf32>
    %703 = arith.maximumf %701, %702 : vector<24x64xf32>
    %c6_528 = arith.constant 6 : index
    %c0_529 = arith.constant 0 : index
    %704 = vector.load %arg6[%c6_528, %c0_529] : memref<8x64xf32, #tpu.memory_space<vmem>>, vector<1x64xf32>
    %c6_530 = arith.constant 6 : index
    %c0_531 = arith.constant 0 : index
    %705 = vector.load %arg7[%c6_530, %c0_531] : memref<8x64xf32, #tpu.memory_space<vmem>>, vector<1x64xf32>
    %706 = arith.truncf %703 : vector<24x64xf32> to vector<24x64xbf16>
    %c0_532 = arith.constant 0 : index
    %c0_533 = arith.constant 0 : index
    %c0_534 = arith.constant 0 : index
    %707 = vector.load %arg1[%c0_532, %c0_533, %c0_534] : memref<9x24x24xbf16, #tpu.memory_space<vmem>>, vector<1x24x24xbf16>
    %708 = vector.shape_cast %707 : vector<1x24x24xbf16> to vector<24x24xbf16>
    %cst_535 = arith.constant dense<0.000000e+00> : vector<24x64xf32>
    %709 = tpu.matmul %708, %706, %cst_535 {dimension_numbers = #tpu.dot_dimension_numbers<[1], [0], [0], [1], [0, 0, 1, 1], [], []>} : vector<24x24xbf16>, vector<24x64xbf16>, vector<24x64xf32> -> vector<24x64xf32>
    %710 = arith.truncf %709 : vector<24x64xf32> to vector<24x64xbf16>
    %c54 = arith.constant 54 : index
    %c0_536 = arith.constant 0 : index
    %c0_537 = arith.constant 0 : index
    %711 = vector.load %arg5[%c54, %c0_536, %c0_537] : memref<72x64x64xbf16, #tpu.memory_space<vmem>>, vector<1x64x64xbf16>
    %712 = vector.shape_cast %711 : vector<1x64x64xbf16> to vector<64x64xbf16>
    %cst_538 = arith.constant dense<0.000000e+00> : vector<24x64xf32>
    %713 = tpu.matmul %710, %712, %cst_538 {dimension_numbers = #tpu.dot_dimension_numbers<[1], [0], [0], [1], [0, 0, 1, 1], [], []>} : vector<24x64xbf16>, vector<64x64xbf16>, vector<24x64xf32> -> vector<24x64xf32>
    %c1_539 = arith.constant 1 : index
    %c0_540 = arith.constant 0 : index
    %c0_541 = arith.constant 0 : index
    %714 = vector.load %arg1[%c1_539, %c0_540, %c0_541] : memref<9x24x24xbf16, #tpu.memory_space<vmem>>, vector<1x24x24xbf16>
    %715 = vector.shape_cast %714 : vector<1x24x24xbf16> to vector<24x24xbf16>
    %cst_542 = arith.constant dense<0.000000e+00> : vector<24x64xf32>
    %716 = tpu.matmul %715, %706, %cst_542 {dimension_numbers = #tpu.dot_dimension_numbers<[1], [0], [0], [1], [0, 0, 1, 1], [], []>} : vector<24x24xbf16>, vector<24x64xbf16>, vector<24x64xf32> -> vector<24x64xf32>
    %717 = arith.truncf %716 : vector<24x64xf32> to vector<24x64xbf16>
    %c55 = arith.constant 55 : index
    %c0_543 = arith.constant 0 : index
    %c0_544 = arith.constant 0 : index
    %718 = vector.load %arg5[%c55, %c0_543, %c0_544] : memref<72x64x64xbf16, #tpu.memory_space<vmem>>, vector<1x64x64xbf16>
    %719 = vector.shape_cast %718 : vector<1x64x64xbf16> to vector<64x64xbf16>
    %cst_545 = arith.constant dense<0.000000e+00> : vector<24x64xf32>
    %720 = tpu.matmul %717, %719, %cst_545 {dimension_numbers = #tpu.dot_dimension_numbers<[1], [0], [0], [1], [0, 0, 1, 1], [], []>} : vector<24x64xbf16>, vector<64x64xbf16>, vector<24x64xf32> -> vector<24x64xf32>
    %721 = arith.addf %713, %720 : vector<24x64xf32>
    %c2_546 = arith.constant 2 : index
    %c0_547 = arith.constant 0 : index
    %c0_548 = arith.constant 0 : index
    %722 = vector.load %arg1[%c2_546, %c0_547, %c0_548] : memref<9x24x24xbf16, #tpu.memory_space<vmem>>, vector<1x24x24xbf16>
    %723 = vector.shape_cast %722 : vector<1x24x24xbf16> to vector<24x24xbf16>
    %cst_549 = arith.constant dense<0.000000e+00> : vector<24x64xf32>
    %724 = tpu.matmul %723, %706, %cst_549 {dimension_numbers = #tpu.dot_dimension_numbers<[1], [0], [0], [1], [0, 0, 1, 1], [], []>} : vector<24x24xbf16>, vector<24x64xbf16>, vector<24x64xf32> -> vector<24x64xf32>
    %725 = arith.truncf %724 : vector<24x64xf32> to vector<24x64xbf16>
    %c56 = arith.constant 56 : index
    %c0_550 = arith.constant 0 : index
    %c0_551 = arith.constant 0 : index
    %726 = vector.load %arg5[%c56, %c0_550, %c0_551] : memref<72x64x64xbf16, #tpu.memory_space<vmem>>, vector<1x64x64xbf16>
    %727 = vector.shape_cast %726 : vector<1x64x64xbf16> to vector<64x64xbf16>
    %cst_552 = arith.constant dense<0.000000e+00> : vector<24x64xf32>
    %728 = tpu.matmul %725, %727, %cst_552 {dimension_numbers = #tpu.dot_dimension_numbers<[1], [0], [0], [1], [0, 0, 1, 1], [], []>} : vector<24x64xbf16>, vector<64x64xbf16>, vector<24x64xf32> -> vector<24x64xf32>
    %729 = arith.addf %721, %728 : vector<24x64xf32>
    %c3_553 = arith.constant 3 : index
    %c0_554 = arith.constant 0 : index
    %c0_555 = arith.constant 0 : index
    %730 = vector.load %arg1[%c3_553, %c0_554, %c0_555] : memref<9x24x24xbf16, #tpu.memory_space<vmem>>, vector<1x24x24xbf16>
    %731 = vector.shape_cast %730 : vector<1x24x24xbf16> to vector<24x24xbf16>
    %cst_556 = arith.constant dense<0.000000e+00> : vector<24x64xf32>
    %732 = tpu.matmul %731, %706, %cst_556 {dimension_numbers = #tpu.dot_dimension_numbers<[1], [0], [0], [1], [0, 0, 1, 1], [], []>} : vector<24x24xbf16>, vector<24x64xbf16>, vector<24x64xf32> -> vector<24x64xf32>
    %733 = arith.truncf %732 : vector<24x64xf32> to vector<24x64xbf16>
    %c57 = arith.constant 57 : index
    %c0_557 = arith.constant 0 : index
    %c0_558 = arith.constant 0 : index
    %734 = vector.load %arg5[%c57, %c0_557, %c0_558] : memref<72x64x64xbf16, #tpu.memory_space<vmem>>, vector<1x64x64xbf16>
    %735 = vector.shape_cast %734 : vector<1x64x64xbf16> to vector<64x64xbf16>
    %cst_559 = arith.constant dense<0.000000e+00> : vector<24x64xf32>
    %736 = tpu.matmul %733, %735, %cst_559 {dimension_numbers = #tpu.dot_dimension_numbers<[1], [0], [0], [1], [0, 0, 1, 1], [], []>} : vector<24x64xbf16>, vector<64x64xbf16>, vector<24x64xf32> -> vector<24x64xf32>
    %737 = arith.addf %729, %736 : vector<24x64xf32>
    %c4_560 = arith.constant 4 : index
    %c0_561 = arith.constant 0 : index
    %c0_562 = arith.constant 0 : index
    %738 = vector.load %arg1[%c4_560, %c0_561, %c0_562] : memref<9x24x24xbf16, #tpu.memory_space<vmem>>, vector<1x24x24xbf16>
    %739 = vector.shape_cast %738 : vector<1x24x24xbf16> to vector<24x24xbf16>
    %cst_563 = arith.constant dense<0.000000e+00> : vector<24x64xf32>
    %740 = tpu.matmul %739, %706, %cst_563 {dimension_numbers = #tpu.dot_dimension_numbers<[1], [0], [0], [1], [0, 0, 1, 1], [], []>} : vector<24x24xbf16>, vector<24x64xbf16>, vector<24x64xf32> -> vector<24x64xf32>
    %741 = arith.truncf %740 : vector<24x64xf32> to vector<24x64xbf16>
    %c58 = arith.constant 58 : index
    %c0_564 = arith.constant 0 : index
    %c0_565 = arith.constant 0 : index
    %742 = vector.load %arg5[%c58, %c0_564, %c0_565] : memref<72x64x64xbf16, #tpu.memory_space<vmem>>, vector<1x64x64xbf16>
    %743 = vector.shape_cast %742 : vector<1x64x64xbf16> to vector<64x64xbf16>
    %cst_566 = arith.constant dense<0.000000e+00> : vector<24x64xf32>
    %744 = tpu.matmul %741, %743, %cst_566 {dimension_numbers = #tpu.dot_dimension_numbers<[1], [0], [0], [1], [0, 0, 1, 1], [], []>} : vector<24x64xbf16>, vector<64x64xbf16>, vector<24x64xf32> -> vector<24x64xf32>
    %745 = arith.addf %737, %744 : vector<24x64xf32>
    %c5_567 = arith.constant 5 : index
    %c0_568 = arith.constant 0 : index
    %c0_569 = arith.constant 0 : index
    %746 = vector.load %arg1[%c5_567, %c0_568, %c0_569] : memref<9x24x24xbf16, #tpu.memory_space<vmem>>, vector<1x24x24xbf16>
    %747 = vector.shape_cast %746 : vector<1x24x24xbf16> to vector<24x24xbf16>
    %cst_570 = arith.constant dense<0.000000e+00> : vector<24x64xf32>
    %748 = tpu.matmul %747, %706, %cst_570 {dimension_numbers = #tpu.dot_dimension_numbers<[1], [0], [0], [1], [0, 0, 1, 1], [], []>} : vector<24x24xbf16>, vector<24x64xbf16>, vector<24x64xf32> -> vector<24x64xf32>
    %749 = arith.truncf %748 : vector<24x64xf32> to vector<24x64xbf16>
    %c59 = arith.constant 59 : index
    %c0_571 = arith.constant 0 : index
    %c0_572 = arith.constant 0 : index
    %750 = vector.load %arg5[%c59, %c0_571, %c0_572] : memref<72x64x64xbf16, #tpu.memory_space<vmem>>, vector<1x64x64xbf16>
    %751 = vector.shape_cast %750 : vector<1x64x64xbf16> to vector<64x64xbf16>
    %cst_573 = arith.constant dense<0.000000e+00> : vector<24x64xf32>
    %752 = tpu.matmul %749, %751, %cst_573 {dimension_numbers = #tpu.dot_dimension_numbers<[1], [0], [0], [1], [0, 0, 1, 1], [], []>} : vector<24x64xbf16>, vector<64x64xbf16>, vector<24x64xf32> -> vector<24x64xf32>
    %753 = arith.addf %745, %752 : vector<24x64xf32>
    %c6_574 = arith.constant 6 : index
    %c0_575 = arith.constant 0 : index
    %c0_576 = arith.constant 0 : index
    %754 = vector.load %arg1[%c6_574, %c0_575, %c0_576] : memref<9x24x24xbf16, #tpu.memory_space<vmem>>, vector<1x24x24xbf16>
    %755 = vector.shape_cast %754 : vector<1x24x24xbf16> to vector<24x24xbf16>
    %cst_577 = arith.constant dense<0.000000e+00> : vector<24x64xf32>
    %756 = tpu.matmul %755, %706, %cst_577 {dimension_numbers = #tpu.dot_dimension_numbers<[1], [0], [0], [1], [0, 0, 1, 1], [], []>} : vector<24x24xbf16>, vector<24x64xbf16>, vector<24x64xf32> -> vector<24x64xf32>
    %757 = arith.truncf %756 : vector<24x64xf32> to vector<24x64xbf16>
    %c60 = arith.constant 60 : index
    %c0_578 = arith.constant 0 : index
    %c0_579 = arith.constant 0 : index
    %758 = vector.load %arg5[%c60, %c0_578, %c0_579] : memref<72x64x64xbf16, #tpu.memory_space<vmem>>, vector<1x64x64xbf16>
    %759 = vector.shape_cast %758 : vector<1x64x64xbf16> to vector<64x64xbf16>
    %cst_580 = arith.constant dense<0.000000e+00> : vector<24x64xf32>
    %760 = tpu.matmul %757, %759, %cst_580 {dimension_numbers = #tpu.dot_dimension_numbers<[1], [0], [0], [1], [0, 0, 1, 1], [], []>} : vector<24x64xbf16>, vector<64x64xbf16>, vector<24x64xf32> -> vector<24x64xf32>
    %761 = arith.addf %753, %760 : vector<24x64xf32>
    %c7_581 = arith.constant 7 : index
    %c0_582 = arith.constant 0 : index
    %c0_583 = arith.constant 0 : index
    %762 = vector.load %arg1[%c7_581, %c0_582, %c0_583] : memref<9x24x24xbf16, #tpu.memory_space<vmem>>, vector<1x24x24xbf16>
    %763 = vector.shape_cast %762 : vector<1x24x24xbf16> to vector<24x24xbf16>
    %cst_584 = arith.constant dense<0.000000e+00> : vector<24x64xf32>
    %764 = tpu.matmul %763, %706, %cst_584 {dimension_numbers = #tpu.dot_dimension_numbers<[1], [0], [0], [1], [0, 0, 1, 1], [], []>} : vector<24x24xbf16>, vector<24x64xbf16>, vector<24x64xf32> -> vector<24x64xf32>
    %765 = arith.truncf %764 : vector<24x64xf32> to vector<24x64xbf16>
    %c61 = arith.constant 61 : index
    %c0_585 = arith.constant 0 : index
    %c0_586 = arith.constant 0 : index
    %766 = vector.load %arg5[%c61, %c0_585, %c0_586] : memref<72x64x64xbf16, #tpu.memory_space<vmem>>, vector<1x64x64xbf16>
    %767 = vector.shape_cast %766 : vector<1x64x64xbf16> to vector<64x64xbf16>
    %cst_587 = arith.constant dense<0.000000e+00> : vector<24x64xf32>
    %768 = tpu.matmul %765, %767, %cst_587 {dimension_numbers = #tpu.dot_dimension_numbers<[1], [0], [0], [1], [0, 0, 1, 1], [], []>} : vector<24x64xbf16>, vector<64x64xbf16>, vector<24x64xf32> -> vector<24x64xf32>
    %769 = arith.addf %761, %768 : vector<24x64xf32>
    %c8_588 = arith.constant 8 : index
    %c0_589 = arith.constant 0 : index
    %c0_590 = arith.constant 0 : index
    %770 = vector.load %arg1[%c8_588, %c0_589, %c0_590] : memref<9x24x24xbf16, #tpu.memory_space<vmem>>, vector<1x24x24xbf16>
    %771 = vector.shape_cast %770 : vector<1x24x24xbf16> to vector<24x24xbf16>
    %cst_591 = arith.constant dense<0.000000e+00> : vector<24x64xf32>
    %772 = tpu.matmul %771, %706, %cst_591 {dimension_numbers = #tpu.dot_dimension_numbers<[1], [0], [0], [1], [0, 0, 1, 1], [], []>} : vector<24x24xbf16>, vector<24x64xbf16>, vector<24x64xf32> -> vector<24x64xf32>
    %773 = arith.truncf %772 : vector<24x64xf32> to vector<24x64xbf16>
    %c62 = arith.constant 62 : index
    %c0_592 = arith.constant 0 : index
    %c0_593 = arith.constant 0 : index
    %774 = vector.load %arg5[%c62, %c0_592, %c0_593] : memref<72x64x64xbf16, #tpu.memory_space<vmem>>, vector<1x64x64xbf16>
    %775 = vector.shape_cast %774 : vector<1x64x64xbf16> to vector<64x64xbf16>
    %cst_594 = arith.constant dense<0.000000e+00> : vector<24x64xf32>
    %776 = tpu.matmul %773, %775, %cst_594 {dimension_numbers = #tpu.dot_dimension_numbers<[1], [0], [0], [1], [0, 0, 1, 1], [], []>} : vector<24x64xbf16>, vector<64x64xbf16>, vector<24x64xf32> -> vector<24x64xf32>
    %777 = arith.addf %769, %776 : vector<24x64xf32>
    %cst_595 = arith.constant dense<0.000000e+00> : vector<64xf32>
    %778 = vector.multi_reduction <add>, %777, %cst_595 [0] : vector<24x64xf32> to vector<64xf32>
    %779 = vector.shape_cast %778 : vector<64xf32> to vector<1x64xf32>
    %cst_596 = arith.constant 0.055555556 : f32
    %780 = vector.broadcast %cst_596 : f32 to vector<1x64xf32>
    %781 = arith.mulf %779, %780 : vector<1x64xf32>
    %782 = arith.mulf %777, %777 : vector<24x64xf32>
    %cst_597 = arith.constant dense<0.000000e+00> : vector<64xf32>
    %783 = vector.multi_reduction <add>, %782, %cst_597 [0] : vector<24x64xf32> to vector<64xf32>
    %784 = vector.shape_cast %783 : vector<64xf32> to vector<1x64xf32>
    %cst_598 = arith.constant 0.055555556 : f32
    %785 = vector.broadcast %cst_598 : f32 to vector<1x64xf32>
    %786 = arith.mulf %784, %785 : vector<1x64xf32>
    %787 = arith.mulf %781, %781 : vector<1x64xf32>
    %788 = arith.subf %786, %787 : vector<1x64xf32>
    %cst_599 = arith.constant 0.000000e+00 : f32
    %789 = vector.broadcast %cst_599 : f32 to vector<1x64xf32>
    %790 = arith.maximumf %788, %789 : vector<1x64xf32>
    %791 = vector.broadcast %781 : vector<1x64xf32> to vector<24x64xf32>
    %792 = arith.subf %777, %791 : vector<24x64xf32>
    %cst_600 = arith.constant 9.99999974E-6 : f32
    %793 = vector.broadcast %cst_600 : f32 to vector<1x64xf32>
    %794 = arith.addf %790, %793 : vector<1x64xf32>
    %795 = math.rsqrt %794 : vector<1x64xf32>
    %796 = vector.broadcast %795 : vector<1x64xf32> to vector<24x64xf32>
    %797 = arith.mulf %792, %796 : vector<24x64xf32>
    %798 = vector.broadcast %704 : vector<1x64xf32> to vector<24x64xf32>
    %799 = arith.mulf %797, %798 : vector<24x64xf32>
    %800 = vector.broadcast %705 : vector<1x64xf32> to vector<24x64xf32>
    %801 = arith.addf %799, %800 : vector<24x64xf32>
    %cst_601 = arith.constant 0.000000e+00 : f32
    %802 = vector.broadcast %cst_601 : f32 to vector<24x64xf32>
    %803 = arith.maximumf %801, %802 : vector<24x64xf32>
    %c7_602 = arith.constant 7 : index
    %c0_603 = arith.constant 0 : index
    %804 = vector.load %arg6[%c7_602, %c0_603] : memref<8x64xf32, #tpu.memory_space<vmem>>, vector<1x64xf32>
    %c7_604 = arith.constant 7 : index
    %c0_605 = arith.constant 0 : index
    %805 = vector.load %arg7[%c7_604, %c0_605] : memref<8x64xf32, #tpu.memory_space<vmem>>, vector<1x64xf32>
    %806 = arith.truncf %803 : vector<24x64xf32> to vector<24x64xbf16>
    %c0_606 = arith.constant 0 : index
    %c0_607 = arith.constant 0 : index
    %c0_608 = arith.constant 0 : index
    %807 = vector.load %arg1[%c0_606, %c0_607, %c0_608] : memref<9x24x24xbf16, #tpu.memory_space<vmem>>, vector<1x24x24xbf16>
    %808 = vector.shape_cast %807 : vector<1x24x24xbf16> to vector<24x24xbf16>
    %cst_609 = arith.constant dense<0.000000e+00> : vector<24x64xf32>
    %809 = tpu.matmul %808, %806, %cst_609 {dimension_numbers = #tpu.dot_dimension_numbers<[1], [0], [0], [1], [0, 0, 1, 1], [], []>} : vector<24x24xbf16>, vector<24x64xbf16>, vector<24x64xf32> -> vector<24x64xf32>
    %810 = arith.truncf %809 : vector<24x64xf32> to vector<24x64xbf16>
    %c63 = arith.constant 63 : index
    %c0_610 = arith.constant 0 : index
    %c0_611 = arith.constant 0 : index
    %811 = vector.load %arg5[%c63, %c0_610, %c0_611] : memref<72x64x64xbf16, #tpu.memory_space<vmem>>, vector<1x64x64xbf16>
    %812 = vector.shape_cast %811 : vector<1x64x64xbf16> to vector<64x64xbf16>
    %cst_612 = arith.constant dense<0.000000e+00> : vector<24x64xf32>
    %813 = tpu.matmul %810, %812, %cst_612 {dimension_numbers = #tpu.dot_dimension_numbers<[1], [0], [0], [1], [0, 0, 1, 1], [], []>} : vector<24x64xbf16>, vector<64x64xbf16>, vector<24x64xf32> -> vector<24x64xf32>
    %c1_613 = arith.constant 1 : index
    %c0_614 = arith.constant 0 : index
    %c0_615 = arith.constant 0 : index
    %814 = vector.load %arg1[%c1_613, %c0_614, %c0_615] : memref<9x24x24xbf16, #tpu.memory_space<vmem>>, vector<1x24x24xbf16>
    %815 = vector.shape_cast %814 : vector<1x24x24xbf16> to vector<24x24xbf16>
    %cst_616 = arith.constant dense<0.000000e+00> : vector<24x64xf32>
    %816 = tpu.matmul %815, %806, %cst_616 {dimension_numbers = #tpu.dot_dimension_numbers<[1], [0], [0], [1], [0, 0, 1, 1], [], []>} : vector<24x24xbf16>, vector<24x64xbf16>, vector<24x64xf32> -> vector<24x64xf32>
    %817 = arith.truncf %816 : vector<24x64xf32> to vector<24x64xbf16>
    %c64 = arith.constant 64 : index
    %c0_617 = arith.constant 0 : index
    %c0_618 = arith.constant 0 : index
    %818 = vector.load %arg5[%c64, %c0_617, %c0_618] : memref<72x64x64xbf16, #tpu.memory_space<vmem>>, vector<1x64x64xbf16>
    %819 = vector.shape_cast %818 : vector<1x64x64xbf16> to vector<64x64xbf16>
    %cst_619 = arith.constant dense<0.000000e+00> : vector<24x64xf32>
    %820 = tpu.matmul %817, %819, %cst_619 {dimension_numbers = #tpu.dot_dimension_numbers<[1], [0], [0], [1], [0, 0, 1, 1], [], []>} : vector<24x64xbf16>, vector<64x64xbf16>, vector<24x64xf32> -> vector<24x64xf32>
    %821 = arith.addf %813, %820 : vector<24x64xf32>
    %c2_620 = arith.constant 2 : index
    %c0_621 = arith.constant 0 : index
    %c0_622 = arith.constant 0 : index
    %822 = vector.load %arg1[%c2_620, %c0_621, %c0_622] : memref<9x24x24xbf16, #tpu.memory_space<vmem>>, vector<1x24x24xbf16>
    %823 = vector.shape_cast %822 : vector<1x24x24xbf16> to vector<24x24xbf16>
    %cst_623 = arith.constant dense<0.000000e+00> : vector<24x64xf32>
    %824 = tpu.matmul %823, %806, %cst_623 {dimension_numbers = #tpu.dot_dimension_numbers<[1], [0], [0], [1], [0, 0, 1, 1], [], []>} : vector<24x24xbf16>, vector<24x64xbf16>, vector<24x64xf32> -> vector<24x64xf32>
    %825 = arith.truncf %824 : vector<24x64xf32> to vector<24x64xbf16>
    %c65 = arith.constant 65 : index
    %c0_624 = arith.constant 0 : index
    %c0_625 = arith.constant 0 : index
    %826 = vector.load %arg5[%c65, %c0_624, %c0_625] : memref<72x64x64xbf16, #tpu.memory_space<vmem>>, vector<1x64x64xbf16>
    %827 = vector.shape_cast %826 : vector<1x64x64xbf16> to vector<64x64xbf16>
    %cst_626 = arith.constant dense<0.000000e+00> : vector<24x64xf32>
    %828 = tpu.matmul %825, %827, %cst_626 {dimension_numbers = #tpu.dot_dimension_numbers<[1], [0], [0], [1], [0, 0, 1, 1], [], []>} : vector<24x64xbf16>, vector<64x64xbf16>, vector<24x64xf32> -> vector<24x64xf32>
    %829 = arith.addf %821, %828 : vector<24x64xf32>
    %c3_627 = arith.constant 3 : index
    %c0_628 = arith.constant 0 : index
    %c0_629 = arith.constant 0 : index
    %830 = vector.load %arg1[%c3_627, %c0_628, %c0_629] : memref<9x24x24xbf16, #tpu.memory_space<vmem>>, vector<1x24x24xbf16>
    %831 = vector.shape_cast %830 : vector<1x24x24xbf16> to vector<24x24xbf16>
    %cst_630 = arith.constant dense<0.000000e+00> : vector<24x64xf32>
    %832 = tpu.matmul %831, %806, %cst_630 {dimension_numbers = #tpu.dot_dimension_numbers<[1], [0], [0], [1], [0, 0, 1, 1], [], []>} : vector<24x24xbf16>, vector<24x64xbf16>, vector<24x64xf32> -> vector<24x64xf32>
    %833 = arith.truncf %832 : vector<24x64xf32> to vector<24x64xbf16>
    %c66 = arith.constant 66 : index
    %c0_631 = arith.constant 0 : index
    %c0_632 = arith.constant 0 : index
    %834 = vector.load %arg5[%c66, %c0_631, %c0_632] : memref<72x64x64xbf16, #tpu.memory_space<vmem>>, vector<1x64x64xbf16>
    %835 = vector.shape_cast %834 : vector<1x64x64xbf16> to vector<64x64xbf16>
    %cst_633 = arith.constant dense<0.000000e+00> : vector<24x64xf32>
    %836 = tpu.matmul %833, %835, %cst_633 {dimension_numbers = #tpu.dot_dimension_numbers<[1], [0], [0], [1], [0, 0, 1, 1], [], []>} : vector<24x64xbf16>, vector<64x64xbf16>, vector<24x64xf32> -> vector<24x64xf32>
    %837 = arith.addf %829, %836 : vector<24x64xf32>
    %c4_634 = arith.constant 4 : index
    %c0_635 = arith.constant 0 : index
    %c0_636 = arith.constant 0 : index
    %838 = vector.load %arg1[%c4_634, %c0_635, %c0_636] : memref<9x24x24xbf16, #tpu.memory_space<vmem>>, vector<1x24x24xbf16>
    %839 = vector.shape_cast %838 : vector<1x24x24xbf16> to vector<24x24xbf16>
    %cst_637 = arith.constant dense<0.000000e+00> : vector<24x64xf32>
    %840 = tpu.matmul %839, %806, %cst_637 {dimension_numbers = #tpu.dot_dimension_numbers<[1], [0], [0], [1], [0, 0, 1, 1], [], []>} : vector<24x24xbf16>, vector<24x64xbf16>, vector<24x64xf32> -> vector<24x64xf32>
    %841 = arith.truncf %840 : vector<24x64xf32> to vector<24x64xbf16>
    %c67 = arith.constant 67 : index
    %c0_638 = arith.constant 0 : index
    %c0_639 = arith.constant 0 : index
    %842 = vector.load %arg5[%c67, %c0_638, %c0_639] : memref<72x64x64xbf16, #tpu.memory_space<vmem>>, vector<1x64x64xbf16>
    %843 = vector.shape_cast %842 : vector<1x64x64xbf16> to vector<64x64xbf16>
    %cst_640 = arith.constant dense<0.000000e+00> : vector<24x64xf32>
    %844 = tpu.matmul %841, %843, %cst_640 {dimension_numbers = #tpu.dot_dimension_numbers<[1], [0], [0], [1], [0, 0, 1, 1], [], []>} : vector<24x64xbf16>, vector<64x64xbf16>, vector<24x64xf32> -> vector<24x64xf32>
    %845 = arith.addf %837, %844 : vector<24x64xf32>
    %c5_641 = arith.constant 5 : index
    %c0_642 = arith.constant 0 : index
    %c0_643 = arith.constant 0 : index
    %846 = vector.load %arg1[%c5_641, %c0_642, %c0_643] : memref<9x24x24xbf16, #tpu.memory_space<vmem>>, vector<1x24x24xbf16>
    %847 = vector.shape_cast %846 : vector<1x24x24xbf16> to vector<24x24xbf16>
    %cst_644 = arith.constant dense<0.000000e+00> : vector<24x64xf32>
    %848 = tpu.matmul %847, %806, %cst_644 {dimension_numbers = #tpu.dot_dimension_numbers<[1], [0], [0], [1], [0, 0, 1, 1], [], []>} : vector<24x24xbf16>, vector<24x64xbf16>, vector<24x64xf32> -> vector<24x64xf32>
    %849 = arith.truncf %848 : vector<24x64xf32> to vector<24x64xbf16>
    %c68 = arith.constant 68 : index
    %c0_645 = arith.constant 0 : index
    %c0_646 = arith.constant 0 : index
    %850 = vector.load %arg5[%c68, %c0_645, %c0_646] : memref<72x64x64xbf16, #tpu.memory_space<vmem>>, vector<1x64x64xbf16>
    %851 = vector.shape_cast %850 : vector<1x64x64xbf16> to vector<64x64xbf16>
    %cst_647 = arith.constant dense<0.000000e+00> : vector<24x64xf32>
    %852 = tpu.matmul %849, %851, %cst_647 {dimension_numbers = #tpu.dot_dimension_numbers<[1], [0], [0], [1], [0, 0, 1, 1], [], []>} : vector<24x64xbf16>, vector<64x64xbf16>, vector<24x64xf32> -> vector<24x64xf32>
    %853 = arith.addf %845, %852 : vector<24x64xf32>
    %c6_648 = arith.constant 6 : index
    %c0_649 = arith.constant 0 : index
    %c0_650 = arith.constant 0 : index
    %854 = vector.load %arg1[%c6_648, %c0_649, %c0_650] : memref<9x24x24xbf16, #tpu.memory_space<vmem>>, vector<1x24x24xbf16>
    %855 = vector.shape_cast %854 : vector<1x24x24xbf16> to vector<24x24xbf16>
    %cst_651 = arith.constant dense<0.000000e+00> : vector<24x64xf32>
    %856 = tpu.matmul %855, %806, %cst_651 {dimension_numbers = #tpu.dot_dimension_numbers<[1], [0], [0], [1], [0, 0, 1, 1], [], []>} : vector<24x24xbf16>, vector<24x64xbf16>, vector<24x64xf32> -> vector<24x64xf32>
    %857 = arith.truncf %856 : vector<24x64xf32> to vector<24x64xbf16>
    %c69 = arith.constant 69 : index
    %c0_652 = arith.constant 0 : index
    %c0_653 = arith.constant 0 : index
    %858 = vector.load %arg5[%c69, %c0_652, %c0_653] : memref<72x64x64xbf16, #tpu.memory_space<vmem>>, vector<1x64x64xbf16>
    %859 = vector.shape_cast %858 : vector<1x64x64xbf16> to vector<64x64xbf16>
    %cst_654 = arith.constant dense<0.000000e+00> : vector<24x64xf32>
    %860 = tpu.matmul %857, %859, %cst_654 {dimension_numbers = #tpu.dot_dimension_numbers<[1], [0], [0], [1], [0, 0, 1, 1], [], []>} : vector<24x64xbf16>, vector<64x64xbf16>, vector<24x64xf32> -> vector<24x64xf32>
    %861 = arith.addf %853, %860 : vector<24x64xf32>
    %c7_655 = arith.constant 7 : index
    %c0_656 = arith.constant 0 : index
    %c0_657 = arith.constant 0 : index
    %862 = vector.load %arg1[%c7_655, %c0_656, %c0_657] : memref<9x24x24xbf16, #tpu.memory_space<vmem>>, vector<1x24x24xbf16>
    %863 = vector.shape_cast %862 : vector<1x24x24xbf16> to vector<24x24xbf16>
    %cst_658 = arith.constant dense<0.000000e+00> : vector<24x64xf32>
    %864 = tpu.matmul %863, %806, %cst_658 {dimension_numbers = #tpu.dot_dimension_numbers<[1], [0], [0], [1], [0, 0, 1, 1], [], []>} : vector<24x24xbf16>, vector<24x64xbf16>, vector<24x64xf32> -> vector<24x64xf32>
    %865 = arith.truncf %864 : vector<24x64xf32> to vector<24x64xbf16>
    %c70 = arith.constant 70 : index
    %c0_659 = arith.constant 0 : index
    %c0_660 = arith.constant 0 : index
    %866 = vector.load %arg5[%c70, %c0_659, %c0_660] : memref<72x64x64xbf16, #tpu.memory_space<vmem>>, vector<1x64x64xbf16>
    %867 = vector.shape_cast %866 : vector<1x64x64xbf16> to vector<64x64xbf16>
    %cst_661 = arith.constant dense<0.000000e+00> : vector<24x64xf32>
    %868 = tpu.matmul %865, %867, %cst_661 {dimension_numbers = #tpu.dot_dimension_numbers<[1], [0], [0], [1], [0, 0, 1, 1], [], []>} : vector<24x64xbf16>, vector<64x64xbf16>, vector<24x64xf32> -> vector<24x64xf32>
    %869 = arith.addf %861, %868 : vector<24x64xf32>
    %c8_662 = arith.constant 8 : index
    %c0_663 = arith.constant 0 : index
    %c0_664 = arith.constant 0 : index
    %870 = vector.load %arg1[%c8_662, %c0_663, %c0_664] : memref<9x24x24xbf16, #tpu.memory_space<vmem>>, vector<1x24x24xbf16>
    %871 = vector.shape_cast %870 : vector<1x24x24xbf16> to vector<24x24xbf16>
    %cst_665 = arith.constant dense<0.000000e+00> : vector<24x64xf32>
    %872 = tpu.matmul %871, %806, %cst_665 {dimension_numbers = #tpu.dot_dimension_numbers<[1], [0], [0], [1], [0, 0, 1, 1], [], []>} : vector<24x24xbf16>, vector<24x64xbf16>, vector<24x64xf32> -> vector<24x64xf32>
    %873 = arith.truncf %872 : vector<24x64xf32> to vector<24x64xbf16>
    %c71 = arith.constant 71 : index
    %c0_666 = arith.constant 0 : index
    %c0_667 = arith.constant 0 : index
    %874 = vector.load %arg5[%c71, %c0_666, %c0_667] : memref<72x64x64xbf16, #tpu.memory_space<vmem>>, vector<1x64x64xbf16>
    %875 = vector.shape_cast %874 : vector<1x64x64xbf16> to vector<64x64xbf16>
    %cst_668 = arith.constant dense<0.000000e+00> : vector<24x64xf32>
    %876 = tpu.matmul %873, %875, %cst_668 {dimension_numbers = #tpu.dot_dimension_numbers<[1], [0], [0], [1], [0, 0, 1, 1], [], []>} : vector<24x64xbf16>, vector<64x64xbf16>, vector<24x64xf32> -> vector<24x64xf32>
    %877 = arith.addf %869, %876 : vector<24x64xf32>
    %cst_669 = arith.constant dense<0.000000e+00> : vector<64xf32>
    %878 = vector.multi_reduction <add>, %877, %cst_669 [0] : vector<24x64xf32> to vector<64xf32>
    %879 = vector.shape_cast %878 : vector<64xf32> to vector<1x64xf32>
    %cst_670 = arith.constant 0.055555556 : f32
    %880 = vector.broadcast %cst_670 : f32 to vector<1x64xf32>
    %881 = arith.mulf %879, %880 : vector<1x64xf32>
    %882 = arith.mulf %877, %877 : vector<24x64xf32>
    %cst_671 = arith.constant dense<0.000000e+00> : vector<64xf32>
    %883 = vector.multi_reduction <add>, %882, %cst_671 [0] : vector<24x64xf32> to vector<64xf32>
    %884 = vector.shape_cast %883 : vector<64xf32> to vector<1x64xf32>
    %cst_672 = arith.constant 0.055555556 : f32
    %885 = vector.broadcast %cst_672 : f32 to vector<1x64xf32>
    %886 = arith.mulf %884, %885 : vector<1x64xf32>
    %887 = arith.mulf %881, %881 : vector<1x64xf32>
    %888 = arith.subf %886, %887 : vector<1x64xf32>
    %cst_673 = arith.constant 0.000000e+00 : f32
    %889 = vector.broadcast %cst_673 : f32 to vector<1x64xf32>
    %890 = arith.maximumf %888, %889 : vector<1x64xf32>
    %891 = vector.broadcast %881 : vector<1x64xf32> to vector<24x64xf32>
    %892 = arith.subf %877, %891 : vector<24x64xf32>
    %cst_674 = arith.constant 9.99999974E-6 : f32
    %893 = vector.broadcast %cst_674 : f32 to vector<1x64xf32>
    %894 = arith.addf %890, %893 : vector<1x64xf32>
    %895 = math.rsqrt %894 : vector<1x64xf32>
    %896 = vector.broadcast %895 : vector<1x64xf32> to vector<24x64xf32>
    %897 = arith.mulf %892, %896 : vector<24x64xf32>
    %898 = vector.broadcast %804 : vector<1x64xf32> to vector<24x64xf32>
    %899 = arith.mulf %897, %898 : vector<24x64xf32>
    %900 = vector.broadcast %805 : vector<1x64xf32> to vector<24x64xf32>
    %901 = arith.addf %899, %900 : vector<24x64xf32>
    %902 = arith.addf %901, %703 : vector<24x64xf32>
    %cst_675 = arith.constant 0.000000e+00 : f32
    %903 = vector.broadcast %cst_675 : f32 to vector<24x64xf32>
    %904 = arith.maximumf %902, %903 : vector<24x64xf32>
    %c0_676 = arith.constant 0 : index
    %c0_677 = arith.constant 0 : index
    %905 = vector.load %arg9[%c0_676, %c0_677] : memref<1x8xf32, #tpu.memory_space<vmem>>, vector<1x8xf32>
    %c0_678 = arith.constant 0 : index
    %c0_679 = arith.constant 0 : index
    %906 = vector.load %arg10[%c0_678, %c0_679] : memref<1x8xf32, #tpu.memory_space<vmem>>, vector<1x8xf32>
    %907 = arith.truncf %904 : vector<24x64xf32> to vector<24x64xbf16>
    %c0_680 = arith.constant 0 : index
    %c0_681 = arith.constant 0 : index
    %c0_682 = arith.constant 0 : index
    %908 = vector.load %arg1[%c0_680, %c0_681, %c0_682] : memref<9x24x24xbf16, #tpu.memory_space<vmem>>, vector<1x24x24xbf16>
    %909 = vector.shape_cast %908 : vector<1x24x24xbf16> to vector<24x24xbf16>
    %cst_683 = arith.constant dense<0.000000e+00> : vector<24x64xf32>
    %910 = tpu.matmul %909, %907, %cst_683 {dimension_numbers = #tpu.dot_dimension_numbers<[1], [0], [0], [1], [0, 0, 1, 1], [], []>} : vector<24x24xbf16>, vector<24x64xbf16>, vector<24x64xf32> -> vector<24x64xf32>
    %911 = arith.truncf %910 : vector<24x64xf32> to vector<24x64xbf16>
    %c0_684 = arith.constant 0 : index
    %c0_685 = arith.constant 0 : index
    %c0_686 = arith.constant 0 : index
    %912 = vector.load %arg8[%c0_684, %c0_685, %c0_686] : memref<9x64x8xbf16, #tpu.memory_space<vmem>>, vector<1x64x8xbf16>
    %913 = vector.shape_cast %912 : vector<1x64x8xbf16> to vector<64x8xbf16>
    %cst_687 = arith.constant dense<0.000000e+00> : vector<24x8xf32>
    %914 = tpu.matmul %911, %913, %cst_687 {dimension_numbers = #tpu.dot_dimension_numbers<[1], [0], [0], [1], [0, 0, 1, 1], [], []>} : vector<24x64xbf16>, vector<64x8xbf16>, vector<24x8xf32> -> vector<24x8xf32>
    %c1_688 = arith.constant 1 : index
    %c0_689 = arith.constant 0 : index
    %c0_690 = arith.constant 0 : index
    %915 = vector.load %arg1[%c1_688, %c0_689, %c0_690] : memref<9x24x24xbf16, #tpu.memory_space<vmem>>, vector<1x24x24xbf16>
    %916 = vector.shape_cast %915 : vector<1x24x24xbf16> to vector<24x24xbf16>
    %cst_691 = arith.constant dense<0.000000e+00> : vector<24x64xf32>
    %917 = tpu.matmul %916, %907, %cst_691 {dimension_numbers = #tpu.dot_dimension_numbers<[1], [0], [0], [1], [0, 0, 1, 1], [], []>} : vector<24x24xbf16>, vector<24x64xbf16>, vector<24x64xf32> -> vector<24x64xf32>
    %918 = arith.truncf %917 : vector<24x64xf32> to vector<24x64xbf16>
    %c1_692 = arith.constant 1 : index
    %c0_693 = arith.constant 0 : index
    %c0_694 = arith.constant 0 : index
    %919 = vector.load %arg8[%c1_692, %c0_693, %c0_694] : memref<9x64x8xbf16, #tpu.memory_space<vmem>>, vector<1x64x8xbf16>
    %920 = vector.shape_cast %919 : vector<1x64x8xbf16> to vector<64x8xbf16>
    %cst_695 = arith.constant dense<0.000000e+00> : vector<24x8xf32>
    %921 = tpu.matmul %918, %920, %cst_695 {dimension_numbers = #tpu.dot_dimension_numbers<[1], [0], [0], [1], [0, 0, 1, 1], [], []>} : vector<24x64xbf16>, vector<64x8xbf16>, vector<24x8xf32> -> vector<24x8xf32>
    %922 = arith.addf %914, %921 : vector<24x8xf32>
    %c2_696 = arith.constant 2 : index
    %c0_697 = arith.constant 0 : index
    %c0_698 = arith.constant 0 : index
    %923 = vector.load %arg1[%c2_696, %c0_697, %c0_698] : memref<9x24x24xbf16, #tpu.memory_space<vmem>>, vector<1x24x24xbf16>
    %924 = vector.shape_cast %923 : vector<1x24x24xbf16> to vector<24x24xbf16>
    %cst_699 = arith.constant dense<0.000000e+00> : vector<24x64xf32>
    %925 = tpu.matmul %924, %907, %cst_699 {dimension_numbers = #tpu.dot_dimension_numbers<[1], [0], [0], [1], [0, 0, 1, 1], [], []>} : vector<24x24xbf16>, vector<24x64xbf16>, vector<24x64xf32> -> vector<24x64xf32>
    %926 = arith.truncf %925 : vector<24x64xf32> to vector<24x64xbf16>
    %c2_700 = arith.constant 2 : index
    %c0_701 = arith.constant 0 : index
    %c0_702 = arith.constant 0 : index
    %927 = vector.load %arg8[%c2_700, %c0_701, %c0_702] : memref<9x64x8xbf16, #tpu.memory_space<vmem>>, vector<1x64x8xbf16>
    %928 = vector.shape_cast %927 : vector<1x64x8xbf16> to vector<64x8xbf16>
    %cst_703 = arith.constant dense<0.000000e+00> : vector<24x8xf32>
    %929 = tpu.matmul %926, %928, %cst_703 {dimension_numbers = #tpu.dot_dimension_numbers<[1], [0], [0], [1], [0, 0, 1, 1], [], []>} : vector<24x64xbf16>, vector<64x8xbf16>, vector<24x8xf32> -> vector<24x8xf32>
    %930 = arith.addf %922, %929 : vector<24x8xf32>
    %c3_704 = arith.constant 3 : index
    %c0_705 = arith.constant 0 : index
    %c0_706 = arith.constant 0 : index
    %931 = vector.load %arg1[%c3_704, %c0_705, %c0_706] : memref<9x24x24xbf16, #tpu.memory_space<vmem>>, vector<1x24x24xbf16>
    %932 = vector.shape_cast %931 : vector<1x24x24xbf16> to vector<24x24xbf16>
    %cst_707 = arith.constant dense<0.000000e+00> : vector<24x64xf32>
    %933 = tpu.matmul %932, %907, %cst_707 {dimension_numbers = #tpu.dot_dimension_numbers<[1], [0], [0], [1], [0, 0, 1, 1], [], []>} : vector<24x24xbf16>, vector<24x64xbf16>, vector<24x64xf32> -> vector<24x64xf32>
    %934 = arith.truncf %933 : vector<24x64xf32> to vector<24x64xbf16>
    %c3_708 = arith.constant 3 : index
    %c0_709 = arith.constant 0 : index
    %c0_710 = arith.constant 0 : index
    %935 = vector.load %arg8[%c3_708, %c0_709, %c0_710] : memref<9x64x8xbf16, #tpu.memory_space<vmem>>, vector<1x64x8xbf16>
    %936 = vector.shape_cast %935 : vector<1x64x8xbf16> to vector<64x8xbf16>
    %cst_711 = arith.constant dense<0.000000e+00> : vector<24x8xf32>
    %937 = tpu.matmul %934, %936, %cst_711 {dimension_numbers = #tpu.dot_dimension_numbers<[1], [0], [0], [1], [0, 0, 1, 1], [], []>} : vector<24x64xbf16>, vector<64x8xbf16>, vector<24x8xf32> -> vector<24x8xf32>
    %938 = arith.addf %930, %937 : vector<24x8xf32>
    %c4_712 = arith.constant 4 : index
    %c0_713 = arith.constant 0 : index
    %c0_714 = arith.constant 0 : index
    %939 = vector.load %arg1[%c4_712, %c0_713, %c0_714] : memref<9x24x24xbf16, #tpu.memory_space<vmem>>, vector<1x24x24xbf16>
    %940 = vector.shape_cast %939 : vector<1x24x24xbf16> to vector<24x24xbf16>
    %cst_715 = arith.constant dense<0.000000e+00> : vector<24x64xf32>
    %941 = tpu.matmul %940, %907, %cst_715 {dimension_numbers = #tpu.dot_dimension_numbers<[1], [0], [0], [1], [0, 0, 1, 1], [], []>} : vector<24x24xbf16>, vector<24x64xbf16>, vector<24x64xf32> -> vector<24x64xf32>
    %942 = arith.truncf %941 : vector<24x64xf32> to vector<24x64xbf16>
    %c4_716 = arith.constant 4 : index
    %c0_717 = arith.constant 0 : index
    %c0_718 = arith.constant 0 : index
    %943 = vector.load %arg8[%c4_716, %c0_717, %c0_718] : memref<9x64x8xbf16, #tpu.memory_space<vmem>>, vector<1x64x8xbf16>
    %944 = vector.shape_cast %943 : vector<1x64x8xbf16> to vector<64x8xbf16>
    %cst_719 = arith.constant dense<0.000000e+00> : vector<24x8xf32>
    %945 = tpu.matmul %942, %944, %cst_719 {dimension_numbers = #tpu.dot_dimension_numbers<[1], [0], [0], [1], [0, 0, 1, 1], [], []>} : vector<24x64xbf16>, vector<64x8xbf16>, vector<24x8xf32> -> vector<24x8xf32>
    %946 = arith.addf %938, %945 : vector<24x8xf32>
    %c5_720 = arith.constant 5 : index
    %c0_721 = arith.constant 0 : index
    %c0_722 = arith.constant 0 : index
    %947 = vector.load %arg1[%c5_720, %c0_721, %c0_722] : memref<9x24x24xbf16, #tpu.memory_space<vmem>>, vector<1x24x24xbf16>
    %948 = vector.shape_cast %947 : vector<1x24x24xbf16> to vector<24x24xbf16>
    %cst_723 = arith.constant dense<0.000000e+00> : vector<24x64xf32>
    %949 = tpu.matmul %948, %907, %cst_723 {dimension_numbers = #tpu.dot_dimension_numbers<[1], [0], [0], [1], [0, 0, 1, 1], [], []>} : vector<24x24xbf16>, vector<24x64xbf16>, vector<24x64xf32> -> vector<24x64xf32>
    %950 = arith.truncf %949 : vector<24x64xf32> to vector<24x64xbf16>
    %c5_724 = arith.constant 5 : index
    %c0_725 = arith.constant 0 : index
    %c0_726 = arith.constant 0 : index
    %951 = vector.load %arg8[%c5_724, %c0_725, %c0_726] : memref<9x64x8xbf16, #tpu.memory_space<vmem>>, vector<1x64x8xbf16>
    %952 = vector.shape_cast %951 : vector<1x64x8xbf16> to vector<64x8xbf16>
    %cst_727 = arith.constant dense<0.000000e+00> : vector<24x8xf32>
    %953 = tpu.matmul %950, %952, %cst_727 {dimension_numbers = #tpu.dot_dimension_numbers<[1], [0], [0], [1], [0, 0, 1, 1], [], []>} : vector<24x64xbf16>, vector<64x8xbf16>, vector<24x8xf32> -> vector<24x8xf32>
    %954 = arith.addf %946, %953 : vector<24x8xf32>
    %c6_728 = arith.constant 6 : index
    %c0_729 = arith.constant 0 : index
    %c0_730 = arith.constant 0 : index
    %955 = vector.load %arg1[%c6_728, %c0_729, %c0_730] : memref<9x24x24xbf16, #tpu.memory_space<vmem>>, vector<1x24x24xbf16>
    %956 = vector.shape_cast %955 : vector<1x24x24xbf16> to vector<24x24xbf16>
    %cst_731 = arith.constant dense<0.000000e+00> : vector<24x64xf32>
    %957 = tpu.matmul %956, %907, %cst_731 {dimension_numbers = #tpu.dot_dimension_numbers<[1], [0], [0], [1], [0, 0, 1, 1], [], []>} : vector<24x24xbf16>, vector<24x64xbf16>, vector<24x64xf32> -> vector<24x64xf32>
    %958 = arith.truncf %957 : vector<24x64xf32> to vector<24x64xbf16>
    %c6_732 = arith.constant 6 : index
    %c0_733 = arith.constant 0 : index
    %c0_734 = arith.constant 0 : index
    %959 = vector.load %arg8[%c6_732, %c0_733, %c0_734] : memref<9x64x8xbf16, #tpu.memory_space<vmem>>, vector<1x64x8xbf16>
    %960 = vector.shape_cast %959 : vector<1x64x8xbf16> to vector<64x8xbf16>
    %cst_735 = arith.constant dense<0.000000e+00> : vector<24x8xf32>
    %961 = tpu.matmul %958, %960, %cst_735 {dimension_numbers = #tpu.dot_dimension_numbers<[1], [0], [0], [1], [0, 0, 1, 1], [], []>} : vector<24x64xbf16>, vector<64x8xbf16>, vector<24x8xf32> -> vector<24x8xf32>
    %962 = arith.addf %954, %961 : vector<24x8xf32>
    %c7_736 = arith.constant 7 : index
    %c0_737 = arith.constant 0 : index
    %c0_738 = arith.constant 0 : index
    %963 = vector.load %arg1[%c7_736, %c0_737, %c0_738] : memref<9x24x24xbf16, #tpu.memory_space<vmem>>, vector<1x24x24xbf16>
    %964 = vector.shape_cast %963 : vector<1x24x24xbf16> to vector<24x24xbf16>
    %cst_739 = arith.constant dense<0.000000e+00> : vector<24x64xf32>
    %965 = tpu.matmul %964, %907, %cst_739 {dimension_numbers = #tpu.dot_dimension_numbers<[1], [0], [0], [1], [0, 0, 1, 1], [], []>} : vector<24x24xbf16>, vector<24x64xbf16>, vector<24x64xf32> -> vector<24x64xf32>
    %966 = arith.truncf %965 : vector<24x64xf32> to vector<24x64xbf16>
    %c7_740 = arith.constant 7 : index
    %c0_741 = arith.constant 0 : index
    %c0_742 = arith.constant 0 : index
    %967 = vector.load %arg8[%c7_740, %c0_741, %c0_742] : memref<9x64x8xbf16, #tpu.memory_space<vmem>>, vector<1x64x8xbf16>
    %968 = vector.shape_cast %967 : vector<1x64x8xbf16> to vector<64x8xbf16>
    %cst_743 = arith.constant dense<0.000000e+00> : vector<24x8xf32>
    %969 = tpu.matmul %966, %968, %cst_743 {dimension_numbers = #tpu.dot_dimension_numbers<[1], [0], [0], [1], [0, 0, 1, 1], [], []>} : vector<24x64xbf16>, vector<64x8xbf16>, vector<24x8xf32> -> vector<24x8xf32>
    %970 = arith.addf %962, %969 : vector<24x8xf32>
    %c8_744 = arith.constant 8 : index
    %c0_745 = arith.constant 0 : index
    %c0_746 = arith.constant 0 : index
    %971 = vector.load %arg1[%c8_744, %c0_745, %c0_746] : memref<9x24x24xbf16, #tpu.memory_space<vmem>>, vector<1x24x24xbf16>
    %972 = vector.shape_cast %971 : vector<1x24x24xbf16> to vector<24x24xbf16>
    %cst_747 = arith.constant dense<0.000000e+00> : vector<24x64xf32>
    %973 = tpu.matmul %972, %907, %cst_747 {dimension_numbers = #tpu.dot_dimension_numbers<[1], [0], [0], [1], [0, 0, 1, 1], [], []>} : vector<24x24xbf16>, vector<24x64xbf16>, vector<24x64xf32> -> vector<24x64xf32>
    %974 = arith.truncf %973 : vector<24x64xf32> to vector<24x64xbf16>
    %c8_748 = arith.constant 8 : index
    %c0_749 = arith.constant 0 : index
    %c0_750 = arith.constant 0 : index
    %975 = vector.load %arg8[%c8_748, %c0_749, %c0_750] : memref<9x64x8xbf16, #tpu.memory_space<vmem>>, vector<1x64x8xbf16>
    %976 = vector.shape_cast %975 : vector<1x64x8xbf16> to vector<64x8xbf16>
    %cst_751 = arith.constant dense<0.000000e+00> : vector<24x8xf32>
    %977 = tpu.matmul %974, %976, %cst_751 {dimension_numbers = #tpu.dot_dimension_numbers<[1], [0], [0], [1], [0, 0, 1, 1], [], []>} : vector<24x64xbf16>, vector<64x8xbf16>, vector<24x8xf32> -> vector<24x8xf32>
    %978 = arith.addf %970, %977 : vector<24x8xf32>
    %cst_752 = arith.constant dense<0.000000e+00> : vector<8xf32>
    %979 = vector.multi_reduction <add>, %978, %cst_752 [0] : vector<24x8xf32> to vector<8xf32>
    %980 = vector.shape_cast %979 : vector<8xf32> to vector<1x8xf32>
    %cst_753 = arith.constant 0.055555556 : f32
    %981 = vector.broadcast %cst_753 : f32 to vector<1x8xf32>
    %982 = arith.mulf %980, %981 : vector<1x8xf32>
    %983 = arith.mulf %978, %978 : vector<24x8xf32>
    %cst_754 = arith.constant dense<0.000000e+00> : vector<8xf32>
    %984 = vector.multi_reduction <add>, %983, %cst_754 [0] : vector<24x8xf32> to vector<8xf32>
    %985 = vector.shape_cast %984 : vector<8xf32> to vector<1x8xf32>
    %cst_755 = arith.constant 0.055555556 : f32
    %986 = vector.broadcast %cst_755 : f32 to vector<1x8xf32>
    %987 = arith.mulf %985, %986 : vector<1x8xf32>
    %988 = arith.mulf %982, %982 : vector<1x8xf32>
    %989 = arith.subf %987, %988 : vector<1x8xf32>
    %cst_756 = arith.constant 0.000000e+00 : f32
    %990 = vector.broadcast %cst_756 : f32 to vector<1x8xf32>
    %991 = arith.maximumf %989, %990 : vector<1x8xf32>
    %992 = vector.broadcast %982 : vector<1x8xf32> to vector<24x8xf32>
    %993 = arith.subf %978, %992 : vector<24x8xf32>
    %cst_757 = arith.constant 9.99999974E-6 : f32
    %994 = vector.broadcast %cst_757 : f32 to vector<1x8xf32>
    %995 = arith.addf %991, %994 : vector<1x8xf32>
    %996 = math.rsqrt %995 : vector<1x8xf32>
    %997 = vector.broadcast %996 : vector<1x8xf32> to vector<24x8xf32>
    %998 = arith.mulf %993, %997 : vector<24x8xf32>
    %999 = vector.broadcast %905 : vector<1x8xf32> to vector<24x8xf32>
    %1000 = arith.mulf %998, %999 : vector<24x8xf32>
    %1001 = vector.broadcast %906 : vector<1x8xf32> to vector<24x8xf32>
    %1002 = arith.addf %1000, %1001 : vector<24x8xf32>
    %cst_758 = arith.constant 0.000000e+00 : f32
    %1003 = vector.broadcast %cst_758 : f32 to vector<24x8xf32>
    %1004 = arith.maximumf %1002, %1003 : vector<24x8xf32>
    %c0_759 = arith.constant 0 : index
    %c0_760 = arith.constant 0 : index
    %c0_761 = arith.constant 0 : index
    %1005 = vector.load %arg11[%c0_759, %c0_760, %c0_761] : memref<9x8x24xf32, #tpu.memory_space<vmem>>, vector<1x8x24xf32>
    %1006 = vector.shape_cast %1005 : vector<1x8x24xf32> to vector<8x24xf32>
    %cst_762 = arith.constant dense<0.000000e+00> : vector<8x8xf32>
    %1007 = tpu.matmul %1006, %1004, %cst_762 {dimension_numbers = #tpu.dot_dimension_numbers<[1], [0], [0], [1], [0, 0, 1, 1], [], []>} : vector<8x24xf32>, vector<24x8xf32>, vector<8x8xf32> -> vector<8x8xf32>
    %c0_763 = arith.constant 0 : index
    %c0_764 = arith.constant 0 : index
    %c0_765 = arith.constant 0 : index
    %1008 = vector.load %arg12[%c0_763, %c0_764, %c0_765] : memref<9x8x128xf32, #tpu.memory_space<vmem>>, vector<1x8x128xf32>
    %1009 = vector.shape_cast %1008 : vector<1x8x128xf32> to vector<8x128xf32>
    %cst_766 = arith.constant dense<0.000000e+00> : vector<8x128xf32>
    %1010 = tpu.matmul %1007, %1009, %cst_766 {dimension_numbers = #tpu.dot_dimension_numbers<[1], [0], [0], [1], [0, 0, 1, 1], [], []>} : vector<8x8xf32>, vector<8x128xf32>, vector<8x128xf32> -> vector<8x128xf32>
    %c1_767 = arith.constant 1 : index
    %c0_768 = arith.constant 0 : index
    %c0_769 = arith.constant 0 : index
    %1011 = vector.load %arg11[%c1_767, %c0_768, %c0_769] : memref<9x8x24xf32, #tpu.memory_space<vmem>>, vector<1x8x24xf32>
    %1012 = vector.shape_cast %1011 : vector<1x8x24xf32> to vector<8x24xf32>
    %cst_770 = arith.constant dense<0.000000e+00> : vector<8x8xf32>
    %1013 = tpu.matmul %1012, %1004, %cst_770 {dimension_numbers = #tpu.dot_dimension_numbers<[1], [0], [0], [1], [0, 0, 1, 1], [], []>} : vector<8x24xf32>, vector<24x8xf32>, vector<8x8xf32> -> vector<8x8xf32>
    %c1_771 = arith.constant 1 : index
    %c0_772 = arith.constant 0 : index
    %c0_773 = arith.constant 0 : index
    %1014 = vector.load %arg12[%c1_771, %c0_772, %c0_773] : memref<9x8x128xf32, #tpu.memory_space<vmem>>, vector<1x8x128xf32>
    %1015 = vector.shape_cast %1014 : vector<1x8x128xf32> to vector<8x128xf32>
    %cst_774 = arith.constant dense<0.000000e+00> : vector<8x128xf32>
    %1016 = tpu.matmul %1013, %1015, %cst_774 {dimension_numbers = #tpu.dot_dimension_numbers<[1], [0], [0], [1], [0, 0, 1, 1], [], []>} : vector<8x8xf32>, vector<8x128xf32>, vector<8x128xf32> -> vector<8x128xf32>
    %1017 = arith.addf %1010, %1016 : vector<8x128xf32>
    %c2_775 = arith.constant 2 : index
    %c0_776 = arith.constant 0 : index
    %c0_777 = arith.constant 0 : index
    %1018 = vector.load %arg11[%c2_775, %c0_776, %c0_777] : memref<9x8x24xf32, #tpu.memory_space<vmem>>, vector<1x8x24xf32>
    %1019 = vector.shape_cast %1018 : vector<1x8x24xf32> to vector<8x24xf32>
    %cst_778 = arith.constant dense<0.000000e+00> : vector<8x8xf32>
    %1020 = tpu.matmul %1019, %1004, %cst_778 {dimension_numbers = #tpu.dot_dimension_numbers<[1], [0], [0], [1], [0, 0, 1, 1], [], []>} : vector<8x24xf32>, vector<24x8xf32>, vector<8x8xf32> -> vector<8x8xf32>
    %c2_779 = arith.constant 2 : index
    %c0_780 = arith.constant 0 : index
    %c0_781 = arith.constant 0 : index
    %1021 = vector.load %arg12[%c2_779, %c0_780, %c0_781] : memref<9x8x128xf32, #tpu.memory_space<vmem>>, vector<1x8x128xf32>
    %1022 = vector.shape_cast %1021 : vector<1x8x128xf32> to vector<8x128xf32>
    %cst_782 = arith.constant dense<0.000000e+00> : vector<8x128xf32>
    %1023 = tpu.matmul %1020, %1022, %cst_782 {dimension_numbers = #tpu.dot_dimension_numbers<[1], [0], [0], [1], [0, 0, 1, 1], [], []>} : vector<8x8xf32>, vector<8x128xf32>, vector<8x128xf32> -> vector<8x128xf32>
    %1024 = arith.addf %1017, %1023 : vector<8x128xf32>
    %c3_783 = arith.constant 3 : index
    %c0_784 = arith.constant 0 : index
    %c0_785 = arith.constant 0 : index
    %1025 = vector.load %arg11[%c3_783, %c0_784, %c0_785] : memref<9x8x24xf32, #tpu.memory_space<vmem>>, vector<1x8x24xf32>
    %1026 = vector.shape_cast %1025 : vector<1x8x24xf32> to vector<8x24xf32>
    %cst_786 = arith.constant dense<0.000000e+00> : vector<8x8xf32>
    %1027 = tpu.matmul %1026, %1004, %cst_786 {dimension_numbers = #tpu.dot_dimension_numbers<[1], [0], [0], [1], [0, 0, 1, 1], [], []>} : vector<8x24xf32>, vector<24x8xf32>, vector<8x8xf32> -> vector<8x8xf32>
    %c3_787 = arith.constant 3 : index
    %c0_788 = arith.constant 0 : index
    %c0_789 = arith.constant 0 : index
    %1028 = vector.load %arg12[%c3_787, %c0_788, %c0_789] : memref<9x8x128xf32, #tpu.memory_space<vmem>>, vector<1x8x128xf32>
    %1029 = vector.shape_cast %1028 : vector<1x8x128xf32> to vector<8x128xf32>
    %cst_790 = arith.constant dense<0.000000e+00> : vector<8x128xf32>
    %1030 = tpu.matmul %1027, %1029, %cst_790 {dimension_numbers = #tpu.dot_dimension_numbers<[1], [0], [0], [1], [0, 0, 1, 1], [], []>} : vector<8x8xf32>, vector<8x128xf32>, vector<8x128xf32> -> vector<8x128xf32>
    %1031 = arith.addf %1024, %1030 : vector<8x128xf32>
    %c4_791 = arith.constant 4 : index
    %c0_792 = arith.constant 0 : index
    %c0_793 = arith.constant 0 : index
    %1032 = vector.load %arg11[%c4_791, %c0_792, %c0_793] : memref<9x8x24xf32, #tpu.memory_space<vmem>>, vector<1x8x24xf32>
    %1033 = vector.shape_cast %1032 : vector<1x8x24xf32> to vector<8x24xf32>
    %cst_794 = arith.constant dense<0.000000e+00> : vector<8x8xf32>
    %1034 = tpu.matmul %1033, %1004, %cst_794 {dimension_numbers = #tpu.dot_dimension_numbers<[1], [0], [0], [1], [0, 0, 1, 1], [], []>} : vector<8x24xf32>, vector<24x8xf32>, vector<8x8xf32> -> vector<8x8xf32>
    %c4_795 = arith.constant 4 : index
    %c0_796 = arith.constant 0 : index
    %c0_797 = arith.constant 0 : index
    %1035 = vector.load %arg12[%c4_795, %c0_796, %c0_797] : memref<9x8x128xf32, #tpu.memory_space<vmem>>, vector<1x8x128xf32>
    %1036 = vector.shape_cast %1035 : vector<1x8x128xf32> to vector<8x128xf32>
    %cst_798 = arith.constant dense<0.000000e+00> : vector<8x128xf32>
    %1037 = tpu.matmul %1034, %1036, %cst_798 {dimension_numbers = #tpu.dot_dimension_numbers<[1], [0], [0], [1], [0, 0, 1, 1], [], []>} : vector<8x8xf32>, vector<8x128xf32>, vector<8x128xf32> -> vector<8x128xf32>
    %1038 = arith.addf %1031, %1037 : vector<8x128xf32>
    %c5_799 = arith.constant 5 : index
    %c0_800 = arith.constant 0 : index
    %c0_801 = arith.constant 0 : index
    %1039 = vector.load %arg11[%c5_799, %c0_800, %c0_801] : memref<9x8x24xf32, #tpu.memory_space<vmem>>, vector<1x8x24xf32>
    %1040 = vector.shape_cast %1039 : vector<1x8x24xf32> to vector<8x24xf32>
    %cst_802 = arith.constant dense<0.000000e+00> : vector<8x8xf32>
    %1041 = tpu.matmul %1040, %1004, %cst_802 {dimension_numbers = #tpu.dot_dimension_numbers<[1], [0], [0], [1], [0, 0, 1, 1], [], []>} : vector<8x24xf32>, vector<24x8xf32>, vector<8x8xf32> -> vector<8x8xf32>
    %c5_803 = arith.constant 5 : index
    %c0_804 = arith.constant 0 : index
    %c0_805 = arith.constant 0 : index
    %1042 = vector.load %arg12[%c5_803, %c0_804, %c0_805] : memref<9x8x128xf32, #tpu.memory_space<vmem>>, vector<1x8x128xf32>
    %1043 = vector.shape_cast %1042 : vector<1x8x128xf32> to vector<8x128xf32>
    %cst_806 = arith.constant dense<0.000000e+00> : vector<8x128xf32>
    %1044 = tpu.matmul %1041, %1043, %cst_806 {dimension_numbers = #tpu.dot_dimension_numbers<[1], [0], [0], [1], [0, 0, 1, 1], [], []>} : vector<8x8xf32>, vector<8x128xf32>, vector<8x128xf32> -> vector<8x128xf32>
    %1045 = arith.addf %1038, %1044 : vector<8x128xf32>
    %c6_807 = arith.constant 6 : index
    %c0_808 = arith.constant 0 : index
    %c0_809 = arith.constant 0 : index
    %1046 = vector.load %arg11[%c6_807, %c0_808, %c0_809] : memref<9x8x24xf32, #tpu.memory_space<vmem>>, vector<1x8x24xf32>
    %1047 = vector.shape_cast %1046 : vector<1x8x24xf32> to vector<8x24xf32>
    %cst_810 = arith.constant dense<0.000000e+00> : vector<8x8xf32>
    %1048 = tpu.matmul %1047, %1004, %cst_810 {dimension_numbers = #tpu.dot_dimension_numbers<[1], [0], [0], [1], [0, 0, 1, 1], [], []>} : vector<8x24xf32>, vector<24x8xf32>, vector<8x8xf32> -> vector<8x8xf32>
    %c6_811 = arith.constant 6 : index
    %c0_812 = arith.constant 0 : index
    %c0_813 = arith.constant 0 : index
    %1049 = vector.load %arg12[%c6_811, %c0_812, %c0_813] : memref<9x8x128xf32, #tpu.memory_space<vmem>>, vector<1x8x128xf32>
    %1050 = vector.shape_cast %1049 : vector<1x8x128xf32> to vector<8x128xf32>
    %cst_814 = arith.constant dense<0.000000e+00> : vector<8x128xf32>
    %1051 = tpu.matmul %1048, %1050, %cst_814 {dimension_numbers = #tpu.dot_dimension_numbers<[1], [0], [0], [1], [0, 0, 1, 1], [], []>} : vector<8x8xf32>, vector<8x128xf32>, vector<8x128xf32> -> vector<8x128xf32>
    %1052 = arith.addf %1045, %1051 : vector<8x128xf32>
    %c7_815 = arith.constant 7 : index
    %c0_816 = arith.constant 0 : index
    %c0_817 = arith.constant 0 : index
    %1053 = vector.load %arg11[%c7_815, %c0_816, %c0_817] : memref<9x8x24xf32, #tpu.memory_space<vmem>>, vector<1x8x24xf32>
    %1054 = vector.shape_cast %1053 : vector<1x8x24xf32> to vector<8x24xf32>
    %cst_818 = arith.constant dense<0.000000e+00> : vector<8x8xf32>
    %1055 = tpu.matmul %1054, %1004, %cst_818 {dimension_numbers = #tpu.dot_dimension_numbers<[1], [0], [0], [1], [0, 0, 1, 1], [], []>} : vector<8x24xf32>, vector<24x8xf32>, vector<8x8xf32> -> vector<8x8xf32>
    %c7_819 = arith.constant 7 : index
    %c0_820 = arith.constant 0 : index
    %c0_821 = arith.constant 0 : index
    %1056 = vector.load %arg12[%c7_819, %c0_820, %c0_821] : memref<9x8x128xf32, #tpu.memory_space<vmem>>, vector<1x8x128xf32>
    %1057 = vector.shape_cast %1056 : vector<1x8x128xf32> to vector<8x128xf32>
    %cst_822 = arith.constant dense<0.000000e+00> : vector<8x128xf32>
    %1058 = tpu.matmul %1055, %1057, %cst_822 {dimension_numbers = #tpu.dot_dimension_numbers<[1], [0], [0], [1], [0, 0, 1, 1], [], []>} : vector<8x8xf32>, vector<8x128xf32>, vector<8x128xf32> -> vector<8x128xf32>
    %1059 = arith.addf %1052, %1058 : vector<8x128xf32>
    %c8_823 = arith.constant 8 : index
    %c0_824 = arith.constant 0 : index
    %c0_825 = arith.constant 0 : index
    %1060 = vector.load %arg11[%c8_823, %c0_824, %c0_825] : memref<9x8x24xf32, #tpu.memory_space<vmem>>, vector<1x8x24xf32>
    %1061 = vector.shape_cast %1060 : vector<1x8x24xf32> to vector<8x24xf32>
    %cst_826 = arith.constant dense<0.000000e+00> : vector<8x8xf32>
    %1062 = tpu.matmul %1061, %1004, %cst_826 {dimension_numbers = #tpu.dot_dimension_numbers<[1], [0], [0], [1], [0, 0, 1, 1], [], []>} : vector<8x24xf32>, vector<24x8xf32>, vector<8x8xf32> -> vector<8x8xf32>
    %c8_827 = arith.constant 8 : index
    %c0_828 = arith.constant 0 : index
    %c0_829 = arith.constant 0 : index
    %1063 = vector.load %arg12[%c8_827, %c0_828, %c0_829] : memref<9x8x128xf32, #tpu.memory_space<vmem>>, vector<1x8x128xf32>
    %1064 = vector.shape_cast %1063 : vector<1x8x128xf32> to vector<8x128xf32>
    %cst_830 = arith.constant dense<0.000000e+00> : vector<8x128xf32>
    %1065 = tpu.matmul %1062, %1064, %cst_830 {dimension_numbers = #tpu.dot_dimension_numbers<[1], [0], [0], [1], [0, 0, 1, 1], [], []>} : vector<8x8xf32>, vector<8x128xf32>, vector<8x128xf32> -> vector<8x128xf32>
    %1066 = arith.addf %1059, %1065 : vector<8x128xf32>
    %c0_831 = arith.constant 0 : index
    %c0_832 = arith.constant 0 : index
    %1067 = vector.load %arg13[%c0_831, %c0_832] : memref<1x128xf32, #tpu.memory_space<vmem>>, vector<1x128xf32>
    %1068 = vector.broadcast %1067 : vector<1x128xf32> to vector<8x128xf32>
    %1069 = arith.addf %1066, %1068 : vector<8x128xf32>
    %1070 = tpu.iota {dimensions = array<i32: 1>} : vector<8x128xi32>
    %c9_i32 = arith.constant 9 : i32
    %1071 = vector.broadcast %c9_i32 : i32 to vector<8x128xi32>
    %1072 = arith.cmpi eq, %1070, %1071 : vector<8x128xi32>
    %1073 = math.tanh %1069 : vector<8x128xf32>
    %1074 = arith.select %1072, %1073, %1069 : vector<8x128xi1>, vector<8x128xf32>
    %c0_833 = arith.constant 0 : index
    %c0_834 = arith.constant 0 : index
    %1075 = vector.load %arg14[%c0_833, %c0_834] : memref<8x128xf32, #tpu.memory_space<vmem>>, vector<8x128xf32>
    tpu.vector_store %arg14[%c0_833, %c0_834], %1074 {strides = array<i32>} : memref<8x128xf32, #tpu.memory_space<vmem>>, vector<8x128xf32>,
    return
  }
}

</mosaic_0001>

<bundles_post_ra>
// kernel: resnet_forward.1
= control target key start
LH: loop header
LB: loop body
LE: loop exit
PB: predicated region body
PF: predicated region fallthrough
CT: control target
= control target key end

     0   :  { %vm73_vm0 = vcmask 1043456   ;;  %vm66_vm1 = vcmask 195584   ;;  %vm138_vm2 = vcmask 64512   ;;  %vm683_vm3 = vcmask 523264   ;;  %s13578_s0 = inlined_call_operand.vmem [shape: f32[24,8], index: 0, kind: input, shape index: {}]   ;;  %s13579_s1 = inlined_call_operand.vmem [shape: bf16[9,24,24], index: 1, kind: input, shape index: {}]   ;;  %s13580_s2 = inlined_call_operand.vmem [shape: bf16[9,8,64], index: 2, kind: input, shape index: {}]   ;;  %s13581_s3 = inlined_call_operand.vmem [shape: f32[1,64], index: 3, kind: input, shape index: {}]   ;;  %s13582_s4 = inlined_call_operand.vmem [shape: f32[1,64], index: 4, kind: input, shape index: {}]   ;;  %s13583_s5 = inlined_call_operand.vmem [shape: bf16[72,64,64], index: 5, kind: input, shape index: {}]   ;;  %s13584_s6 = inlined_call_operand.vmem [shape: f32[8,64], index: 6, kind: input, shape index: {}]   ;;  %s13585_s7 = inlined_call_operand.vmem [shape: f32[8,64], index: 7, kind: input, shape index: {}]   ;;  %s13586_s8 = inlined_call_operand.vmem [shape: bf16[9,64,8], index: 8, kind: input, shape index: {}]   ;;  %s13587_s9 = inlined_call_operand.vmem [shape: f32[1,8], index: 9, kind: input, shape index: {}]   ;;  %s13588_s10 = inlined_call_operand.vmem [shape: f32[1,8], index: 10, kind: input, shape index: {}]   ;;  %s13589_s12 = inlined_call_operand.vmem [shape: f32[9,8,128], index: 12, kind: input, shape index: {}]   ;;  %s13590_s11 = inlined_call_operand.vmem [shape: f32[9,8,24], index: 11, kind: input, shape index: {}]   ;;  %s13591_s13 = inlined_call_operand.vmem [shape: f32[1,128], index: 13, kind: input, shape index: {}]   ;;  %s13592_s14 = inlined_call_operand.vmem [shape: f32[8,128], index: 14, kind: output, shape index: {}]  }
   0x1   :  { %v50_v0 = vld [vmem:[%s13578_s0 + $0x10] sm:$0xff]  ;;  %v48_v1 = vld [vmem:[%s13578_s0] sm:$0xff]  ;;  %v49_v2 = vld [vmem:[%s13578_s0 + $0x8] sm:$0xff] }
   0x2   :  { %v54_v3 = vpack.c.bf16 %v50_v0, %v50_v0  ;;  %v11130_v5 = vpack.c.bf16 %v49_v2, %v48_v1  ;;  %v11137_v6 = vld [vmem:[%s13579_s1] sm:$0xff]  ;;  %v11142_v7 = vld [vmem:[%s13579_s1 + $0xc] sm:$0xff]  ;;  %v8249_v8 = vld [vmem:[%s13579_s1 + $0x14] sm:$0xf] }
   0x3   :  { %v57_v9 = vld [vmem:[%s13579_s1 + $0x8] sm:$0xf]  ;;  %v107_v10 = vunpack.c.l.b16 %v8249_v8  ;;  %v8256_v14 = vld [vmem:[%s13580_s2 + $0x4] sm:$0xf]  ;;  %v97_v15 = vld [vmem:[%s13580_s2] sm:$0xf] }
   0x4   :  { %v11128_v4 = vsel %vm73_vm0, %v54_v3, 0  ;;  %v63_v11 = vunpack.c.l.b16 %v57_v9  ;;  %v146_v16 = vsel %vm73_vm0, %v8256_v14, 0  ;;  %v173_v17 = vsel %vm73_vm0, %v97_v15, 0  ;;  %v11183_v24 = vld [vmem:[%s13579_s1 + $0x24] sm:$0xff]  ;;  %v8275_v31 = vld [vmem:[%s13579_s1 + $0x2c] sm:$0xf] }
   0x5   :  { %83 = vmatpush.bf16.msra.mxu0 %v11128_v4  ;;  %122 = vmatpush.bf16.msra.mxu1 %v11128_v4  ;;  %v11160_v12 = vpack.c.b16 %v107_v10, %v107_v10  ;;  %v272_v32 = vunpack.c.l.b16 %v8275_v31  ;;  %v11203_v34 = vld [vmem:[%s13579_s1 + $0x18] sm:$0xff]  ;;  %v8263_v36 = vld [vmem:[%s13579_s1 + $0x20] sm:$0xf]  ;;  %v8299_v39 = vld [vmem:[%s13579_s1 + $0x44] sm:$0xf] }
   0x6   :  { %v11162_v13 = vpack.c.b16 %v63_v11, %v63_v11  ;;  %155 = vmatpush.bf16.msra.mxu2 %v146_v16  ;;  %182 = vmatpush.bf16.msra.mxu3 %v173_v17  ;;  %v11210_v35 = vld [vmem:[%s13579_s1 + $0x3c] sm:$0xff]  ;;  %v202_v37 = vunpack.c.l.b16 %v8263_v36  ;;  %v412_v40 = vunpack.c.l.b16 %v8299_v39  ;;  %v11233_v42 = vld [vmem:[%s13579_s1 + $0x30] sm:$0xff]  ;;  %v8287_v44 = vld [vmem:[%s13579_s1 + $0x38] sm:$0xf] }
   0x7   :  { %v11196_v33 = vpack.c.b16 %v272_v32, %v272_v32  ;;  %v11240_v43 = vld [vmem:[%s13579_s1 + $0x54] sm:$0xff]  ;;  %v342_v45 = vunpack.c.l.b16 %v8287_v44  ;;  %v11256_v47 = vld [vmem:[%s13579_s1 + $0x48] sm:$0xff]  ;;  %v8323_v48 = vld [vmem:[%s13579_s1 + $0x5c] sm:$0xf] }
   0x8   :  { %v11219_v38 = vpack.c.b16 %v202_v37, %v202_v37  ;;  %v11226_v41 = vpack.c.b16 %v412_v40, %v412_v40  ;;  %v552_v49 = vunpack.c.l.b16 %v8323_v48  ;;  %v8311_v51 = vld [vmem:[%s13579_s1 + $0x50] sm:$0xf]  ;;  %v11277_v54 = vld [vmem:[%s13579_s1 + $0x60] sm:$0xff]  ;;  %v8270_v57 = vld [vmem:[%s13580_s2 + $0x8] sm:$0xf] }
   0x9   :  { %84 = vmatpush.bf16.msra.mxu0 %v11130_v5  ;;  %123 = vmatpush.bf16.msra.mxu1 %v11130_v5  ;;  %v11249_v46 = vpack.c.b16 %v342_v45, %v342_v45  ;;  %v482_v52 = vunpack.c.l.b16 %v8311_v51  ;;  %v240_v59 = vsel %vm73_vm0, %v8270_v57, 0  ;;  %v8335_v60 = vld [vmem:[%s13579_s1 + $0x68] sm:$0xf]  ;;  %v8282_v2 = vld [vmem:[%s13580_s2 + $0xc] sm:$0xf] }
   0xa   :  { %217 = vmatpush.bf16.msrb.mxu2 %v11128_v4  ;;  %v11263_v50 = vpack.c.b16 %v552_v49, %v552_v49  ;;  %249 = vmatpush.bf16.msrb.mxu3 %v240_v59  ;;  %v622_v61 = vunpack.c.l.b16 %v8335_v60  ;;  %v310_v3 = vsel %vm73_vm0, %v8282_v2, 0  ;;  %v8318_v39 = vld [vmem:[%s13580_s2 + $0x18] sm:$0xf]  ;;  %v8330_v51 = vld [vmem:[%s13580_s2 + $0x1c] sm:$0xf] }
   0xb   :  { %v11270_v53 = vpack.c.b16 %v482_v52, %v482_v52  ;;  %v520_v44 = vsel %vm73_vm0, %v8318_v39, 0  ;;  %v590_v52 = vsel %vm73_vm0, %v8330_v51, 0  ;;  %v8342_v2 = vld [vmem:[%s13580_s2 + $0x20] sm:$0xf] }
   0xc   :  { %8245 = vmatmul.msk.bf16.vlgmr.msra.gmra.mxu0 %vm66_vm1, %v11137_v6  ;;  %8254 = vmatmul.msk.bf16.vlgmr.msra.gmra.mxu1 %vm66_vm1, %v11142_v7  ;;  %v11294_v0 = vpack.c.b16 %v622_v61, %v622_v61 }
   0xd   :  { %287 = vmatpush.bf16.msrb.mxu0 %v11128_v4  ;;  %319 = vmatpush.bf16.msrb.mxu1 %v310_v3 }
   0xe   :  { %218 = vmatpush.bf16.msrb.mxu2 %v11130_v5 }
  0x11   :  { %288 = vmatpush.bf16.msrb.mxu0 %v11130_v5 }
  0x15   :  { %427 = vmatpush.bf16.msra.mxu0 %v11128_v4 }
  0x19   :  { %428 = vmatpush.bf16.msra.mxu0 %v11130_v5 }
  0x1c   :  { %8255 = vmatmul.msk.bf16.gmra.mxu1 %vm66_vm1, %v11160_v12  ;;  %8246 = vmatmul.msk.bf16.gmra.mxu0 %vm66_vm1, %v11162_v13 }
  0x2c   :  { %8280 = vmatmul.msk.bf16.vlgmr.msrb.gmra.mxu0 %vm66_vm1, %v11183_v24 }
  0x2d   :  { %567 = vmatpush.bf16.msrb.mxu0 %v11128_v4 }
  0x31   :  { %568 = vmatpush.bf16.msrb.mxu0 %v11130_v5 }
  0x3c   :  { %8281 = vmatmul.msk.bf16.gmra.mxu0 %vm66_vm1, %v11196_v33 }
  0x4c   :  { %8304 = vmatmul.msk.bf16.vlgmr.msra.gmra.mxu0 %vm66_vm1, %v11210_v35 }
  0x5c   :  { %8305 = vmatmul.msk.bf16.gmra.mxu0 %vm66_vm1, %v11226_v41 }
  0x6c   :  { %8328 = vmatmul.msk.bf16.vlgmr.msrb.gmra.mxu0 %vm66_vm1, %v11240_v43 }
  0x7c   :  { %8329 = vmatmul.msk.bf16.gmra.mxu0 %vm66_vm1, %v11263_v50 }
  0x89   :  { %v86_v18 = vpop.f32.mrf.mxu0  ;;  %v125_v19 = vpop.f32.mrf.mxu1 }
  0x91   :  { %v88_v20 = vpop.f32.mrf.mxu0  ;;  %v127_v21 = vpop.f32.mrf.mxu1 }
  0x92   :  { %v95_v22 = vpack.c.bf16 %v88_v20, %v86_v18  ;;  %v134_v23 = vpack.c.bf16 %v127_v21, %v125_v19  ;;  %v8294_v18 = vld [vmem:[%s13580_s2 + $0x10] sm:$0xf] }
  0x93   :  { %v380_v20 = vsel %vm73_vm0, %v8294_v18, 0 }
  0x94   :  { %8257 = vmatmul.msk.bf16.vlgmr.msra.gmra.mxu2 %vm138_vm2, %v134_v23  ;;  %8259 = vmatmul.msk.bf16.vlgmr.msra.gmra.mxu3 %vm138_vm2, %v95_v22 }
  0x95   :  { %357 = vmatpush.bf16.msra.mxu2 %v11128_v4  ;;  %389 = vmatpush.bf16.msra.mxu3 %v380_v20 }
  0x99   :  { %v130_v25 = vpop.f32.mrf.mxu1  ;;  %v91_v26 = vpop.f32.mrf.mxu0  ;;  %358 = vmatpush.bf16.msra.mxu2 %v11130_v5 }
  0x9a   :  { %v135_v27 = vpack.c.bf16 %v130_v25, %v130_v25  ;;  %v96_v28 = vpack.c.bf16 %v91_v26, %v91_v26  ;;  %v8306_v25 = vld [vmem:[%s13580_s2 + $0x14] sm:$0xf] }
  0x9b   :  { %v450_v26 = vsel %vm73_vm0, %v8306_v25, 0 }
  0x9c   :  { %459 = vmatpush.bf16.msra.mxu1 %v450_v26 }
  0xa1   :  { %v132_v29 = vpop.f32.mrf.mxu1  ;;  %v93_v30 = vpop.f32.mrf.mxu0 }
  0xa4   :  { %8258 = vmatmul.msk.bf16.gmra.mxu2 %vm138_vm2, %v135_v27  ;;  %8260 = vmatmul.msk.bf16.gmra.mxu3 %vm138_vm2, %v96_v28 }
  0xa9   :  { %v290_v1 = vpop.f32.mrf.mxu0 }
  0xb1   :  { %v292_v9 = vpop.f32.mrf.mxu0 }
  0xb2   :  { %v299_v10 = vpack.c.bf16 %v292_v9, %v290_v1 }
  0xb4   :  { %8268 = vmatmul.msk.bf16.vlgmr.msrb.gmra.mxu2 %vm66_vm1, %v11203_v34  ;;  %8283 = vmatmul.msk.bf16.vlgmr.msrb.gmra.mxu1 %vm138_vm2, %v299_v10 }
  0xb5   :  { %497 = vmatpush.bf16.msrb.mxu2 %v11128_v4  ;;  %599 = vmatpush.bf16.msrb.mxu1 %v590_v52 }
  0xb9   :  { %498 = vmatpush.bf16.msrb.mxu2 %v11130_v5  ;;  %v295_v15 = vpop.f32.mrf.mxu0 }
  0xba   :  { %v300_v17 = vpack.c.bf16 %v295_v15, %v295_v15 }
  0xc1   :  { %v297_v19 = vpop.f32.mrf.mxu0 }
  0xc4   :  { %8269 = vmatmul.msk.bf16.gmra.mxu2 %vm66_vm1, %v11219_v38  ;;  %8284 = vmatmul.msk.bf16.gmra.mxu1 %vm138_vm2, %v300_v17 }
  0xc9   :  { %v430_v23 = vpop.f32.mrf.mxu0 }
  0xd1   :  { %v432_v28 = vpop.f32.mrf.mxu0 }
  0xd2   :  { %v439_v29 = vpack.c.bf16 %v432_v28, %v430_v23 }
  0xd4   :  { %8292 = vmatmul.msk.bf16.vlgmr.msra.gmra.mxu2 %vm66_vm1, %v11233_v42  ;;  %8307 = vmatmul.msk.bf16.vlgmr.msra.gmra.mxu1 %vm138_vm2, %v439_v29 }
  0xd5   :  { %637 = vmatpush.bf16.msra.mxu2 %v11128_v4 }
  0xd9   :  { %638 = vmatpush.bf16.msra.mxu2 %v11130_v5  ;;  %v435_v32 = vpop.f32.mrf.mxu0 }
  0xda   :  { %v440_v37 = vpack.c.bf16 %v435_v32, %v435_v32 }
  0xe1   :  { %v437_v40 = vpop.f32.mrf.mxu0 }
  0xe4   :  { %8293 = vmatmul.msk.bf16.gmra.mxu2 %vm66_vm1, %v11249_v46  ;;  %8308 = vmatmul.msk.bf16.gmra.mxu1 %vm138_vm2, %v440_v37 }
  0xe9   :  { %v570_v49 = vpop.f32.mrf.mxu0 }
  0xf4   :  { %8316 = vmatmul.msk.bf16.vlgmr.msrb.gmra.mxu2 %vm66_vm1, %v11256_v47 }
 0x104   :  { %8317 = vmatmul.msk.bf16.gmra.mxu2 %vm66_vm1, %v11270_v53 }
 0x114   :  { %8340 = vmatmul.msk.bf16.vlgmr.msra.gmra.mxu2 %vm66_vm1, %v11277_v54 }
 0x117   :  { %v157_v55 = vpop.f32.mrf.mxu2  ;;  %v184_v56 = vpop.f32.mrf.mxu3 }
 0x118   :  { %v11284_v58 = vadd.f32 %v184_v56, %v157_v55  ;;  %v572_v56 = vpop.f32.mrf.mxu0 }
 0x119   :  { %v579_v57 = vpack.c.bf16 %v572_v56, %v570_v49 }
 0x11b   :  { %8331 = vmatmul.msk.bf16.vlgmr.msrb.gmra.mxu1 %vm138_vm2, %v579_v57 }
 0x11f   :  { %v11290_v62 = vpop.f32.mrf.mxu2  ;;  %v11292_v63 = vpop.f32.mrf.mxu3 }
 0x120   :  { %v575_v1 = vpop.f32.mrf.mxu0 }
 0x121   :  { %v580_v3 = vpack.c.bf16 %v575_v1, %v575_v1 }
 0x124   :  { %8341 = vmatmul.msk.bf16.gmra.mxu2 %vm66_vm1, %v11294_v0 }
 0x127   :  { %v162_v4 = vpop.f32.mrf.mxu2  ;;  %v189_v5 = vpop.f32.mrf.mxu3 }
 0x128   :  { %v11302_v8 = vadd.f32 %v189_v5, %v162_v4  ;;  %v660_v4 = vsel %vm73_vm0, %v8342_v2, 0  ;;  %v577_v9 = vpop.f32.mrf.mxu0 }
 0x129   :  { %v187_v9 = vadd.f32 %v11292_v63, %v11290_v62 }
 0x12b   :  { %8332 = vmatmul.msk.bf16.gmra.mxu1 %vm138_vm2, %v580_v3 }
 0x12f   :  { %v164_v11 = vpop.f32.mrf.mxu2  ;;  %v191_v14 = vpop.f32.mrf.mxu3 }
 0x131   :  { %v321_v20 = vpop.f32.mrf.mxu1 }
 0x137   :  { %v220_v16 = vpop.f32.mrf.mxu2 }
 0x139   :  { %v323_v23 = vpop.f32.mrf.mxu1 }
 0x13f   :  { %v222_v21 = vpop.f32.mrf.mxu2 }
 0x140   :  { %v229_v22 = vpack.c.bf16 %v222_v21, %v220_v16 }
 0x141   :  { %v326_v25 = vpop.f32.mrf.mxu1 }
 0x142   :  { %8271 = vmatmul.msk.bf16.vlgmr.msrb.gmra.mxu3 %vm138_vm2, %v229_v22 }
 0x143   :  { %529 = vmatpush.bf16.msrb.mxu3 %v520_v44 }
 0x147   :  { %v225_v27 = vpop.f32.mrf.mxu2 }
 0x148   :  { %v230_v31 = vpack.c.bf16 %v225_v27, %v225_v27 }
 0x149   :  { %v328_v26 = vpop.f32.mrf.mxu1 }
 0x14f   :  { %v227_v30 = vpop.f32.mrf.mxu2 }
 0x151   :  { %v461_v30 = vpop.f32.mrf.mxu1 }
 0x152   :  { %8272 = vmatmul.msk.bf16.gmra.mxu3 %vm138_vm2, %v230_v31 }
 0x157   :  { %v360_v36 = vpop.f32.mrf.mxu2 }
 0x159   :  { %v463_v32 = vpop.f32.mrf.mxu1 }
 0x15f   :  { %v362_v45 = vpop.f32.mrf.mxu2 }
 0x160   :  { %v369_v48 = vpack.c.bf16 %v362_v45, %v360_v36 }
 0x161   :  { %v466_v40 = vpop.f32.mrf.mxu1 }
 0x162   :  { %8295 = vmatmul.msk.bf16.vlgmr.msra.gmra.mxu3 %vm138_vm2, %v369_v48 }
 0x163   :  { %669 = vmatpush.bf16.msra.mxu3 %v660_v4 }
 0x167   :  { %v365_v55 = vpop.f32.mrf.mxu2 }
 0x168   :  { %v370_v60 = vpack.c.bf16 %v365_v55, %v365_v55 }
 0x169   :  { %v468_v45 = vpop.f32.mrf.mxu1 }
 0x16f   :  { %v367_v59 = vpop.f32.mrf.mxu2 }
 0x172   :  { %8296 = vmatmul.msk.bf16.gmra.mxu3 %vm138_vm2, %v370_v60 }
 0x177   :  { %v500_v61 = vpop.f32.mrf.mxu2 }
 0x17f   :  { %v502_v5 = vpop.f32.mrf.mxu2 }
 0x180   :  { %v509_v10 = vpack.c.bf16 %v502_v5, %v500_v61 }
 0x182   :  { %8319 = vmatmul.msk.bf16.vlgmr.msrb.gmra.mxu3 %vm138_vm2, %v509_v10 }
 0x187   :  { %v505_v11 = vpop.f32.mrf.mxu2 }
 0x188   :  { %v510_v15 = vpack.c.bf16 %v505_v11, %v505_v11 }
 0x18f   :  { %v507_v14 = vpop.f32.mrf.mxu2 }
 0x192   :  { %8320 = vmatmul.msk.bf16.gmra.mxu3 %vm138_vm2, %v510_v15 }
 0x197   :  { %v640_v16 = vpop.f32.mrf.mxu2 }
 0x198   :  { %v601_v52 = vpop.f32.mrf.mxu1 }
 0x19f   :  { %v642_v17 = vpop.f32.mrf.mxu2 }
 0x1a0   :  { %v649_v18 = vpack.c.bf16 %v642_v17, %v640_v16  ;;  %v603_v56 = vpop.f32.mrf.mxu1 }
 0x1a2   :  { %8343 = vmatmul.msk.bf16.vlgmr.msra.gmra.mxu3 %vm138_vm2, %v649_v18 }
 0x1a7   :  { %v645_v19 = vpop.f32.mrf.mxu2 }
 0x1a8   :  { %v650_v21 = vpack.c.bf16 %v645_v19, %v645_v19  ;;  %v606_v60 = vpop.f32.mrf.mxu1 }
 0x1af   :  { %v647_v22 = vpop.f32.mrf.mxu2 }
 0x1b0   :  { %v608_v1 = vpop.f32.mrf.mxu1 }
 0x1b1   :  { %v10646_v1 = vld [vmem:[%s13583_s5 + $0x30] sm:$0xff] }
 0x1b2   :  { %8344 = vmatmul.msk.bf16.gmra.mxu3 %vm138_vm2, %v650_v21 }
 0x1c5   :  { %v251_v27 = vpop.f32.mrf.mxu3 }
 0x1c6   :  { %v260_v28 = vadd.f32 %v251_v27, %v11284_v58 }
 0x1c8   :  { %v330_v29 = vadd.f32 %v321_v20, %v260_v28 }
 0x1cd   :  { %v253_v31 = vpop.f32.mrf.mxu3 }
 0x1ce   :  { %v261_v10 = vadd.f32 %v253_v31, %v187_v9 }
 0x1d0   :  { %v331_v14 = vadd.f32 %v323_v23, %v261_v10 }
 0x1d5   :  { %v256_v36 = vpop.f32.mrf.mxu3 }
 0x1d6   :  { %v262_v37 = vadd.f32 %v256_v36, %v11302_v8 }
 0x1d8   :  { %v332_v39 = vadd.f32 %v326_v25, %v262_v37 }
 0x1dd   :  { %v258_v44 = vpop.f32.mrf.mxu3 }
 0x1e5   :  { %v391_v48 = vpop.f32.mrf.mxu3 }
 0x1e6   :  { %v400_v49 = vadd.f32 %v391_v48, %v330_v29 }
 0x1e8   :  { %v470_v51 = vadd.f32 %v461_v30, %v400_v49 }
 0x1ed   :  { %v393_v55 = vpop.f32.mrf.mxu3 }
 0x1ee   :  { %v401_v15 = vadd.f32 %v393_v55, %v331_v14 }
 0x1f0   :  { %v471_v17 = vadd.f32 %v463_v32, %v401_v15 }
 0x1f5   :  { %v396_v57 = vpop.f32.mrf.mxu3 }
 0x1f6   :  { %v402_v59 = vadd.f32 %v396_v57, %v332_v39  ;;  %v10647_v57 = vld [vmem:[%s13583_s5 + $0x38] sm:$0xff] }
 0x1f7   :  { %844 = vmatpush.bf16.msrb.mxu2 %v10647_v57 }
 0x1f8   :  { %v472_v58 = vadd.f32 %v466_v40, %v402_v59 }
 0x1fb   :  { %845 = vmatpush.bf16.msrb.mxu2 %v10646_v1 }
 0x1fd   :  { %v398_v61 = vpop.f32.mrf.mxu3 }
 0x205   :  { %v531_v2 = vpop.f32.mrf.mxu3 }
 0x206   :  { %v540_v3 = vadd.f32 %v531_v2, %v470_v51 }
 0x208   :  { %v610_v4 = vadd.f32 %v601_v52, %v540_v3 }
 0x20d   :  { %v533_v8 = vpop.f32.mrf.mxu3 }
 0x20e   :  { %v541_v18 = vadd.f32 %v533_v8, %v471_v17 }
 0x210   :  { %v611_v19 = vadd.f32 %v603_v56, %v541_v18 }
 0x215   :  { %v536_v5 = vpop.f32.mrf.mxu3 }
 0x216   :  { %v542_v22 = vadd.f32 %v536_v5, %v472_v58  ;;  %v10645_v5 = vld [vmem:[%s13583_s5 + $0x28] sm:$0xff] }
 0x217   :  { %846 = vmatpush.bf16.msrb.mxu2 %v10645_v5 }
 0x218   :  { %v612_v27 = vadd.f32 %v606_v60, %v542_v22 }
 0x21d   :  { %v538_v11 = vpop.f32.mrf.mxu3 }
 0x225   :  { %v671_v16 = vpop.f32.mrf.mxu3 }
 0x226   :  { %v680_v25 = vadd.f32 %v671_v16, %v610_v4  ;;  %v10644_v16 = vld [vmem:[%s13583_s5 + $0x20] sm:$0xff] }
 0x227   :  { %847 = vmatpush.bf16.msrb.mxu2 %v10644_v16 }
 0x228   :  { %v696_v28 = vmul.f32 %v680_v25, %v680_v25  ;;  %v684_v23 = vsel %vm683_vm3, %v680_v25, 0.0 }
 0x22a   :  { %v699_v32 = vsel %vm683_vm3, %v696_v28, 0.0 }
 0x22d   :  { %v673_v20 = vpop.f32.mrf.mxu3 }
 0x22e   :  { %v11342_v21 = vadd.f32 %v673_v20, %v611_v19 }
 0x230   :  { %v697_v26 = vmul.f32 %v11342_v21, %v11342_v21  ;;  %v685_v62 = vsel %vm683_vm3, %v11342_v21, 0.0 }
 0x231   :  { %v686_v31 = vadd.f32 %v685_v62, %v684_v23  ;;  %v10964_v62 = vld [vmem:[%s13581_s3] ss:$0 sm:$0xff] }
 0x232   :  { %v700_v29 = vsel %vm683_vm3, %v697_v26, 0.0 }
 0x233   :  { %v701_v39 = vadd.f32 %v700_v29, %v699_v32 }
 0x235   :  { %v676_v63 = vpop.f32.mrf.mxu3 }
 0x236   :  { %v682_v30 = vadd.f32 %v676_v63, %v612_v27 }
 0x238   :  { %v687_v36 = vsel %vm683_vm3, %v682_v30, 0.0  ;;  %v698_v37 = vmul.f32 %v682_v30, %v682_v30 }
 0x239   :  { %v688_v40 = vadd.f32 %v687_v36, %v686_v31  ;;  %v10965_v31 = vld [vmem:[%s13582_s4] ss:$0 sm:$0xff] }
 0x23a   :  { %v702_v44 = vsel %vm683_vm3, %v698_v37, 0.0 }
 0x23b   :  { %v689_v45 = vrot.slane %v688_v40, 4  ;;  %v703_v48 = vadd.f32 %v702_v44, %v701_v39 }
 0x23d   :  { %v690_v49 = vadd.f32 %v689_v45, %v688_v40  ;;  %v704_v51 = vrot.slane %v703_v48, 4  ;;  %v678_v52 = vpop.f32.mrf.mxu3 }
 0x23f   :  { %v691_v55 = vrot.slane %v690_v49, 2  ;;  %v705_v56 = vadd.f32 %v704_v51, %v703_v48 }
 0x241   :  { %v692_v59 = vadd.f32 %v691_v55, %v690_v49  ;;  %v706_v58 = vrot.slane %v705_v56, 2  ;;  %v10651_v55 = vld [vmem:[%s13583_s5 + $0x58] sm:$0xff] }
 0x243   :  { %v693_v60 = vrot.slane %v692_v59, 1  ;;  %v707_v61 = vadd.f32 %v706_v58, %v705_v56  ;;  %v10650_v56 = vld [vmem:[%s13583_s5 + $0x50] sm:$0xff]  ;;  %v10648_v58 = vld [vmem:[%s13583_s5 + $0x40] sm:$0xff] }
 0x245   :  { %v694_v2 = vadd.f32 %v693_v60, %v692_v59  ;;  %v708_v3 = vrot.slane %v707_v61, 1  ;;  %v10649_v59 = vld [vmem:[%s13583_s5 + $0x48] sm:$0xff] }
 0x247   :  { %v695_v4 = vmul.f32 0.055555556, %v694_v2  ;;  %v709_v8 = vadd.f32 %v708_v3, %v707_v61 }
 0x249   :  { %v710_v9 = vmul.f32 0.055555556, %v709_v8  ;;  %v711_v10 = vmul.f32 %v695_v4, %v695_v4  ;;  %v714_v11 = vsub.f32 %v680_v25, %v695_v4  ;;  %v716_v14 = vsub.f32 %v682_v30, %v695_v4 }
 0x24a   :  { %v715_v25 = vsub.f32 %v11342_v21, %v695_v4 }
 0x24b   :  { %v712_v15 = vsub.f32 %v710_v9, %v711_v10 }
 0x24d   :  { %v713_v17 = vmax.f32 %v712_v15, 0.0 }
 0x24f   :  { %v717_v18 = vadd.f32 1e-05, %v713_v17 }
 0x251   :  { %10985 = vrsqrt.f32 %v717_v18  ;;  %vm724_vm5 = vweird.f32 %v717_v18 }
 0x257   :  { %v10986_v19 = vpop.eup %10985 }
 0x258   :  { %v719_v20 = vmul.f32 %v10986_v19, %v717_v18  ;;  %vm725_vm4 = vweird.f32 %v10986_v19  ;;  %v10658_v18 = vld [vmem:[%s13583_s5 + $0x90] sm:$0xff] }
 0x259   :  { %vm726_vm6 = vmor %vm724_vm5, %vm725_vm4 }
 0x25a   :  { %v720_v22 = vmul.f32 %v10986_v19, %v719_v20  ;;  %v10654_v20 = vld [vmem:[%s13583_s5 + $0x70] sm:$0xff] }
 0x25c   :  { %v721_v26 = vmul.f32 0.5, %v720_v22  ;;  %v10656_v22 = vld [vmem:[%s13583_s5 + $0x80] sm:$0xff] }
 0x25e   :  { %v722_v27 = vsub.f32 1.5, %v721_v26 }
 0x260   :  { %v723_v28 = vmul.f32 %v10986_v19, %v722_v27 }
 0x262   :  { %v727_v63 = vsel %vm726_vm6, %v10986_v19, %v723_v28 }
 0x263   :  { %v728_v23 = vmul.f32 %v727_v63, %v714_v11  ;;  %v729_v29 = vmul.f32 %v727_v63, %v715_v25  ;;  %v730_v30 = vmul.f32 %v727_v63, %v716_v14  ;;  %v10653_v63 = vld [vmem:[%s13583_s5 + $0x68] sm:$0xff] }
 0x265   :  { %v734_v32 = vmul.f32 %v10964_v62, %v728_v23  ;;  %v735_v36 = vmul.f32 %v10964_v62, %v729_v29  ;;  %v736_v37 = vmul.f32 %v10964_v62, %v730_v30  ;;  %v10652_v23 = vld [vmem:[%s13583_s5 + $0x60] sm:$0xff] }
 0x267   :  { %v742_v39 = vadd.f32 %v10965_v31, %v736_v37  ;;  %v11372_v40 = vadd.f32 %v10965_v31, %v734_v32  ;;  %v11374_v21 = vadd.f32 %v10965_v31, %v735_v36 }
 0x269   :  { %v11376_v44 = vmax.f32 %v742_v39, 0.0  ;;  %v743_v48 = vmax.f32 %v11372_v40, 0.0  ;;  %v744_v49 = vmax.f32 %v11374_v21, 0.0  ;;  %v10715_v21 = vld [vmem:[%s13583_s5 + $0x258] sm:$0xff] }
 0x26b   :  { %v749_v45 = vpack.c.bf16 %v11376_v44, %v11376_v44  ;;  %v11392_v52 = vpack.c.bf16 %v744_v49, %v743_v48 }
 0x26d   :  { %v11383_v51 = vsel %vm73_vm0, %v749_v45, 0 }
 0x26e   :  { %759 = vmatpush.bf16.msra.mxu0 %v11383_v51  ;;  %787 = vmatpush.bf16.msra.mxu1 %v11383_v51 }
 0x26f   :  { %992 = vmatpush.bf16.msra.mxu2 %v11383_v51 }
 0x272   :  { %760 = vmatpush.bf16.msra.mxu0 %v11392_v52  ;;  %788 = vmatpush.bf16.msra.mxu1 %v11392_v52 }
 0x273   :  { %993 = vmatpush.bf16.msra.mxu2 %v11392_v52 }
 0x275   :  { %8345 = vmatmul.msk.bf16.vlgmr.msra.gmra.mxu0 %vm66_vm1, %v11137_v6  ;;  %8347 = vmatmul.msk.bf16.vlgmr.msra.gmra.mxu1 %vm66_vm1, %v11142_v7  ;;  %v10643_v6 = vld [vmem:[%s13583_s5 + $0x18] sm:$0xff]  ;;  %v10642_v7 = vld [vmem:[%s13583_s5 + $0x10] sm:$0xff] }
 0x276   :  { %912 = vmatpush.bf16.msrb.mxu0 %v11383_v51  ;;  %892 = vmatpush.bf16.msrb.mxu3 %v10643_v6 }
 0x277   :  { %969 = vmatpush.bf16.msrb.mxu1 %v10651_v55 }
 0x27a   :  { %913 = vmatpush.bf16.msrb.mxu0 %v11392_v52  ;;  %893 = vmatpush.bf16.msrb.mxu3 %v10642_v7 }
 0x27b   :  { %970 = vmatpush.bf16.msrb.mxu1 %v10650_v56  ;;  %v10663_v56 = vld [vmem:[%s13583_s5 + $0xb8] sm:$0xff] }
 0x27e   :  { %1072 = vmatpush.bf16.msra.mxu0 %v11383_v51 }
 0x27f   :  { %971 = vmatpush.bf16.msrb.mxu1 %v10649_v59  ;;  %v10664_v59 = vld [vmem:[%s13583_s5 + $0xc0] sm:$0xff] }
 0x282   :  { %1073 = vmatpush.bf16.msra.mxu0 %v11392_v52 }
 0x283   :  { %972 = vmatpush.bf16.msrb.mxu1 %v10648_v58 }
 0x285   :  { %8346 = vmatmul.msk.bf16.gmra.mxu0 %vm66_vm1, %v11162_v13  ;;  %8348 = vmatmul.msk.bf16.gmra.mxu1 %vm66_vm1, %v11160_v12 }
 0x295   :  { %8393 = vmatmul.msk.bf16.vlgmr.msrb.gmra.mxu0 %vm66_vm1, %v11203_v34  ;;  %v10641_v34 = vld [vmem:[%s13583_s5 + $0x8] sm:$0xff] }
 0x296   :  { %1232 = vmatpush.bf16.msrb.mxu0 %v11383_v51  ;;  %894 = vmatpush.bf16.msrb.mxu3 %v10641_v34 }
 0x29a   :  { %1233 = vmatpush.bf16.msrb.mxu0 %v11392_v52 }
 0x2a5   :  { %8394 = vmatmul.msk.bf16.gmra.mxu0 %vm66_vm1, %v11219_v38 }
 0x2b5   :  { %8449 = vmatmul.msk.bf16.vlgmr.msra.gmra.mxu0 %vm66_vm1, %v11233_v42  ;;  %v10640_v42 = vld [vmem:[%s13583_s5] sm:$0xff] }
 0x2b6   :  { %1392 = vmatpush.bf16.msra.mxu0 %v11383_v51  ;;  %895 = vmatpush.bf16.msrb.mxu3 %v10640_v42 }
 0x2ba   :  { %1393 = vmatpush.bf16.msra.mxu0 %v11392_v52 }
 0x2c5   :  { %8450 = vmatmul.msk.bf16.gmra.mxu0 %vm66_vm1, %v11249_v46 }
 0x2d5   :  { %8505 = vmatmul.msk.bf16.vlgmr.msrb.gmra.mxu0 %vm66_vm1, %v11256_v47 }
 0x2e5   :  { %8506 = vmatmul.msk.bf16.gmra.mxu0 %vm66_vm1, %v11270_v53 }
 0x2f2   :  { %v762_v57 = vpop.f32.mrf.mxu0  ;;  %v790_v47 = vpop.f32.mrf.mxu1 }
 0x2f5   :  { %8561 = vmatmul.msk.bf16.vlgmr.msra.gmra.mxu0 %vm66_vm1, %v11277_v54 }
 0x2fa   :  { %v764_v60 = vpop.f32.mrf.mxu0  ;;  %v792_v61 = vpop.f32.mrf.mxu1 }
 0x2fb   :  { %v771_v1 = vpack.c.bf16 %v764_v60, %v762_v57  ;;  %v799_v2 = vpack.c.bf16 %v792_v61, %v790_v47  ;;  %v10665_v57 = vld [vmem:[%s13583_s5 + $0xc8] sm:$0xff]  ;;  %v10662_v47 = vld [vmem:[%s13583_s5 + $0xb0] sm:$0xff] }
 0x2fc   :  { %v10661_v61 = vld [vmem:[%s13583_s5 + $0xa8] sm:$0xff] }
 0x2fd   :  { %8373 = vmatmul.msk.bf16.vlgmr.msrb.gmra.mxu2 %vm683_vm3, %v799_v2  ;;  %8391 = vmatmul.msk.bf16.vlgmr.msrb.gmra.mxu3 %vm683_vm3, %v771_v1 }
 0x2fe   :  { %1152 = vmatpush.bf16.msrb.mxu2 %v11383_v51 }
 0x302   :  { %1153 = vmatpush.bf16.msrb.mxu2 %v11392_v52  ;;  %v767_v3 = vpop.f32.mrf.mxu0  ;;  %v795_v54 = vpop.f32.mrf.mxu1 }
 0x303   :  { %v772_v4 = vpack.c.bf16 %v767_v3, %v767_v3  ;;  %v800_v8 = vpack.c.bf16 %v795_v54, %v795_v54  ;;  %v10660_v3 = vld [vmem:[%s13583_s5 + $0xa0] sm:$0xff] }
 0x305   :  { %8562 = vmatmul.msk.bf16.gmra.mxu0 %vm66_vm1, %v11294_v0 }
 0x30a   :  { %v769_v5 = vpop.f32.mrf.mxu0  ;;  %v797_v9 = vpop.f32.mrf.mxu1 }
 0x30d   :  { %8374 = vmatmul.msk.bf16.gmra.mxu2 %vm683_vm3, %v800_v8  ;;  %8392 = vmatmul.msk.bf16.gmra.mxu3 %vm683_vm3, %v772_v4 }
 0x312   :  { %v915_v10 = vpop.f32.mrf.mxu0 }
 0x31a   :  { %v917_v11 = vpop.f32.mrf.mxu0 }
 0x31b   :  { %v924_v14 = vpack.c.bf16 %v917_v11, %v915_v10 }
 0x31d   :  { %8419 = vmatmul.msk.bf16.vlgmr.msrb.gmra.mxu1 %vm683_vm3, %v924_v14  ;;  %8421 = vmatmul.msk.bf16.vlgmr.msra.gmra.mxu2 %vm66_vm1, %v11183_v24  ;;  %v10659_v24 = vld [vmem:[%s13583_s5 + $0x98] sm:$0xff] }
 0x31e   :  { %1312 = vmatpush.bf16.msra.mxu2 %v11383_v51  ;;  %1129 = vmatpush.bf16.msra.mxu1 %v10659_v24  ;;  %v10667_v51 = vld [vmem:[%s13583_s5 + $0xd8] sm:$0xff] }
 0x322   :  { %1313 = vmatpush.bf16.msra.mxu2 %v11392_v52  ;;  %v920_v15 = vpop.f32.mrf.mxu0  ;;  %1130 = vmatpush.bf16.msra.mxu1 %v10658_v18  ;;  %v10666_v52 = vld [vmem:[%s13583_s5 + $0xd0] sm:$0xff] }
 0x323   :  { %v925_v16 = vpack.c.bf16 %v920_v15, %v920_v15  ;;  %v10675_v15 = vld [vmem:[%s13583_s5 + $0x118] sm:$0xff] }
 0x32a   :  { %v922_v17 = vpop.f32.mrf.mxu0 }
 0x32b   :  { %v10674_v17 = vld [vmem:[%s13583_s5 + $0x110] sm:$0xff] }
 0x32d   :  { %8420 = vmatmul.msk.bf16.gmra.mxu1 %vm683_vm3, %v925_v16  ;;  %8422 = vmatmul.msk.bf16.gmra.mxu2 %vm66_vm1, %v11196_v33 }
 0x332   :  { %v1075_v19 = vpop.f32.mrf.mxu0 }
 0x33a   :  { %v1077_v25 = vpop.f32.mrf.mxu0 }
 0x33b   :  { %v1084_v62 = vpack.c.bf16 %v1077_v25, %v1075_v19 }
 0x33d   :  { %8477 = vmatmul.msk.bf16.vlgmr.msrb.gmra.mxu2 %vm66_vm1, %v11210_v35  ;;  %v10655_v35 = vld [vmem:[%s13583_s5 + $0x78] sm:$0xff] }
 0x33e   :  { %1049 = vmatpush.bf16.msra.mxu3 %v10655_v35  ;;  %v10671_v35 = vld [vmem:[%s13583_s5 + $0xf8] sm:$0xff] }
 0x342   :  { %1050 = vmatpush.bf16.msra.mxu3 %v10654_v20  ;;  %v1080_v31 = vpop.f32.mrf.mxu0  ;;  %v10670_v20 = vld [vmem:[%s13583_s5 + $0xf0] sm:$0xff] }
 0x343   :  { %v1085_v37 = vpack.c.bf16 %v1080_v31, %v1080_v31 }
 0x346   :  { %1051 = vmatpush.bf16.msra.mxu3 %v10653_v63 }
 0x34a   :  { %1052 = vmatpush.bf16.msra.mxu3 %v10652_v23  ;;  %v1082_v45 = vpop.f32.mrf.mxu0 }
 0x34d   :  { %8478 = vmatmul.msk.bf16.gmra.mxu2 %vm66_vm1, %v11226_v41 }
 0x34e   :  { %1209 = vmatpush.bf16.msrb.mxu3 %v10663_v56 }
 0x352   :  { %v1235_v34 = vpop.f32.mrf.mxu0  ;;  %1210 = vmatpush.bf16.msrb.mxu3 %v10662_v47 }
 0x356   :  { %1211 = vmatpush.bf16.msrb.mxu3 %v10661_v61 }
 0x35a   :  { %v1237_v60 = vpop.f32.mrf.mxu0  ;;  %1212 = vmatpush.bf16.msrb.mxu3 %v10660_v3 }
 0x35b   :  { %v1244_v2 = vpack.c.bf16 %v1237_v60, %v1235_v34 }
 0x35d   :  { %8533 = vmatmul.msk.bf16.vlgmr.msra.gmra.mxu2 %vm66_vm1, %v11240_v43  ;;  %v10657_v43 = vld [vmem:[%s13583_s5 + $0x88] sm:$0xff] }
 0x35e   :  { %1131 = vmatpush.bf16.msra.mxu1 %v10657_v43  ;;  %v10673_v43 = vld [vmem:[%s13583_s5 + $0x108] sm:$0xff] }
 0x362   :  { %1132 = vmatpush.bf16.msra.mxu1 %v10656_v22  ;;  %v1240_v8 = vpop.f32.mrf.mxu0  ;;  %v10672_v22 = vld [vmem:[%s13583_s5 + $0x100] sm:$0xff] }
 0x363   :  { %v1245_v11 = vpack.c.bf16 %v1240_v8, %v1240_v8 }
 0x365   :  { %8475 = vmatmul.msk.bf16.vlgmr.msra.gmra.mxu1 %vm683_vm3, %v1084_v62  ;;  %v10668_v62 = vld [vmem:[%s13583_s5 + $0xe0] sm:$0xff] }
 0x366   :  { %1289 = vmatpush.bf16.msrb.mxu1 %v10667_v51 }
 0x36a   :  { %1290 = vmatpush.bf16.msrb.mxu1 %v10666_v52  ;;  %v1242_v14 = vpop.f32.mrf.mxu0 }
 0x36d   :  { %8534 = vmatmul.msk.bf16.gmra.mxu2 %vm66_vm1, %v11263_v50 }
 0x36e   :  { %1291 = vmatpush.bf16.msrb.mxu1 %v10665_v57 }
 0x372   :  { %1292 = vmatpush.bf16.msrb.mxu1 %v10664_v59  ;;  %v1395_v19 = vpop.f32.mrf.mxu0 }
 0x375   :  { %8476 = vmatmul.msk.bf16.gmra.mxu1 %vm683_vm3, %v1085_v37 }
 0x376   :  { %1449 = vmatpush.bf16.msra.mxu1 %v10675_v15 }
 0x37a   :  { %1450 = vmatpush.bf16.msra.mxu1 %v10674_v17 }
 0x37e   :  { %1451 = vmatpush.bf16.msra.mxu1 %v10673_v43 }
 0x380   :  { %v849_v26 = vpop.f32.mrf.mxu2  ;;  %v897_v27 = vpop.f32.mrf.mxu3 }
 0x381   :  { %v898_v28 = vadd.f32 %v897_v27, %v849_v26  ;;  %v1397_v27 = vpop.f32.mrf.mxu0 }
 0x382   :  { %1452 = vmatpush.bf16.msra.mxu1 %v10672_v22  ;;  %v1404_v25 = vpack.c.bf16 %v1397_v27, %v1395_v19 }
 0x385   :  { %8531 = vmatmul.msk.bf16.vlgmr.msrb.gmra.mxu1 %vm683_vm3, %v1244_v2 }
 0x388   :  { %v11500_v29 = vpop.f32.mrf.mxu2  ;;  %v11502_v30 = vpop.f32.mrf.mxu3 }
 0x389   :  { %v900_v27 = vadd.f32 %v11502_v30, %v11500_v29 }
 0x390   :  { %v854_v32 = vpop.f32.mrf.mxu2  ;;  %v902_v36 = vpop.f32.mrf.mxu3 }
 0x391   :  { %v903_v39 = vadd.f32 %v902_v36, %v854_v32  ;;  %v1400_v36 = vpop.f32.mrf.mxu0 }
 0x395   :  { %8532 = vmatmul.msk.bf16.gmra.mxu1 %vm683_vm3, %v1245_v11 }
 0x398   :  { %v856_v6 = vpop.f32.mrf.mxu2  ;;  %v904_v7 = vpop.f32.mrf.mxu3 }
 0x399   :  { %v1402_v51 = vpop.f32.mrf.mxu0 }
 0x39a   :  { %v974_v42 = vpop.f32.mrf.mxu1 }
 0x39b   :  { %v11511_v55 = vadd.f32 %v974_v42, %v898_v28  ;;  %v10669_v28 = vld [vmem:[%s13583_s5 + $0xe8] sm:$0xff] }
 0x3a0   :  { %v995_v58 = vpop.f32.mrf.mxu2 }
 0x3a2   :  { %v11528_v1 = vpop.f32.mrf.mxu1 }
 0x3a5   :  { %8587 = vmatmul.msk.bf16.vlgmr.msra.gmra.mxu1 %vm683_vm3, %v1404_v25 }
 0x3a8   :  { %v997_v54 = vpop.f32.mrf.mxu2 }
 0x3a9   :  { %v1004_v4 = vpack.c.bf16 %v997_v54, %v995_v58 }
 0x3aa   :  { %v979_v5 = vpop.f32.mrf.mxu1 }
 0x3ab   :  { %v11534_v9 = vadd.f32 %v979_v5, %v903_v39  ;;  %8447 = vmatmul.msk.bf16.vlgmr.msra.gmra.mxu3 %vm683_vm3, %v1004_v4  ;;  %v1405_v39 = vpack.c.bf16 %v1400_v36, %v1400_v36 }
 0x3ac   :  { %1369 = vmatpush.bf16.msra.mxu3 %v10671_v35 }
 0x3b0   :  { %v1000_v10 = vpop.f32.mrf.mxu2  ;;  %1370 = vmatpush.bf16.msra.mxu3 %v10670_v20 }
 0x3b1   :  { %v1005_v18 = vpack.c.bf16 %v1000_v10, %v1000_v10 }
 0x3b2   :  { %v981_v16 = vpop.f32.mrf.mxu1 }
 0x3b4   :  { %1371 = vmatpush.bf16.msra.mxu3 %v10669_v28  ;;  %v984_v28 = vadd.f32 %v11528_v1, %v900_v27  ;;  %v10680_v27 = vld [vmem:[%s13583_s5 + $0x140] sm:$0xff] }
 0x3b5   :  { %8588 = vmatmul.msk.bf16.gmra.mxu1 %vm683_vm3, %v1405_v39 }
 0x3b8   :  { %v1002_v24 = vpop.f32.mrf.mxu2  ;;  %1372 = vmatpush.bf16.msra.mxu3 %v10668_v62 }
 0x3bb   :  { %8448 = vmatmul.msk.bf16.gmra.mxu3 %vm683_vm3, %v1005_v18 }
 0x3c0   :  { %v1155_v26 = vpop.f32.mrf.mxu2 }
 0x3c8   :  { %v1157_v63 = vpop.f32.mrf.mxu2 }
 0x3c9   :  { %v1164_v23 = vpack.c.bf16 %v1157_v63, %v1155_v26 }
 0x3cb   :  { %8503 = vmatmul.msk.bf16.vlgmr.msrb.gmra.mxu3 %vm683_vm3, %v1164_v23 }
 0x3d0   :  { %v1160_v31 = vpop.f32.mrf.mxu2 }
 0x3d1   :  { %v1165_v37 = vpack.c.bf16 %v1160_v31, %v1160_v31 }
 0x3d8   :  { %v1162_v32 = vpop.f32.mrf.mxu2 }
 0x3db   :  { %8504 = vmatmul.msk.bf16.gmra.mxu3 %vm683_vm3, %v1165_v37 }
 0x3e0   :  { %v1315_v45 = vpop.f32.mrf.mxu2 }
 0x3e2   :  { %v1134_v56 = vpop.f32.mrf.mxu1 }
 0x3e8   :  { %v1317_v52 = vpop.f32.mrf.mxu2 }
 0x3e9   :  { %v1324_v6 = vpack.c.bf16 %v1317_v52, %v1315_v45 }
 0x3ea   :  { %v1136_v57 = vpop.f32.mrf.mxu1 }
 0x3eb   :  { %8559 = vmatmul.msk.bf16.vlgmr.msra.gmra.mxu3 %vm683_vm3, %v1324_v6 }
 0x3f0   :  { %v1320_v7 = vpop.f32.mrf.mxu2 }
 0x3f1   :  { %v1325_v34 = vpack.c.bf16 %v1320_v7, %v1320_v7 }
 0x3f2   :  { %v1139_v47 = vpop.f32.mrf.mxu1 }
 0x3f8   :  { %v1322_v42 = vpop.f32.mrf.mxu2 }
 0x3fa   :  { %v1141_v59 = vpop.f32.mrf.mxu1 }
 0x3fb   :  { %8560 = vmatmul.msk.bf16.gmra.mxu3 %vm683_vm3, %v1325_v34 }
 0x402   :  { %v1294_v58 = vpop.f32.mrf.mxu1 }
 0x40a   :  { %v1296_v60 = vpop.f32.mrf.mxu1 }
 0x412   :  { %v1299_v54 = vpop.f32.mrf.mxu1 }
 0x41a   :  { %v1301_v8 = vpop.f32.mrf.mxu1 }
 0x422   :  { %v1454_v15 = vpop.f32.mrf.mxu1 }
 0x42a   :  { %v1456_v24 = vpop.f32.mrf.mxu1 }
 0x42e   :  { %v1054_v61 = vpop.f32.mrf.mxu3 }
 0x42f   :  { %v1063_v2 = vadd.f32 %v1054_v61, %v11511_v55 }
 0x431   :  { %v1143_v3 = vadd.f32 %v1134_v56, %v1063_v2 }
 0x432   :  { %v1459_v35 = vpop.f32.mrf.mxu1 }
 0x436   :  { %v1056_v4 = vpop.f32.mrf.mxu3 }
 0x43a   :  { %v1461_v55 = vpop.f32.mrf.mxu1 }
 0x43e   :  { %v1059_v5 = vpop.f32.mrf.mxu3 }
 0x43f   :  { %v1065_v10 = vadd.f32 %v1059_v5, %v11534_v9  ;;  %v1064_v9 = vadd.f32 %v1056_v4, %v984_v28  ;;  %v10683_v5 = vld [vmem:[%s13583_s5 + $0x158] sm:$0xff] }
 0x440   :  { %1623 = vmatpush.bf16.msrb.mxu0 %v10683_v5  ;;  %v10678_v5 = vld [vmem:[%s13583_s5 + $0x130] sm:$0xff] }
 0x441   :  { %v1145_v11 = vadd.f32 %v1139_v47, %v1065_v10  ;;  %v1144_v62 = vadd.f32 %v1136_v57, %v1064_v9 }
 0x446   :  { %v1061_v14 = vpop.f32.mrf.mxu3 }
 0x44e   :  { %v1214_v16 = vpop.f32.mrf.mxu3 }
 0x44f   :  { %v1223_v17 = vadd.f32 %v1214_v16, %v1143_v3  ;;  %v10682_v16 = vld [vmem:[%s13583_s5 + $0x150] sm:$0xff] }
 0x450   :  { %1624 = vmatpush.bf16.msrb.mxu0 %v10682_v16  ;;  %v10686_v16 = vld [vmem:[%s13583_s5 + $0x170] sm:$0xff] }
 0x451   :  { %v1303_v18 = vadd.f32 %v1294_v58, %v1223_v17 }
 0x456   :  { %v1216_v19 = vpop.f32.mrf.mxu3 }
 0x457   :  { %v1224_v63 = vadd.f32 %v1216_v19, %v1144_v62 }
 0x459   :  { %v1304_v23 = vadd.f32 %v1296_v60, %v1224_v63 }
 0x45e   :  { %v1219_v43 = vpop.f32.mrf.mxu3 }
 0x45f   :  { %v1225_v20 = vadd.f32 %v1219_v43, %v1145_v11 }
 0x461   :  { %v1305_v22 = vadd.f32 %v1299_v54, %v1225_v20 }
 0x466   :  { %v1221_v26 = vpop.f32.mrf.mxu3 }
 0x46e   :  { %v1374_v25 = vpop.f32.mrf.mxu3 }
 0x46f   :  { %v1383_v32 = vadd.f32 %v1374_v25, %v1303_v18 }
 0x471   :  { %v1463_v39 = vadd.f32 %v1454_v15, %v1383_v32 }
 0x473   :  { %v1478_v52 = vmul.f32 %v1463_v39, %v1463_v39  ;;  %v1466_v29 = vsel %vm683_vm3, %v1463_v39, 0.0 }
 0x475   :  { %v1481_v42 = vsel %vm683_vm3, %v1478_v52, 0.0 }
 0x476   :  { %v1376_v31 = vpop.f32.mrf.mxu3 }
 0x477   :  { %v1384_v36 = vadd.f32 %v1376_v31, %v1304_v23 }
 0x479   :  { %v1464_v37 = vadd.f32 %v1456_v24, %v1384_v36 }
 0x47b   :  { %v1479_v45 = vmul.f32 %v1464_v37, %v1464_v37  ;;  %v1467_v6 = vsel %vm683_vm3, %v1464_v37, 0.0 }
 0x47c   :  { %v1468_v34 = vadd.f32 %v1467_v6, %v1466_v29 }
 0x47d   :  { %v1482_v30 = vsel %vm683_vm3, %v1479_v45, 0.0 }
 0x47e   :  { %v1379_v51 = vpop.f32.mrf.mxu3  ;;  %v1483_v47 = vadd.f32 %v1482_v30, %v1481_v42 }
 0x47f   :  { %v1385_v7 = vadd.f32 %v1379_v51, %v1305_v22 }
 0x481   :  { %v1465_v1 = vadd.f32 %v1459_v35, %v1385_v7  ;;  %v10681_v35 = vld [vmem:[%s13583_s5 + $0x148] sm:$0xff]  ;;  %v10967_v7 = vld [vmem:[%s13585_s7] ss:$0 sm:$0xff] }
 0x482   :  { %1625 = vmatpush.bf16.msrb.mxu0 %v10681_v35 }
 0x483   :  { %v1469_v56 = vsel %vm683_vm3, %v1465_v1, 0.0  ;;  %v1480_v57 = vmul.f32 %v1465_v1, %v1465_v1 }
 0x484   :  { %v1470_v59 = vadd.f32 %v1469_v56, %v1468_v34 }
 0x485   :  { %v1484_v58 = vsel %vm683_vm3, %v1480_v57, 0.0 }
 0x486   :  { %v1471_v60 = vrot.slane %v1470_v59, 4  ;;  %v1485_v61 = vadd.f32 %v1484_v58, %v1483_v47  ;;  %v1381_v2 = vpop.f32.mrf.mxu3  ;;  %1626 = vmatpush.bf16.msrb.mxu0 %v10680_v27 }
 0x487   :  { %v11620_v2 = vld [vmem:[%s13579_s1 + $0xc] sm:$0xff] }
 0x488   :  { %v1472_v3 = vadd.f32 %v1471_v60, %v1470_v59  ;;  %v1486_v54 = vrot.slane %v1485_v61, 4 }
 0x48a   :  { %v1473_v4 = vrot.slane %v1472_v3, 2  ;;  %v1487_v8 = vadd.f32 %v1486_v54, %v1485_v61  ;;  %v11613_v61 = vld [vmem:[%s13579_s1] sm:$0xff]  ;;  %v10679_v54 = vld [vmem:[%s13583_s5 + $0x138] sm:$0xff] }
 0x48b   :  { %1671 = vmatpush.bf16.msrb.mxu1 %v10679_v54 }
 0x48c   :  { %v1474_v10 = vadd.f32 %v1473_v4, %v1472_v3  ;;  %v1488_v11 = vrot.slane %v1487_v8, 2  ;;  %v11634_v3 = vld [vmem:[%s13579_s1 + $0x18] sm:$0xff]  ;;  %v11648_v4 = vld [vmem:[%s13579_s1 + $0x30] sm:$0xff] }
 0x48e   :  { %v1475_v14 = vrot.slane %v1474_v10, 1  ;;  %v1489_v15 = vadd.f32 %v1488_v11, %v1487_v8  ;;  %v11659_v8 = vld [vmem:[%s13579_s1 + $0x48] sm:$0xff]  ;;  %v10676_v11 = vld [vmem:[%s13583_s5 + $0x120] sm:$0xff] }
 0x48f   :  { %1672 = vmatpush.bf16.msrb.mxu1 %v10678_v5  ;;  %v10688_v5 = vld [vmem:[%s13583_s5 + $0x180] sm:$0xff] }
 0x490   :  { %v1476_v17 = vadd.f32 %v1475_v14, %v1474_v10  ;;  %v1490_v24 = vrot.slane %v1489_v15, 1  ;;  %v10677_v10 = vld [vmem:[%s13583_s5 + $0x128] sm:$0xff]  ;;  %v10687_v14 = vld [vmem:[%s13583_s5 + $0x178] sm:$0xff] }
 0x492   :  { %v1477_v18 = vmul.f32 0.055555556, %v1476_v17  ;;  %v1491_v19 = vadd.f32 %v1490_v24, %v1489_v15  ;;  %v11680_v15 = vld [vmem:[%s13579_s1 + $0x60] sm:$0xff] }
 0x493   :  { %1673 = vmatpush.bf16.msrb.mxu1 %v10677_v10  ;;  %v10703_v10 = vld [vmem:[%s13583_s5 + $0x1f8] sm:$0xff] }
 0x494   :  { %v1492_v43 = vmul.f32 0.055555556, %v1491_v19  ;;  %v1493_v20 = vmul.f32 %v1477_v18, %v1477_v18  ;;  %v1496_v22 = vsub.f32 %v1463_v39, %v1477_v18  ;;  %v1498_v55 = vsub.f32 %v1465_v1, %v1477_v18  ;;  %v10966_v39 = vld [vmem:[%s13584_s6] ss:$0 sm:$0xff] }
 0x495   :  { %v1497_v36 = vsub.f32 %v1464_v37, %v1477_v18  ;;  %v10685_v18 = vld [vmem:[%s13583_s5 + $0x168] sm:$0xff]  ;;  %v10684_v19 = vld [vmem:[%s13583_s5 + $0x160] sm:$0xff] }
 0x496   :  { %v1494_v26 = vsub.f32 %v1492_v43, %v1493_v20 }
 0x497   :  { %1674 = vmatpush.bf16.msrb.mxu1 %v10676_v11 }
 0x498   :  { %v1495_v28 = vmax.f32 %v1494_v26, 0.0 }
 0x49a   :  { %v1499_v9 = vadd.f32 1e-05, %v1495_v28 }
 0x49c   :  { %10987 = vrsqrt.f32 %v1499_v9  ;;  %vm1506_vm8 = vweird.f32 %v1499_v9 }
 0x4a2   :  { %v10988_v25 = vpop.eup %10987 }
 0x4a3   :  { %v1501_v62 = vmul.f32 %v10988_v25, %v1499_v9  ;;  %vm1507_vm7 = vweird.f32 %v10988_v25 }
 0x4a4   :  { %vm1508_vm9 = vmor %vm1506_vm8, %vm1507_vm7 }
 0x4a5   :  { %v1502_v63 = vmul.f32 %v10988_v25, %v1501_v62 }
 0x4a7   :  { %v1503_v23 = vmul.f32 0.5, %v1502_v63 }
 0x4a9   :  { %v1504_v31 = vsub.f32 1.5, %v1503_v23 }
 0x4ab   :  { %v1505_v32 = vmul.f32 %v10988_v25, %v1504_v31  ;;  %v11705_v31 = vld [vmem:[%s13579_s1 + $0x24] sm:$0xff] }
 0x4ad   :  { %v1509_v45 = vsel %vm1508_vm9, %v10988_v25, %v1505_v32 }
 0x4ae   :  { %v1510_v51 = vmul.f32 %v1509_v45, %v1496_v22  ;;  %v1511_v52 = vmul.f32 %v1509_v45, %v1497_v36  ;;  %v1512_v6 = vmul.f32 %v1509_v45, %v1498_v55  ;;  %v11717_v45 = vld [vmem:[%s13579_s1 + $0x3c] sm:$0xff] }
 0x4b0   :  { %v1514_v29 = vmul.f32 %v10966_v39, %v1510_v51  ;;  %v1515_v30 = vmul.f32 %v10966_v39, %v1511_v52  ;;  %v1516_v1 = vmul.f32 %v10966_v39, %v1512_v6  ;;  %v11726_v51 = vld [vmem:[%s13579_s1 + $0x54] sm:$0xff] }
 0x4b1   :  { %v10695_v52 = vld [vmem:[%s13583_s5 + $0x1b8] sm:$0xff] }
 0x4b2   :  { %v1518_v34 = vadd.f32 %v10967_v7, %v1514_v29  ;;  %v1519_v42 = vadd.f32 %v10967_v7, %v1515_v30  ;;  %v1520_v56 = vadd.f32 %v10967_v7, %v1516_v1  ;;  %v10694_v7 = vld [vmem:[%s13583_s5 + $0x1b0] sm:$0xff]  ;;  %v10693_v29 = vld [vmem:[%s13583_s5 + $0x1a8] sm:$0xff]  ;;  %v10692_v1 = vld [vmem:[%s13583_s5 + $0x1a0] sm:$0xff] }
 0x4b4   :  { %v1521_v37 = vmax.f32 %v1518_v34, 0.0  ;;  %v1522_v57 = vmax.f32 %v1519_v42, 0.0  ;;  %v1523_v47 = vmax.f32 %v1520_v56, 0.0  ;;  %v10691_v42 = vld [vmem:[%s13583_s5 + $0x198] sm:$0xff] }
 0x4b5   :  { %1828 = vmatpush.bf16.msra.mxu1 %v10691_v42 }
 0x4b6   :  { %v11598_v59 = vpack.c.bf16 %v1522_v57, %v1521_v37  ;;  %v1527_v58 = vpack.c.bf16 %v1523_v47, %v1523_v47  ;;  %v10690_v37 = vld [vmem:[%s13583_s5 + $0x190] sm:$0xff] }
 0x4b8   :  { %v11601_v60 = vsel %vm73_vm0, %v1527_v58, 0  ;;  %v10689_v58 = vld [vmem:[%s13583_s5 + $0x188] sm:$0xff] }
 0x4b9   :  { %1537 = vmatpush.bf16.msrb.mxu2 %v11601_v60  ;;  %1566 = vmatpush.bf16.msrb.mxu3 %v11601_v60 }
 0x4ba   :  { %1771 = vmatpush.bf16.msra.mxu0 %v11601_v60  ;;  %1829 = vmatpush.bf16.msra.mxu1 %v10690_v37 }
 0x4bd   :  { %1538 = vmatpush.bf16.msrb.mxu2 %v11598_v59  ;;  %1567 = vmatpush.bf16.msrb.mxu3 %v11598_v59 }
 0x4be   :  { %1772 = vmatpush.bf16.msra.mxu0 %v11598_v59  ;;  %1830 = vmatpush.bf16.msra.mxu1 %v10689_v58 }
 0x4c0   :  { %8589 = vmatmul.msk.bf16.vlgmr.msrb.gmra.mxu2 %vm66_vm1, %v11613_v61  ;;  %8599 = vmatmul.msk.bf16.vlgmr.msrb.gmra.mxu3 %vm66_vm1, %v11620_v2 }
 0x4c1   :  { %1691 = vmatpush.bf16.msra.mxu2 %v11601_v60  ;;  %1748 = vmatpush.bf16.msra.mxu3 %v10687_v14 }
 0x4c2   :  { %1831 = vmatpush.bf16.msra.mxu1 %v10688_v5 }
 0x4c5   :  { %1692 = vmatpush.bf16.msra.mxu2 %v11598_v59  ;;  %1749 = vmatpush.bf16.msra.mxu3 %v10686_v16 }
 0x4c9   :  { %1851 = vmatpush.bf16.msrb.mxu2 %v11601_v60  ;;  %1750 = vmatpush.bf16.msra.mxu3 %v10685_v18 }
 0x4cd   :  { %1852 = vmatpush.bf16.msrb.mxu2 %v11598_v59  ;;  %1751 = vmatpush.bf16.msra.mxu3 %v10684_v19 }
 0x4d0   :  { %8590 = vmatmul.msk.bf16.gmra.mxu2 %vm66_vm1, %v11162_v13  ;;  %8600 = vmatmul.msk.bf16.gmra.mxu3 %vm66_vm1, %v11160_v12 }
 0x4d1   :  { %1908 = vmatpush.bf16.msrb.mxu3 %v10695_v52  ;;  %v10711_v52 = vld [vmem:[%s13583_s5 + $0x238] sm:$0xff] }
 0x4d5   :  { %1909 = vmatpush.bf16.msrb.mxu3 %v10694_v7 }
 0x4d9   :  { %1910 = vmatpush.bf16.msrb.mxu3 %v10693_v29 }
 0x4dd   :  { %1911 = vmatpush.bf16.msrb.mxu3 %v10692_v1 }
 0x4e0   :  { %8645 = vmatmul.msk.bf16.vlgmr.msra.gmra.mxu2 %vm66_vm1, %v11634_v3 }
 0x4e1   :  { %2011 = vmatpush.bf16.msra.mxu2 %v11601_v60 }
 0x4e5   :  { %2012 = vmatpush.bf16.msra.mxu2 %v11598_v59 }
 0x4f0   :  { %8646 = vmatmul.msk.bf16.gmra.mxu2 %vm66_vm1, %v11219_v38 }
 0x500   :  { %8701 = vmatmul.msk.bf16.vlgmr.msrb.gmra.mxu2 %vm66_vm1, %v11648_v4 }
 0x501   :  { %2171 = vmatpush.bf16.msrb.mxu2 %v11601_v60 }
 0x505   :  { %2172 = vmatpush.bf16.msrb.mxu2 %v11598_v59 }
 0x510   :  { %8702 = vmatmul.msk.bf16.gmra.mxu2 %vm66_vm1, %v11249_v46 }
 0x520   :  { %8757 = vmatmul.msk.bf16.vlgmr.msra.gmra.mxu2 %vm66_vm1, %v11659_v8 }
 0x530   :  { %8758 = vmatmul.msk.bf16.gmra.mxu2 %vm66_vm1, %v11270_v53 }
 0x540   :  { %8813 = vmatmul.msk.bf16.vlgmr.msrb.gmra.mxu2 %vm66_vm1, %v11680_v15 }
 0x543   :  { %v1540_v17 = vpop.f32.mrf.mxu2  ;;  %v1569_v24 = vpop.f32.mrf.mxu3 }
 0x54b   :  { %v1542_v35 = vpop.f32.mrf.mxu2  ;;  %v1571_v43 = vpop.f32.mrf.mxu3 }
 0x54c   :  { %v1549_v20 = vpack.c.bf16 %v1542_v35, %v1540_v17  ;;  %v1578_v22 = vpack.c.bf16 %v1571_v43, %v1569_v24  ;;  %v10702_v17 = vld [vmem:[%s13583_s5 + $0x1f0] sm:$0xff]  ;;  %v10701_v24 = vld [vmem:[%s13583_s5 + $0x1e8] sm:$0xff]  ;;  %v10700_v43 = vld [vmem:[%s13583_s5 + $0x1e0] sm:$0xff] }
 0x54e   :  { %8625 = vmatmul.msk.bf16.vlgmr.msrb.gmra.mxu0 %vm683_vm3, %v1578_v22  ;;  %8643 = vmatmul.msk.bf16.vlgmr.msrb.gmra.mxu1 %vm683_vm3, %v1549_v20 }
 0x54f   :  { %1931 = vmatpush.bf16.msrb.mxu0 %v11601_v60 }
 0x550   :  { %8814 = vmatmul.msk.bf16.gmra.mxu2 %vm66_vm1, %v11294_v0 }
 0x553   :  { %1932 = vmatpush.bf16.msrb.mxu0 %v11598_v59  ;;  %v1545_v55 = vpop.f32.mrf.mxu2  ;;  %v1574_v26 = vpop.f32.mrf.mxu3 }
 0x554   :  { %v1550_v27 = vpack.c.bf16 %v1545_v55, %v1545_v55  ;;  %v1579_v28 = vpack.c.bf16 %v1574_v26, %v1574_v26 }
 0x55b   :  { %v1547_v9 = vpop.f32.mrf.mxu2  ;;  %v1576_v25 = vpop.f32.mrf.mxu3 }
 0x55c   :  { %v10698_v9 = vld [vmem:[%s13583_s5 + $0x1d0] sm:$0xff] }
 0x55e   :  { %8626 = vmatmul.msk.bf16.gmra.mxu0 %vm683_vm3, %v1579_v28  ;;  %8644 = vmatmul.msk.bf16.gmra.mxu1 %vm683_vm3, %v1550_v27  ;;  %v10699_v27 = vld [vmem:[%s13583_s5 + $0x1d8] sm:$0xff] }
 0x55f   :  { %1988 = vmatpush.bf16.msrb.mxu1 %v10699_v27 }
 0x563   :  { %v1694_v62 = vpop.f32.mrf.mxu2  ;;  %1989 = vmatpush.bf16.msrb.mxu1 %v10698_v9 }
 0x56b   :  { %v1696_v63 = vpop.f32.mrf.mxu2 }
 0x56c   :  { %v1703_v23 = vpack.c.bf16 %v1696_v63, %v1694_v62  ;;  %v10697_v62 = vld [vmem:[%s13583_s5 + $0x1c8] sm:$0xff] }
 0x56d   :  { %1990 = vmatpush.bf16.msrb.mxu1 %v10697_v62 }
 0x56e   :  { %8671 = vmatmul.msk.bf16.vlgmr.msra.gmra.mxu3 %vm683_vm3, %v1703_v23  ;;  %8673 = vmatmul.msk.bf16.vlgmr.msra.gmra.mxu0 %vm66_vm1, %v11705_v31 }
 0x56f   :  { %2091 = vmatpush.bf16.msra.mxu0 %v11601_v60  ;;  %2068 = vmatpush.bf16.msra.mxu3 %v10703_v10  ;;  %v10706_v10 = vld [vmem:[%s13583_s5 + $0x210] sm:$0xff] }
 0x573   :  { %2092 = vmatpush.bf16.msra.mxu0 %v11598_v59  ;;  %v1699_v32 = vpop.f32.mrf.mxu2  ;;  %2069 = vmatpush.bf16.msra.mxu3 %v10702_v17  ;;  %v10705_v17 = vld [vmem:[%s13583_s5 + $0x208] sm:$0xff] }
 0x574   :  { %v1704_v36 = vpack.c.bf16 %v1699_v32, %v1699_v32 }
 0x577   :  { %2070 = vmatpush.bf16.msra.mxu3 %v10701_v24  ;;  %v10704_v24 = vld [vmem:[%s13583_s5 + $0x200] sm:$0xff] }
 0x57b   :  { %v1701_v39 = vpop.f32.mrf.mxu2  ;;  %2071 = vmatpush.bf16.msra.mxu3 %v10700_v43 }
 0x57c   :  { %v10696_v39 = vld [vmem:[%s13583_s5 + $0x1c0] sm:$0xff] }
 0x57d   :  { %1991 = vmatpush.bf16.msrb.mxu1 %v10696_v39 }
 0x57e   :  { %8672 = vmatmul.msk.bf16.gmra.mxu3 %vm683_vm3, %v1704_v36  ;;  %8674 = vmatmul.msk.bf16.gmra.mxu0 %vm66_vm1, %v11196_v33 }
 0x583   :  { %v1854_v6 = vpop.f32.mrf.mxu2 }
 0x58b   :  { %v1856_v30 = vpop.f32.mrf.mxu2 }
 0x58c   :  { %v1863_v34 = vpack.c.bf16 %v1856_v30, %v1854_v6  ;;  %v10710_v30 = vld [vmem:[%s13583_s5 + $0x230] sm:$0xff] }
 0x58e   :  { %8729 = vmatmul.msk.bf16.vlgmr.msrb.gmra.mxu0 %vm66_vm1, %v11717_v45  ;;  %8727 = vmatmul.msk.bf16.vlgmr.msrb.gmra.mxu3 %vm683_vm3, %v1863_v34  ;;  %v10709_v34 = vld [vmem:[%s13583_s5 + $0x228] sm:$0xff] }
 0x58f   :  { %2228 = vmatpush.bf16.msrb.mxu3 %v10711_v52 }
 0x593   :  { %v1859_v56 = vpop.f32.mrf.mxu2  ;;  %2229 = vmatpush.bf16.msrb.mxu3 %v10710_v30 }
 0x594   :  { %v1864_v54 = vpack.c.bf16 %v1859_v56, %v1859_v56  ;;  %v10708_v56 = vld [vmem:[%s13583_s5 + $0x220] sm:$0xff] }
 0x597   :  { %2230 = vmatpush.bf16.msrb.mxu3 %v10709_v34 }
 0x59b   :  { %v1861_v60 = vpop.f32.mrf.mxu2  ;;  %2231 = vmatpush.bf16.msrb.mxu3 %v10708_v56 }
 0x59e   :  { %8730 = vmatmul.msk.bf16.gmra.mxu0 %vm66_vm1, %v11226_v41  ;;  %8728 = vmatmul.msk.bf16.gmra.mxu3 %vm683_vm3, %v1864_v54  ;;  %v10707_v54 = vld [vmem:[%s13583_s5 + $0x218] sm:$0xff] }
 0x5a3   :  { %v2014_v16 = vpop.f32.mrf.mxu2 }
 0x5ab   :  { %v2016_v20 = vpop.f32.mrf.mxu2 }
 0x5ac   :  { %v2023_v22 = vpack.c.bf16 %v2016_v20, %v2014_v16 }
 0x5ae   :  { %8785 = vmatmul.msk.bf16.vlgmr.msra.gmra.mxu0 %vm66_vm1, %v11726_v51  ;;  %8783 = vmatmul.msk.bf16.vlgmr.msra.gmra.mxu3 %vm683_vm3, %v2023_v22 }
 0x5af   :  { %2453 = vmatpush.bf16.msra.mxu3 %v10715_v21 }
 0x5b3   :  { %v2019_v28 = vpop.f32.mrf.mxu2 }
 0x5b4   :  { %v2024_v23 = vpack.c.bf16 %v2019_v28, %v2019_v28 }
 0x5bb   :  { %v2021_v63 = vpop.f32.mrf.mxu2 }
 0x5be   :  { %8786 = vmatmul.msk.bf16.gmra.mxu0 %vm66_vm1, %v11263_v50  ;;  %8784 = vmatmul.msk.bf16.gmra.mxu3 %vm683_vm3, %v2024_v23 }
 0x5c3   :  { %v2174_v29 = vpop.f32.mrf.mxu2 }
 0x5cb   :  { %v1628_v57 = vpop.f32.mrf.mxu0  ;;  %v1676_v47 = vpop.f32.mrf.mxu1 }
 0x5cc   :  { %v1677_v59 = vadd.f32 %v1676_v47, %v1628_v57  ;;  %v2176_v37 = vpop.f32.mrf.mxu2 }
 0x5cd   :  { %v2183_v57 = vpack.c.bf16 %v2176_v37, %v2174_v29 }
 0x5cf   :  { %8839 = vmatmul.msk.bf16.vlgmr.msrb.gmra.mxu3 %vm683_vm3, %v2183_v57 }
 0x5d3   :  { %v11760_v11 = vpop.f32.mrf.mxu0  ;;  %v11762_v14 = vpop.f32.mrf.mxu1 }
 0x5db   :  { %v1633_v18 = vpop.f32.mrf.mxu0  ;;  %v1681_v19 = vpop.f32.mrf.mxu1 }
 0x5dc   :  { %v1682_v35 = vadd.f32 %v1681_v19, %v1633_v18 }
 0x5e3   :  { %v1635_v55 = vpop.f32.mrf.mxu0  ;;  %v1683_v26 = vpop.f32.mrf.mxu1 }
 0x5eb   :  { %v1774_v25 = vpop.f32.mrf.mxu0 }
 0x5f1   :  { %v1753_v32 = vpop.f32.mrf.mxu3 }
 0x5f2   :  { %v1762_v36 = vadd.f32 %v1753_v32, %v1677_v59 }
 0x5f3   :  { %v1776_v6 = vpop.f32.mrf.mxu0 }
 0x5f4   :  { %v1783_v7 = vpack.c.bf16 %v1776_v6, %v1774_v25 }
 0x5f6   :  { %8699 = vmatmul.msk.bf16.vlgmr.msra.gmra.mxu1 %vm683_vm3, %v1783_v7 }
 0x5f7   :  { %2148 = vmatpush.bf16.msra.mxu1 %v10707_v54 }
 0x5f9   :  { %v11795_v1 = vpop.f32.mrf.mxu3 }
 0x5fb   :  { %v1779_v42 = vpop.f32.mrf.mxu0  ;;  %2149 = vmatpush.bf16.msra.mxu1 %v10706_v10 }
 0x5fc   :  { %v1784_v60 = vpack.c.bf16 %v1779_v42, %v1779_v42 }
 0x5ff   :  { %2150 = vmatpush.bf16.msra.mxu1 %v10705_v17 }
 0x601   :  { %v1758_v47 = vpop.f32.mrf.mxu3 }
 0x602   :  { %v1764_v59 = vadd.f32 %v1758_v47, %v1682_v35  ;;  %v2179_v35 = vpop.f32.mrf.mxu2 }
 0x603   :  { %v1781_v58 = vpop.f32.mrf.mxu0  ;;  %2151 = vmatpush.bf16.msra.mxu1 %v10704_v24  ;;  %v2184_v43 = vpack.c.bf16 %v2179_v35, %v2179_v35 }
 0x605   :  { %8840 = vmatmul.msk.bf16.gmra.mxu3 %vm683_vm3, %v2184_v43 }
 0x606   :  { %8700 = vmatmul.msk.bf16.gmra.mxu1 %vm683_vm3, %v1784_v60 }
 0x609   :  { %v1760_v5 = vpop.f32.mrf.mxu3 }
 0x60a   :  { %v2181_v22 = vpop.f32.mrf.mxu2 }
 0x60b   :  { %v1934_v16 = vpop.f32.mrf.mxu0  ;;  %v1679_v22 = vadd.f32 %v11762_v14, %v11760_v11 }
 0x611   :  { %v1913_v23 = vpop.f32.mrf.mxu3 }
 0x613   :  { %v1936_v18 = vpop.f32.mrf.mxu0 }
 0x614   :  { %v1943_v19 = vpack.c.bf16 %v1936_v18, %v1934_v16 }
 0x616   :  { %8755 = vmatmul.msk.bf16.vlgmr.msrb.gmra.mxu1 %vm683_vm3, %v1943_v19 }
 0x619   :  { %v1915_v32 = vpop.f32.mrf.mxu3 }
 0x61b   :  { %v1939_v20 = vpop.f32.mrf.mxu0 }
 0x61c   :  { %v1944_v26 = vpack.c.bf16 %v1939_v20, %v1939_v20 }
 0x621   :  { %v1918_v39 = vpop.f32.mrf.mxu3 }
 0x623   :  { %v1941_v55 = vpop.f32.mrf.mxu0 }
 0x624   :  { %v1763_v55 = vadd.f32 %v11795_v1, %v1679_v22  ;;  %v10718_v22 = vld [vmem:[%s13583_s5 + $0x270] sm:$0xff] }
 0x626   :  { %8756 = vmatmul.msk.bf16.gmra.mxu1 %vm683_vm3, %v1944_v26 }
 0x629   :  { %v1920_v52 = vpop.f32.mrf.mxu3 }
 0x62b   :  { %v2094_v27 = vpop.f32.mrf.mxu0 }
 0x631   :  { %v2073_v6 = vpop.f32.mrf.mxu3 }
 0x633   :  { %v2096_v28 = vpop.f32.mrf.mxu0 }
 0x634   :  { %v2103_v9 = vpack.c.bf16 %v2096_v28, %v2094_v27 }
 0x636   :  { %8811 = vmatmul.msk.bf16.vlgmr.msra.gmra.mxu1 %vm683_vm3, %v2103_v9 }
 0x639   :  { %v2075_v7 = vpop.f32.mrf.mxu3 }
 0x63b   :  { %v2099_v25 = vpop.f32.mrf.mxu0 }
 0x63c   :  { %v2104_v62 = vpack.c.bf16 %v2099_v25, %v2099_v25 }
 0x641   :  { %v2078_v42 = vpop.f32.mrf.mxu3 }
 0x643   :  { %v2101_v63 = vpop.f32.mrf.mxu0 }
 0x646   :  { %8812 = vmatmul.msk.bf16.gmra.mxu1 %vm683_vm3, %v2104_v62 }
 0x649   :  { %v2080_v37 = vpop.f32.mrf.mxu3 }
 0x652   :  { %v2233_v54 = vpop.f32.mrf.mxu3 }
 0x65a   :  { %v2235_v16 = vpop.f32.mrf.mxu3 }
 0x673   :  { %v1833_v29 = vpop.f32.mrf.mxu1 }
 0x674   :  { %v1842_v30 = vadd.f32 %v1833_v29, %v1762_v36 }
 0x676   :  { %v1922_v34 = vadd.f32 %v1913_v23, %v1842_v30 }
 0x67b   :  { %v1835_v56 = vpop.f32.mrf.mxu1 }
 0x683   :  { %v1838_v57 = vpop.f32.mrf.mxu1 }
 0x684   :  { %v1844_v47 = vadd.f32 %v1838_v57, %v1764_v59  ;;  %v1843_v59 = vadd.f32 %v1835_v56, %v1763_v55 }
 0x686   :  { %v1924_v58 = vadd.f32 %v1918_v39, %v1844_v47  ;;  %v1923_v27 = vadd.f32 %v1915_v32, %v1843_v59 }
 0x688   :  { %v2238_v18 = vpop.f32.mrf.mxu3 }
 0x68b   :  { %v1840_v60 = vpop.f32.mrf.mxu1 }
 0x690   :  { %v2240_v20 = vpop.f32.mrf.mxu3 }
 0x693   :  { %v1993_v5 = vpop.f32.mrf.mxu1 }
 0x694   :  { %v2002_v10 = vadd.f32 %v1993_v5, %v1922_v34 }
 0x696   :  { %v2082_v17 = vadd.f32 %v2073_v6, %v2002_v10 }
 0x69b   :  { %v1995_v24 = vpop.f32.mrf.mxu1 }
 0x69c   :  { %v2003_v28 = vadd.f32 %v1995_v24, %v1923_v27 }
 0x69e   :  { %v2083_v9 = vadd.f32 %v2075_v7, %v2003_v28 }
 0x6a3   :  { %v1998_v19 = vpop.f32.mrf.mxu1 }
 0x6a4   :  { %v2004_v35 = vadd.f32 %v1998_v19, %v1924_v58 }
 0x6a6   :  { %v2084_v43 = vadd.f32 %v2078_v42, %v2004_v35 }
 0x6ab   :  { %v2000_v36 = vpop.f32.mrf.mxu1 }
 0x6b3   :  { %v2153_v26 = vpop.f32.mrf.mxu1 }
 0x6b4   :  { %v2162_v62 = vadd.f32 %v2153_v26, %v2082_v17 }
 0x6b6   :  { %v2242_v39 = vadd.f32 %v2233_v54, %v2162_v62 }
 0x6b8   :  { %v2257_v29 = vmul.f32 %v2242_v39, %v2242_v39  ;;  %v2245_v11 = vsel %vm683_vm3, %v2242_v39, 0.0 }
 0x6ba   :  { %v2260_v32 = vsel %vm683_vm3, %v2257_v29, 0.0 }
 0x6bb   :  { %v2155_v25 = vpop.f32.mrf.mxu1 }
 0x6bc   :  { %v2163_v63 = vadd.f32 %v2155_v25, %v2083_v9  ;;  %v10717_v25 = vld [vmem:[%s13583_s5 + $0x268] sm:$0xff] }
 0x6be   :  { %v2243_v23 = vadd.f32 %v2235_v16, %v2163_v63 }
 0x6c0   :  { %v2258_v52 = vmul.f32 %v2243_v23, %v2243_v23  ;;  %v2246_v30 = vsel %vm683_vm3, %v2243_v23, 0.0 }
 0x6c1   :  { %v2247_v42 = vadd.f32 %v2246_v30, %v2245_v11 }
 0x6c2   :  { %v2261_v14 = vsel %vm683_vm3, %v2258_v52, 0.0  ;;  %v10716_v52 = vld [vmem:[%s13583_s5 + $0x260] sm:$0xff] }
 0x6c3   :  { %v2158_v6 = vpop.f32.mrf.mxu1  ;;  %v2262_v37 = vadd.f32 %v2261_v14, %v2260_v32 }
 0x6c4   :  { %v2164_v34 = vadd.f32 %v2158_v6, %v2084_v43 }
 0x6c6   :  { %v2244_v1 = vadd.f32 %v2238_v18, %v2164_v34  ;;  %v10719_v18 = vld [vmem:[%s13583_s5 + $0x278] sm:$0xff] }
 0x6c7   :  { %2405 = vmatpush.bf16.msra.mxu2 %v10719_v18 }
 0x6c8   :  { %v2248_v7 = vsel %vm683_vm3, %v2244_v1, 0.0  ;;  %v2259_v56 = vmul.f32 %v2244_v1, %v2244_v1 }
 0x6c9   :  { %v2249_v57 = vadd.f32 %v2248_v7, %v2247_v42  ;;  %v10968_v42 = vld [vmem:[%s13584_s6 + $0x1] ss:$0 sm:$0xff] }
 0x6ca   :  { %v2263_v47 = vsel %vm683_vm3, %v2259_v56, 0.0 }
 0x6cb   :  { %v2250_v58 = vrot.slane %v2249_v57, 4  ;;  %v2264_v60 = vadd.f32 %v2263_v47, %v2262_v37  ;;  %v2160_v54 = vpop.f32.mrf.mxu1  ;;  %2406 = vmatpush.bf16.msra.mxu2 %v10718_v22 }
 0x6cd   :  { %v2251_v5 = vadd.f32 %v2250_v58, %v2249_v57  ;;  %v2265_v10 = vrot.slane %v2264_v60, 4  ;;  %v10969_v57 = vld [vmem:[%s13585_s7 + $0x1] ss:$0 sm:$0xff] }
 0x6cf   :  { %v2252_v16 = vrot.slane %v2251_v5, 2  ;;  %v2266_v17 = vadd.f32 %v2265_v10, %v2264_v60  ;;  %2407 = vmatpush.bf16.msra.mxu2 %v10717_v25 }
 0x6d1   :  { %v2253_v24 = vadd.f32 %v2252_v16, %v2251_v5  ;;  %v2267_v19 = vrot.slane %v2266_v17, 2 }
 0x6d3   :  { %v2254_v35 = vrot.slane %v2253_v24, 1  ;;  %v2268_v43 = vadd.f32 %v2267_v19, %v2266_v17  ;;  %2408 = vmatpush.bf16.msra.mxu2 %v10716_v52 }
 0x6d5   :  { %v2255_v20 = vadd.f32 %v2254_v35, %v2253_v24  ;;  %v2269_v36 = vrot.slane %v2268_v43, 1 }
 0x6d7   :  { %v2256_v55 = vmul.f32 0.055555556, %v2255_v20  ;;  %v2270_v59 = vadd.f32 %v2269_v36, %v2268_v43  ;;  %v10720_v20 = vld [vmem:[%s13583_s5 + $0x280] sm:$0xff] }
 0x6d9   :  { %v2271_v26 = vmul.f32 0.055555556, %v2270_v59  ;;  %v2272_v27 = vmul.f32 %v2256_v55, %v2256_v55  ;;  %v2275_v28 = vsub.f32 %v2242_v39, %v2256_v55  ;;  %v2277_v9 = vsub.f32 %v2244_v1, %v2256_v55 }
 0x6da   :  { %v2276_v1 = vsub.f32 %v2243_v23, %v2256_v55 }
 0x6db   :  { %v2273_v62 = vsub.f32 %v2271_v26, %v2272_v27 }
 0x6dd   :  { %v2274_v63 = vmax.f32 %v2273_v62, 0.0 }
 0x6df   :  { %v2278_v6 = vadd.f32 1e-05, %v2274_v63 }
 0x6e1   :  { %10989 = vrsqrt.f32 %v2278_v6  ;;  %vm2285_vm11 = vweird.f32 %v2278_v6 }
 0x6e7   :  { %v10990_v29 = vpop.eup %10989 }
 0x6e8   :  { %v2280_v30 = vmul.f32 %v10990_v29, %v2278_v6  ;;  %vm2286_vm10 = vweird.f32 %v10990_v29 }
 0x6e9   :  { %vm2287_vm12 = vmor %vm2285_vm11, %vm2286_vm10 }
 0x6ea   :  { %v2281_v34 = vmul.f32 %v10990_v29, %v2280_v30 }
 0x6ec   :  { %v2282_v11 = vmul.f32 0.5, %v2281_v34  ;;  %v10730_v34 = vld [vmem:[%s13583_s5 + $0x2d0] sm:$0xff] }
 0x6ee   :  { %v2283_v39 = vsub.f32 1.5, %v2282_v11 }
 0x6f0   :  { %v2284_v14 = vmul.f32 %v10990_v29, %v2283_v39  ;;  %v10726_v39 = vld [vmem:[%s13583_s5 + $0x2b0] sm:$0xff] }
 0x6f2   :  { %v2288_v32 = vsel %vm2287_vm12, %v10990_v29, %v2284_v14  ;;  %v10728_v14 = vld [vmem:[%s13583_s5 + $0x2c0] sm:$0xff] }
 0x6f3   :  { %v2289_v7 = vmul.f32 %v2288_v32, %v2275_v28  ;;  %v2290_v56 = vmul.f32 %v2288_v32, %v2276_v1  ;;  %v2291_v37 = vmul.f32 %v2288_v32, %v2277_v9 }
 0x6f5   :  { %v2293_v47 = vmul.f32 %v10968_v42, %v2289_v7  ;;  %v2294_v58 = vmul.f32 %v10968_v42, %v2290_v56  ;;  %v2295_v60 = vmul.f32 %v10968_v42, %v2291_v37  ;;  %v10725_v37 = vld [vmem:[%s13583_s5 + $0x2a8] sm:$0xff] }
 0x6f7   :  { %v2297_v54 = vadd.f32 %v10969_v57, %v2293_v47  ;;  %v2298_v5 = vadd.f32 %v10969_v57, %v2294_v58  ;;  %v2299_v10 = vadd.f32 %v10969_v57, %v2295_v60  ;;  %v10724_v57 = vld [vmem:[%s13583_s5 + $0x2a0] sm:$0xff] }
 0x6f9   :  { %v2302_v23 = vadd.f32 %v2299_v10, %v11376_v44  ;;  %v11852_v16 = vadd.f32 %v2297_v54, %v743_v48  ;;  %v11856_v17 = vadd.f32 %v2298_v5, %v744_v49  ;;  %v10714_v44 = vld [vmem:[%s13583_s5 + $0x250] sm:$0xff]  ;;  %v10713_v48 = vld [vmem:[%s13583_s5 + $0x248] sm:$0xff]  ;;  %v10712_v49 = vld [vmem:[%s13583_s5 + $0x240] sm:$0xff] }
 0x6fa   :  { %2454 = vmatpush.bf16.msra.mxu3 %v10714_v44 }
 0x6fb   :  { %v11858_v24 = vmax.f32 %v2302_v23, 0.0  ;;  %v2303_v18 = vmax.f32 %v11852_v16, 0.0  ;;  %v2304_v35 = vmax.f32 %v11856_v17, 0.0  ;;  %v10787_v17 = vld [vmem:[%s13583_s5 + $0x498] sm:$0xff] }
 0x6fd   :  { %v2309_v19 = vpack.c.bf16 %v11858_v24, %v11858_v24  ;;  %v11874_v40 = vpack.c.bf16 %v2304_v35, %v2303_v18 }
 0x6fe   :  { %2455 = vmatpush.bf16.msra.mxu3 %v10713_v48 }
 0x6ff   :  { %v11865_v43 = vsel %vm73_vm0, %v2309_v19, 0 }
 0x700   :  { %2319 = vmatpush.bf16.msrb.mxu0 %v11865_v43  ;;  %2348 = vmatpush.bf16.msrb.mxu1 %v11865_v43 }
 0x701   :  { %2553 = vmatpush.bf16.msrb.mxu2 %v11865_v43 }
 0x702   :  { %2456 = vmatpush.bf16.msra.mxu3 %v10712_v49 }
 0x704   :  { %2320 = vmatpush.bf16.msrb.mxu0 %v11874_v40  ;;  %2349 = vmatpush.bf16.msrb.mxu1 %v11874_v40 }
 0x705   :  { %2554 = vmatpush.bf16.msrb.mxu2 %v11874_v40 }
 0x707   :  { %8841 = vmatmul.msk.bf16.vlgmr.msrb.gmra.mxu0 %vm66_vm1, %v11613_v61  ;;  %8851 = vmatmul.msk.bf16.vlgmr.msrb.gmra.mxu1 %vm66_vm1, %v11620_v2  ;;  %v10723_v61 = vld [vmem:[%s13583_s5 + $0x298] sm:$0xff]  ;;  %v10722_v2 = vld [vmem:[%s13583_s5 + $0x290] sm:$0xff] }
 0x708   :  { %2473 = vmatpush.bf16.msra.mxu0 %v11865_v43  ;;  %2530 = vmatpush.bf16.msra.mxu1 %v10723_v61 }
 0x70c   :  { %2474 = vmatpush.bf16.msra.mxu0 %v11874_v40  ;;  %2531 = vmatpush.bf16.msra.mxu1 %v10722_v2  ;;  %v10735_v2 = vld [vmem:[%s13583_s5 + $0x2f8] sm:$0xff] }
 0x710   :  { %2633 = vmatpush.bf16.msrb.mxu0 %v11865_v43 }
 0x714   :  { %2634 = vmatpush.bf16.msrb.mxu0 %v11874_v40 }
 0x717   :  { %8842 = vmatmul.msk.bf16.gmra.mxu0 %vm66_vm1, %v11162_v13  ;;  %8852 = vmatmul.msk.bf16.gmra.mxu1 %vm66_vm1, %v11160_v12 }
 0x727   :  { %8897 = vmatmul.msk.bf16.vlgmr.msra.gmra.mxu0 %vm66_vm1, %v11634_v3 }
 0x728   :  { %2793 = vmatpush.bf16.msra.mxu0 %v11865_v43 }
 0x72c   :  { %2794 = vmatpush.bf16.msra.mxu0 %v11874_v40 }
 0x737   :  { %8898 = vmatmul.msk.bf16.gmra.mxu0 %vm66_vm1, %v11219_v38 }
 0x747   :  { %8953 = vmatmul.msk.bf16.vlgmr.msrb.gmra.mxu0 %vm66_vm1, %v11648_v4 }
 0x748   :  { %2953 = vmatpush.bf16.msrb.mxu0 %v11865_v43 }
 0x74c   :  { %2954 = vmatpush.bf16.msrb.mxu0 %v11874_v40 }
 0x757   :  { %8954 = vmatmul.msk.bf16.gmra.mxu0 %vm66_vm1, %v11249_v46 }
 0x767   :  { %9009 = vmatmul.msk.bf16.vlgmr.msra.gmra.mxu0 %vm66_vm1, %v11659_v8  ;;  %v10721_v8 = vld [vmem:[%s13583_s5 + $0x288] sm:$0xff] }
 0x768   :  { %2532 = vmatpush.bf16.msra.mxu1 %v10721_v8  ;;  %v10736_v8 = vld [vmem:[%s13583_s5 + $0x300] sm:$0xff] }
 0x76c   :  { %2533 = vmatpush.bf16.msra.mxu1 %v10720_v20 }
 0x777   :  { %9010 = vmatmul.msk.bf16.gmra.mxu0 %vm66_vm1, %v11270_v53 }
 0x784   :  { %v2322_v3 = vpop.f32.mrf.mxu0  ;;  %v2351_v4 = vpop.f32.mrf.mxu1 }
 0x787   :  { %9065 = vmatmul.msk.bf16.vlgmr.msrb.gmra.mxu0 %vm66_vm1, %v11680_v15 }
 0x78c   :  { %v2324_v36 = vpop.f32.mrf.mxu0  ;;  %v2353_v22 = vpop.f32.mrf.mxu1 }
 0x78d   :  { %v2331_v55 = vpack.c.bf16 %v2324_v36, %v2322_v3  ;;  %v2360_v59 = vpack.c.bf16 %v2353_v22, %v2351_v4  ;;  %v10737_v3 = vld [vmem:[%s13583_s5 + $0x308] sm:$0xff]  ;;  %v10734_v4 = vld [vmem:[%s13583_s5 + $0x2f0] sm:$0xff] }
 0x78e   :  { %v10733_v22 = vld [vmem:[%s13583_s5 + $0x2e8] sm:$0xff] }
 0x78f   :  { %8877 = vmatmul.msk.bf16.vlgmr.msra.gmra.mxu2 %vm683_vm3, %v2360_v59  ;;  %8895 = vmatmul.msk.bf16.vlgmr.msra.gmra.mxu3 %vm683_vm3, %v2331_v55 }
 0x790   :  { %2713 = vmatpush.bf16.msra.mxu2 %v11865_v43 }
 0x794   :  { %2714 = vmatpush.bf16.msra.mxu2 %v11874_v40  ;;  %v2327_v26 = vpop.f32.mrf.mxu0  ;;  %v2356_v15 = vpop.f32.mrf.mxu1 }
 0x795   :  { %v2332_v27 = vpack.c.bf16 %v2327_v26, %v2327_v26  ;;  %v2361_v28 = vpack.c.bf16 %v2356_v15, %v2356_v15  ;;  %v10732_v26 = vld [vmem:[%s13583_s5 + $0x2e0] sm:$0xff] }
 0x797   :  { %9066 = vmatmul.msk.bf16.gmra.mxu0 %vm66_vm1, %v11294_v0 }
 0x79c   :  { %v2329_v9 = vpop.f32.mrf.mxu0  ;;  %v2358_v25 = vpop.f32.mrf.mxu1 }
 0x79f   :  { %8878 = vmatmul.msk.bf16.gmra.mxu2 %vm683_vm3, %v2361_v28  ;;  %8896 = vmatmul.msk.bf16.gmra.mxu3 %vm683_vm3, %v2332_v27 }
 0x7a4   :  { %v2476_v62 = vpop.f32.mrf.mxu0 }
 0x7ac   :  { %v2478_v63 = vpop.f32.mrf.mxu0 }
 0x7ad   :  { %v2485_v52 = vpack.c.bf16 %v2478_v63, %v2476_v62 }
 0x7af   :  { %8923 = vmatmul.msk.bf16.vlgmr.msra.gmra.mxu1 %vm683_vm3, %v2485_v52  ;;  %8925 = vmatmul.msk.bf16.vlgmr.msrb.gmra.mxu2 %vm66_vm1, %v11705_v31  ;;  %v10731_v31 = vld [vmem:[%s13583_s5 + $0x2d8] sm:$0xff] }
 0x7b0   :  { %2873 = vmatpush.bf16.msrb.mxu2 %v11865_v43  ;;  %2690 = vmatpush.bf16.msrb.mxu1 %v10731_v31  ;;  %v10739_v43 = vld [vmem:[%s13583_s5 + $0x318] sm:$0xff] }
 0x7b4   :  { %2874 = vmatpush.bf16.msrb.mxu2 %v11874_v40  ;;  %v2481_v6 = vpop.f32.mrf.mxu0  ;;  %2691 = vmatpush.bf16.msrb.mxu1 %v10730_v34  ;;  %v10738_v40 = vld [vmem:[%s13583_s5 + $0x310] sm:$0xff] }
 0x7b5   :  { %v2486_v29 = vpack.c.bf16 %v2481_v6, %v2481_v6  ;;  %v10747_v6 = vld [vmem:[%s13583_s5 + $0x358] sm:$0xff] }
 0x7bc   :  { %v2483_v30 = vpop.f32.mrf.mxu0 }
 0x7bd   :  { %v10746_v30 = vld [vmem:[%s13583_s5 + $0x350] sm:$0xff] }
 0x7bf   :  { %8924 = vmatmul.msk.bf16.gmra.mxu1 %vm683_vm3, %v2486_v29  ;;  %8926 = vmatmul.msk.bf16.gmra.mxu2 %vm66_vm1, %v11196_v33 }
 0x7c4   :  { %v2636_v11 = vpop.f32.mrf.mxu0 }
 0x7cc   :  { %v2638_v7 = vpop.f32.mrf.mxu0 }
 0x7cd   :  { %v2645_v56 = vpack.c.bf16 %v2638_v7, %v2636_v11 }
 0x7cf   :  { %8981 = vmatmul.msk.bf16.vlgmr.msra.gmra.mxu2 %vm66_vm1, %v11717_v45  ;;  %v10727_v45 = vld [vmem:[%s13583_s5 + $0x2b8] sm:$0xff] }
 0x7d0   :  { %2610 = vmatpush.bf16.msrb.mxu3 %v10727_v45  ;;  %v10743_v45 = vld [vmem:[%s13583_s5 + $0x338] sm:$0xff] }
 0x7d4   :  { %2611 = vmatpush.bf16.msrb.mxu3 %v10726_v39  ;;  %v2641_v60 = vpop.f32.mrf.mxu0  ;;  %v10742_v39 = vld [vmem:[%s13583_s5 + $0x330] sm:$0xff] }
 0x7d5   :  { %v2646_v10 = vpack.c.bf16 %v2641_v60, %v2641_v60 }
 0x7d8   :  { %2612 = vmatpush.bf16.msrb.mxu3 %v10725_v37 }
 0x7dc   :  { %2613 = vmatpush.bf16.msrb.mxu3 %v10724_v57  ;;  %v2643_v19 = vpop.f32.mrf.mxu0 }
 0x7df   :  { %8982 = vmatmul.msk.bf16.gmra.mxu2 %vm66_vm1, %v11226_v41 }
 0x7e0   :  { %2770 = vmatpush.bf16.msra.mxu3 %v10735_v2 }
 0x7e4   :  { %v2796_v48 = vpop.f32.mrf.mxu0  ;;  %2771 = vmatpush.bf16.msra.mxu3 %v10734_v4 }
 0x7e8   :  { %2772 = vmatpush.bf16.msra.mxu3 %v10733_v22 }
 0x7ec   :  { %v2798_v36 = vpop.f32.mrf.mxu0  ;;  %2773 = vmatpush.bf16.msra.mxu3 %v10732_v26 }
 0x7ed   :  { %v2805_v59 = vpack.c.bf16 %v2798_v36, %v2796_v48 }
 0x7ef   :  { %9037 = vmatmul.msk.bf16.vlgmr.msrb.gmra.mxu2 %vm66_vm1, %v11726_v51  ;;  %v10729_v51 = vld [vmem:[%s13583_s5 + $0x2c8] sm:$0xff] }
 0x7f0   :  { %2692 = vmatpush.bf16.msrb.mxu1 %v10729_v51  ;;  %v10745_v51 = vld [vmem:[%s13583_s5 + $0x348] sm:$0xff] }
 0x7f4   :  { %2693 = vmatpush.bf16.msrb.mxu1 %v10728_v14  ;;  %v2801_v28 = vpop.f32.mrf.mxu0  ;;  %v10744_v14 = vld [vmem:[%s13583_s5 + $0x340] sm:$0xff] }
 0x7f5   :  { %v2806_v63 = vpack.c.bf16 %v2801_v28, %v2801_v28 }
 0x7f7   :  { %8979 = vmatmul.msk.bf16.vlgmr.msrb.gmra.mxu1 %vm683_vm3, %v2645_v56  ;;  %v10740_v56 = vld [vmem:[%s13583_s5 + $0x320] sm:$0xff] }
 0x7f8   :  { %2850 = vmatpush.bf16.msra.mxu1 %v10739_v43 }
 0x7fc   :  { %2851 = vmatpush.bf16.msra.mxu1 %v10738_v40  ;;  %v2803_v52 = vpop.f32.mrf.mxu0 }
 0x7ff   :  { %9038 = vmatmul.msk.bf16.gmra.mxu2 %vm66_vm1, %v11263_v50 }
 0x800   :  { %2852 = vmatpush.bf16.msra.mxu1 %v10737_v3 }
 0x804   :  { %2853 = vmatpush.bf16.msra.mxu1 %v10736_v8  ;;  %v2956_v11 = vpop.f32.mrf.mxu0 }
 0x807   :  { %8980 = vmatmul.msk.bf16.gmra.mxu1 %vm683_vm3, %v2646_v10 }
 0x808   :  { %3010 = vmatpush.bf16.msrb.mxu1 %v10747_v6 }
 0x80c   :  { %3011 = vmatpush.bf16.msrb.mxu1 %v10746_v30 }
 0x810   :  { %3012 = vmatpush.bf16.msrb.mxu1 %v10745_v51 }
 0x812   :  { %v2410_v1 = vpop.f32.mrf.mxu2  ;;  %v2458_v42 = vpop.f32.mrf.mxu3 }
 0x813   :  { %v2459_v32 = vadd.f32 %v2458_v42, %v2410_v1  ;;  %v2958_v42 = vpop.f32.mrf.mxu0 }
 0x814   :  { %3013 = vmatpush.bf16.msrb.mxu1 %v10744_v14  ;;  %v2965_v7 = vpack.c.bf16 %v2958_v42, %v2956_v11 }
 0x817   :  { %9035 = vmatmul.msk.bf16.vlgmr.msra.gmra.mxu1 %vm683_vm3, %v2805_v59 }
 0x81a   :  { %v11982_v47 = vpop.f32.mrf.mxu2  ;;  %v11984_v58 = vpop.f32.mrf.mxu3 }
 0x81b   :  { %v2461_v42 = vadd.f32 %v11984_v58, %v11982_v47 }
 0x822   :  { %v2415_v54 = vpop.f32.mrf.mxu2  ;;  %v2463_v5 = vpop.f32.mrf.mxu3 }
 0x823   :  { %v2464_v23 = vadd.f32 %v2463_v5, %v2415_v54  ;;  %v2961_v5 = vpop.f32.mrf.mxu0 }
 0x827   :  { %9036 = vmatmul.msk.bf16.gmra.mxu1 %vm683_vm3, %v2806_v63 }
 0x82a   :  { %v2417_v21 = vpop.f32.mrf.mxu2  ;;  %v2465_v44 = vpop.f32.mrf.mxu3 }
 0x82b   :  { %v2963_v43 = vpop.f32.mrf.mxu0 }
 0x82c   :  { %v2535_v49 = vpop.f32.mrf.mxu1 }
 0x82d   :  { %v11993_v61 = vadd.f32 %v2535_v49, %v2459_v32  ;;  %v10741_v32 = vld [vmem:[%s13583_s5 + $0x328] sm:$0xff] }
 0x832   :  { %v2556_v20 = vpop.f32.mrf.mxu2 }
 0x834   :  { %v12010_v55 = vpop.f32.mrf.mxu1 }
 0x837   :  { %9091 = vmatmul.msk.bf16.vlgmr.msrb.gmra.mxu1 %vm683_vm3, %v2965_v7 }
 0x83a   :  { %v2558_v15 = vpop.f32.mrf.mxu2 }
 0x83b   :  { %v2565_v27 = vpack.c.bf16 %v2558_v15, %v2556_v20 }
 0x83c   :  { %v2540_v9 = vpop.f32.mrf.mxu1 }
 0x83d   :  { %v12016_v25 = vadd.f32 %v2540_v9, %v2464_v23  ;;  %8951 = vmatmul.msk.bf16.vlgmr.msrb.gmra.mxu3 %vm683_vm3, %v2565_v27  ;;  %v2966_v23 = vpack.c.bf16 %v2961_v5, %v2961_v5 }
 0x83e   :  { %2930 = vmatpush.bf16.msrb.mxu3 %v10743_v45 }
 0x842   :  { %v2561_v62 = vpop.f32.mrf.mxu2  ;;  %2931 = vmatpush.bf16.msrb.mxu3 %v10742_v39 }
 0x843   :  { %v2566_v34 = vpack.c.bf16 %v2561_v62, %v2561_v62 }
 0x844   :  { %v2542_v29 = vpop.f32.mrf.mxu1 }
 0x846   :  { %2932 = vmatpush.bf16.msrb.mxu3 %v10741_v32  ;;  %v2545_v32 = vadd.f32 %v12010_v55, %v2461_v42  ;;  %v10752_v42 = vld [vmem:[%s13583_s5 + $0x380] sm:$0xff] }
 0x847   :  { %9092 = vmatmul.msk.bf16.gmra.mxu1 %vm683_vm3, %v2966_v23 }
 0x84a   :  { %v2563_v31 = vpop.f32.mrf.mxu2  ;;  %2933 = vmatpush.bf16.msrb.mxu3 %v10740_v56 }
 0x84d   :  { %8952 = vmatmul.msk.bf16.gmra.mxu3 %vm683_vm3, %v2566_v34 }
 0x852   :  { %v2716_v1 = vpop.f32.mrf.mxu2 }
 0x85a   :  { %v2718_v37 = vpop.f32.mrf.mxu2 }
 0x85b   :  { %v2725_v57 = vpack.c.bf16 %v2718_v37, %v2716_v1 }
 0x85d   :  { %9007 = vmatmul.msk.bf16.vlgmr.msra.gmra.mxu3 %vm683_vm3, %v2725_v57 }
 0x862   :  { %v2721_v60 = vpop.f32.mrf.mxu2 }
 0x863   :  { %v2726_v10 = vpack.c.bf16 %v2721_v60, %v2721_v60 }
 0x86a   :  { %v2723_v54 = vpop.f32.mrf.mxu2 }
 0x86d   :  { %9008 = vmatmul.msk.bf16.gmra.mxu3 %vm683_vm3, %v2726_v10 }
 0x872   :  { %v2876_v19 = vpop.f32.mrf.mxu2 }
 0x874   :  { %v2695_v2 = vpop.f32.mrf.mxu1 }
 0x87a   :  { %v2878_v40 = vpop.f32.mrf.mxu2 }
 0x87b   :  { %v2885_v21 = vpack.c.bf16 %v2878_v40, %v2876_v19 }
 0x87c   :  { %v2697_v3 = vpop.f32.mrf.mxu1 }
 0x87d   :  { %9063 = vmatmul.msk.bf16.vlgmr.msrb.gmra.mxu3 %vm683_vm3, %v2885_v21 }
 0x882   :  { %v2881_v44 = vpop.f32.mrf.mxu2 }
 0x883   :  { %v2886_v48 = vpack.c.bf16 %v2881_v44, %v2881_v44 }
 0x884   :  { %v2700_v4 = vpop.f32.mrf.mxu1 }
 0x88a   :  { %v2883_v49 = vpop.f32.mrf.mxu2 }
 0x88c   :  { %v2702_v8 = vpop.f32.mrf.mxu1 }
 0x88d   :  { %9064 = vmatmul.msk.bf16.gmra.mxu3 %vm683_vm3, %v2886_v48 }
 0x894   :  { %v2855_v20 = vpop.f32.mrf.mxu1 }
 0x89c   :  { %v2857_v36 = vpop.f32.mrf.mxu1 }
 0x8a4   :  { %v2860_v15 = vpop.f32.mrf.mxu1 }
 0x8ac   :  { %v2862_v28 = vpop.f32.mrf.mxu1 }
 0x8b4   :  { %v3015_v6 = vpop.f32.mrf.mxu1 }
 0x8bc   :  { %v3017_v31 = vpop.f32.mrf.mxu1 }
 0x8c0   :  { %v2615_v22 = vpop.f32.mrf.mxu3 }
 0x8c1   :  { %v2624_v59 = vadd.f32 %v2615_v22, %v11993_v61 }
 0x8c3   :  { %v2704_v26 = vadd.f32 %v2695_v2, %v2624_v59 }
 0x8c4   :  { %v3020_v45 = vpop.f32.mrf.mxu1 }
 0x8c8   :  { %v2617_v27 = vpop.f32.mrf.mxu3 }
 0x8cc   :  { %v3022_v61 = vpop.f32.mrf.mxu1 }
 0x8d0   :  { %v2620_v9 = vpop.f32.mrf.mxu3 }
 0x8d1   :  { %v2626_v62 = vadd.f32 %v2620_v9, %v12016_v25  ;;  %v2625_v25 = vadd.f32 %v2617_v27, %v2545_v32  ;;  %v10755_v9 = vld [vmem:[%s13583_s5 + $0x398] sm:$0xff] }
 0x8d2   :  { %3184 = vmatpush.bf16.msra.mxu0 %v10755_v9  ;;  %v10750_v9 = vld [vmem:[%s13583_s5 + $0x370] sm:$0xff] }
 0x8d3   :  { %v2706_v63 = vadd.f32 %v2700_v4, %v2626_v62  ;;  %v2705_v56 = vadd.f32 %v2697_v3, %v2625_v25 }
 0x8d8   :  { %v2622_v52 = vpop.f32.mrf.mxu3 }
 0x8e0   :  { %v2775_v29 = vpop.f32.mrf.mxu3 }
 0x8e1   :  { %v2784_v30 = vadd.f32 %v2775_v29, %v2704_v26  ;;  %v10754_v29 = vld [vmem:[%s13583_s5 + $0x390] sm:$0xff] }
 0x8e2   :  { %3185 = vmatpush.bf16.msra.mxu0 %v10754_v29  ;;  %v10758_v29 = vld [vmem:[%s13583_s5 + $0x3b0] sm:$0xff] }
 0x8e3   :  { %v2864_v34 = vadd.f32 %v2855_v20, %v2784_v30 }
 0x8e8   :  { %v2777_v11 = vpop.f32.mrf.mxu3 }
 0x8e9   :  { %v2785_v37 = vadd.f32 %v2777_v11, %v2705_v56 }
 0x8eb   :  { %v2865_v57 = vadd.f32 %v2857_v36, %v2785_v37 }
 0x8f0   :  { %v2780_v51 = vpop.f32.mrf.mxu3 }
 0x8f1   :  { %v2786_v39 = vadd.f32 %v2780_v51, %v2706_v63 }
 0x8f3   :  { %v2866_v14 = vadd.f32 %v2860_v15, %v2786_v39 }
 0x8f8   :  { %v2782_v1 = vpop.f32.mrf.mxu3 }
 0x900   :  { %v2935_v7 = vpop.f32.mrf.mxu3 }
 0x901   :  { %v2944_v54 = vadd.f32 %v2935_v7, %v2864_v34 }
 0x903   :  { %v3024_v23 = vadd.f32 %v3015_v6, %v2944_v54 }
 0x905   :  { %v3039_v40 = vmul.f32 %v3024_v23, %v3024_v23  ;;  %v3027_v47 = vsel %vm683_vm3, %v3024_v23, 0.0 }
 0x907   :  { %v3042_v49 = vsel %vm683_vm3, %v3039_v40, 0.0 }
 0x908   :  { %v2937_v60 = vpop.f32.mrf.mxu3 }
 0x909   :  { %v2945_v5 = vadd.f32 %v2937_v60, %v2865_v57 }
 0x90b   :  { %v3025_v10 = vadd.f32 %v3017_v31, %v2945_v5 }
 0x90d   :  { %v3040_v19 = vmul.f32 %v3025_v10, %v3025_v10  ;;  %v3028_v21 = vsel %vm683_vm3, %v3025_v10, 0.0 }
 0x90e   :  { %v3029_v48 = vadd.f32 %v3028_v21, %v3027_v47 }
 0x90f   :  { %v3043_v58 = vsel %vm683_vm3, %v3040_v19, 0.0 }
 0x910   :  { %v2940_v43 = vpop.f32.mrf.mxu3  ;;  %v3044_v4 = vadd.f32 %v3043_v58, %v3042_v49 }
 0x911   :  { %v2946_v44 = vadd.f32 %v2940_v43, %v2866_v14 }
 0x913   :  { %v3026_v55 = vadd.f32 %v3020_v45, %v2946_v44  ;;  %v10753_v45 = vld [vmem:[%s13583_s5 + $0x388] sm:$0xff]  ;;  %v10971_v44 = vld [vmem:[%s13585_s7 + $0x2] ss:$0 sm:$0xff] }
 0x914   :  { %3186 = vmatpush.bf16.msra.mxu0 %v10753_v45 }
 0x915   :  { %v3030_v2 = vsel %vm683_vm3, %v3026_v55, 0.0  ;;  %v3041_v3 = vmul.f32 %v3026_v55, %v3026_v55 }
 0x916   :  { %v3031_v8 = vadd.f32 %v3030_v2, %v3029_v48 }
 0x917   :  { %v3045_v20 = vsel %vm683_vm3, %v3041_v3, 0.0 }
 0x918   :  { %v3032_v36 = vrot.slane %v3031_v8, 4  ;;  %v3046_v22 = vadd.f32 %v3045_v20, %v3044_v4  ;;  %v2942_v59 = vpop.f32.mrf.mxu3  ;;  %3187 = vmatpush.bf16.msra.mxu0 %v10752_v42 }
 0x919   :  { %v12102_v59 = vld [vmem:[%s13579_s1 + $0xc] sm:$0xff] }
 0x91a   :  { %v3033_v26 = vadd.f32 %v3032_v36, %v3031_v8  ;;  %v3047_v15 = vrot.slane %v3046_v22, 4 }
 0x91c   :  { %v3034_v27 = vrot.slane %v3033_v26, 2  ;;  %v3048_v28 = vadd.f32 %v3047_v15, %v3046_v22  ;;  %v12095_v22 = vld [vmem:[%s13579_s1] sm:$0xff]  ;;  %v10751_v15 = vld [vmem:[%s13583_s5 + $0x378] sm:$0xff] }
 0x91d   :  { %3232 = vmatpush.bf16.msra.mxu1 %v10751_v15 }
 0x91e   :  { %v3035_v62 = vadd.f32 %v3034_v27, %v3033_v26  ;;  %v3049_v63 = vrot.slane %v3048_v28, 2  ;;  %v12116_v26 = vld [vmem:[%s13579_s1 + $0x18] sm:$0xff]  ;;  %v12130_v27 = vld [vmem:[%s13579_s1 + $0x30] sm:$0xff] }
 0x920   :  { %v3036_v52 = vrot.slane %v3035_v62, 1  ;;  %v3050_v6 = vadd.f32 %v3049_v63, %v3048_v28  ;;  %v12141_v28 = vld [vmem:[%s13579_s1 + $0x48] sm:$0xff]  ;;  %v10748_v63 = vld [vmem:[%s13583_s5 + $0x360] sm:$0xff] }
 0x921   :  { %3233 = vmatpush.bf16.msra.mxu1 %v10750_v9  ;;  %v10760_v9 = vld [vmem:[%s13583_s5 + $0x3c0] sm:$0xff] }
 0x922   :  { %v3037_v30 = vadd.f32 %v3036_v52, %v3035_v62  ;;  %v3051_v31 = vrot.slane %v3050_v6, 1  ;;  %v10749_v62 = vld [vmem:[%s13583_s5 + $0x368] sm:$0xff]  ;;  %v10759_v52 = vld [vmem:[%s13583_s5 + $0x3b8] sm:$0xff] }
 0x924   :  { %v3038_v34 = vmul.f32 0.055555556, %v3037_v30  ;;  %v3052_v11 = vadd.f32 %v3051_v31, %v3050_v6  ;;  %v12162_v6 = vld [vmem:[%s13579_s1 + $0x60] sm:$0xff] }
 0x925   :  { %3234 = vmatpush.bf16.msra.mxu1 %v10749_v62  ;;  %v10775_v62 = vld [vmem:[%s13583_s5 + $0x438] sm:$0xff] }
 0x926   :  { %v3053_v51 = vmul.f32 0.055555556, %v3052_v11  ;;  %v3054_v39 = vmul.f32 %v3038_v34, %v3038_v34  ;;  %v3057_v14 = vsub.f32 %v3024_v23, %v3038_v34  ;;  %v3059_v61 = vsub.f32 %v3026_v55, %v3038_v34  ;;  %v10970_v23 = vld [vmem:[%s13584_s6 + $0x2] ss:$0 sm:$0xff] }
 0x927   :  { %v3058_v5 = vsub.f32 %v3025_v10, %v3038_v34  ;;  %v10757_v34 = vld [vmem:[%s13583_s5 + $0x3a8] sm:$0xff]  ;;  %v10756_v11 = vld [vmem:[%s13583_s5 + $0x3a0] sm:$0xff] }
 0x928   :  { %v3055_v1 = vsub.f32 %v3053_v51, %v3054_v39 }
 0x929   :  { %3235 = vmatpush.bf16.msra.mxu1 %v10748_v63 }
 0x92a   :  { %v3056_v32 = vmax.f32 %v3055_v1, 0.0 }
 0x92c   :  { %v3060_v25 = vadd.f32 1e-05, %v3056_v32 }
 0x92e   :  { %10991 = vrsqrt.f32 %v3060_v25  ;;  %vm3067_vm14 = vweird.f32 %v3060_v25 }
 0x934   :  { %v10992_v7 = vpop.eup %10991 }
 0x935   :  { %v3062_v56 = vmul.f32 %v10992_v7, %v3060_v25  ;;  %vm3068_vm13 = vweird.f32 %v10992_v7 }
 0x936   :  { %vm3069_vm15 = vmor %vm3067_vm14, %vm3068_vm13 }
 0x937   :  { %v3063_v37 = vmul.f32 %v10992_v7, %v3062_v56 }
 0x939   :  { %v3064_v57 = vmul.f32 0.5, %v3063_v37 }
 0x93b   :  { %v3065_v60 = vsub.f32 1.5, %v3064_v57 }
 0x93d   :  { %v3066_v54 = vmul.f32 %v10992_v7, %v3065_v60  ;;  %v12187_v60 = vld [vmem:[%s13579_s1 + $0x24] sm:$0xff] }
 0x93f   :  { %v3070_v19 = vsel %vm3069_vm15, %v10992_v7, %v3066_v54 }
 0x940   :  { %v3071_v43 = vmul.f32 %v3070_v19, %v3057_v14  ;;  %v3072_v40 = vmul.f32 %v3070_v19, %v3058_v5  ;;  %v3073_v21 = vmul.f32 %v3070_v19, %v3059_v61  ;;  %v12199_v19 = vld [vmem:[%s13579_s1 + $0x3c] sm:$0xff] }
 0x942   :  { %v3075_v47 = vmul.f32 %v10970_v23, %v3071_v43  ;;  %v3076_v58 = vmul.f32 %v10970_v23, %v3072_v40  ;;  %v3077_v55 = vmul.f32 %v10970_v23, %v3073_v21  ;;  %v12208_v43 = vld [vmem:[%s13579_s1 + $0x54] sm:$0xff] }
 0x943   :  { %v10767_v40 = vld [vmem:[%s13583_s5 + $0x3f8] sm:$0xff] }
 0x944   :  { %v3079_v48 = vadd.f32 %v10971_v44, %v3075_v47  ;;  %v3080_v49 = vadd.f32 %v10971_v44, %v3076_v58  ;;  %v3081_v2 = vadd.f32 %v10971_v44, %v3077_v55  ;;  %v10766_v44 = vld [vmem:[%s13583_s5 + $0x3f0] sm:$0xff]  ;;  %v10765_v47 = vld [vmem:[%s13583_s5 + $0x3e8] sm:$0xff]  ;;  %v10764_v55 = vld [vmem:[%s13583_s5 + $0x3e0] sm:$0xff] }
 0x946   :  { %v3082_v10 = vmax.f32 %v3079_v48, 0.0  ;;  %v3083_v3 = vmax.f32 %v3080_v49, 0.0  ;;  %v3084_v4 = vmax.f32 %v3081_v2, 0.0  ;;  %v10763_v49 = vld [vmem:[%s13583_s5 + $0x3d8] sm:$0xff] }
 0x947   :  { %3389 = vmatpush.bf16.msrb.mxu1 %v10763_v49 }
 0x948   :  { %v12080_v8 = vpack.c.bf16 %v3083_v3, %v3082_v10  ;;  %v3088_v20 = vpack.c.bf16 %v3084_v4, %v3084_v4  ;;  %v10762_v10 = vld [vmem:[%s13583_s5 + $0x3d0] sm:$0xff] }
 0x94a   :  { %v12083_v36 = vsel %vm73_vm0, %v3088_v20, 0  ;;  %v10761_v20 = vld [vmem:[%s13583_s5 + $0x3c8] sm:$0xff] }
 0x94b   :  { %3098 = vmatpush.bf16.msra.mxu2 %v12083_v36  ;;  %3127 = vmatpush.bf16.msra.mxu3 %v12083_v36 }
 0x94c   :  { %3332 = vmatpush.bf16.msrb.mxu0 %v12083_v36  ;;  %3390 = vmatpush.bf16.msrb.mxu1 %v10762_v10 }
 0x94f   :  { %3099 = vmatpush.bf16.msra.mxu2 %v12080_v8  ;;  %3128 = vmatpush.bf16.msra.mxu3 %v12080_v8 }
 0x950   :  { %3333 = vmatpush.bf16.msrb.mxu0 %v12080_v8  ;;  %3391 = vmatpush.bf16.msrb.mxu1 %v10761_v20 }
 0x952   :  { %9093 = vmatmul.msk.bf16.vlgmr.msra.gmra.mxu2 %vm66_vm1, %v12095_v22  ;;  %9103 = vmatmul.msk.bf16.vlgmr.msra.gmra.mxu3 %vm66_vm1, %v12102_v59 }
 0x953   :  { %3252 = vmatpush.bf16.msrb.mxu2 %v12083_v36  ;;  %3309 = vmatpush.bf16.msrb.mxu3 %v10759_v52 }
 0x954   :  { %3392 = vmatpush.bf16.msrb.mxu1 %v10760_v9 }
 0x957   :  { %3253 = vmatpush.bf16.msrb.mxu2 %v12080_v8  ;;  %3310 = vmatpush.bf16.msrb.mxu3 %v10758_v29 }
 0x95b   :  { %3412 = vmatpush.bf16.msra.mxu2 %v12083_v36  ;;  %3311 = vmatpush.bf16.msrb.mxu3 %v10757_v34 }
 0x95f   :  { %3413 = vmatpush.bf16.msra.mxu2 %v12080_v8  ;;  %3312 = vmatpush.bf16.msrb.mxu3 %v10756_v11 }
 0x962   :  { %9094 = vmatmul.msk.bf16.gmra.mxu2 %vm66_vm1, %v11162_v13  ;;  %9104 = vmatmul.msk.bf16.gmra.mxu3 %vm66_vm1, %v11160_v12 }
 0x963   :  { %3469 = vmatpush.bf16.msra.mxu3 %v10767_v40  ;;  %v10783_v40 = vld [vmem:[%s13583_s5 + $0x478] sm:$0xff] }
 0x967   :  { %3470 = vmatpush.bf16.msra.mxu3 %v10766_v44 }
 0x96b   :  { %3471 = vmatpush.bf16.msra.mxu3 %v10765_v47 }
 0x96f   :  { %3472 = vmatpush.bf16.msra.mxu3 %v10764_v55 }
 0x972   :  { %9149 = vmatmul.msk.bf16.vlgmr.msrb.gmra.mxu2 %vm66_vm1, %v12116_v26 }
 0x973   :  { %3572 = vmatpush.bf16.msrb.mxu2 %v12083_v36 }
 0x977   :  { %3573 = vmatpush.bf16.msrb.mxu2 %v12080_v8 }
 0x982   :  { %9150 = vmatmul.msk.bf16.gmra.mxu2 %vm66_vm1, %v11219_v38 }
 0x992   :  { %9205 = vmatmul.msk.bf16.vlgmr.msra.gmra.mxu2 %vm66_vm1, %v12130_v27 }
 0x993   :  { %3732 = vmatpush.bf16.msra.mxu2 %v12083_v36 }
 0x997   :  { %3733 = vmatpush.bf16.msra.mxu2 %v12080_v8 }
 0x9a2   :  { %9206 = vmatmul.msk.bf16.gmra.mxu2 %vm66_vm1, %v11249_v46 }
 0x9b2   :  { %9261 = vmatmul.msk.bf16.vlgmr.msrb.gmra.mxu2 %vm66_vm1, %v12141_v28 }
 0x9c2   :  { %9262 = vmatmul.msk.bf16.gmra.mxu2 %vm66_vm1, %v11270_v53 }
 0x9d2   :  { %9317 = vmatmul.msk.bf16.vlgmr.msra.gmra.mxu2 %vm66_vm1, %v12162_v6 }
 0x9d5   :  { %v3101_v30 = vpop.f32.mrf.mxu2  ;;  %v3130_v31 = vpop.f32.mrf.mxu3 }
 0x9dd   :  { %v3103_v45 = vpop.f32.mrf.mxu2  ;;  %v3132_v51 = vpop.f32.mrf.mxu3 }
 0x9de   :  { %v3110_v39 = vpack.c.bf16 %v3103_v45, %v3101_v30  ;;  %v3139_v14 = vpack.c.bf16 %v3132_v51, %v3130_v31  ;;  %v10774_v30 = vld [vmem:[%s13583_s5 + $0x430] sm:$0xff]  ;;  %v10773_v31 = vld [vmem:[%s13583_s5 + $0x428] sm:$0xff]  ;;  %v10772_v51 = vld [vmem:[%s13583_s5 + $0x420] sm:$0xff] }
 0x9e0   :  { %9129 = vmatmul.msk.bf16.vlgmr.msra.gmra.mxu0 %vm683_vm3, %v3139_v14  ;;  %9147 = vmatmul.msk.bf16.vlgmr.msra.gmra.mxu1 %vm683_vm3, %v3110_v39 }
 0x9e1   :  { %3492 = vmatpush.bf16.msra.mxu0 %v12083_v36 }
 0x9e2   :  { %9318 = vmatmul.msk.bf16.gmra.mxu2 %vm66_vm1, %v11294_v0 }
 0x9e5   :  { %3493 = vmatpush.bf16.msra.mxu0 %v12080_v8  ;;  %v3106_v61 = vpop.f32.mrf.mxu2  ;;  %v3135_v1 = vpop.f32.mrf.mxu3 }
 0x9e6   :  { %v3111_v42 = vpack.c.bf16 %v3106_v61, %v3106_v61  ;;  %v3140_v32 = vpack.c.bf16 %v3135_v1, %v3135_v1 }
 0x9ed   :  { %v3108_v25 = vpop.f32.mrf.mxu2  ;;  %v3137_v7 = vpop.f32.mrf.mxu3 }
 0x9ee   :  { %v10770_v25 = vld [vmem:[%s13583_s5 + $0x410] sm:$0xff] }
 0x9f0   :  { %9130 = vmatmul.msk.bf16.gmra.mxu0 %vm683_vm3, %v3140_v32  ;;  %9148 = vmatmul.msk.bf16.gmra.mxu1 %vm683_vm3, %v3111_v42  ;;  %v10771_v42 = vld [vmem:[%s13583_s5 + $0x418] sm:$0xff] }
 0x9f1   :  { %3549 = vmatpush.bf16.msra.mxu1 %v10771_v42 }
 0x9f5   :  { %v3255_v56 = vpop.f32.mrf.mxu2  ;;  %3550 = vmatpush.bf16.msra.mxu1 %v10770_v25 }
 0x9fd   :  { %v3257_v37 = vpop.f32.mrf.mxu2 }
 0x9fe   :  { %v3264_v57 = vpack.c.bf16 %v3257_v37, %v3255_v56  ;;  %v10769_v56 = vld [vmem:[%s13583_s5 + $0x408] sm:$0xff] }
 0x9ff   :  { %3551 = vmatpush.bf16.msra.mxu1 %v10769_v56 }
 0xa00   :  { %9175 = vmatmul.msk.bf16.vlgmr.msrb.gmra.mxu3 %vm683_vm3, %v3264_v57  ;;  %9177 = vmatmul.msk.bf16.vlgmr.msrb.gmra.mxu0 %vm66_vm1, %v12187_v60 }
 0xa01   :  { %3652 = vmatpush.bf16.msrb.mxu0 %v12083_v36  ;;  %3629 = vmatpush.bf16.msrb.mxu3 %v10775_v62  ;;  %v10778_v62 = vld [vmem:[%s13583_s5 + $0x450] sm:$0xff] }
 0xa05   :  { %3653 = vmatpush.bf16.msrb.mxu0 %v12080_v8  ;;  %v3260_v54 = vpop.f32.mrf.mxu2  ;;  %3630 = vmatpush.bf16.msrb.mxu3 %v10774_v30  ;;  %v10777_v30 = vld [vmem:[%s13583_s5 + $0x448] sm:$0xff] }
 0xa06   :  { %v3265_v5 = vpack.c.bf16 %v3260_v54, %v3260_v54 }
 0xa09   :  { %3631 = vmatpush.bf16.msrb.mxu3 %v10773_v31  ;;  %v10776_v31 = vld [vmem:[%s13583_s5 + $0x440] sm:$0xff] }
 0xa0d   :  { %v3262_v23 = vpop.f32.mrf.mxu2  ;;  %3632 = vmatpush.bf16.msrb.mxu3 %v10772_v51 }
 0xa0e   :  { %v10768_v23 = vld [vmem:[%s13583_s5 + $0x400] sm:$0xff] }
 0xa0f   :  { %3552 = vmatpush.bf16.msra.mxu1 %v10768_v23 }
 0xa10   :  { %9176 = vmatmul.msk.bf16.gmra.mxu3 %vm683_vm3, %v3265_v5  ;;  %9178 = vmatmul.msk.bf16.gmra.mxu0 %vm66_vm1, %v11196_v33 }
 0xa15   :  { %v3415_v21 = vpop.f32.mrf.mxu2 }
 0xa1d   :  { %v3417_v58 = vpop.f32.mrf.mxu2 }
 0xa1e   :  { %v3424_v48 = vpack.c.bf16 %v3417_v58, %v3415_v21  ;;  %v10782_v58 = vld [vmem:[%s13583_s5 + $0x470] sm:$0xff] }
 0xa20   :  { %9233 = vmatmul.msk.bf16.vlgmr.msra.gmra.mxu0 %vm66_vm1, %v12199_v19  ;;  %9231 = vmatmul.msk.bf16.vlgmr.msra.gmra.mxu3 %vm683_vm3, %v3424_v48  ;;  %v10781_v48 = vld [vmem:[%s13583_s5 + $0x468] sm:$0xff] }
 0xa21   :  { %3789 = vmatpush.bf16.msra.mxu3 %v10783_v40 }
 0xa25   :  { %v3420_v2 = vpop.f32.mrf.mxu2  ;;  %3790 = vmatpush.bf16.msra.mxu3 %v10782_v58 }
 0xa26   :  { %v3425_v15 = vpack.c.bf16 %v3420_v2, %v3420_v2  ;;  %v10780_v2 = vld [vmem:[%s13583_s5 + $0x460] sm:$0xff] }
 0xa29   :  { %3791 = vmatpush.bf16.msra.mxu3 %v10781_v48 }
 0xa2d   :  { %v3422_v36 = vpop.f32.mrf.mxu2  ;;  %3792 = vmatpush.bf16.msra.mxu3 %v10780_v2 }
 0xa30   :  { %9234 = vmatmul.msk.bf16.gmra.mxu0 %vm66_vm1, %v11226_v41  ;;  %9232 = vmatmul.msk.bf16.gmra.mxu3 %vm683_vm3, %v3425_v15  ;;  %v10779_v15 = vld [vmem:[%s13583_s5 + $0x458] sm:$0xff] }
 0xa35   :  { %v3575_v29 = vpop.f32.mrf.mxu2 }
 0xa3d   :  { %v3577_v39 = vpop.f32.mrf.mxu2 }
 0xa3e   :  { %v3584_v14 = vpack.c.bf16 %v3577_v39, %v3575_v29 }
 0xa40   :  { %9289 = vmatmul.msk.bf16.vlgmr.msrb.gmra.mxu0 %vm66_vm1, %v12208_v43  ;;  %9287 = vmatmul.msk.bf16.vlgmr.msrb.gmra.mxu3 %vm683_vm3, %v3584_v14 }
 0xa41   :  { %4014 = vmatpush.bf16.msrb.mxu3 %v10787_v17 }
 0xa45   :  { %v3580_v32 = vpop.f32.mrf.mxu2 }
 0xa46   :  { %v3585_v57 = vpack.c.bf16 %v3580_v32, %v3580_v32 }
 0xa4d   :  { %v3582_v37 = vpop.f32.mrf.mxu2 }
 0xa50   :  { %9290 = vmatmul.msk.bf16.gmra.mxu0 %vm66_vm1, %v11263_v50  ;;  %9288 = vmatmul.msk.bf16.gmra.mxu3 %vm683_vm3, %v3585_v57 }
 0xa55   :  { %v3735_v47 = vpop.f32.mrf.mxu2 }
 0xa5d   :  { %v3189_v3 = vpop.f32.mrf.mxu0  ;;  %v3237_v4 = vpop.f32.mrf.mxu1 }
 0xa5e   :  { %v3238_v8 = vadd.f32 %v3237_v4, %v3189_v3  ;;  %v3737_v10 = vpop.f32.mrf.mxu2 }
 0xa5f   :  { %v3744_v3 = vpack.c.bf16 %v3737_v10, %v3735_v47 }
 0xa61   :  { %9343 = vmatmul.msk.bf16.vlgmr.msra.gmra.mxu3 %vm683_vm3, %v3744_v3 }
 0xa65   :  { %v12242_v63 = vpop.f32.mrf.mxu0  ;;  %v12244_v52 = vpop.f32.mrf.mxu1 }
 0xa6d   :  { %v3194_v34 = vpop.f32.mrf.mxu0  ;;  %v3242_v11 = vpop.f32.mrf.mxu1 }
 0xa6e   :  { %v3243_v45 = vadd.f32 %v3242_v11, %v3194_v34 }
 0xa75   :  { %v3196_v61 = vpop.f32.mrf.mxu0  ;;  %v3244_v1 = vpop.f32.mrf.mxu1 }
 0xa7d   :  { %v3335_v7 = vpop.f32.mrf.mxu0 }
 0xa83   :  { %v3314_v54 = vpop.f32.mrf.mxu3 }
 0xa84   :  { %v3323_v5 = vadd.f32 %v3314_v54, %v3238_v8 }
 0xa85   :  { %v3337_v21 = vpop.f32.mrf.mxu0 }
 0xa86   :  { %v3344_v44 = vpack.c.bf16 %v3337_v21, %v3335_v7 }
 0xa88   :  { %9203 = vmatmul.msk.bf16.vlgmr.msrb.gmra.mxu1 %vm683_vm3, %v3344_v44 }
 0xa89   :  { %3709 = vmatpush.bf16.msrb.mxu1 %v10779_v15 }
 0xa8b   :  { %v12277_v55 = vpop.f32.mrf.mxu3 }
 0xa8d   :  { %v3340_v49 = vpop.f32.mrf.mxu0  ;;  %3710 = vmatpush.bf16.msrb.mxu1 %v10778_v62 }
 0xa8e   :  { %v3345_v36 = vpack.c.bf16 %v3340_v49, %v3340_v49 }
 0xa91   :  { %3711 = vmatpush.bf16.msrb.mxu1 %v10777_v30 }
 0xa93   :  { %v3319_v4 = vpop.f32.mrf.mxu3 }
 0xa94   :  { %v3325_v8 = vadd.f32 %v3319_v4, %v3243_v45  ;;  %v3740_v45 = vpop.f32.mrf.mxu2 }
 0xa95   :  { %v3342_v20 = vpop.f32.mrf.mxu0  ;;  %3712 = vmatpush.bf16.msrb.mxu1 %v10776_v31  ;;  %v3745_v51 = vpack.c.bf16 %v3740_v45, %v3740_v45 }
 0xa97   :  { %9344 = vmatmul.msk.bf16.gmra.mxu3 %vm683_vm3, %v3745_v51 }
 0xa98   :  { %9204 = vmatmul.msk.bf16.gmra.mxu1 %vm683_vm3, %v3345_v36 }
 0xa9b   :  { %v3321_v9 = vpop.f32.mrf.mxu3 }
 0xa9c   :  { %v3742_v14 = vpop.f32.mrf.mxu2 }
 0xa9d   :  { %v3495_v29 = vpop.f32.mrf.mxu0  ;;  %v3240_v14 = vadd.f32 %v12244_v52, %v12242_v63 }
 0xaa3   :  { %v3474_v57 = vpop.f32.mrf.mxu3 }
 0xaa5   :  { %v3497_v34 = vpop.f32.mrf.mxu0 }
 0xaa6   :  { %v3504_v11 = vpack.c.bf16 %v3497_v34, %v3495_v29 }
 0xaa8   :  { %9259 = vmatmul.msk.bf16.vlgmr.msra.gmra.mxu1 %vm683_vm3, %v3504_v11 }
 0xaab   :  { %v3476_v54 = vpop.f32.mrf.mxu3 }
 0xaad   :  { %v3500_v39 = vpop.f32.mrf.mxu0 }
 0xaae   :  { %v3505_v1 = vpack.c.bf16 %v3500_v39, %v3500_v39 }
 0xab3   :  { %v3479_v23 = vpop.f32.mrf.mxu3 }
 0xab5   :  { %v3502_v61 = vpop.f32.mrf.mxu0 }
 0xab6   :  { %v3324_v61 = vadd.f32 %v12277_v55, %v3240_v14  ;;  %v10790_v14 = vld [vmem:[%s13583_s5 + $0x4b0] sm:$0xff] }
 0xab8   :  { %9260 = vmatmul.msk.bf16.gmra.mxu1 %vm683_vm3, %v3505_v1 }
 0xabb   :  { %v3481_v40 = vpop.f32.mrf.mxu3 }
 0xabd   :  { %v3655_v42 = vpop.f32.mrf.mxu0 }
 0xac3   :  { %v3634_v21 = vpop.f32.mrf.mxu3 }
 0xac5   :  { %v3657_v32 = vpop.f32.mrf.mxu0 }
 0xac6   :  { %v3664_v25 = vpack.c.bf16 %v3657_v32, %v3655_v42 }
 0xac8   :  { %9315 = vmatmul.msk.bf16.vlgmr.msrb.gmra.mxu1 %vm683_vm3, %v3664_v25 }
 0xacb   :  { %v3636_v44 = vpop.f32.mrf.mxu3 }
 0xacd   :  { %v3660_v7 = vpop.f32.mrf.mxu0 }
 0xace   :  { %v3665_v56 = vpack.c.bf16 %v3660_v7, %v3660_v7 }
 0xad3   :  { %v3639_v49 = vpop.f32.mrf.mxu3 }
 0xad5   :  { %v3662_v37 = vpop.f32.mrf.mxu0 }
 0xad8   :  { %9316 = vmatmul.msk.bf16.gmra.mxu1 %vm683_vm3, %v3665_v56 }
 0xadb   :  { %v3641_v10 = vpop.f32.mrf.mxu3 }
 0xae4   :  { %v3794_v15 = vpop.f32.mrf.mxu3 }
 0xaec   :  { %v3796_v29 = vpop.f32.mrf.mxu3 }
 0xb05   :  { %v3394_v47 = vpop.f32.mrf.mxu1 }
 0xb06   :  { %v3403_v58 = vadd.f32 %v3394_v47, %v3323_v5 }
 0xb08   :  { %v3483_v48 = vadd.f32 %v3474_v57, %v3403_v58 }
 0xb0d   :  { %v3396_v2 = vpop.f32.mrf.mxu1 }
 0xb15   :  { %v3399_v3 = vpop.f32.mrf.mxu1 }
 0xb16   :  { %v3405_v4 = vadd.f32 %v3399_v3, %v3325_v8  ;;  %v3404_v8 = vadd.f32 %v3396_v2, %v3324_v61 }
 0xb18   :  { %v3485_v20 = vadd.f32 %v3479_v23, %v3405_v4  ;;  %v3484_v42 = vadd.f32 %v3476_v54, %v3404_v8 }
 0xb1a   :  { %v3799_v34 = vpop.f32.mrf.mxu3 }
 0xb1d   :  { %v3401_v36 = vpop.f32.mrf.mxu1 }
 0xb22   :  { %v3801_v39 = vpop.f32.mrf.mxu3 }
 0xb25   :  { %v3554_v9 = vpop.f32.mrf.mxu1 }
 0xb26   :  { %v3563_v62 = vadd.f32 %v3554_v9, %v3483_v48 }
 0xb28   :  { %v3643_v30 = vadd.f32 %v3634_v21, %v3563_v62 }
 0xb2d   :  { %v3556_v31 = vpop.f32.mrf.mxu1 }
 0xb2e   :  { %v3564_v32 = vadd.f32 %v3556_v31, %v3484_v42 }
 0xb30   :  { %v3644_v25 = vadd.f32 %v3636_v44, %v3564_v32 }
 0xb35   :  { %v3559_v11 = vpop.f32.mrf.mxu1 }
 0xb36   :  { %v3565_v45 = vadd.f32 %v3559_v11, %v3485_v20 }
 0xb38   :  { %v3645_v51 = vadd.f32 %v3639_v49, %v3565_v45 }
 0xb3d   :  { %v3561_v5 = vpop.f32.mrf.mxu1 }
 0xb45   :  { %v3714_v1 = vpop.f32.mrf.mxu1 }
 0xb46   :  { %v3723_v56 = vadd.f32 %v3714_v1, %v3643_v30 }
 0xb48   :  { %v3803_v23 = vadd.f32 %v3794_v15, %v3723_v56 }
 0xb4a   :  { %v3818_v47 = vmul.f32 %v3803_v23, %v3803_v23  ;;  %v3806_v63 = vsel %vm683_vm3, %v3803_v23, 0.0 }
 0xb4c   :  { %v3821_v54 = vsel %vm683_vm3, %v3818_v47, 0.0 }
 0xb4d   :  { %v3716_v7 = vpop.f32.mrf.mxu1 }
 0xb4e   :  { %v3724_v37 = vadd.f32 %v3716_v7, %v3644_v25  ;;  %v10789_v7 = vld [vmem:[%s13583_s5 + $0x4a8] sm:$0xff] }
 0xb50   :  { %v3804_v57 = vadd.f32 %v3796_v29, %v3724_v37 }
 0xb52   :  { %v3819_v40 = vmul.f32 %v3804_v57, %v3804_v57  ;;  %v3807_v58 = vsel %vm683_vm3, %v3804_v57, 0.0 }
 0xb53   :  { %v3808_v49 = vadd.f32 %v3807_v58, %v3806_v63 }
 0xb54   :  { %v3822_v52 = vsel %vm683_vm3, %v3819_v40, 0.0  ;;  %v10788_v40 = vld [vmem:[%s13583_s5 + $0x4a0] sm:$0xff] }
 0xb55   :  { %v3719_v21 = vpop.f32.mrf.mxu1  ;;  %v3823_v10 = vadd.f32 %v3822_v52, %v3821_v54 }
 0xb56   :  { %v3725_v48 = vadd.f32 %v3719_v21, %v3645_v51 }
 0xb58   :  { %v3805_v55 = vadd.f32 %v3799_v34, %v3725_v48  ;;  %v10791_v34 = vld [vmem:[%s13583_s5 + $0x4b8] sm:$0xff] }
 0xb59   :  { %3966 = vmatpush.bf16.msrb.mxu2 %v10791_v34 }
 0xb5a   :  { %v3809_v44 = vsel %vm683_vm3, %v3805_v55, 0.0  ;;  %v3820_v2 = vmul.f32 %v3805_v55, %v3805_v55 }
 0xb5b   :  { %v3810_v3 = vadd.f32 %v3809_v44, %v3808_v49  ;;  %v10972_v49 = vld [vmem:[%s13584_s6 + $0x3] ss:$0 sm:$0xff] }
 0xb5c   :  { %v3824_v4 = vsel %vm683_vm3, %v3820_v2, 0.0 }
 0xb5d   :  { %v3811_v20 = vrot.slane %v3810_v3, 4  ;;  %v3825_v36 = vadd.f32 %v3824_v4, %v3823_v10  ;;  %v3721_v15 = vpop.f32.mrf.mxu1  ;;  %3967 = vmatpush.bf16.msrb.mxu2 %v10790_v14 }
 0xb5f   :  { %v3812_v9 = vadd.f32 %v3811_v20, %v3810_v3  ;;  %v3826_v62 = vrot.slane %v3825_v36, 4  ;;  %v10973_v3 = vld [vmem:[%s13585_s7 + $0x3] ss:$0 sm:$0xff] }
 0xb61   :  { %v3813_v29 = vrot.slane %v3812_v9, 2  ;;  %v3827_v30 = vadd.f32 %v3826_v62, %v3825_v36  ;;  %3968 = vmatpush.bf16.msrb.mxu2 %v10789_v7 }
 0xb63   :  { %v3814_v31 = vadd.f32 %v3813_v29, %v3812_v9  ;;  %v3828_v11 = vrot.slane %v3827_v30, 2 }
 0xb65   :  { %v3815_v45 = vrot.slane %v3814_v31, 1  ;;  %v3829_v51 = vadd.f32 %v3828_v11, %v3827_v30  ;;  %3969 = vmatpush.bf16.msrb.mxu2 %v10788_v40 }
 0xb67   :  { %v3816_v39 = vadd.f32 %v3815_v45, %v3814_v31  ;;  %v3830_v5 = vrot.slane %v3829_v51, 1 }
 0xb69   :  { %v3817_v61 = vmul.f32 0.055555556, %v3816_v39  ;;  %v3831_v8 = vadd.f32 %v3830_v5, %v3829_v51  ;;  %v10792_v39 = vld [vmem:[%s13583_s5 + $0x4c0] sm:$0xff] }
 0xb6b   :  { %v3832_v1 = vmul.f32 0.055555556, %v3831_v8  ;;  %v3833_v42 = vmul.f32 %v3817_v61, %v3817_v61  ;;  %v3836_v32 = vsub.f32 %v3803_v23, %v3817_v61  ;;  %v3838_v25 = vsub.f32 %v3805_v55, %v3817_v61 }
 0xb6c   :  { %v3837_v55 = vsub.f32 %v3804_v57, %v3817_v61 }
 0xb6d   :  { %v3834_v56 = vsub.f32 %v3832_v1, %v3833_v42 }
 0xb6f   :  { %v3835_v37 = vmax.f32 %v3834_v56, 0.0 }
 0xb71   :  { %v3839_v21 = vadd.f32 1e-05, %v3835_v37 }
 0xb73   :  { %10993 = vrsqrt.f32 %v3839_v21  ;;  %vm3846_vm5 = vweird.f32 %v3839_v21 }
 0xb79   :  { %v10994_v47 = vpop.eup %10993 }
 0xb7a   :  { %v3841_v58 = vmul.f32 %v10994_v47, %v3839_v21  ;;  %vm3847_vm4 = vweird.f32 %v10994_v47 }
 0xb7b   :  { %vm3848_vm6 = vmor %vm3846_vm5, %vm3847_vm4 }
 0xb7c   :  { %v3842_v48 = vmul.f32 %v10994_v47, %v3841_v58 }
 0xb7e   :  { %v3843_v63 = vmul.f32 0.5, %v3842_v48  ;;  %v10802_v48 = vld [vmem:[%s13583_s5 + $0x510] sm:$0xff] }
 0xb80   :  { %v3844_v23 = vsub.f32 1.5, %v3843_v63 }
 0xb82   :  { %v3845_v52 = vmul.f32 %v10994_v47, %v3844_v23  ;;  %v10798_v23 = vld [vmem:[%s13583_s5 + $0x4f0] sm:$0xff] }
 0xb84   :  { %v3849_v54 = vsel %vm3848_vm6, %v10994_v47, %v3845_v52  ;;  %v10800_v52 = vld [vmem:[%s13583_s5 + $0x500] sm:$0xff] }
 0xb85   :  { %v3850_v44 = vmul.f32 %v3849_v54, %v3836_v32  ;;  %v3851_v2 = vmul.f32 %v3849_v54, %v3837_v55  ;;  %v3852_v10 = vmul.f32 %v3849_v54, %v3838_v25 }
 0xb87   :  { %v3854_v4 = vmul.f32 %v10972_v49, %v3850_v44  ;;  %v3855_v20 = vmul.f32 %v10972_v49, %v3851_v2  ;;  %v3856_v36 = vmul.f32 %v10972_v49, %v3852_v10  ;;  %v10797_v10 = vld [vmem:[%s13583_s5 + $0x4e8] sm:$0xff] }
 0xb89   :  { %v3858_v15 = vadd.f32 %v10973_v3, %v3854_v4  ;;  %v3859_v9 = vadd.f32 %v10973_v3, %v3855_v20  ;;  %v3860_v62 = vadd.f32 %v10973_v3, %v3856_v36  ;;  %v10796_v3 = vld [vmem:[%s13583_s5 + $0x4e0] sm:$0xff] }
 0xb8b   :  { %v3863_v57 = vadd.f32 %v3860_v62, %v11858_v24  ;;  %v12334_v29 = vadd.f32 %v3858_v15, %v2303_v18  ;;  %v12338_v30 = vadd.f32 %v3859_v9, %v2304_v35  ;;  %v10786_v24 = vld [vmem:[%s13583_s5 + $0x490] sm:$0xff]  ;;  %v10785_v18 = vld [vmem:[%s13583_s5 + $0x488] sm:$0xff]  ;;  %v10784_v35 = vld [vmem:[%s13583_s5 + $0x480] sm:$0xff] }
 0xb8c   :  { %4015 = vmatpush.bf16.msrb.mxu3 %v10786_v24 }
 0xb8d   :  { %v12340_v31 = vmax.f32 %v3863_v57, 0.0  ;;  %v3864_v34 = vmax.f32 %v12334_v29, 0.0  ;;  %v3865_v45 = vmax.f32 %v12338_v30, 0.0  ;;  %v10859_v30 = vld [vmem:[%s13583_s5 + $0x6d8] sm:$0xff] }
 0xb8f   :  { %v3870_v11 = vpack.c.bf16 %v12340_v31, %v12340_v31  ;;  %v12356_v16 = vpack.c.bf16 %v3865_v45, %v3864_v34 }
 0xb90   :  { %4016 = vmatpush.bf16.msrb.mxu3 %v10785_v18 }
 0xb91   :  { %v12347_v51 = vsel %vm73_vm0, %v3870_v11, 0 }
 0xb92   :  { %3880 = vmatpush.bf16.msra.mxu0 %v12347_v51  ;;  %3909 = vmatpush.bf16.msra.mxu1 %v12347_v51 }
 0xb93   :  { %4114 = vmatpush.bf16.msra.mxu2 %v12347_v51 }
 0xb94   :  { %4017 = vmatpush.bf16.msrb.mxu3 %v10784_v35 }
 0xb96   :  { %3881 = vmatpush.bf16.msra.mxu0 %v12356_v16  ;;  %3910 = vmatpush.bf16.msra.mxu1 %v12356_v16 }
 0xb97   :  { %4115 = vmatpush.bf16.msra.mxu2 %v12356_v16 }
 0xb99   :  { %9345 = vmatmul.msk.bf16.vlgmr.msra.gmra.mxu0 %vm66_vm1, %v12095_v22  ;;  %9355 = vmatmul.msk.bf16.vlgmr.msra.gmra.mxu1 %vm66_vm1, %v12102_v59  ;;  %v10795_v22 = vld [vmem:[%s13583_s5 + $0x4d8] sm:$0xff]  ;;  %v10794_v59 = vld [vmem:[%s13583_s5 + $0x4d0] sm:$0xff] }
 0xb9a   :  { %4034 = vmatpush.bf16.msrb.mxu0 %v12347_v51  ;;  %4091 = vmatpush.bf16.msrb.mxu1 %v10795_v22 }
 0xb9e   :  { %4035 = vmatpush.bf16.msrb.mxu0 %v12356_v16  ;;  %4092 = vmatpush.bf16.msrb.mxu1 %v10794_v59  ;;  %v10807_v59 = vld [vmem:[%s13583_s5 + $0x538] sm:$0xff] }
 0xba2   :  { %4194 = vmatpush.bf16.msra.mxu0 %v12347_v51 }
 0xba6   :  { %4195 = vmatpush.bf16.msra.mxu0 %v12356_v16 }
 0xba9   :  { %9346 = vmatmul.msk.bf16.gmra.mxu0 %vm66_vm1, %v11162_v13  ;;  %9356 = vmatmul.msk.bf16.gmra.mxu1 %vm66_vm1, %v11160_v12 }
 0xbb9   :  { %9401 = vmatmul.msk.bf16.vlgmr.msrb.gmra.mxu0 %vm66_vm1, %v12116_v26 }
 0xbba   :  { %4354 = vmatpush.bf16.msrb.mxu0 %v12347_v51 }
 0xbbe   :  { %4355 = vmatpush.bf16.msrb.mxu0 %v12356_v16 }
 0xbc9   :  { %9402 = vmatmul.msk.bf16.gmra.mxu0 %vm66_vm1, %v11219_v38 }
 0xbd9   :  { %9457 = vmatmul.msk.bf16.vlgmr.msra.gmra.mxu0 %vm66_vm1, %v12130_v27 }
 0xbda   :  { %4514 = vmatpush.bf16.msra.mxu0 %v12347_v51 }
 0xbde   :  { %4515 = vmatpush.bf16.msra.mxu0 %v12356_v16 }
 0xbe9   :  { %9458 = vmatmul.msk.bf16.gmra.mxu0 %vm66_vm1, %v11249_v46 }
 0xbf9   :  { %9513 = vmatmul.msk.bf16.vlgmr.msrb.gmra.mxu0 %vm66_vm1, %v12141_v28  ;;  %v10793_v28 = vld [vmem:[%s13583_s5 + $0x4c8] sm:$0xff] }
 0xbfa   :  { %4093 = vmatpush.bf16.msrb.mxu1 %v10793_v28  ;;  %v10808_v28 = vld [vmem:[%s13583_s5 + $0x540] sm:$0xff] }
 0xbfe   :  { %4094 = vmatpush.bf16.msrb.mxu1 %v10792_v39 }
 0xc09   :  { %9514 = vmatmul.msk.bf16.gmra.mxu0 %vm66_vm1, %v11270_v53 }
 0xc16   :  { %v3883_v26 = vpop.f32.mrf.mxu0  ;;  %v3912_v27 = vpop.f32.mrf.mxu1 }
 0xc19   :  { %9569 = vmatmul.msk.bf16.vlgmr.msra.gmra.mxu0 %vm66_vm1, %v12162_v6 }
 0xc1e   :  { %v3885_v5 = vpop.f32.mrf.mxu0  ;;  %v3914_v14 = vpop.f32.mrf.mxu1 }
 0xc1f   :  { %v3892_v61 = vpack.c.bf16 %v3885_v5, %v3883_v26  ;;  %v3921_v8 = vpack.c.bf16 %v3914_v14, %v3912_v27  ;;  %v10809_v26 = vld [vmem:[%s13583_s5 + $0x548] sm:$0xff]  ;;  %v10806_v27 = vld [vmem:[%s13583_s5 + $0x530] sm:$0xff] }
 0xc20   :  { %v10805_v14 = vld [vmem:[%s13583_s5 + $0x528] sm:$0xff] }
 0xc21   :  { %9381 = vmatmul.msk.bf16.vlgmr.msrb.gmra.mxu2 %vm683_vm3, %v3921_v8  ;;  %9399 = vmatmul.msk.bf16.vlgmr.msrb.gmra.mxu3 %vm683_vm3, %v3892_v61 }
 0xc22   :  { %4274 = vmatpush.bf16.msrb.mxu2 %v12347_v51 }
 0xc26   :  { %4275 = vmatpush.bf16.msrb.mxu2 %v12356_v16  ;;  %v3888_v1 = vpop.f32.mrf.mxu0  ;;  %v3917_v6 = vpop.f32.mrf.mxu1 }
 0xc27   :  { %v3893_v42 = vpack.c.bf16 %v3888_v1, %v3888_v1  ;;  %v3922_v32 = vpack.c.bf16 %v3917_v6, %v3917_v6  ;;  %v10804_v1 = vld [vmem:[%s13583_s5 + $0x520] sm:$0xff] }
 0xc29   :  { %9570 = vmatmul.msk.bf16.gmra.mxu0 %vm66_vm1, %v11294_v0 }
 0xc2e   :  { %v3890_v25 = vpop.f32.mrf.mxu0  ;;  %v3919_v7 = vpop.f32.mrf.mxu1 }
 0xc31   :  { %9382 = vmatmul.msk.bf16.gmra.mxu2 %vm683_vm3, %v3922_v32  ;;  %9400 = vmatmul.msk.bf16.gmra.mxu3 %vm683_vm3, %v3893_v42 }
 0xc36   :  { %v4037_v56 = vpop.f32.mrf.mxu0 }
 0xc3e   :  { %v4039_v37 = vpop.f32.mrf.mxu0 }
 0xc3f   :  { %v4046_v40 = vpack.c.bf16 %v4039_v37, %v4037_v56 }
 0xc41   :  { %9427 = vmatmul.msk.bf16.vlgmr.msrb.gmra.mxu1 %vm683_vm3, %v4046_v40  ;;  %9429 = vmatmul.msk.bf16.vlgmr.msra.gmra.mxu2 %vm66_vm1, %v12187_v60  ;;  %v10803_v60 = vld [vmem:[%s13583_s5 + $0x518] sm:$0xff] }
 0xc42   :  { %4434 = vmatpush.bf16.msra.mxu2 %v12347_v51  ;;  %4251 = vmatpush.bf16.msra.mxu1 %v10803_v60  ;;  %v10811_v51 = vld [vmem:[%s13583_s5 + $0x558] sm:$0xff] }
 0xc46   :  { %4435 = vmatpush.bf16.msra.mxu2 %v12356_v16  ;;  %v4042_v21 = vpop.f32.mrf.mxu0  ;;  %4252 = vmatpush.bf16.msra.mxu1 %v10802_v48  ;;  %v10810_v16 = vld [vmem:[%s13583_s5 + $0x550] sm:$0xff] }
 0xc47   :  { %v4047_v47 = vpack.c.bf16 %v4042_v21, %v4042_v21  ;;  %v10819_v21 = vld [vmem:[%s13583_s5 + $0x598] sm:$0xff] }
 0xc4e   :  { %v4044_v58 = vpop.f32.mrf.mxu0 }
 0xc4f   :  { %v10818_v58 = vld [vmem:[%s13583_s5 + $0x590] sm:$0xff] }
 0xc51   :  { %9428 = vmatmul.msk.bf16.gmra.mxu1 %vm683_vm3, %v4047_v47  ;;  %9430 = vmatmul.msk.bf16.gmra.mxu2 %vm66_vm1, %v11196_v33 }
 0xc56   :  { %v4197_v63 = vpop.f32.mrf.mxu0 }
 0xc5e   :  { %v4199_v44 = vpop.f32.mrf.mxu0 }
 0xc5f   :  { %v4206_v2 = vpack.c.bf16 %v4199_v44, %v4197_v63 }
 0xc61   :  { %9485 = vmatmul.msk.bf16.vlgmr.msrb.gmra.mxu2 %vm66_vm1, %v12199_v19  ;;  %v10799_v19 = vld [vmem:[%s13583_s5 + $0x4f8] sm:$0xff] }
 0xc62   :  { %4171 = vmatpush.bf16.msra.mxu3 %v10799_v19  ;;  %v10815_v19 = vld [vmem:[%s13583_s5 + $0x578] sm:$0xff] }
 0xc66   :  { %4172 = vmatpush.bf16.msra.mxu3 %v10798_v23  ;;  %v4202_v36 = vpop.f32.mrf.mxu0  ;;  %v10814_v23 = vld [vmem:[%s13583_s5 + $0x570] sm:$0xff] }
 0xc67   :  { %v4207_v62 = vpack.c.bf16 %v4202_v36, %v4202_v36 }
 0xc6a   :  { %4173 = vmatpush.bf16.msra.mxu3 %v10797_v10 }
 0xc6e   :  { %4174 = vmatpush.bf16.msra.mxu3 %v10796_v3  ;;  %v4204_v11 = vpop.f32.mrf.mxu0 }
 0xc71   :  { %9486 = vmatmul.msk.bf16.gmra.mxu2 %vm66_vm1, %v11226_v41 }
 0xc72   :  { %4331 = vmatpush.bf16.msrb.mxu3 %v10807_v59 }
 0xc76   :  { %v4357_v18 = vpop.f32.mrf.mxu0  ;;  %4332 = vmatpush.bf16.msrb.mxu3 %v10806_v27 }
 0xc7a   :  { %4333 = vmatpush.bf16.msrb.mxu3 %v10805_v14 }
 0xc7e   :  { %v4359_v5 = vpop.f32.mrf.mxu0  ;;  %4334 = vmatpush.bf16.msrb.mxu3 %v10804_v1 }
 0xc7f   :  { %v4366_v8 = vpack.c.bf16 %v4359_v5, %v4357_v18 }
 0xc81   :  { %9541 = vmatmul.msk.bf16.vlgmr.msra.gmra.mxu2 %vm66_vm1, %v12208_v43  ;;  %v10801_v43 = vld [vmem:[%s13583_s5 + $0x508] sm:$0xff] }
 0xc82   :  { %4253 = vmatpush.bf16.msra.mxu1 %v10801_v43  ;;  %v10817_v43 = vld [vmem:[%s13583_s5 + $0x588] sm:$0xff] }
 0xc86   :  { %4254 = vmatpush.bf16.msra.mxu1 %v10800_v52  ;;  %v4362_v32 = vpop.f32.mrf.mxu0  ;;  %v10816_v52 = vld [vmem:[%s13583_s5 + $0x580] sm:$0xff] }
 0xc87   :  { %v4367_v37 = vpack.c.bf16 %v4362_v32, %v4362_v32 }
 0xc89   :  { %9483 = vmatmul.msk.bf16.vlgmr.msra.gmra.mxu1 %vm683_vm3, %v4206_v2  ;;  %v10812_v2 = vld [vmem:[%s13583_s5 + $0x560] sm:$0xff] }
 0xc8a   :  { %4411 = vmatpush.bf16.msrb.mxu1 %v10811_v51 }
 0xc8e   :  { %4412 = vmatpush.bf16.msrb.mxu1 %v10810_v16  ;;  %v4364_v40 = vpop.f32.mrf.mxu0 }
 0xc91   :  { %9542 = vmatmul.msk.bf16.gmra.mxu2 %vm66_vm1, %v11263_v50 }
 0xc92   :  { %4413 = vmatpush.bf16.msrb.mxu1 %v10809_v26 }
 0xc96   :  { %4414 = vmatpush.bf16.msrb.mxu1 %v10808_v28  ;;  %v4517_v63 = vpop.f32.mrf.mxu0 }
 0xc99   :  { %9484 = vmatmul.msk.bf16.gmra.mxu1 %vm683_vm3, %v4207_v62 }
 0xc9a   :  { %4571 = vmatpush.bf16.msra.mxu1 %v10819_v21 }
 0xc9e   :  { %4572 = vmatpush.bf16.msra.mxu1 %v10818_v58 }
 0xca2   :  { %4573 = vmatpush.bf16.msra.mxu1 %v10817_v43 }
 0xca4   :  { %v3971_v55 = vpop.f32.mrf.mxu2  ;;  %v4019_v49 = vpop.f32.mrf.mxu3 }
 0xca5   :  { %v4020_v54 = vadd.f32 %v4019_v49, %v3971_v55  ;;  %v4519_v49 = vpop.f32.mrf.mxu0 }
 0xca6   :  { %4574 = vmatpush.bf16.msra.mxu1 %v10816_v52  ;;  %v4526_v44 = vpack.c.bf16 %v4519_v49, %v4517_v63 }
 0xca9   :  { %9539 = vmatmul.msk.bf16.vlgmr.msrb.gmra.mxu1 %vm683_vm3, %v4366_v8 }
 0xcac   :  { %v12464_v4 = vpop.f32.mrf.mxu2  ;;  %v12466_v20 = vpop.f32.mrf.mxu3 }
 0xcad   :  { %v4022_v49 = vadd.f32 %v12466_v20, %v12464_v4 }
 0xcb4   :  { %v3976_v15 = vpop.f32.mrf.mxu2  ;;  %v4024_v9 = vpop.f32.mrf.mxu3 }
 0xcb5   :  { %v4025_v57 = vadd.f32 %v4024_v9, %v3976_v15  ;;  %v4522_v9 = vpop.f32.mrf.mxu0 }
 0xcb9   :  { %9540 = vmatmul.msk.bf16.gmra.mxu1 %vm683_vm3, %v4367_v37 }
 0xcbc   :  { %v3978_v17 = vpop.f32.mrf.mxu2  ;;  %v4026_v24 = vpop.f32.mrf.mxu3 }
 0xcbd   :  { %v4524_v51 = vpop.f32.mrf.mxu0 }
 0xcbe   :  { %v4096_v35 = vpop.f32.mrf.mxu1 }
 0xcbf   :  { %v12475_v22 = vadd.f32 %v4096_v35, %v4020_v54  ;;  %v10813_v54 = vld [vmem:[%s13583_s5 + $0x568] sm:$0xff] }
 0xcc4   :  { %v4117_v39 = vpop.f32.mrf.mxu2 }
 0xcc6   :  { %v12492_v61 = vpop.f32.mrf.mxu1 }
 0xcc9   :  { %9595 = vmatmul.msk.bf16.vlgmr.msra.gmra.mxu1 %vm683_vm3, %v4526_v44 }
 0xccc   :  { %v4119_v6 = vpop.f32.mrf.mxu2 }
 0xccd   :  { %v4126_v42 = vpack.c.bf16 %v4119_v6, %v4117_v39 }
 0xcce   :  { %v4101_v25 = vpop.f32.mrf.mxu1 }
 0xccf   :  { %v12498_v7 = vadd.f32 %v4101_v25, %v4025_v57  ;;  %9455 = vmatmul.msk.bf16.vlgmr.msra.gmra.mxu3 %vm683_vm3, %v4126_v42  ;;  %v4527_v57 = vpack.c.bf16 %v4522_v9, %v4522_v9 }
 0xcd0   :  { %4491 = vmatpush.bf16.msra.mxu3 %v10815_v19 }
 0xcd4   :  { %v4122_v56 = vpop.f32.mrf.mxu2  ;;  %4492 = vmatpush.bf16.msra.mxu3 %v10814_v23 }
 0xcd5   :  { %v4127_v48 = vpack.c.bf16 %v4122_v56, %v4122_v56 }
 0xcd6   :  { %v4103_v47 = vpop.f32.mrf.mxu1 }
 0xcd8   :  { %4493 = vmatpush.bf16.msra.mxu3 %v10813_v54  ;;  %v4106_v54 = vadd.f32 %v12492_v61, %v4022_v49  ;;  %v10824_v49 = vld [vmem:[%s13583_s5 + $0x5c0] sm:$0xff] }
 0xcd9   :  { %9596 = vmatmul.msk.bf16.gmra.mxu1 %vm683_vm3, %v4527_v57 }
 0xcdc   :  { %v4124_v60 = vpop.f32.mrf.mxu2  ;;  %4494 = vmatpush.bf16.msra.mxu3 %v10812_v2 }
 0xcdf   :  { %9456 = vmatmul.msk.bf16.gmra.mxu3 %vm683_vm3, %v4127_v48 }
 0xce4   :  { %v4277_v55 = vpop.f32.mrf.mxu2 }
 0xcec   :  { %v4279_v10 = vpop.f32.mrf.mxu2 }
 0xced   :  { %v4286_v3 = vpack.c.bf16 %v4279_v10, %v4277_v55 }
 0xcef   :  { %9511 = vmatmul.msk.bf16.vlgmr.msrb.gmra.mxu3 %vm683_vm3, %v4286_v3 }
 0xcf4   :  { %v4282_v36 = vpop.f32.mrf.mxu2 }
 0xcf5   :  { %v4287_v62 = vpack.c.bf16 %v4282_v36, %v4282_v36 }
 0xcfc   :  { %v4284_v15 = vpop.f32.mrf.mxu2 }
 0xcff   :  { %9512 = vmatmul.msk.bf16.gmra.mxu3 %vm683_vm3, %v4287_v62 }
 0xd04   :  { %v4437_v11 = vpop.f32.mrf.mxu2 }
 0xd06   :  { %v4256_v59 = vpop.f32.mrf.mxu1 }
 0xd0c   :  { %v4439_v16 = vpop.f32.mrf.mxu2 }
 0xd0d   :  { %v4446_v17 = vpack.c.bf16 %v4439_v16, %v4437_v11 }
 0xd0e   :  { %v4258_v26 = vpop.f32.mrf.mxu1 }
 0xd0f   :  { %9567 = vmatmul.msk.bf16.vlgmr.msra.gmra.mxu3 %vm683_vm3, %v4446_v17 }
 0xd14   :  { %v4442_v24 = vpop.f32.mrf.mxu2 }
 0xd15   :  { %v4447_v18 = vpack.c.bf16 %v4442_v24, %v4442_v24 }
 0xd16   :  { %v4261_v27 = vpop.f32.mrf.mxu1 }
 0xd1c   :  { %v4444_v35 = vpop.f32.mrf.mxu2 }
 0xd1e   :  { %v4263_v28 = vpop.f32.mrf.mxu1 }
 0xd1f   :  { %9568 = vmatmul.msk.bf16.gmra.mxu3 %vm683_vm3, %v4447_v18 }
 0xd26   :  { %v4416_v39 = vpop.f32.mrf.mxu1 }
 0xd2e   :  { %v4418_v5 = vpop.f32.mrf.mxu1 }
 0xd36   :  { %v4421_v6 = vpop.f32.mrf.mxu1 }
 0xd3e   :  { %v4423_v32 = vpop.f32.mrf.mxu1 }
 0xd46   :  { %v4576_v21 = vpop.f32.mrf.mxu1 }
 0xd4e   :  { %v4578_v60 = vpop.f32.mrf.mxu1 }
 0xd52   :  { %v4176_v14 = vpop.f32.mrf.mxu3 }
 0xd53   :  { %v4185_v8 = vadd.f32 %v4176_v14, %v12475_v22 }
 0xd55   :  { %v4265_v1 = vadd.f32 %v4256_v59, %v4185_v8 }
 0xd56   :  { %v4581_v19 = vpop.f32.mrf.mxu1 }
 0xd5a   :  { %v4178_v42 = vpop.f32.mrf.mxu3 }
 0xd5e   :  { %v4583_v22 = vpop.f32.mrf.mxu1 }
 0xd62   :  { %v4181_v25 = vpop.f32.mrf.mxu3 }
 0xd63   :  { %v4187_v56 = vadd.f32 %v4181_v25, %v12498_v7  ;;  %v4186_v7 = vadd.f32 %v4178_v42, %v4106_v54  ;;  %v10827_v25 = vld [vmem:[%s13583_s5 + $0x5d8] sm:$0xff] }
 0xd64   :  { %4745 = vmatpush.bf16.msrb.mxu0 %v10827_v25  ;;  %v10822_v25 = vld [vmem:[%s13583_s5 + $0x5b0] sm:$0xff] }
 0xd65   :  { %v4267_v37 = vadd.f32 %v4261_v27, %v4187_v56  ;;  %v4266_v2 = vadd.f32 %v4258_v26, %v4186_v7 }
 0xd6a   :  { %v4183_v40 = vpop.f32.mrf.mxu3 }
 0xd72   :  { %v4336_v47 = vpop.f32.mrf.mxu3 }
 0xd73   :  { %v4345_v58 = vadd.f32 %v4336_v47, %v4265_v1  ;;  %v10826_v47 = vld [vmem:[%s13583_s5 + $0x5d0] sm:$0xff] }
 0xd74   :  { %4746 = vmatpush.bf16.msrb.mxu0 %v10826_v47  ;;  %v10830_v47 = vld [vmem:[%s13583_s5 + $0x5f0] sm:$0xff] }
 0xd75   :  { %v4425_v48 = vadd.f32 %v4416_v39, %v4345_v58 }
 0xd7a   :  { %v4338_v63 = vpop.f32.mrf.mxu3 }
 0xd7b   :  { %v4346_v10 = vadd.f32 %v4338_v63, %v4266_v2 }
 0xd7d   :  { %v4426_v3 = vadd.f32 %v4418_v5, %v4346_v10 }
 0xd82   :  { %v4341_v43 = vpop.f32.mrf.mxu3 }
 0xd83   :  { %v4347_v23 = vadd.f32 %v4341_v43, %v4267_v37 }
 0xd85   :  { %v4427_v52 = vadd.f32 %v4421_v6, %v4347_v23 }
 0xd8a   :  { %v4343_v55 = vpop.f32.mrf.mxu3 }
 0xd92   :  { %v4496_v44 = vpop.f32.mrf.mxu3 }
 0xd93   :  { %v4505_v15 = vadd.f32 %v4496_v44, %v4425_v48 }
 0xd95   :  { %v4585_v57 = vadd.f32 %v4576_v21, %v4505_v15 }
 0xd97   :  { %v4600_v16 = vmul.f32 %v4585_v57, %v4585_v57  ;;  %v4588_v4 = vsel %vm683_vm3, %v4585_v57, 0.0 }
 0xd99   :  { %v4603_v35 = vsel %vm683_vm3, %v4600_v16, 0.0 }
 0xd9a   :  { %v4498_v36 = vpop.f32.mrf.mxu3 }
 0xd9b   :  { %v4506_v9 = vadd.f32 %v4498_v36, %v4426_v3 }
 0xd9d   :  { %v4586_v62 = vadd.f32 %v4578_v60, %v4506_v9 }
 0xd9f   :  { %v4601_v11 = vmul.f32 %v4586_v62, %v4586_v62  ;;  %v4589_v17 = vsel %vm683_vm3, %v4586_v62, 0.0 }
 0xda0   :  { %v4590_v18 = vadd.f32 %v4589_v17, %v4588_v4 }
 0xda1   :  { %v4604_v20 = vsel %vm683_vm3, %v4601_v11, 0.0 }
 0xda2   :  { %v4501_v51 = vpop.f32.mrf.mxu3  ;;  %v4605_v27 = vadd.f32 %v4604_v20, %v4603_v35 }
 0xda3   :  { %v4507_v24 = vadd.f32 %v4501_v51, %v4427_v52 }
 0xda5   :  { %v4587_v61 = vadd.f32 %v4581_v19, %v4507_v24  ;;  %v10825_v19 = vld [vmem:[%s13583_s5 + $0x5c8] sm:$0xff]  ;;  %v10975_v24 = vld [vmem:[%s13585_s7 + $0x4] ss:$0 sm:$0xff] }
 0xda6   :  { %4747 = vmatpush.bf16.msrb.mxu0 %v10825_v19 }
 0xda7   :  { %v4591_v59 = vsel %vm683_vm3, %v4587_v61, 0.0  ;;  %v4602_v26 = vmul.f32 %v4587_v61, %v4587_v61 }
 0xda8   :  { %v4592_v28 = vadd.f32 %v4591_v59, %v4590_v18 }
 0xda9   :  { %v4606_v39 = vsel %vm683_vm3, %v4602_v26, 0.0 }
 0xdaa   :  { %v4593_v5 = vrot.slane %v4592_v28, 4  ;;  %v4607_v14 = vadd.f32 %v4606_v39, %v4605_v27  ;;  %v4503_v8 = vpop.f32.mrf.mxu3  ;;  %4748 = vmatpush.bf16.msrb.mxu0 %v10824_v49 }
 0xdab   :  { %v12584_v8 = vld [vmem:[%s13579_s1 + $0xc] sm:$0xff] }
 0xdac   :  { %v4594_v1 = vadd.f32 %v4593_v5, %v4592_v28  ;;  %v4608_v6 = vrot.slane %v4607_v14, 4 }
 0xdae   :  { %v4595_v42 = vrot.slane %v4594_v1, 2  ;;  %v4609_v32 = vadd.f32 %v4608_v6, %v4607_v14  ;;  %v12577_v14 = vld [vmem:[%s13579_s1] sm:$0xff]  ;;  %v10823_v6 = vld [vmem:[%s13583_s5 + $0x5b8] sm:$0xff] }
 0xdaf   :  { %4793 = vmatpush.bf16.msrb.mxu1 %v10823_v6 }
 0xdb0   :  { %v4596_v56 = vadd.f32 %v4595_v42, %v4594_v1  ;;  %v4610_v37 = vrot.slane %v4609_v32, 2  ;;  %v12598_v1 = vld [vmem:[%s13579_s1 + $0x18] sm:$0xff]  ;;  %v12612_v42 = vld [vmem:[%s13579_s1 + $0x30] sm:$0xff] }
 0xdb2   :  { %v4597_v40 = vrot.slane %v4596_v56, 1  ;;  %v4611_v21 = vadd.f32 %v4610_v37, %v4609_v32  ;;  %v12623_v32 = vld [vmem:[%s13579_s1 + $0x48] sm:$0xff]  ;;  %v10820_v37 = vld [vmem:[%s13583_s5 + $0x5a0] sm:$0xff] }
 0xdb3   :  { %4794 = vmatpush.bf16.msrb.mxu1 %v10822_v25  ;;  %v10832_v25 = vld [vmem:[%s13583_s5 + $0x600] sm:$0xff] }
 0xdb4   :  { %v4598_v58 = vadd.f32 %v4597_v40, %v4596_v56  ;;  %v4612_v60 = vrot.slane %v4611_v21, 1  ;;  %v10821_v56 = vld [vmem:[%s13583_s5 + $0x5a8] sm:$0xff]  ;;  %v10831_v40 = vld [vmem:[%s13583_s5 + $0x5f8] sm:$0xff] }
 0xdb6   :  { %v4599_v48 = vmul.f32 0.055555556, %v4598_v58  ;;  %v4613_v63 = vadd.f32 %v4612_v60, %v4611_v21  ;;  %v12644_v21 = vld [vmem:[%s13579_s1 + $0x60] sm:$0xff] }
 0xdb7   :  { %4795 = vmatpush.bf16.msrb.mxu1 %v10821_v56  ;;  %v10847_v56 = vld [vmem:[%s13583_s5 + $0x678] sm:$0xff] }
 0xdb8   :  { %v4614_v43 = vmul.f32 0.055555556, %v4613_v63  ;;  %v4615_v23 = vmul.f32 %v4599_v48, %v4599_v48  ;;  %v4618_v52 = vsub.f32 %v4585_v57, %v4599_v48  ;;  %v4620_v22 = vsub.f32 %v4587_v61, %v4599_v48  ;;  %v10974_v57 = vld [vmem:[%s13584_s6 + $0x4] ss:$0 sm:$0xff] }
 0xdb9   :  { %v4619_v9 = vsub.f32 %v4586_v62, %v4599_v48  ;;  %v10829_v48 = vld [vmem:[%s13583_s5 + $0x5e8] sm:$0xff]  ;;  %v10828_v63 = vld [vmem:[%s13583_s5 + $0x5e0] sm:$0xff] }
 0xdba   :  { %v4616_v55 = vsub.f32 %v4614_v43, %v4615_v23 }
 0xdbb   :  { %4796 = vmatpush.bf16.msrb.mxu1 %v10820_v37 }
 0xdbc   :  { %v4617_v54 = vmax.f32 %v4616_v55, 0.0 }
 0xdbe   :  { %v4621_v7 = vadd.f32 1e-05, %v4617_v54 }
 0xdc0   :  { %10995 = vrsqrt.f32 %v4621_v7  ;;  %vm4628_vm8 = vweird.f32 %v4621_v7 }
 0xdc6   :  { %v10996_v44 = vpop.eup %10995 }
 0xdc7   :  { %v4623_v2 = vmul.f32 %v10996_v44, %v4621_v7  ;;  %vm4629_vm7 = vweird.f32 %v10996_v44 }
 0xdc8   :  { %vm4630_vm9 = vmor %vm4628_vm8, %vm4629_vm7 }
 0xdc9   :  { %v4624_v10 = vmul.f32 %v10996_v44, %v4623_v2 }
 0xdcb   :  { %v4625_v3 = vmul.f32 0.5, %v4624_v10 }
 0xdcd   :  { %v4626_v36 = vsub.f32 1.5, %v4625_v3 }
 0xdcf   :  { %v4627_v15 = vmul.f32 %v10996_v44, %v4626_v36  ;;  %v12669_v36 = vld [vmem:[%s13579_s1 + $0x24] sm:$0xff] }
 0xdd1   :  { %v4631_v11 = vsel %vm4630_vm9, %v10996_v44, %v4627_v15 }
 0xdd2   :  { %v4632_v51 = vmul.f32 %v4631_v11, %v4618_v52  ;;  %v4633_v16 = vmul.f32 %v4631_v11, %v4619_v9  ;;  %v4634_v17 = vmul.f32 %v4631_v11, %v4620_v22  ;;  %v12681_v11 = vld [vmem:[%s13579_s1 + $0x3c] sm:$0xff] }
 0xdd4   :  { %v4636_v4 = vmul.f32 %v10974_v57, %v4632_v51  ;;  %v4637_v20 = vmul.f32 %v10974_v57, %v4633_v16  ;;  %v4638_v61 = vmul.f32 %v10974_v57, %v4634_v17  ;;  %v12690_v51 = vld [vmem:[%s13579_s1 + $0x54] sm:$0xff] }
 0xdd5   :  { %v10839_v16 = vld [vmem:[%s13583_s5 + $0x638] sm:$0xff] }
 0xdd6   :  { %v4640_v18 = vadd.f32 %v10975_v24, %v4636_v4  ;;  %v4641_v35 = vadd.f32 %v10975_v24, %v4637_v20  ;;  %v4642_v59 = vadd.f32 %v10975_v24, %v4638_v61  ;;  %v10838_v24 = vld [vmem:[%s13583_s5 + $0x630] sm:$0xff]  ;;  %v10837_v4 = vld [vmem:[%s13583_s5 + $0x628] sm:$0xff]  ;;  %v10836_v61 = vld [vmem:[%s13583_s5 + $0x620] sm:$0xff] }
 0xdd8   :  { %v4643_v62 = vmax.f32 %v4640_v18, 0.0  ;;  %v4644_v26 = vmax.f32 %v4641_v35, 0.0  ;;  %v4645_v27 = vmax.f32 %v4642_v59, 0.0  ;;  %v10835_v35 = vld [vmem:[%s13583_s5 + $0x618] sm:$0xff] }
 0xdd9   :  { %4950 = vmatpush.bf16.msra.mxu1 %v10835_v35 }
 0xdda   :  { %v12562_v28 = vpack.c.bf16 %v4644_v26, %v4643_v62  ;;  %v4649_v39 = vpack.c.bf16 %v4645_v27, %v4645_v27  ;;  %v10834_v62 = vld [vmem:[%s13583_s5 + $0x610] sm:$0xff] }
 0xddc   :  { %v12565_v5 = vsel %vm73_vm0, %v4649_v39, 0  ;;  %v10833_v39 = vld [vmem:[%s13583_s5 + $0x608] sm:$0xff] }
 0xddd   :  { %4659 = vmatpush.bf16.msrb.mxu2 %v12565_v5  ;;  %4688 = vmatpush.bf16.msrb.mxu3 %v12565_v5 }
 0xdde   :  { %4893 = vmatpush.bf16.msra.mxu0 %v12565_v5  ;;  %4951 = vmatpush.bf16.msra.mxu1 %v10834_v62 }
 0xde1   :  { %4660 = vmatpush.bf16.msrb.mxu2 %v12562_v28  ;;  %4689 = vmatpush.bf16.msrb.mxu3 %v12562_v28 }
 0xde2   :  { %4894 = vmatpush.bf16.msra.mxu0 %v12562_v28  ;;  %4952 = vmatpush.bf16.msra.mxu1 %v10833_v39 }
 0xde4   :  { %9597 = vmatmul.msk.bf16.vlgmr.msrb.gmra.mxu2 %vm66_vm1, %v12577_v14  ;;  %9607 = vmatmul.msk.bf16.vlgmr.msrb.gmra.mxu3 %vm66_vm1, %v12584_v8 }
 0xde5   :  { %4813 = vmatpush.bf16.msra.mxu2 %v12565_v5  ;;  %4870 = vmatpush.bf16.msra.mxu3 %v10831_v40 }
 0xde6   :  { %4953 = vmatpush.bf16.msra.mxu1 %v10832_v25 }
 0xde9   :  { %4814 = vmatpush.bf16.msra.mxu2 %v12562_v28  ;;  %4871 = vmatpush.bf16.msra.mxu3 %v10830_v47 }
 0xded   :  { %4973 = vmatpush.bf16.msrb.mxu2 %v12565_v5  ;;  %4872 = vmatpush.bf16.msra.mxu3 %v10829_v48 }
 0xdf1   :  { %4974 = vmatpush.bf16.msrb.mxu2 %v12562_v28  ;;  %4873 = vmatpush.bf16.msra.mxu3 %v10828_v63 }
 0xdf4   :  { %9598 = vmatmul.msk.bf16.gmra.mxu2 %vm66_vm1, %v11162_v13  ;;  %9608 = vmatmul.msk.bf16.gmra.mxu3 %vm66_vm1, %v11160_v12 }
 0xdf5   :  { %5030 = vmatpush.bf16.msrb.mxu3 %v10839_v16  ;;  %v10855_v16 = vld [vmem:[%s13583_s5 + $0x6b8] sm:$0xff] }
 0xdf9   :  { %5031 = vmatpush.bf16.msrb.mxu3 %v10838_v24 }
 0xdfd   :  { %5032 = vmatpush.bf16.msrb.mxu3 %v10837_v4 }
 0xe01   :  { %5033 = vmatpush.bf16.msrb.mxu3 %v10836_v61 }
 0xe04   :  { %9653 = vmatmul.msk.bf16.vlgmr.msra.gmra.mxu2 %vm66_vm1, %v12598_v1 }
 0xe05   :  { %5133 = vmatpush.bf16.msra.mxu2 %v12565_v5 }
 0xe09   :  { %5134 = vmatpush.bf16.msra.mxu2 %v12562_v28 }
 0xe14   :  { %9654 = vmatmul.msk.bf16.gmra.mxu2 %vm66_vm1, %v11219_v38 }
 0xe24   :  { %9709 = vmatmul.msk.bf16.vlgmr.msrb.gmra.mxu2 %vm66_vm1, %v12612_v42 }
 0xe25   :  { %5293 = vmatpush.bf16.msrb.mxu2 %v12565_v5 }
 0xe29   :  { %5294 = vmatpush.bf16.msrb.mxu2 %v12562_v28 }
 0xe34   :  { %9710 = vmatmul.msk.bf16.gmra.mxu2 %vm66_vm1, %v11249_v46 }
 0xe44   :  { %9765 = vmatmul.msk.bf16.vlgmr.msra.gmra.mxu2 %vm66_vm1, %v12623_v32 }
 0xe54   :  { %9766 = vmatmul.msk.bf16.gmra.mxu2 %vm66_vm1, %v11270_v53 }
 0xe64   :  { %9821 = vmatmul.msk.bf16.vlgmr.msrb.gmra.mxu2 %vm66_vm1, %v12644_v21 }
 0xe67   :  { %v4662_v58 = vpop.f32.mrf.mxu2  ;;  %v4691_v60 = vpop.f32.mrf.mxu3 }
 0xe6f   :  { %v4664_v19 = vpop.f32.mrf.mxu2  ;;  %v4693_v43 = vpop.f32.mrf.mxu3 }
 0xe70   :  { %v4671_v23 = vpack.c.bf16 %v4664_v19, %v4662_v58  ;;  %v4700_v52 = vpack.c.bf16 %v4693_v43, %v4691_v60  ;;  %v10846_v58 = vld [vmem:[%s13583_s5 + $0x670] sm:$0xff]  ;;  %v10845_v60 = vld [vmem:[%s13583_s5 + $0x668] sm:$0xff]  ;;  %v10844_v43 = vld [vmem:[%s13583_s5 + $0x660] sm:$0xff] }
 0xe72   :  { %9633 = vmatmul.msk.bf16.vlgmr.msrb.gmra.mxu0 %vm683_vm3, %v4700_v52  ;;  %9651 = vmatmul.msk.bf16.vlgmr.msrb.gmra.mxu1 %vm683_vm3, %v4671_v23 }
 0xe73   :  { %5053 = vmatpush.bf16.msrb.mxu0 %v12565_v5 }
 0xe74   :  { %9822 = vmatmul.msk.bf16.gmra.mxu2 %vm66_vm1, %v11294_v0 }
 0xe77   :  { %5054 = vmatpush.bf16.msrb.mxu0 %v12562_v28  ;;  %v4667_v22 = vpop.f32.mrf.mxu2  ;;  %v4696_v55 = vpop.f32.mrf.mxu3 }
 0xe78   :  { %v4672_v49 = vpack.c.bf16 %v4667_v22, %v4667_v22  ;;  %v4701_v54 = vpack.c.bf16 %v4696_v55, %v4696_v55 }
 0xe7f   :  { %v4669_v7 = vpop.f32.mrf.mxu2  ;;  %v4698_v44 = vpop.f32.mrf.mxu3 }
 0xe80   :  { %v10842_v7 = vld [vmem:[%s13583_s5 + $0x650] sm:$0xff] }
 0xe82   :  { %9634 = vmatmul.msk.bf16.gmra.mxu0 %vm683_vm3, %v4701_v54  ;;  %9652 = vmatmul.msk.bf16.gmra.mxu1 %vm683_vm3, %v4672_v49  ;;  %v10843_v49 = vld [vmem:[%s13583_s5 + $0x658] sm:$0xff] }
 0xe83   :  { %5110 = vmatpush.bf16.msrb.mxu1 %v10843_v49 }
 0xe87   :  { %v4816_v2 = vpop.f32.mrf.mxu2  ;;  %5111 = vmatpush.bf16.msrb.mxu1 %v10842_v7 }
 0xe8f   :  { %v4818_v10 = vpop.f32.mrf.mxu2 }
 0xe90   :  { %v4825_v3 = vpack.c.bf16 %v4818_v10, %v4816_v2  ;;  %v10841_v2 = vld [vmem:[%s13583_s5 + $0x648] sm:$0xff] }
 0xe91   :  { %5112 = vmatpush.bf16.msrb.mxu1 %v10841_v2 }
 0xe92   :  { %9679 = vmatmul.msk.bf16.vlgmr.msra.gmra.mxu3 %vm683_vm3, %v4825_v3  ;;  %9681 = vmatmul.msk.bf16.vlgmr.msra.gmra.mxu0 %vm66_vm1, %v12669_v36 }
 0xe93   :  { %5213 = vmatpush.bf16.msra.mxu0 %v12565_v5  ;;  %5190 = vmatpush.bf16.msra.mxu3 %v10847_v56  ;;  %v10850_v56 = vld [vmem:[%s13583_s5 + $0x690] sm:$0xff] }
 0xe97   :  { %5214 = vmatpush.bf16.msra.mxu0 %v12562_v28  ;;  %v4821_v15 = vpop.f32.mrf.mxu2  ;;  %5191 = vmatpush.bf16.msra.mxu3 %v10846_v58  ;;  %v10849_v58 = vld [vmem:[%s13583_s5 + $0x688] sm:$0xff] }
 0xe98   :  { %v4826_v9 = vpack.c.bf16 %v4821_v15, %v4821_v15 }
 0xe9b   :  { %5192 = vmatpush.bf16.msra.mxu3 %v10845_v60  ;;  %v10848_v60 = vld [vmem:[%s13583_s5 + $0x680] sm:$0xff] }
 0xe9f   :  { %v4823_v57 = vpop.f32.mrf.mxu2  ;;  %5193 = vmatpush.bf16.msra.mxu3 %v10844_v43 }
 0xea0   :  { %v10840_v57 = vld [vmem:[%s13583_s5 + $0x640] sm:$0xff] }
 0xea1   :  { %5113 = vmatpush.bf16.msrb.mxu1 %v10840_v57 }
 0xea2   :  { %9680 = vmatmul.msk.bf16.gmra.mxu3 %vm683_vm3, %v4826_v9  ;;  %9682 = vmatmul.msk.bf16.gmra.mxu0 %vm66_vm1, %v11196_v33 }
 0xea7   :  { %v4976_v17 = vpop.f32.mrf.mxu2 }
 0xeaf   :  { %v4978_v20 = vpop.f32.mrf.mxu2 }
 0xeb0   :  { %v4985_v18 = vpack.c.bf16 %v4978_v20, %v4976_v17  ;;  %v10854_v20 = vld [vmem:[%s13583_s5 + $0x6b0] sm:$0xff] }
 0xeb2   :  { %9737 = vmatmul.msk.bf16.vlgmr.msrb.gmra.mxu0 %vm66_vm1, %v12681_v11  ;;  %9735 = vmatmul.msk.bf16.vlgmr.msrb.gmra.mxu3 %vm683_vm3, %v4985_v18  ;;  %v10853_v18 = vld [vmem:[%s13583_s5 + $0x6a8] sm:$0xff] }
 0xeb3   :  { %5350 = vmatpush.bf16.msrb.mxu3 %v10855_v16 }
 0xeb7   :  { %v4981_v59 = vpop.f32.mrf.mxu2  ;;  %5351 = vmatpush.bf16.msrb.mxu3 %v10854_v20 }
 0xeb8   :  { %v4986_v6 = vpack.c.bf16 %v4981_v59, %v4981_v59  ;;  %v10852_v59 = vld [vmem:[%s13583_s5 + $0x6a0] sm:$0xff] }
 0xebb   :  { %5352 = vmatpush.bf16.msrb.mxu3 %v10853_v18 }
 0xebf   :  { %v4983_v5 = vpop.f32.mrf.mxu2  ;;  %5353 = vmatpush.bf16.msrb.mxu3 %v10852_v59 }
 0xec2   :  { %9738 = vmatmul.msk.bf16.gmra.mxu0 %vm66_vm1, %v11226_v41  ;;  %9736 = vmatmul.msk.bf16.gmra.mxu3 %vm683_vm3, %v4986_v6  ;;  %v10851_v6 = vld [vmem:[%s13583_s5 + $0x698] sm:$0xff] }
 0xec7   :  { %v5136_v47 = vpop.f32.mrf.mxu2 }
 0xecf   :  { %v5138_v23 = vpop.f32.mrf.mxu2 }
 0xed0   :  { %v5145_v52 = vpack.c.bf16 %v5138_v23, %v5136_v47 }
 0xed2   :  { %9793 = vmatmul.msk.bf16.vlgmr.msra.gmra.mxu0 %vm66_vm1, %v12690_v51  ;;  %9791 = vmatmul.msk.bf16.vlgmr.msra.gmra.mxu3 %vm683_vm3, %v5145_v52 }
 0xed3   :  { %5575 = vmatpush.bf16.msra.mxu3 %v10859_v30 }
 0xed7   :  { %v5141_v54 = vpop.f32.mrf.mxu2 }
 0xed8   :  { %v5146_v3 = vpack.c.bf16 %v5141_v54, %v5141_v54 }
 0xedf   :  { %v5143_v10 = vpop.f32.mrf.mxu2 }
 0xee2   :  { %9794 = vmatmul.msk.bf16.gmra.mxu0 %vm66_vm1, %v11263_v50  ;;  %9792 = vmatmul.msk.bf16.gmra.mxu3 %vm683_vm3, %v5146_v3 }
 0xee7   :  { %v5296_v4 = vpop.f32.mrf.mxu2 }
 0xeef   :  { %v4750_v26 = vpop.f32.mrf.mxu0  ;;  %v4798_v27 = vpop.f32.mrf.mxu1 }
 0xef0   :  { %v4799_v28 = vadd.f32 %v4798_v27, %v4750_v26  ;;  %v5298_v62 = vpop.f32.mrf.mxu2 }
 0xef1   :  { %v5305_v26 = vpack.c.bf16 %v5298_v62, %v5296_v4 }
 0xef3   :  { %9847 = vmatmul.msk.bf16.vlgmr.msrb.gmra.mxu3 %vm683_vm3, %v5305_v26 }
 0xef7   :  { %v12724_v37 = vpop.f32.mrf.mxu0  ;;  %v12726_v40 = vpop.f32.mrf.mxu1 }
 0xeff   :  { %v4755_v48 = vpop.f32.mrf.mxu0  ;;  %v4803_v63 = vpop.f32.mrf.mxu1 }
 0xf00   :  { %v4804_v19 = vadd.f32 %v4803_v63, %v4755_v48 }
 0xf07   :  { %v4757_v22 = vpop.f32.mrf.mxu0  ;;  %v4805_v55 = vpop.f32.mrf.mxu1 }
 0xf0f   :  { %v4896_v44 = vpop.f32.mrf.mxu0 }
 0xf15   :  { %v4875_v15 = vpop.f32.mrf.mxu3 }
 0xf16   :  { %v4884_v9 = vadd.f32 %v4875_v15, %v4799_v28 }
 0xf17   :  { %v4898_v17 = vpop.f32.mrf.mxu0 }
 0xf18   :  { %v4905_v24 = vpack.c.bf16 %v4898_v17, %v4896_v44 }
 0xf1a   :  { %9707 = vmatmul.msk.bf16.vlgmr.msra.gmra.mxu1 %vm683_vm3, %v4905_v24 }
 0xf1b   :  { %5270 = vmatpush.bf16.msra.mxu1 %v10851_v6 }
 0xf1d   :  { %v12759_v61 = vpop.f32.mrf.mxu3 }
 0xf1f   :  { %v4901_v35 = vpop.f32.mrf.mxu0  ;;  %5271 = vmatpush.bf16.msra.mxu1 %v10850_v56 }
 0xf20   :  { %v4906_v5 = vpack.c.bf16 %v4901_v35, %v4901_v35 }
 0xf23   :  { %5272 = vmatpush.bf16.msra.mxu1 %v10849_v58 }
 0xf25   :  { %v4880_v27 = vpop.f32.mrf.mxu3 }
 0xf26   :  { %v4886_v28 = vadd.f32 %v4880_v27, %v4804_v19  ;;  %v5301_v19 = vpop.f32.mrf.mxu2 }
 0xf27   :  { %v4903_v39 = vpop.f32.mrf.mxu0  ;;  %5273 = vmatpush.bf16.msra.mxu1 %v10848_v60  ;;  %v5306_v43 = vpack.c.bf16 %v5301_v19, %v5301_v19 }
 0xf29   :  { %9848 = vmatmul.msk.bf16.gmra.mxu3 %vm683_vm3, %v5306_v43 }
 0xf2a   :  { %9708 = vmatmul.msk.bf16.gmra.mxu1 %vm683_vm3, %v4906_v5 }
 0xf2d   :  { %v4882_v25 = vpop.f32.mrf.mxu3 }
 0xf2e   :  { %v5303_v52 = vpop.f32.mrf.mxu2 }
 0xf2f   :  { %v5056_v47 = vpop.f32.mrf.mxu0  ;;  %v4801_v52 = vadd.f32 %v12726_v40, %v12724_v37 }
 0xf35   :  { %v5035_v3 = vpop.f32.mrf.mxu3 }
 0xf37   :  { %v5058_v48 = vpop.f32.mrf.mxu0 }
 0xf38   :  { %v5065_v63 = vpack.c.bf16 %v5058_v48, %v5056_v47 }
 0xf3a   :  { %9763 = vmatmul.msk.bf16.vlgmr.msrb.gmra.mxu1 %vm683_vm3, %v5065_v63 }
 0xf3d   :  { %v5037_v15 = vpop.f32.mrf.mxu3 }
 0xf3f   :  { %v5061_v23 = vpop.f32.mrf.mxu0 }
 0xf40   :  { %v5066_v55 = vpack.c.bf16 %v5061_v23, %v5061_v23 }
 0xf45   :  { %v5040_v57 = vpop.f32.mrf.mxu3 }
 0xf47   :  { %v5063_v22 = vpop.f32.mrf.mxu0 }
 0xf48   :  { %v4885_v22 = vadd.f32 %v12759_v61, %v4801_v52  ;;  %v10862_v52 = vld [vmem:[%s13583_s5 + $0x6f0] sm:$0xff] }
 0xf4a   :  { %9764 = vmatmul.msk.bf16.gmra.mxu1 %vm683_vm3, %v5066_v55 }
 0xf4d   :  { %v5042_v16 = vpop.f32.mrf.mxu3 }
 0xf4f   :  { %v5216_v49 = vpop.f32.mrf.mxu0 }
 0xf55   :  { %v5195_v17 = vpop.f32.mrf.mxu3 }
 0xf57   :  { %v5218_v54 = vpop.f32.mrf.mxu0 }
 0xf58   :  { %v5225_v7 = vpack.c.bf16 %v5218_v54, %v5216_v49 }
 0xf5a   :  { %9819 = vmatmul.msk.bf16.vlgmr.msra.gmra.mxu1 %vm683_vm3, %v5225_v7 }
 0xf5d   :  { %v5197_v24 = vpop.f32.mrf.mxu3 }
 0xf5f   :  { %v5221_v44 = vpop.f32.mrf.mxu0 }
 0xf60   :  { %v5226_v2 = vpack.c.bf16 %v5221_v44, %v5221_v44 }
 0xf65   :  { %v5200_v35 = vpop.f32.mrf.mxu3 }
 0xf67   :  { %v5223_v10 = vpop.f32.mrf.mxu0 }
 0xf6a   :  { %9820 = vmatmul.msk.bf16.gmra.mxu1 %vm683_vm3, %v5226_v2 }
 0xf6d   :  { %v5202_v62 = vpop.f32.mrf.mxu3 }
 0xf76   :  { %v5355_v6 = vpop.f32.mrf.mxu3 }
 0xf7e   :  { %v5357_v47 = vpop.f32.mrf.mxu3 }
 0xf97   :  { %v4955_v4 = vpop.f32.mrf.mxu1 }
 0xf98   :  { %v4964_v20 = vadd.f32 %v4955_v4, %v4884_v9 }
 0xf9a   :  { %v5044_v18 = vadd.f32 %v5035_v3, %v4964_v20 }
 0xf9f   :  { %v4957_v59 = vpop.f32.mrf.mxu1 }
 0xfa7   :  { %v4960_v26 = vpop.f32.mrf.mxu1 }
 0xfa8   :  { %v4966_v27 = vadd.f32 %v4960_v26, %v4886_v28  ;;  %v4965_v28 = vadd.f32 %v4957_v59, %v4885_v22 }
 0xfaa   :  { %v5046_v39 = vadd.f32 %v5040_v57, %v4966_v27  ;;  %v5045_v49 = vadd.f32 %v5037_v15, %v4965_v28 }
 0xfac   :  { %v5360_v48 = vpop.f32.mrf.mxu3 }
 0xfaf   :  { %v4962_v5 = vpop.f32.mrf.mxu1 }
 0xfb4   :  { %v5362_v23 = vpop.f32.mrf.mxu3 }
 0xfb7   :  { %v5115_v25 = vpop.f32.mrf.mxu1 }
 0xfb8   :  { %v5124_v56 = vadd.f32 %v5115_v25, %v5044_v18 }
 0xfba   :  { %v5204_v58 = vadd.f32 %v5195_v17, %v5124_v56 }
 0xfbf   :  { %v5117_v60 = vpop.f32.mrf.mxu1 }
 0xfc0   :  { %v5125_v54 = vadd.f32 %v5117_v60, %v5045_v49 }
 0xfc2   :  { %v5205_v7 = vadd.f32 %v5197_v24, %v5125_v54 }
 0xfc7   :  { %v5120_v63 = vpop.f32.mrf.mxu1 }
 0xfc8   :  { %v5126_v19 = vadd.f32 %v5120_v63, %v5046_v39 }
 0xfca   :  { %v5206_v43 = vadd.f32 %v5200_v35, %v5126_v19 }
 0xfcf   :  { %v5122_v9 = vpop.f32.mrf.mxu1 }
 0xfd7   :  { %v5275_v55 = vpop.f32.mrf.mxu1 }
 0xfd8   :  { %v5284_v2 = vadd.f32 %v5275_v55, %v5204_v58 }
 0xfda   :  { %v5364_v57 = vadd.f32 %v5355_v6, %v5284_v2 }
 0xfdc   :  { %v5379_v4 = vmul.f32 %v5364_v57, %v5364_v57  ;;  %v5367_v37 = vsel %vm683_vm3, %v5364_v57, 0.0 }
 0xfde   :  { %v5382_v15 = vsel %vm683_vm3, %v5379_v4, 0.0 }
 0xfdf   :  { %v5277_v44 = vpop.f32.mrf.mxu1 }
 0xfe0   :  { %v5285_v10 = vadd.f32 %v5277_v44, %v5205_v7  ;;  %v10861_v44 = vld [vmem:[%s13583_s5 + $0x6e8] sm:$0xff] }
 0xfe2   :  { %v5365_v3 = vadd.f32 %v5357_v47, %v5285_v10 }
 0xfe4   :  { %v5380_v16 = vmul.f32 %v5365_v3, %v5365_v3  ;;  %v5368_v20 = vsel %vm683_vm3, %v5365_v3, 0.0 }
 0xfe5   :  { %v5369_v35 = vadd.f32 %v5368_v20, %v5367_v37 }
 0xfe6   :  { %v5383_v40 = vsel %vm683_vm3, %v5380_v16, 0.0  ;;  %v10860_v16 = vld [vmem:[%s13583_s5 + $0x6e0] sm:$0xff] }
 0xfe7   :  { %v5280_v17 = vpop.f32.mrf.mxu1  ;;  %v5384_v62 = vadd.f32 %v5383_v40, %v5382_v15 }
 0xfe8   :  { %v5286_v18 = vadd.f32 %v5280_v17, %v5206_v43 }
 0xfea   :  { %v5366_v61 = vadd.f32 %v5360_v48, %v5286_v18  ;;  %v10863_v48 = vld [vmem:[%s13583_s5 + $0x6f8] sm:$0xff] }
 0xfeb   :  { %5527 = vmatpush.bf16.msra.mxu2 %v10863_v48 }
 0xfec   :  { %v5370_v24 = vsel %vm683_vm3, %v5366_v61, 0.0  ;;  %v5381_v59 = vmul.f32 %v5366_v61, %v5366_v61 }
 0xfed   :  { %v5371_v26 = vadd.f32 %v5370_v24, %v5369_v35  ;;  %v10976_v35 = vld [vmem:[%s13584_s6 + $0x5] ss:$0 sm:$0xff] }
 0xfee   :  { %v5385_v27 = vsel %vm683_vm3, %v5381_v59, 0.0 }
 0xfef   :  { %v5372_v39 = vrot.slane %v5371_v26, 4  ;;  %v5386_v5 = vadd.f32 %v5385_v27, %v5384_v62  ;;  %v5282_v6 = vpop.f32.mrf.mxu1  ;;  %5528 = vmatpush.bf16.msra.mxu2 %v10862_v52 }
 0xff1   :  { %v5373_v25 = vadd.f32 %v5372_v39, %v5371_v26  ;;  %v5387_v56 = vrot.slane %v5386_v5, 4  ;;  %v10977_v26 = vld [vmem:[%s13585_s7 + $0x5] ss:$0 sm:$0xff] }
 0xff3   :  { %v5374_v47 = vrot.slane %v5373_v25, 2  ;;  %v5388_v58 = vadd.f32 %v5387_v56, %v5386_v5  ;;  %5529 = vmatpush.bf16.msra.mxu2 %v10861_v44 }
 0xff5   :  { %v5375_v60 = vadd.f32 %v5374_v47, %v5373_v25  ;;  %v5389_v63 = vrot.slane %v5388_v58, 2 }
 0xff7   :  { %v5376_v19 = vrot.slane %v5375_v60, 1  ;;  %v5390_v43 = vadd.f32 %v5389_v63, %v5388_v58  ;;  %5530 = vmatpush.bf16.msra.mxu2 %v10860_v16 }
 0xff9   :  { %v5377_v23 = vadd.f32 %v5376_v19, %v5375_v60  ;;  %v5391_v9 = vrot.slane %v5390_v43, 1 }
 0xffb   :  { %v5378_v22 = vmul.f32 0.055555556, %v5377_v23  ;;  %v5392_v28 = vadd.f32 %v5391_v9, %v5390_v43  ;;  %v10864_v23 = vld [vmem:[%s13583_s5 + $0x700] sm:$0xff] }
 0xffd   :  { %v5393_v55 = vmul.f32 0.055555556, %v5392_v28  ;;  %v5394_v49 = vmul.f32 %v5378_v22, %v5378_v22  ;;  %v5397_v54 = vsub.f32 %v5364_v57, %v5378_v22  ;;  %v5399_v7 = vsub.f32 %v5366_v61, %v5378_v22 }
 0xffe   :  { %v5398_v61 = vsub.f32 %v5365_v3, %v5378_v22 }
 0xfff   :  { %v5395_v2 = vsub.f32 %v5393_v55, %v5394_v49 }
0x1001   :  { %v5396_v10 = vmax.f32 %v5395_v2, 0.0 }
0x1003   :  { %v5400_v17 = vadd.f32 1e-05, %v5396_v10 }
0x1005   :  { %10997 = vrsqrt.f32 %v5400_v17  ;;  %vm5407_vm11 = vweird.f32 %v5400_v17 }
0x100b   :  { %v10998_v4 = vpop.eup %10997 }
0x100c   :  { %v5402_v20 = vmul.f32 %v10998_v4, %v5400_v17  ;;  %vm5408_vm10 = vweird.f32 %v10998_v4 }
0x100d   :  { %vm5409_vm12 = vmor %vm5407_vm11, %vm5408_vm10 }
0x100e   :  { %v5403_v18 = vmul.f32 %v10998_v4, %v5402_v20 }
0x1010   :  { %v5404_v37 = vmul.f32 0.5, %v5403_v18  ;;  %v10874_v18 = vld [vmem:[%s13583_s5 + $0x750] sm:$0xff] }
0x1012   :  { %v5405_v57 = vsub.f32 1.5, %v5404_v37 }
0x1014   :  { %v5406_v40 = vmul.f32 %v10998_v4, %v5405_v57  ;;  %v10870_v57 = vld [vmem:[%s13583_s5 + $0x730] sm:$0xff] }
0x1016   :  { %v5410_v15 = vsel %vm5409_vm12, %v10998_v4, %v5406_v40  ;;  %v10872_v40 = vld [vmem:[%s13583_s5 + $0x740] sm:$0xff] }
0x1017   :  { %v5411_v24 = vmul.f32 %v5410_v15, %v5397_v54  ;;  %v5412_v59 = vmul.f32 %v5410_v15, %v5398_v61  ;;  %v5413_v62 = vmul.f32 %v5410_v15, %v5399_v7 }
0x1019   :  { %v5415_v27 = vmul.f32 %v10976_v35, %v5411_v24  ;;  %v5416_v39 = vmul.f32 %v10976_v35, %v5412_v59  ;;  %v5417_v5 = vmul.f32 %v10976_v35, %v5413_v62  ;;  %v10869_v62 = vld [vmem:[%s13583_s5 + $0x728] sm:$0xff] }
0x101b   :  { %v5419_v6 = vadd.f32 %v10977_v26, %v5415_v27  ;;  %v5420_v25 = vadd.f32 %v10977_v26, %v5416_v39  ;;  %v5421_v56 = vadd.f32 %v10977_v26, %v5417_v5  ;;  %v10868_v26 = vld [vmem:[%s13583_s5 + $0x720] sm:$0xff] }
0x101d   :  { %v5424_v3 = vadd.f32 %v5421_v56, %v12340_v31  ;;  %v12816_v47 = vadd.f32 %v5419_v6, %v3864_v34  ;;  %v12820_v58 = vadd.f32 %v5420_v25, %v3865_v45  ;;  %v10858_v31 = vld [vmem:[%s13583_s5 + $0x6d0] sm:$0xff]  ;;  %v10857_v34 = vld [vmem:[%s13583_s5 + $0x6c8] sm:$0xff]  ;;  %v10856_v45 = vld [vmem:[%s13583_s5 + $0x6c0] sm:$0xff] }
0x101e   :  { %5576 = vmatpush.bf16.msra.mxu3 %v10858_v31 }
0x101f   :  { %v12822_v60 = vmax.f32 %v5424_v3, 0.0  ;;  %v5425_v48 = vmax.f32 %v12816_v47, 0.0  ;;  %v5426_v19 = vmax.f32 %v12820_v58, 0.0  ;;  %v10931_v47 = vld [vmem:[%s13586_s8 + $0x18] sm:$0xff]  ;;  %v10938_v58 = vld [vmem:[%s13586_s8 + $0x50] sm:$0xff] }
0x1021   :  { %v5431_v63 = vpack.c.bf16 %v12822_v60, %v12822_v60  ;;  %v12838_v29 = vpack.c.bf16 %v5426_v19, %v5425_v48 }
0x1022   :  { %5577 = vmatpush.bf16.msra.mxu3 %v10857_v34 }
0x1023   :  { %v12829_v43 = vsel %vm73_vm0, %v5431_v63, 0 }
0x1024   :  { %5441 = vmatpush.bf16.msrb.mxu0 %v12829_v43  ;;  %5470 = vmatpush.bf16.msrb.mxu1 %v12829_v43 }
0x1025   :  { %5675 = vmatpush.bf16.msrb.mxu2 %v12829_v43 }
0x1026   :  { %5578 = vmatpush.bf16.msra.mxu3 %v10856_v45 }
0x1028   :  { %5442 = vmatpush.bf16.msrb.mxu0 %v12838_v29  ;;  %5471 = vmatpush.bf16.msrb.mxu1 %v12838_v29 }
0x1029   :  { %5676 = vmatpush.bf16.msrb.mxu2 %v12838_v29 }
0x102b   :  { %9849 = vmatmul.msk.bf16.vlgmr.msrb.gmra.mxu0 %vm66_vm1, %v12577_v14  ;;  %9859 = vmatmul.msk.bf16.vlgmr.msrb.gmra.mxu1 %vm66_vm1, %v12584_v8  ;;  %v10867_v14 = vld [vmem:[%s13583_s5 + $0x718] sm:$0xff]  ;;  %v10866_v8 = vld [vmem:[%s13583_s5 + $0x710] sm:$0xff] }
0x102c   :  { %5595 = vmatpush.bf16.msra.mxu0 %v12829_v43  ;;  %5652 = vmatpush.bf16.msra.mxu1 %v10867_v14 }
0x1030   :  { %5596 = vmatpush.bf16.msra.mxu0 %v12838_v29  ;;  %5653 = vmatpush.bf16.msra.mxu1 %v10866_v8  ;;  %v10879_v8 = vld [vmem:[%s13583_s5 + $0x778] sm:$0xff] }
0x1034   :  { %5755 = vmatpush.bf16.msrb.mxu0 %v12829_v43 }
0x1038   :  { %5756 = vmatpush.bf16.msrb.mxu0 %v12838_v29 }
0x103b   :  { %9850 = vmatmul.msk.bf16.gmra.mxu0 %vm66_vm1, %v11162_v13  ;;  %9860 = vmatmul.msk.bf16.gmra.mxu1 %vm66_vm1, %v11160_v12 }
0x104b   :  { %9905 = vmatmul.msk.bf16.vlgmr.msra.gmra.mxu0 %vm66_vm1, %v12598_v1 }
0x104c   :  { %5915 = vmatpush.bf16.msra.mxu0 %v12829_v43 }
0x1050   :  { %5916 = vmatpush.bf16.msra.mxu0 %v12838_v29 }
0x105b   :  { %9906 = vmatmul.msk.bf16.gmra.mxu0 %vm66_vm1, %v11219_v38 }
0x106b   :  { %9961 = vmatmul.msk.bf16.vlgmr.msrb.gmra.mxu0 %vm66_vm1, %v12612_v42 }
0x106c   :  { %6075 = vmatpush.bf16.msrb.mxu0 %v12829_v43 }
0x1070   :  { %6076 = vmatpush.bf16.msrb.mxu0 %v12838_v29 }
0x107b   :  { %9962 = vmatmul.msk.bf16.gmra.mxu0 %vm66_vm1, %v11249_v46 }
0x108b   :  { %10017 = vmatmul.msk.bf16.vlgmr.msra.gmra.mxu0 %vm66_vm1, %v12623_v32  ;;  %v10865_v32 = vld [vmem:[%s13583_s5 + $0x708] sm:$0xff] }
0x108c   :  { %5654 = vmatpush.bf16.msra.mxu1 %v10865_v32  ;;  %v10880_v32 = vld [vmem:[%s13583_s5 + $0x780] sm:$0xff] }
0x1090   :  { %5655 = vmatpush.bf16.msra.mxu1 %v10864_v23 }
0x109b   :  { %10018 = vmatmul.msk.bf16.gmra.mxu0 %vm66_vm1, %v11270_v53 }
0x10a8   :  { %v5444_v1 = vpop.f32.mrf.mxu0  ;;  %v5473_v42 = vpop.f32.mrf.mxu1 }
0x10ab   :  { %10073 = vmatmul.msk.bf16.vlgmr.msrb.gmra.mxu0 %vm66_vm1, %v12644_v21 }
0x10b0   :  { %v5446_v9 = vpop.f32.mrf.mxu0  ;;  %v5475_v52 = vpop.f32.mrf.mxu1 }
0x10b1   :  { %v5453_v22 = vpack.c.bf16 %v5446_v9, %v5444_v1  ;;  %v5482_v28 = vpack.c.bf16 %v5475_v52, %v5473_v42  ;;  %v10881_v1 = vld [vmem:[%s13583_s5 + $0x788] sm:$0xff]  ;;  %v10878_v42 = vld [vmem:[%s13583_s5 + $0x770] sm:$0xff] }
0x10b2   :  { %v10877_v52 = vld [vmem:[%s13583_s5 + $0x768] sm:$0xff] }
0x10b3   :  { %9885 = vmatmul.msk.bf16.vlgmr.msra.gmra.mxu2 %vm683_vm3, %v5482_v28  ;;  %9903 = vmatmul.msk.bf16.vlgmr.msra.gmra.mxu3 %vm683_vm3, %v5453_v22 }
0x10b4   :  { %5835 = vmatpush.bf16.msra.mxu2 %v12829_v43 }
0x10b8   :  { %5836 = vmatpush.bf16.msra.mxu2 %v12838_v29  ;;  %v5449_v55 = vpop.f32.mrf.mxu0  ;;  %v5478_v21 = vpop.f32.mrf.mxu1 }
0x10b9   :  { %v5454_v49 = vpack.c.bf16 %v5449_v55, %v5449_v55  ;;  %v5483_v54 = vpack.c.bf16 %v5478_v21, %v5478_v21  ;;  %v10876_v55 = vld [vmem:[%s13583_s5 + $0x760] sm:$0xff] }
0x10bb   :  { %10074 = vmatmul.msk.bf16.gmra.mxu0 %vm66_vm1, %v11294_v0 }
0x10c0   :  { %v5451_v7 = vpop.f32.mrf.mxu0  ;;  %v5480_v44 = vpop.f32.mrf.mxu1 }
0x10c3   :  { %9886 = vmatmul.msk.bf16.gmra.mxu2 %vm683_vm3, %v5483_v54  ;;  %9904 = vmatmul.msk.bf16.gmra.mxu3 %vm683_vm3, %v5454_v49 }
0x10c8   :  { %v5598_v2 = vpop.f32.mrf.mxu0 }
0x10d0   :  { %v5600_v10 = vpop.f32.mrf.mxu0 }
0x10d1   :  { %v5607_v16 = vpack.c.bf16 %v5600_v10, %v5598_v2 }
0x10d3   :  { %9931 = vmatmul.msk.bf16.vlgmr.msra.gmra.mxu1 %vm683_vm3, %v5607_v16  ;;  %9933 = vmatmul.msk.bf16.vlgmr.msrb.gmra.mxu2 %vm66_vm1, %v12669_v36  ;;  %v10875_v36 = vld [vmem:[%s13583_s5 + $0x758] sm:$0xff] }
0x10d4   :  { %5995 = vmatpush.bf16.msrb.mxu2 %v12829_v43  ;;  %5812 = vmatpush.bf16.msrb.mxu1 %v10875_v36  ;;  %v10883_v43 = vld [vmem:[%s13583_s5 + $0x798] sm:$0xff] }
0x10d8   :  { %5996 = vmatpush.bf16.msrb.mxu2 %v12838_v29  ;;  %v5603_v17 = vpop.f32.mrf.mxu0  ;;  %5813 = vmatpush.bf16.msrb.mxu1 %v10874_v18  ;;  %v10882_v29 = vld [vmem:[%s13583_s5 + $0x790] sm:$0xff] }
0x10d9   :  { %v5608_v4 = vpack.c.bf16 %v5603_v17, %v5603_v17  ;;  %v10891_v17 = vld [vmem:[%s13583_s5 + $0x7d8] sm:$0xff] }
0x10e0   :  { %v5605_v20 = vpop.f32.mrf.mxu0 }
0x10e1   :  { %v10890_v20 = vld [vmem:[%s13583_s5 + $0x7d0] sm:$0xff] }
0x10e3   :  { %9932 = vmatmul.msk.bf16.gmra.mxu1 %vm683_vm3, %v5608_v4  ;;  %9934 = vmatmul.msk.bf16.gmra.mxu2 %vm66_vm1, %v11196_v33 }
0x10e8   :  { %v5758_v37 = vpop.f32.mrf.mxu0 }
0x10f0   :  { %v5760_v24 = vpop.f32.mrf.mxu0 }
0x10f1   :  { %v5767_v59 = vpack.c.bf16 %v5760_v24, %v5758_v37 }
0x10f3   :  { %9989 = vmatmul.msk.bf16.vlgmr.msra.gmra.mxu2 %vm66_vm1, %v12681_v11  ;;  %v10871_v11 = vld [vmem:[%s13583_s5 + $0x738] sm:$0xff] }
0x10f4   :  { %5732 = vmatpush.bf16.msrb.mxu3 %v10871_v11  ;;  %v10887_v11 = vld [vmem:[%s13583_s5 + $0x7b8] sm:$0xff] }
0x10f8   :  { %5733 = vmatpush.bf16.msrb.mxu3 %v10870_v57  ;;  %v5763_v5 = vpop.f32.mrf.mxu0  ;;  %v10886_v57 = vld [vmem:[%s13583_s5 + $0x7b0] sm:$0xff] }
0x10f9   :  { %v5768_v56 = vpack.c.bf16 %v5763_v5, %v5763_v5 }
0x10fc   :  { %5734 = vmatpush.bf16.msrb.mxu3 %v10869_v62 }
0x1100   :  { %5735 = vmatpush.bf16.msrb.mxu3 %v10868_v26  ;;  %v5765_v63 = vpop.f32.mrf.mxu0 }
0x1103   :  { %9990 = vmatmul.msk.bf16.gmra.mxu2 %vm66_vm1, %v11226_v41 }
0x1104   :  { %5892 = vmatpush.bf16.msra.mxu3 %v10879_v8 }
0x1108   :  { %v5918_v34 = vpop.f32.mrf.mxu0  ;;  %5893 = vmatpush.bf16.msra.mxu3 %v10878_v42 }
0x110c   :  { %5894 = vmatpush.bf16.msra.mxu3 %v10877_v52 }
0x1110   :  { %v5920_v9 = vpop.f32.mrf.mxu0  ;;  %5895 = vmatpush.bf16.msra.mxu3 %v10876_v55 }
0x1111   :  { %v5927_v28 = vpack.c.bf16 %v5920_v9, %v5918_v34 }
0x1113   :  { %10045 = vmatmul.msk.bf16.vlgmr.msrb.gmra.mxu2 %vm66_vm1, %v12690_v51  ;;  %v10873_v51 = vld [vmem:[%s13583_s5 + $0x748] sm:$0xff] }
0x1114   :  { %5814 = vmatpush.bf16.msrb.mxu1 %v10873_v51  ;;  %v10889_v51 = vld [vmem:[%s13583_s5 + $0x7c8] sm:$0xff] }
0x1118   :  { %5815 = vmatpush.bf16.msrb.mxu1 %v10872_v40  ;;  %v5923_v54 = vpop.f32.mrf.mxu0  ;;  %v10888_v40 = vld [vmem:[%s13583_s5 + $0x7c0] sm:$0xff] }
0x1119   :  { %v5928_v10 = vpack.c.bf16 %v5923_v54, %v5923_v54 }
0x111b   :  { %9987 = vmatmul.msk.bf16.vlgmr.msrb.gmra.mxu1 %vm683_vm3, %v5767_v59  ;;  %v10884_v59 = vld [vmem:[%s13583_s5 + $0x7a0] sm:$0xff] }
0x111c   :  { %5972 = vmatpush.bf16.msra.mxu1 %v10883_v43 }
0x1120   :  { %5973 = vmatpush.bf16.msra.mxu1 %v10882_v29  ;;  %v5925_v16 = vpop.f32.mrf.mxu0 }
0x1123   :  { %10046 = vmatmul.msk.bf16.gmra.mxu2 %vm66_vm1, %v11263_v50 }
0x1124   :  { %5974 = vmatpush.bf16.msra.mxu1 %v10881_v1 }
0x1128   :  { %5975 = vmatpush.bf16.msra.mxu1 %v10880_v32  ;;  %v6078_v37 = vpop.f32.mrf.mxu0 }
0x112b   :  { %9988 = vmatmul.msk.bf16.gmra.mxu1 %vm683_vm3, %v5768_v56 }
0x112c   :  { %6132 = vmatpush.bf16.msrb.mxu1 %v10891_v17 }
0x1130   :  { %6133 = vmatpush.bf16.msrb.mxu1 %v10890_v20 }
0x1134   :  { %6134 = vmatpush.bf16.msrb.mxu1 %v10889_v51 }
0x1136   :  { %v5532_v61 = vpop.f32.mrf.mxu2  ;;  %v5580_v35 = vpop.f32.mrf.mxu3 }
0x1137   :  { %v5581_v15 = vadd.f32 %v5580_v35, %v5532_v61  ;;  %v6080_v35 = vpop.f32.mrf.mxu0 }
0x1138   :  { %6135 = vmatpush.bf16.msrb.mxu1 %v10888_v40  ;;  %v6087_v24 = vpack.c.bf16 %v6080_v35, %v6078_v37 }
0x113b   :  { %10043 = vmatmul.msk.bf16.vlgmr.msra.gmra.mxu1 %vm683_vm3, %v5927_v28 }
0x113e   :  { %v12946_v27 = vpop.f32.mrf.mxu2  ;;  %v12948_v39 = vpop.f32.mrf.mxu3 }
0x113f   :  { %v5583_v35 = vadd.f32 %v12948_v39, %v12946_v27 }
0x1146   :  { %v5537_v6 = vpop.f32.mrf.mxu2  ;;  %v5585_v25 = vpop.f32.mrf.mxu3 }
0x1147   :  { %v5586_v3 = vadd.f32 %v5585_v25, %v5537_v6  ;;  %v6083_v25 = vpop.f32.mrf.mxu0 }
0x114b   :  { %10044 = vmatmul.msk.bf16.gmra.mxu1 %vm683_vm3, %v5928_v10 }
0x114e   :  { %v5539_v30 = vpop.f32.mrf.mxu2  ;;  %v5587_v31 = vpop.f32.mrf.mxu3 }
0x114f   :  { %v6085_v43 = vpop.f32.mrf.mxu0 }
0x1150   :  { %v5657_v45 = vpop.f32.mrf.mxu1 }
0x1151   :  { %v12957_v14 = vadd.f32 %v5657_v45, %v5581_v15  ;;  %v10885_v15 = vld [vmem:[%s13583_s5 + $0x7a8] sm:$0xff] }
0x1156   :  { %v5678_v23 = vpop.f32.mrf.mxu2 }
0x1158   :  { %v12974_v22 = vpop.f32.mrf.mxu1 }
0x115b   :  { %10099 = vmatmul.msk.bf16.vlgmr.msrb.gmra.mxu1 %vm683_vm3, %v6087_v24 }
0x115e   :  { %v5680_v21 = vpop.f32.mrf.mxu2 }
0x115f   :  { %v5687_v49 = vpack.c.bf16 %v5680_v21, %v5678_v23 }
0x1160   :  { %v5662_v7 = vpop.f32.mrf.mxu1 }
0x1161   :  { %v12980_v44 = vadd.f32 %v5662_v7, %v5586_v3  ;;  %9959 = vmatmul.msk.bf16.vlgmr.msrb.gmra.mxu3 %vm683_vm3, %v5687_v49  ;;  %v6088_v3 = vpack.c.bf16 %v6083_v25, %v6083_v25 }
0x1162   :  { %6052 = vmatpush.bf16.msrb.mxu3 %v10887_v11 }
0x1166   :  { %v5683_v2 = vpop.f32.mrf.mxu2  ;;  %6053 = vmatpush.bf16.msrb.mxu3 %v10886_v57 }
0x1167   :  { %v5688_v18 = vpack.c.bf16 %v5683_v2, %v5683_v2 }
0x1168   :  { %v5664_v4 = vpop.f32.mrf.mxu1 }
0x116a   :  { %6054 = vmatpush.bf16.msrb.mxu3 %v10885_v15  ;;  %v5667_v15 = vadd.f32 %v12974_v22, %v5583_v35  ;;  %v10896_v35 = vld [vmem:[%s13583_s5 + $0x800] sm:$0xff] }
0x116b   :  { %10100 = vmatmul.msk.bf16.gmra.mxu1 %vm683_vm3, %v6088_v3 }
0x116e   :  { %v5685_v36 = vpop.f32.mrf.mxu2  ;;  %6055 = vmatpush.bf16.msrb.mxu3 %v10884_v59 }
0x1171   :  { %9960 = vmatmul.msk.bf16.gmra.mxu3 %vm683_vm3, %v5688_v18 }
0x1176   :  { %v5838_v61 = vpop.f32.mrf.mxu2 }
0x117e   :  { %v5840_v62 = vpop.f32.mrf.mxu2 }
0x117f   :  { %v5847_v26 = vpack.c.bf16 %v5840_v62, %v5838_v61 }
0x1181   :  { %10015 = vmatmul.msk.bf16.vlgmr.msra.gmra.mxu3 %vm683_vm3, %v5847_v26 }
0x1186   :  { %v5843_v5 = vpop.f32.mrf.mxu2 }
0x1187   :  { %v5848_v56 = vpack.c.bf16 %v5843_v5, %v5843_v5 }
0x118e   :  { %v5845_v6 = vpop.f32.mrf.mxu2 }
0x1191   :  { %10016 = vmatmul.msk.bf16.gmra.mxu3 %vm683_vm3, %v5848_v56 }
0x1196   :  { %v5998_v63 = vpop.f32.mrf.mxu2 }
0x1198   :  { %v5817_v8 = vpop.f32.mrf.mxu1 }
0x119e   :  { %v6000_v29 = vpop.f32.mrf.mxu2 }
0x119f   :  { %v6007_v30 = vpack.c.bf16 %v6000_v29, %v5998_v63 }
0x11a0   :  { %v5819_v1 = vpop.f32.mrf.mxu1 }
0x11a1   :  { %10071 = vmatmul.msk.bf16.vlgmr.msrb.gmra.mxu3 %vm683_vm3, %v6007_v30 }
0x11a6   :  { %v6003_v31 = vpop.f32.mrf.mxu2 }
0x11a7   :  { %v6008_v34 = vpack.c.bf16 %v6003_v31, %v6003_v31 }
0x11a8   :  { %v5822_v42 = vpop.f32.mrf.mxu1 }
0x11ae   :  { %v6005_v45 = vpop.f32.mrf.mxu2 }
0x11b0   :  { %v5824_v32 = vpop.f32.mrf.mxu1 }
0x11b1   :  { %10072 = vmatmul.msk.bf16.gmra.mxu3 %vm683_vm3, %v6008_v34 }
0x11b8   :  { %v5977_v23 = vpop.f32.mrf.mxu1 }
0x11c0   :  { %v5979_v9 = vpop.f32.mrf.mxu1 }
0x11c8   :  { %v5982_v21 = vpop.f32.mrf.mxu1 }
0x11d0   :  { %v5984_v54 = vpop.f32.mrf.mxu1 }
0x11d8   :  { %v6137_v17 = vpop.f32.mrf.mxu1 }
0x11e0   :  { %v6139_v36 = vpop.f32.mrf.mxu1 }
0x11e4   :  { %v5737_v52 = vpop.f32.mrf.mxu3 }
0x11e5   :  { %v5746_v28 = vadd.f32 %v5737_v52, %v12957_v14 }
0x11e7   :  { %v5826_v55 = vadd.f32 %v5817_v8, %v5746_v28 }
0x11e8   :  { %v6142_v11 = vpop.f32.mrf.mxu1 }
0x11ec   :  { %v5739_v49 = vpop.f32.mrf.mxu3 }
0x11f0   :  { %v6144_v14 = vpop.f32.mrf.mxu1 }
0x11f4   :  { %v5742_v7 = vpop.f32.mrf.mxu3 }
0x11f5   :  { %v5748_v2 = vadd.f32 %v5742_v7, %v12980_v44  ;;  %v5747_v44 = vadd.f32 %v5739_v49, %v5667_v15  ;;  %v10899_v7 = vld [vmem:[%s13583_s5 + $0x818] sm:$0xff] }
0x11f6   :  { %6306 = vmatpush.bf16.msra.mxu0 %v10899_v7  ;;  %v10894_v7 = vld [vmem:[%s13583_s5 + $0x7f0] sm:$0xff] }
0x11f7   :  { %v5828_v10 = vadd.f32 %v5822_v42, %v5748_v2  ;;  %v5827_v59 = vadd.f32 %v5819_v1, %v5747_v44 }
0x11fc   :  { %v5744_v16 = vpop.f32.mrf.mxu3 }
0x1204   :  { %v5897_v4 = vpop.f32.mrf.mxu3 }
0x1205   :  { %v5906_v20 = vadd.f32 %v5897_v4, %v5826_v55  ;;  %v10898_v4 = vld [vmem:[%s13583_s5 + $0x810] sm:$0xff] }
0x1206   :  { %6307 = vmatpush.bf16.msra.mxu0 %v10898_v4  ;;  %v10902_v4 = vld [vmem:[%s13583_s5 + $0x830] sm:$0xff] }
0x1207   :  { %v5986_v18 = vadd.f32 %v5977_v23, %v5906_v20 }
0x120c   :  { %v5899_v37 = vpop.f32.mrf.mxu3 }
0x120d   :  { %v5907_v62 = vadd.f32 %v5899_v37, %v5827_v59 }
0x120f   :  { %v5987_v26 = vadd.f32 %v5979_v9, %v5907_v62 }
0x1214   :  { %v5902_v51 = vpop.f32.mrf.mxu3 }
0x1215   :  { %v5908_v57 = vadd.f32 %v5902_v51, %v5828_v10 }
0x1217   :  { %v5988_v40 = vadd.f32 %v5982_v21, %v5908_v57 }
0x121c   :  { %v5904_v61 = vpop.f32.mrf.mxu3 }
0x1224   :  { %v6057_v24 = vpop.f32.mrf.mxu3 }
0x1225   :  { %v6066_v6 = vadd.f32 %v6057_v24, %v5986_v18 }
0x1227   :  { %v6146_v3 = vadd.f32 %v6137_v17, %v6066_v6 }
0x1229   :  { %v6161_v29 = vmul.f32 %v6146_v3, %v6146_v3  ;;  %v6149_v27 = vsel %vm683_vm3, %v6146_v3, 0.0 }
0x122b   :  { %v6164_v45 = vsel %vm683_vm3, %v6161_v29, 0.0 }
0x122c   :  { %v6059_v5 = vpop.f32.mrf.mxu3 }
0x122d   :  { %v6067_v25 = vadd.f32 %v6059_v5, %v5987_v26 }
0x122f   :  { %v6147_v56 = vadd.f32 %v6139_v36, %v6067_v25 }
0x1231   :  { %v6162_v63 = vmul.f32 %v6147_v56, %v6147_v56  ;;  %v6150_v30 = vsel %vm683_vm3, %v6147_v56, 0.0 }
0x1232   :  { %v6151_v34 = vadd.f32 %v6150_v30, %v6149_v27 }
0x1233   :  { %v6165_v39 = vsel %vm683_vm3, %v6162_v63, 0.0 }
0x1234   :  { %v6062_v43 = vpop.f32.mrf.mxu3  ;;  %v6166_v42 = vadd.f32 %v6165_v39, %v6164_v45 }
0x1235   :  { %v6068_v31 = vadd.f32 %v6062_v43, %v5988_v40 }
0x1237   :  { %v6148_v22 = vadd.f32 %v6142_v11, %v6068_v31  ;;  %v10897_v11 = vld [vmem:[%s13583_s5 + $0x808] sm:$0xff]  ;;  %v10979_v31 = vld [vmem:[%s13585_s7 + $0x6] ss:$0 sm:$0xff] }
0x1238   :  { %6308 = vmatpush.bf16.msra.mxu0 %v10897_v11 }
0x1239   :  { %v6152_v8 = vsel %vm683_vm3, %v6148_v22, 0.0  ;;  %v6163_v1 = vmul.f32 %v6148_v22, %v6148_v22 }
0x123a   :  { %v6153_v32 = vadd.f32 %v6152_v8, %v6151_v34 }
0x123b   :  { %v6167_v23 = vsel %vm683_vm3, %v6163_v1, 0.0 }
0x123c   :  { %v6154_v9 = vrot.slane %v6153_v32, 4  ;;  %v6168_v52 = vadd.f32 %v6167_v23, %v6166_v42  ;;  %v6064_v28 = vpop.f32.mrf.mxu3  ;;  %6309 = vmatpush.bf16.msra.mxu0 %v10896_v35 }
0x123d   :  { %v13066_v28 = vld [vmem:[%s13579_s1 + $0xc] sm:$0xff] }
0x123e   :  { %v6155_v55 = vadd.f32 %v6154_v9, %v6153_v32  ;;  %v6169_v21 = vrot.slane %v6168_v52, 4 }
0x1240   :  { %v6156_v49 = vrot.slane %v6155_v55, 2  ;;  %v6170_v54 = vadd.f32 %v6169_v21, %v6168_v52  ;;  %v13059_v52 = vld [vmem:[%s13579_s1] sm:$0xff]  ;;  %v10895_v21 = vld [vmem:[%s13583_s5 + $0x7f8] sm:$0xff] }
0x1241   :  { %6354 = vmatpush.bf16.msra.mxu1 %v10895_v21 }
0x1242   :  { %v6157_v2 = vadd.f32 %v6156_v49, %v6155_v55  ;;  %v6171_v10 = vrot.slane %v6170_v54, 2  ;;  %v13080_v55 = vld [vmem:[%s13579_s1 + $0x18] sm:$0xff]  ;;  %v13094_v49 = vld [vmem:[%s13579_s1 + $0x30] sm:$0xff] }
0x1244   :  { %v6158_v16 = vrot.slane %v6157_v2, 1  ;;  %v6172_v17 = vadd.f32 %v6171_v10, %v6170_v54  ;;  %v13105_v54 = vld [vmem:[%s13579_s1 + $0x48] sm:$0xff]  ;;  %v10892_v10 = vld [vmem:[%s13583_s5 + $0x7e0] sm:$0xff] }
0x1245   :  { %6355 = vmatpush.bf16.msra.mxu1 %v10894_v7  ;;  %v10904_v7 = vld [vmem:[%s13583_s5 + $0x840] sm:$0xff] }
0x1246   :  { %v6159_v20 = vadd.f32 %v6158_v16, %v6157_v2  ;;  %v6173_v36 = vrot.slane %v6172_v17, 1  ;;  %v10893_v2 = vld [vmem:[%s13583_s5 + $0x7e8] sm:$0xff]  ;;  %v10903_v16 = vld [vmem:[%s13583_s5 + $0x838] sm:$0xff] }
0x1248   :  { %v6160_v18 = vmul.f32 0.055555556, %v6159_v20  ;;  %v6174_v37 = vadd.f32 %v6173_v36, %v6172_v17  ;;  %v13126_v17 = vld [vmem:[%s13579_s1 + $0x60] sm:$0xff] }
0x1249   :  { %6356 = vmatpush.bf16.msra.mxu1 %v10893_v2  ;;  %v10919_v2 = vld [vmem:[%s13583_s5 + $0x8b8] sm:$0xff] }
0x124a   :  { %v6175_v51 = vmul.f32 0.055555556, %v6174_v37  ;;  %v6176_v57 = vmul.f32 %v6160_v18, %v6160_v18  ;;  %v6179_v40 = vsub.f32 %v6146_v3, %v6160_v18  ;;  %v6181_v14 = vsub.f32 %v6148_v22, %v6160_v18  ;;  %v10978_v3 = vld [vmem:[%s13584_s6 + $0x6] ss:$0 sm:$0xff] }
0x124b   :  { %v6180_v25 = vsub.f32 %v6147_v56, %v6160_v18  ;;  %v10901_v18 = vld [vmem:[%s13583_s5 + $0x828] sm:$0xff]  ;;  %v10900_v37 = vld [vmem:[%s13583_s5 + $0x820] sm:$0xff] }
0x124c   :  { %v6177_v61 = vsub.f32 %v6175_v51, %v6176_v57 }
0x124d   :  { %6357 = vmatpush.bf16.msra.mxu1 %v10892_v10 }
0x124e   :  { %v6178_v15 = vmax.f32 %v6177_v61, 0.0 }
0x1250   :  { %v6182_v44 = vadd.f32 1e-05, %v6178_v15 }
0x1252   :  { %10999 = vrsqrt.f32 %v6182_v44  ;;  %vm6189_vm14 = vweird.f32 %v6182_v44 }
0x1258   :  { %v11000_v24 = vpop.eup %10999 }
0x1259   :  { %v6184_v59 = vmul.f32 %v11000_v24, %v6182_v44  ;;  %vm6190_vm13 = vweird.f32 %v11000_v24 }
0x125a   :  { %vm6191_vm15 = vmor %vm6189_vm14, %vm6190_vm13 }
0x125b   :  { %v6185_v62 = vmul.f32 %v11000_v24, %v6184_v59 }
0x125d   :  { %v6186_v26 = vmul.f32 0.5, %v6185_v62 }
0x125f   :  { %v6187_v5 = vsub.f32 1.5, %v6186_v26 }
0x1261   :  { %v6188_v6 = vmul.f32 %v11000_v24, %v6187_v5  ;;  %v13151_v5 = vld [vmem:[%s13579_s1 + $0x24] sm:$0xff] }
0x1263   :  { %v6192_v63 = vsel %vm6191_vm15, %v11000_v24, %v6188_v6 }
0x1264   :  { %v6193_v43 = vmul.f32 %v6192_v63, %v6179_v40  ;;  %v6194_v29 = vmul.f32 %v6192_v63, %v6180_v25  ;;  %v6195_v30 = vmul.f32 %v6192_v63, %v6181_v14  ;;  %v13163_v63 = vld [vmem:[%s13579_s1 + $0x3c] sm:$0xff] }
0x1266   :  { %v6197_v27 = vmul.f32 %v10978_v3, %v6193_v43  ;;  %v6198_v39 = vmul.f32 %v10978_v3, %v6194_v29  ;;  %v6199_v22 = vmul.f32 %v10978_v3, %v6195_v30  ;;  %v13172_v43 = vld [vmem:[%s13579_s1 + $0x54] sm:$0xff] }
0x1267   :  { %v10911_v29 = vld [vmem:[%s13583_s5 + $0x878] sm:$0xff] }
0x1268   :  { %v6201_v34 = vadd.f32 %v10979_v31, %v6197_v27  ;;  %v6202_v45 = vadd.f32 %v10979_v31, %v6198_v39  ;;  %v6203_v8 = vadd.f32 %v10979_v31, %v6199_v22  ;;  %v10910_v31 = vld [vmem:[%s13583_s5 + $0x870] sm:$0xff]  ;;  %v10909_v27 = vld [vmem:[%s13583_s5 + $0x868] sm:$0xff]  ;;  %v10908_v22 = vld [vmem:[%s13583_s5 + $0x860] sm:$0xff] }
0x126a   :  { %v6204_v56 = vmax.f32 %v6201_v34, 0.0  ;;  %v6205_v1 = vmax.f32 %v6202_v45, 0.0  ;;  %v6206_v42 = vmax.f32 %v6203_v8, 0.0  ;;  %v10907_v45 = vld [vmem:[%s13583_s5 + $0x858] sm:$0xff] }
0x126b   :  { %6511 = vmatpush.bf16.msrb.mxu1 %v10907_v45 }
0x126c   :  { %v13044_v32 = vpack.c.bf16 %v6205_v1, %v6204_v56  ;;  %v6210_v23 = vpack.c.bf16 %v6206_v42, %v6206_v42  ;;  %v10906_v56 = vld [vmem:[%s13583_s5 + $0x850] sm:$0xff] }
0x126e   :  { %v13047_v9 = vsel %vm73_vm0, %v6210_v23, 0  ;;  %v10905_v23 = vld [vmem:[%s13583_s5 + $0x848] sm:$0xff] }
0x126f   :  { %6220 = vmatpush.bf16.msra.mxu2 %v13047_v9  ;;  %6249 = vmatpush.bf16.msra.mxu3 %v13047_v9 }
0x1270   :  { %6454 = vmatpush.bf16.msrb.mxu0 %v13047_v9  ;;  %6512 = vmatpush.bf16.msrb.mxu1 %v10906_v56 }
0x1273   :  { %6221 = vmatpush.bf16.msra.mxu2 %v13044_v32  ;;  %6250 = vmatpush.bf16.msra.mxu3 %v13044_v32 }
0x1274   :  { %6455 = vmatpush.bf16.msrb.mxu0 %v13044_v32  ;;  %6513 = vmatpush.bf16.msrb.mxu1 %v10905_v23 }
0x1276   :  { %10101 = vmatmul.msk.bf16.vlgmr.msra.gmra.mxu2 %vm66_vm1, %v13059_v52  ;;  %10111 = vmatmul.msk.bf16.vlgmr.msra.gmra.mxu3 %vm66_vm1, %v13066_v28 }
0x1277   :  { %6374 = vmatpush.bf16.msrb.mxu2 %v13047_v9  ;;  %6431 = vmatpush.bf16.msrb.mxu3 %v10903_v16 }
0x1278   :  { %6514 = vmatpush.bf16.msrb.mxu1 %v10904_v7 }
0x127b   :  { %6375 = vmatpush.bf16.msrb.mxu2 %v13044_v32  ;;  %6432 = vmatpush.bf16.msrb.mxu3 %v10902_v4 }
0x127f   :  { %6534 = vmatpush.bf16.msra.mxu2 %v13047_v9  ;;  %6433 = vmatpush.bf16.msrb.mxu3 %v10901_v18 }
0x1283   :  { %6535 = vmatpush.bf16.msra.mxu2 %v13044_v32  ;;  %6434 = vmatpush.bf16.msrb.mxu3 %v10900_v37 }
0x1286   :  { %10102 = vmatmul.msk.bf16.gmra.mxu2 %vm66_vm1, %v11162_v13  ;;  %10112 = vmatmul.msk.bf16.gmra.mxu3 %vm66_vm1, %v11160_v12 }
0x1287   :  { %6591 = vmatpush.bf16.msra.mxu3 %v10911_v29  ;;  %v10927_v29 = vld [vmem:[%s13583_s5 + $0x8f8] sm:$0xff] }
0x128b   :  { %6592 = vmatpush.bf16.msra.mxu3 %v10910_v31 }
0x128f   :  { %6593 = vmatpush.bf16.msra.mxu3 %v10909_v27 }
0x1293   :  { %6594 = vmatpush.bf16.msra.mxu3 %v10908_v22 }
0x1296   :  { %10157 = vmatmul.msk.bf16.vlgmr.msrb.gmra.mxu2 %vm66_vm1, %v13080_v55 }
0x1297   :  { %6694 = vmatpush.bf16.msrb.mxu2 %v13047_v9 }
0x129b   :  { %6695 = vmatpush.bf16.msrb.mxu2 %v13044_v32 }
0x12a6   :  { %10158 = vmatmul.msk.bf16.gmra.mxu2 %vm66_vm1, %v11219_v38 }
0x12b6   :  { %10213 = vmatmul.msk.bf16.vlgmr.msra.gmra.mxu2 %vm66_vm1, %v13094_v49 }
0x12b7   :  { %6854 = vmatpush.bf16.msra.mxu2 %v13047_v9 }
0x12bb   :  { %6855 = vmatpush.bf16.msra.mxu2 %v13044_v32 }
0x12c6   :  { %10214 = vmatmul.msk.bf16.gmra.mxu2 %vm66_vm1, %v11249_v46 }
0x12d6   :  { %10269 = vmatmul.msk.bf16.vlgmr.msrb.gmra.mxu2 %vm66_vm1, %v13105_v54 }
0x12e6   :  { %10270 = vmatmul.msk.bf16.gmra.mxu2 %vm66_vm1, %v11270_v53 }
0x12f6   :  { %10325 = vmatmul.msk.bf16.vlgmr.msra.gmra.mxu2 %vm66_vm1, %v13126_v17 }
0x12f9   :  { %v6223_v20 = vpop.f32.mrf.mxu2  ;;  %v6252_v36 = vpop.f32.mrf.mxu3 }
0x1301   :  { %v6225_v11 = vpop.f32.mrf.mxu2  ;;  %v6254_v51 = vpop.f32.mrf.mxu3 }
0x1302   :  { %v6232_v57 = vpack.c.bf16 %v6225_v11, %v6223_v20  ;;  %v6261_v40 = vpack.c.bf16 %v6254_v51, %v6252_v36  ;;  %v10918_v20 = vld [vmem:[%s13583_s5 + $0x8b0] sm:$0xff]  ;;  %v10917_v36 = vld [vmem:[%s13583_s5 + $0x8a8] sm:$0xff]  ;;  %v10916_v51 = vld [vmem:[%s13583_s5 + $0x8a0] sm:$0xff] }
0x1304   :  { %10137 = vmatmul.msk.bf16.vlgmr.msra.gmra.mxu0 %vm683_vm3, %v6261_v40  ;;  %10155 = vmatmul.msk.bf16.vlgmr.msra.gmra.mxu1 %vm683_vm3, %v6232_v57 }
0x1305   :  { %6614 = vmatpush.bf16.msra.mxu0 %v13047_v9 }
0x1306   :  { %10326 = vmatmul.msk.bf16.gmra.mxu2 %vm66_vm1, %v11294_v0 }
0x1309   :  { %6615 = vmatpush.bf16.msra.mxu0 %v13044_v32  ;;  %v6228_v14 = vpop.f32.mrf.mxu2  ;;  %v6257_v61 = vpop.f32.mrf.mxu3 }
0x130a   :  { %v6233_v35 = vpack.c.bf16 %v6228_v14, %v6228_v14  ;;  %v6262_v15 = vpack.c.bf16 %v6257_v61, %v6257_v61 }
0x1311   :  { %v6230_v44 = vpop.f32.mrf.mxu2  ;;  %v6259_v24 = vpop.f32.mrf.mxu3 }
0x1312   :  { %v10914_v44 = vld [vmem:[%s13583_s5 + $0x890] sm:$0xff] }
0x1314   :  { %10138 = vmatmul.msk.bf16.gmra.mxu0 %vm683_vm3, %v6262_v15  ;;  %10156 = vmatmul.msk.bf16.gmra.mxu1 %vm683_vm3, %v6233_v35  ;;  %v10915_v35 = vld [vmem:[%s13583_s5 + $0x898] sm:$0xff] }
0x1315   :  { %6671 = vmatpush.bf16.msra.mxu1 %v10915_v35 }
0x1319   :  { %v6377_v59 = vpop.f32.mrf.mxu2  ;;  %6672 = vmatpush.bf16.msra.mxu1 %v10914_v44 }
0x1321   :  { %v6379_v62 = vpop.f32.mrf.mxu2 }
0x1322   :  { %v6386_v26 = vpack.c.bf16 %v6379_v62, %v6377_v59  ;;  %v10913_v59 = vld [vmem:[%s13583_s5 + $0x888] sm:$0xff] }
0x1323   :  { %6673 = vmatpush.bf16.msra.mxu1 %v10913_v59 }
0x1324   :  { %10183 = vmatmul.msk.bf16.vlgmr.msrb.gmra.mxu3 %vm683_vm3, %v6386_v26  ;;  %10185 = vmatmul.msk.bf16.vlgmr.msrb.gmra.mxu0 %vm66_vm1, %v13151_v5 }
0x1325   :  { %6774 = vmatpush.bf16.msrb.mxu0 %v13047_v9  ;;  %6751 = vmatpush.bf16.msrb.mxu3 %v10919_v2  ;;  %v10922_v2 = vld [vmem:[%s13583_s5 + $0x8d0] sm:$0xff] }
0x1329   :  { %6775 = vmatpush.bf16.msrb.mxu0 %v13044_v32  ;;  %v6382_v6 = vpop.f32.mrf.mxu2  ;;  %6752 = vmatpush.bf16.msrb.mxu3 %v10918_v20  ;;  %v10921_v20 = vld [vmem:[%s13583_s5 + $0x8c8] sm:$0xff] }
0x132a   :  { %v6387_v25 = vpack.c.bf16 %v6382_v6, %v6382_v6 }
0x132d   :  { %6753 = vmatpush.bf16.msrb.mxu3 %v10917_v36  ;;  %v10920_v36 = vld [vmem:[%s13583_s5 + $0x8c0] sm:$0xff] }
0x1331   :  { %v6384_v3 = vpop.f32.mrf.mxu2  ;;  %6754 = vmatpush.bf16.msrb.mxu3 %v10916_v51 }
0x1332   :  { %v10912_v3 = vld [vmem:[%s13583_s5 + $0x880] sm:$0xff] }
0x1333   :  { %6674 = vmatpush.bf16.msra.mxu1 %v10912_v3 }
0x1334   :  { %10184 = vmatmul.msk.bf16.gmra.mxu3 %vm683_vm3, %v6387_v25  ;;  %10186 = vmatmul.msk.bf16.gmra.mxu0 %vm66_vm1, %v11196_v33 }
0x1339   :  { %v6537_v30 = vpop.f32.mrf.mxu2 }
0x1341   :  { %v6539_v39 = vpop.f32.mrf.mxu2 }
0x1342   :  { %v6546_v34 = vpack.c.bf16 %v6539_v39, %v6537_v30  ;;  %v10926_v39 = vld [vmem:[%s13583_s5 + $0x8f0] sm:$0xff] }
0x1344   :  { %10241 = vmatmul.msk.bf16.vlgmr.msra.gmra.mxu0 %vm66_vm1, %v13163_v63  ;;  %10239 = vmatmul.msk.bf16.vlgmr.msra.gmra.mxu3 %vm683_vm3, %v6546_v34  ;;  %v10925_v34 = vld [vmem:[%s13583_s5 + $0x8e8] sm:$0xff] }
0x1345   :  { %6911 = vmatpush.bf16.msra.mxu3 %v10927_v29 }
0x1349   :  { %v6542_v8 = vpop.f32.mrf.mxu2  ;;  %6912 = vmatpush.bf16.msra.mxu3 %v10926_v39 }
0x134a   :  { %v6547_v21 = vpack.c.bf16 %v6542_v8, %v6542_v8  ;;  %v10924_v8 = vld [vmem:[%s13583_s5 + $0x8e0] sm:$0xff] }
0x134d   :  { %6913 = vmatpush.bf16.msra.mxu3 %v10925_v34 }
0x1351   :  { %v6544_v9 = vpop.f32.mrf.mxu2  ;;  %6914 = vmatpush.bf16.msra.mxu3 %v10924_v8 }
0x1354   :  { %10242 = vmatmul.msk.bf16.gmra.mxu0 %vm66_vm1, %v11226_v41  ;;  %10240 = vmatmul.msk.bf16.gmra.mxu3 %vm683_vm3, %v6547_v21  ;;  %v10923_v21 = vld [vmem:[%s13583_s5 + $0x8d8] sm:$0xff] }
0x1359   :  { %v6697_v4 = vpop.f32.mrf.mxu2 }
0x1361   :  { %v6699_v57 = vpop.f32.mrf.mxu2 }
0x1362   :  { %v6706_v40 = vpack.c.bf16 %v6699_v57, %v6697_v4 }
0x1364   :  { %10297 = vmatmul.msk.bf16.vlgmr.msrb.gmra.mxu0 %vm66_vm1, %v13172_v43  ;;  %10295 = vmatmul.msk.bf16.vlgmr.msrb.gmra.mxu3 %vm683_vm3, %v6706_v40 }
0x1365   :  { %7135 = vmatpush.bf16.msrb.mxu3 %v10931_v47 }
0x1369   :  { %v6702_v15 = vpop.f32.mrf.mxu2 }
0x136a   :  { %v6707_v26 = vpack.c.bf16 %v6702_v15, %v6702_v15 }
0x1371   :  { %v6704_v62 = vpop.f32.mrf.mxu2 }
0x1374   :  { %10298 = vmatmul.msk.bf16.gmra.mxu0 %vm66_vm1, %v11263_v50  ;;  %10296 = vmatmul.msk.bf16.gmra.mxu3 %vm683_vm3, %v6707_v26 }
0x1379   :  { %v6857_v27 = vpop.f32.mrf.mxu2 }
0x1381   :  { %v6311_v1 = vpop.f32.mrf.mxu0  ;;  %v6359_v42 = vpop.f32.mrf.mxu1 }
0x1382   :  { %v6360_v32 = vadd.f32 %v6359_v42, %v6311_v1  ;;  %v6859_v56 = vpop.f32.mrf.mxu2 }
0x1383   :  { %v6866_v1 = vpack.c.bf16 %v6859_v56, %v6857_v27 }
0x1385   :  { %10351 = vmatmul.msk.bf16.vlgmr.msra.gmra.mxu3 %vm683_vm3, %v6866_v1 }
0x1389   :  { %v13206_v10 = vpop.f32.mrf.mxu0  ;;  %v13208_v16 = vpop.f32.mrf.mxu1 }
0x1391   :  { %v6316_v18 = vpop.f32.mrf.mxu0  ;;  %v6364_v37 = vpop.f32.mrf.mxu1 }
0x1392   :  { %v6365_v11 = vadd.f32 %v6364_v37, %v6316_v18 }
0x1399   :  { %v6318_v14 = vpop.f32.mrf.mxu0  ;;  %v6366_v61 = vpop.f32.mrf.mxu1 }
0x13a1   :  { %v6457_v24 = vpop.f32.mrf.mxu0 }
0x13a7   :  { %v6436_v6 = vpop.f32.mrf.mxu3 }
0x13a8   :  { %v6445_v25 = vadd.f32 %v6436_v6, %v6360_v32 }
0x13a9   :  { %v6459_v30 = vpop.f32.mrf.mxu0 }
0x13aa   :  { %v6466_v31 = vpack.c.bf16 %v6459_v30, %v6457_v24 }
0x13ac   :  { %10211 = vmatmul.msk.bf16.vlgmr.msrb.gmra.mxu1 %vm683_vm3, %v6466_v31 }
0x13ad   :  { %6831 = vmatpush.bf16.msrb.mxu1 %v10923_v21 }
0x13af   :  { %v13241_v22 = vpop.f32.mrf.mxu3 }
0x13b1   :  { %v6462_v45 = vpop.f32.mrf.mxu0  ;;  %6832 = vmatpush.bf16.msrb.mxu1 %v10922_v2 }
0x13b2   :  { %v6467_v9 = vpack.c.bf16 %v6462_v45, %v6462_v45 }
0x13b5   :  { %6833 = vmatpush.bf16.msrb.mxu1 %v10921_v20 }
0x13b7   :  { %v6441_v42 = vpop.f32.mrf.mxu3 }
0x13b8   :  { %v6447_v32 = vadd.f32 %v6441_v42, %v6365_v11  ;;  %v6862_v11 = vpop.f32.mrf.mxu2 }
0x13b9   :  { %v6464_v23 = vpop.f32.mrf.mxu0  ;;  %6834 = vmatpush.bf16.msrb.mxu1 %v10920_v36  ;;  %v6867_v51 = vpack.c.bf16 %v6862_v11, %v6862_v11  ;;  %v6362_v11 = vadd.f32 %v13208_v16, %v13206_v10 }
0x13bb   :  { %10352 = vmatmul.msk.bf16.gmra.mxu3 %vm683_vm3, %v6867_v51 }
0x13bc   :  { %10212 = vmatmul.msk.bf16.gmra.mxu1 %vm683_vm3, %v6467_v9 }
0x13bf   :  { %v6443_v7 = vpop.f32.mrf.mxu3 }
0x13c0   :  { %v6864_v40 = vpop.f32.mrf.mxu2 }
0x13c1   :  { %v6617_v4 = vpop.f32.mrf.mxu0 }
0x13c7   :  { %v6596_v26 = vpop.f32.mrf.mxu3 }
0x13c9   :  { %v6619_v18 = vpop.f32.mrf.mxu0 }
0x13ca   :  { %v6626_v37 = vpack.c.bf16 %v6619_v18, %v6617_v4 }
0x13cc   :  { %10267 = vmatmul.msk.bf16.vlgmr.msra.gmra.mxu1 %vm683_vm3, %v6626_v37 }
0x13cf   :  { %v6598_v6 = vpop.f32.mrf.mxu3 }
0x13d1   :  { %v6622_v57 = vpop.f32.mrf.mxu0 }
0x13d2   :  { %v6627_v61 = vpack.c.bf16 %v6622_v57, %v6622_v57 }
0x13d7   :  { %v6601_v3 = vpop.f32.mrf.mxu3 }
0x13d9   :  { %v6624_v14 = vpop.f32.mrf.mxu0 }
0x13dc   :  { %10268 = vmatmul.msk.bf16.gmra.mxu1 %vm683_vm3, %v6627_v61 }
0x13df   :  { %v6603_v29 = vpop.f32.mrf.mxu3 }
0x13e1   :  { %v6777_v35 = vpop.f32.mrf.mxu0 }
0x13e7   :  { %v6756_v30 = vpop.f32.mrf.mxu3 }
0x13e9   :  { %v6779_v15 = vpop.f32.mrf.mxu0 }
0x13ea   :  { %v6786_v44 = vpack.c.bf16 %v6779_v15, %v6777_v35 }
0x13ec   :  { %10323 = vmatmul.msk.bf16.vlgmr.msrb.gmra.mxu1 %vm683_vm3, %v6786_v44 }
0x13ef   :  { %v6758_v31 = vpop.f32.mrf.mxu3 }
0x13f1   :  { %v6782_v24 = vpop.f32.mrf.mxu0 }
0x13f2   :  { %v6787_v59 = vpack.c.bf16 %v6782_v24, %v6782_v24 }
0x13f7   :  { %v6761_v45 = vpop.f32.mrf.mxu3 }
0x13f9   :  { %v6784_v62 = vpop.f32.mrf.mxu0 }
0x13fc   :  { %10324 = vmatmul.msk.bf16.gmra.mxu1 %vm683_vm3, %v6787_v59 }
0x13ff   :  { %v6763_v56 = vpop.f32.mrf.mxu3 }
0x1408   :  { %v6916_v21 = vpop.f32.mrf.mxu3 }
0x1410   :  { %v6918_v2 = vpop.f32.mrf.mxu3 }
0x1429   :  { %v6516_v27 = vpop.f32.mrf.mxu1 }
0x142a   :  { %v6525_v39 = vadd.f32 %v6516_v27, %v6445_v25  ;;  %v6446_v25 = vadd.f32 %v13241_v22, %v6362_v11 }
0x142c   :  { %v6605_v34 = vadd.f32 %v6596_v26, %v6525_v39 }
0x1431   :  { %v6518_v8 = vpop.f32.mrf.mxu1 }
0x1432   :  { %v6526_v51 = vadd.f32 %v6518_v8, %v6446_v25 }
0x1434   :  { %v6606_v40 = vadd.f32 %v6598_v6, %v6526_v51 }
0x1439   :  { %v6521_v1 = vpop.f32.mrf.mxu1 }
0x143a   :  { %v6527_v42 = vadd.f32 %v6521_v1, %v6447_v32 }
0x143c   :  { %v6607_v23 = vadd.f32 %v6601_v3, %v6527_v42 }
0x143e   :  { %v6921_v20 = vpop.f32.mrf.mxu3 }
0x1441   :  { %v6523_v9 = vpop.f32.mrf.mxu1 }
0x1446   :  { %v6923_v18 = vpop.f32.mrf.mxu3 }
0x1449   :  { %v6676_v7 = vpop.f32.mrf.mxu1 }
0x144a   :  { %v6685_v14 = vadd.f32 %v6676_v7, %v6605_v34 }
0x144c   :  { %v6765_v61 = vadd.f32 %v6756_v30, %v6685_v14 }
0x1451   :  { %v6678_v4 = vpop.f32.mrf.mxu1 }
0x1452   :  { %v6686_v32 = vadd.f32 %v6678_v4, %v6606_v40  ;;  %v10934_v40 = vld [vmem:[%s13586_s8 + $0x30] sm:$0xff] }
0x1454   :  { %v6766_v35 = vadd.f32 %v6758_v31, %v6686_v32 }
0x1459   :  { %v6681_v36 = vpop.f32.mrf.mxu1 }
0x145a   :  { %v6687_v59 = vadd.f32 %v6681_v36, %v6607_v23 }
0x145c   :  { %v6767_v3 = vadd.f32 %v6761_v45, %v6687_v59 }
0x1461   :  { %v6683_v37 = vpop.f32.mrf.mxu1 }
0x1469   :  { %v6836_v57 = vpop.f32.mrf.mxu1 }
0x146a   :  { %v6845_v44 = vadd.f32 %v6836_v57, %v6765_v61 }
0x146c   :  { %v6925_v26 = vadd.f32 %v6916_v21, %v6845_v44 }
0x146e   :  { %v6940_v22 = vmul.f32 %v6925_v26, %v6925_v26  ;;  %v6928_v30 = vsel %vm683_vm3, %v6925_v26, 0.0 }
0x1470   :  { %v6943_v34 = vsel %vm683_vm3, %v6940_v22, 0.0 }
0x1471   :  { %v6838_v15 = vpop.f32.mrf.mxu1 }
0x1472   :  { %v6846_v24 = vadd.f32 %v6838_v15, %v6766_v35 }
0x1474   :  { %v13271_v62 = vadd.f32 %v6918_v2, %v6846_v24  ;;  %v10933_v24 = vld [vmem:[%s13586_s8 + $0x28] sm:$0xff] }
0x1476   :  { %v6941_v10 = vmul.f32 %v13271_v62, %v13271_v62  ;;  %v6929_v6 = vsel %vm683_vm3, %v13271_v62, 0.0 }
0x1477   :  { %v6930_v39 = vadd.f32 %v6929_v6, %v6928_v30 }
0x1478   :  { %v6944_v31 = vsel %vm683_vm3, %v6941_v10, 0.0  ;;  %v10932_v10 = vld [vmem:[%s13586_s8 + $0x20] sm:$0xff] }
0x1479   :  { %v6841_v16 = vpop.f32.mrf.mxu1  ;;  %v6945_v56 = vadd.f32 %v6944_v31, %v6943_v34 }
0x147a   :  { %v6847_v29 = vadd.f32 %v6841_v16, %v6767_v3 }
0x147c   :  { %v6927_v27 = vadd.f32 %v6921_v20, %v6847_v29  ;;  %v10935_v20 = vld [vmem:[%s13586_s8 + $0x38] sm:$0xff] }
0x147d   :  { %7087 = vmatpush.bf16.msrb.mxu2 %v10935_v20 }
0x147e   :  { %v6931_v8 = vsel %vm683_vm3, %v6927_v27, 0.0  ;;  %v6942_v45 = vmul.f32 %v6927_v27, %v6927_v27 }
0x147f   :  { %v6932_v1 = vadd.f32 %v6931_v8, %v6930_v39  ;;  %v10980_v39 = vld [vmem:[%s13584_s6 + $0x7] ss:$0 sm:$0xff] }
0x1480   :  { %v6946_v42 = vsel %vm683_vm3, %v6942_v45, 0.0 }
0x1481   :  { %v6933_v23 = vrot.slane %v6932_v1, 4  ;;  %v6947_v9 = vadd.f32 %v6946_v42, %v6945_v56  ;;  %v6843_v21 = vpop.f32.mrf.mxu1  ;;  %7088 = vmatpush.bf16.msrb.mxu2 %v10934_v40 }
0x1483   :  { %v6934_v7 = vadd.f32 %v6933_v23, %v6932_v1  ;;  %v6948_v2 = vrot.slane %v6947_v9, 4  ;;  %v10981_v1 = vld [vmem:[%s13585_s7 + $0x7] ss:$0 sm:$0xff] }
0x1485   :  { %v6935_v4 = vrot.slane %v6934_v7, 2  ;;  %v6949_v36 = vadd.f32 %v6948_v2, %v6947_v9  ;;  %7089 = vmatpush.bf16.msrb.mxu2 %v10933_v24 }
0x1487   :  { %v6936_v18 = vadd.f32 %v6935_v4, %v6934_v7  ;;  %v6950_v37 = vrot.slane %v6949_v36, 2 }
0x1489   :  { %v6937_v11 = vrot.slane %v6936_v18, 1  ;;  %v6951_v25 = vadd.f32 %v6950_v37, %v6949_v36  ;;  %7090 = vmatpush.bf16.msrb.mxu2 %v10932_v10 }
0x148b   :  { %v6938_v51 = vadd.f32 %v6937_v11, %v6936_v18  ;;  %v6952_v57 = vrot.slane %v6951_v25, 1 }
0x148d   :  { %v6939_v14 = vmul.f32 0.055555556, %v6938_v51  ;;  %v6953_v32 = vadd.f32 %v6952_v57, %v6951_v25 }
0x148f   :  { %v6954_v61 = vmul.f32 0.055555556, %v6953_v32  ;;  %v6955_v35 = vmul.f32 %v6939_v14, %v6939_v14  ;;  %v6958_v15 = vsub.f32 %v6925_v26, %v6939_v14  ;;  %v6960_v44 = vsub.f32 %v6927_v27, %v6939_v14 }
0x1490   :  { %v6959_v27 = vsub.f32 %v13271_v62, %v6939_v14 }
0x1491   :  { %v6956_v59 = vsub.f32 %v6954_v61, %v6955_v35 }
0x1493   :  { %v6957_v3 = vmax.f32 %v6956_v59, 0.0 }
0x1495   :  { %v6961_v16 = vadd.f32 1e-05, %v6957_v3 }
0x1497   :  { %11001 = vrsqrt.f32 %v6961_v16  ;;  %vm6968_vm5 = vweird.f32 %v6961_v16 }
0x149d   :  { %v11002_v22 = vpop.eup %11001 }
0x149e   :  { %v6963_v6 = vmul.f32 %v11002_v22, %v6961_v16  ;;  %vm6969_vm4 = vweird.f32 %v11002_v22 }
0x149f   :  { %vm6970_vm6 = vmor %vm6968_vm5, %vm6969_vm4 }
0x14a0   :  { %v6964_v29 = vmul.f32 %v11002_v22, %v6963_v6 }
0x14a2   :  { %v6965_v30 = vmul.f32 0.5, %v6964_v29  ;;  %v10941_v29 = vld [vmem:[%s13586_s8 + $0x68] sm:$0xff] }
0x14a4   :  { %v6966_v26 = vsub.f32 1.5, %v6965_v30  ;;  %v10940_v30 = vld [vmem:[%s13586_s8 + $0x60] sm:$0xff] }
0x14a6   :  { %v6967_v31 = vmul.f32 %v11002_v22, %v6966_v26 }
0x14a8   :  { %v6971_v34 = vsel %vm6970_vm6, %v11002_v22, %v6967_v31 }
0x14a9   :  { %v6972_v8 = vmul.f32 %v6971_v34, %v6958_v15  ;;  %v6973_v45 = vmul.f32 %v6971_v34, %v6959_v27  ;;  %v6974_v56 = vmul.f32 %v6971_v34, %v6960_v44 }
0x14ab   :  { %v6976_v42 = vmul.f32 %v10980_v39, %v6972_v8  ;;  %v6977_v23 = vmul.f32 %v10980_v39, %v6973_v45  ;;  %v6978_v9 = vmul.f32 %v10980_v39, %v6974_v56 }
0x14ad   :  { %v6980_v21 = vadd.f32 %v10981_v1, %v6976_v42  ;;  %v6981_v7 = vadd.f32 %v10981_v1, %v6977_v23  ;;  %v6982_v2 = vadd.f32 %v10981_v1, %v6978_v9  ;;  %v10955_v42 = vld [vmem:[%s13586_s8 + $0xd8] sm:$0xff]  ;;  %v10954_v23 = vld [vmem:[%s13586_s8 + $0xd0] sm:$0xff] }
0x14af   :  { %v6983_v62 = vadd.f32 %v6980_v21, %v5425_v48  ;;  %v6984_v4 = vadd.f32 %v6981_v7, %v5426_v19  ;;  %v6985_v36 = vadd.f32 %v6982_v2, %v12822_v60  ;;  %v10937_v19 = vld [vmem:[%s13586_s8 + $0x48] sm:$0xff] }
0x14b1   :  { %v6986_v18 = vmax.f32 %v6983_v62, 0.0  ;;  %v6987_v37 = vmax.f32 %v6984_v4, 0.0  ;;  %v6988_v20 = vmax.f32 %v6985_v36, 0.0  ;;  %v10951_v4 = vld [vmem:[%s13586_s8 + $0xb8] sm:$0xff]  ;;  %v10953_v36 = vld [vmem:[%s13586_s8 + $0xc8] sm:$0xff] }
0x14b3   :  { %v13306_v11 = vpack.c.bf16 %v6987_v37, %v6986_v18  ;;  %v6992_v25 = vpack.c.bf16 %v6988_v20, %v6988_v20  ;;  %v10950_v18 = vld [vmem:[%s13586_s8 + $0xb0] sm:$0xff]  ;;  %v10952_v37 = vld [vmem:[%s13586_s8 + $0xc0] sm:$0xff] }
0x14b5   :  { %v13309_v51 = vsel %vm73_vm0, %v6992_v25, 0  ;;  %v10949_v25 = vld [vmem:[%s13586_s8 + $0xa8] sm:$0xff] }
0x14b6   :  { %7002 = vmatpush.bf16.msra.mxu0 %v13309_v51  ;;  %7030 = vmatpush.bf16.msra.mxu1 %v13309_v51 }
0x14b7   :  { %7235 = vmatpush.bf16.msra.mxu2 %v13309_v51 }
0x14ba   :  { %7003 = vmatpush.bf16.msra.mxu0 %v13306_v11  ;;  %7031 = vmatpush.bf16.msra.mxu1 %v13306_v11 }
0x14bb   :  { %7236 = vmatpush.bf16.msra.mxu2 %v13306_v11 }
0x14bd   :  { %10353 = vmatmul.msk.bf16.vlgmr.msra.gmra.mxu0 %vm66_vm1, %v13059_v52  ;;  %10355 = vmatmul.msk.bf16.vlgmr.msra.gmra.mxu1 %vm66_vm1, %v13066_v28 }
0x14be   :  { %7155 = vmatpush.bf16.msrb.mxu0 %v13309_v51 }
0x14c2   :  { %7156 = vmatpush.bf16.msrb.mxu0 %v13306_v11 }
0x14c6   :  { %7315 = vmatpush.bf16.msra.mxu0 %v13309_v51 }
0x14ca   :  { %7316 = vmatpush.bf16.msra.mxu0 %v13306_v11 }
0x14cd   :  { %10354 = vmatmul.msk.bf16.gmra.mxu0 %vm66_vm1, %v11162_v13  ;;  %10356 = vmatmul.msk.bf16.gmra.mxu1 %vm66_vm1, %v11160_v12  ;;  %v10930_v12 = vld [vmem:[%s13586_s8 + $0x10] sm:$0xff]  ;;  %v10929_v13 = vld [vmem:[%s13586_s8 + $0x8] sm:$0xff] }
0x14ce   :  { %7136 = vmatpush.bf16.msrb.mxu3 %v10930_v12 }
0x14d2   :  { %7137 = vmatpush.bf16.msrb.mxu3 %v10929_v13  ;;  %v10948_v13 = vld [vmem:[%s13586_s8 + $0xa0] sm:$0xff] }
0x14dd   :  { %10401 = vmatmul.msk.bf16.vlgmr.msrb.gmra.mxu0 %vm66_vm1, %v13080_v55 }
0x14de   :  { %7475 = vmatpush.bf16.msrb.mxu0 %v13309_v51 }
0x14e2   :  { %7476 = vmatpush.bf16.msrb.mxu0 %v13306_v11 }
0x14ed   :  { %10402 = vmatmul.msk.bf16.gmra.mxu0 %vm66_vm1, %v11219_v38  ;;  %v10928_v38 = vld [vmem:[%s13586_s8] sm:$0xff] }
0x14ee   :  { %7138 = vmatpush.bf16.msrb.mxu3 %v10928_v38 }
0x14fd   :  { %10457 = vmatmul.msk.bf16.vlgmr.msra.gmra.mxu0 %vm66_vm1, %v13094_v49 }
0x14fe   :  { %7635 = vmatpush.bf16.msra.mxu0 %v13309_v51 }
0x1502   :  { %7636 = vmatpush.bf16.msra.mxu0 %v13306_v11 }
0x150d   :  { %10458 = vmatmul.msk.bf16.gmra.mxu0 %vm66_vm1, %v11249_v46  ;;  %v10939_v46 = vld [vmem:[%s13586_s8 + $0x58] sm:$0xff] }
0x150e   :  { %7212 = vmatpush.bf16.msrb.mxu1 %v10939_v46 }
0x1512   :  { %7213 = vmatpush.bf16.msrb.mxu1 %v10938_v58 }
0x1516   :  { %7214 = vmatpush.bf16.msrb.mxu1 %v10937_v19 }
0x151d   :  { %10513 = vmatmul.msk.bf16.vlgmr.msrb.gmra.mxu0 %vm66_vm1, %v13105_v54 }
0x152d   :  { %10514 = vmatmul.msk.bf16.gmra.mxu0 %vm66_vm1, %v11270_v53  ;;  %v10936_v53 = vld [vmem:[%s13586_s8 + $0x40] sm:$0xff] }
0x152e   :  { %7215 = vmatpush.bf16.msrb.mxu1 %v10936_v53 }
0x153a   :  { %v7005_v60 = vpop.f32.mrf.mxu0  ;;  %v7033_v48 = vpop.f32.mrf.mxu1 }
0x153d   :  { %10569 = vmatmul.msk.bf16.vlgmr.msra.gmra.mxu0 %vm66_vm1, %v13126_v17 }
0x1542   :  { %v7007_v52 = vpop.f32.mrf.mxu0  ;;  %v7035_v28 = vpop.f32.mrf.mxu1 }
0x1543   :  { %v7014_v55 = vpack.c.bf16 %v7007_v52, %v7005_v60  ;;  %v7042_v49 = vpack.c.bf16 %v7035_v28, %v7033_v48  ;;  %v10963_v28 = vld [vmem:[%s13586_s8 + $0x118] sm:$0xff] }
0x1545   :  { %10381 = vmatmul.msk.bf16.vlgmr.msrb.gmra.mxu2 %vm683_vm3, %v7042_v49  ;;  %10399 = vmatmul.msk.bf16.vlgmr.msrb.gmra.mxu3 %vm683_vm3, %v7014_v55  ;;  %v10962_v49 = vld [vmem:[%s13586_s8 + $0x110] sm:$0xff] }
0x1546   :  { %7395 = vmatpush.bf16.msrb.mxu2 %v13309_v51 }
0x154a   :  { %7396 = vmatpush.bf16.msrb.mxu2 %v13306_v11  ;;  %v7010_v54 = vpop.f32.mrf.mxu0  ;;  %v7038_v17 = vpop.f32.mrf.mxu1 }
0x154b   :  { %v7015_v57 = vpack.c.bf16 %v7010_v54, %v7010_v54  ;;  %v7043_v40 = vpack.c.bf16 %v7038_v17, %v7038_v17 }
0x154d   :  { %10570 = vmatmul.msk.bf16.gmra.mxu0 %vm66_vm1, %v11294_v0 }
0x1552   :  { %v7012_v14 = vpop.f32.mrf.mxu0  ;;  %v7040_v32 = vpop.f32.mrf.mxu1 }
0x1553   :  { %v10961_v14 = vld [vmem:[%s13586_s8 + $0x108] sm:$0xff]  ;;  %v10958_v32 = vld [vmem:[%s13586_s8 + $0xf0] sm:$0xff] }
0x1555   :  { %10382 = vmatmul.msk.bf16.gmra.mxu2 %vm683_vm3, %v7043_v40  ;;  %10400 = vmatmul.msk.bf16.gmra.mxu3 %vm683_vm3, %v7015_v57  ;;  %v10959_v40 = vld [vmem:[%s13586_s8 + $0xf8] sm:$0xff] }
0x155a   :  { %v7158_v61 = vpop.f32.mrf.mxu0 }
0x1562   :  { %v7160_v35 = vpop.f32.mrf.mxu0 }
0x1563   :  { %v7167_v15 = vpack.c.bf16 %v7160_v35, %v7158_v61  ;;  %v10960_v61 = vld [vmem:[%s13586_s8 + $0x100] sm:$0xff] }
0x1565   :  { %10427 = vmatmul.msk.bf16.vlgmr.msrb.gmra.mxu1 %vm683_vm3, %v7167_v15  ;;  %10429 = vmatmul.msk.bf16.vlgmr.msra.gmra.mxu2 %vm66_vm1, %v13151_v5  ;;  %v10947_v5 = vld [vmem:[%s13586_s8 + $0x98] sm:$0xff] }
0x1566   :  { %7555 = vmatpush.bf16.msra.mxu2 %v13309_v51  ;;  %7372 = vmatpush.bf16.msra.mxu1 %v10947_v5 }
0x156a   :  { %7556 = vmatpush.bf16.msra.mxu2 %v13306_v11  ;;  %v7163_v0 = vpop.f32.mrf.mxu0 }
0x156b   :  { %v7168_v44 = vpack.c.bf16 %v7163_v0, %v7163_v0  ;;  %v10957_v0 = vld [vmem:[%s13586_s8 + $0xe8] sm:$0xff] }
0x1572   :  { %v7165_v24 = vpop.f32.mrf.mxu0 }
0x1573   :  { %v10956_v24 = vld [vmem:[%s13586_s8 + $0xe0] sm:$0xff] }
0x1575   :  { %10428 = vmatmul.msk.bf16.gmra.mxu1 %vm683_vm3, %v7168_v44  ;;  %10430 = vmatmul.msk.bf16.gmra.mxu2 %vm66_vm1, %v11196_v33  ;;  %v10946_v33 = vld [vmem:[%s13586_s8 + $0x90] sm:$0xff] }
0x1576   :  { %7373 = vmatpush.bf16.msra.mxu1 %v10946_v33 }
0x157a   :  { %v7318_v59 = vpop.f32.mrf.mxu0 }
0x1582   :  { %v7320_v22 = vpop.f32.mrf.mxu0 }
0x1583   :  { %v7327_v6 = vpack.c.bf16 %v7320_v22, %v7318_v59 }
0x1585   :  { %10485 = vmatmul.msk.bf16.vlgmr.msrb.gmra.mxu2 %vm66_vm1, %v13163_v63  ;;  %v10945_v63 = vld [vmem:[%s13586_s8 + $0x88] sm:$0xff] }
0x1586   :  { %7374 = vmatpush.bf16.msra.mxu1 %v10945_v63 }
0x158a   :  { %v7323_v39 = vpop.f32.mrf.mxu0 }
0x158b   :  { %v7328_v45 = vpack.c.bf16 %v7323_v39, %v7323_v39 }
0x1592   :  { %v7325_v1 = vpop.f32.mrf.mxu0 }
0x1595   :  { %10486 = vmatmul.msk.bf16.gmra.mxu2 %vm66_vm1, %v11226_v41  ;;  %v10943_v41 = vld [vmem:[%s13586_s8 + $0x78] sm:$0xff] }
0x1596   :  { %7292 = vmatpush.bf16.msra.mxu3 %v10943_v41 }
0x159a   :  { %v7478_v7 = vpop.f32.mrf.mxu0 }
0x15a2   :  { %v7480_v11 = vpop.f32.mrf.mxu0 }
0x15a3   :  { %v7487_v47 = vpack.c.bf16 %v7480_v11, %v7478_v7 }
0x15a5   :  { %10541 = vmatmul.msk.bf16.vlgmr.msra.gmra.mxu2 %vm66_vm1, %v13172_v43  ;;  %v10944_v43 = vld [vmem:[%s13586_s8 + $0x80] sm:$0xff] }
0x15a6   :  { %7375 = vmatpush.bf16.msra.mxu1 %v10944_v43 }
0x15a9   :  { %10483 = vmatmul.msk.bf16.vlgmr.msra.gmra.mxu1 %vm683_vm3, %v7327_v6 }
0x15aa   :  { %7532 = vmatpush.bf16.msrb.mxu1 %v10955_v42  ;;  %v7483_v58 = vpop.f32.mrf.mxu0 }
0x15ab   :  { %v7488_v53 = vpack.c.bf16 %v7483_v58, %v7483_v58 }
0x15ae   :  { %7533 = vmatpush.bf16.msrb.mxu1 %v10954_v23 }
0x15b2   :  { %7534 = vmatpush.bf16.msrb.mxu1 %v10953_v36  ;;  %v7485_v52 = vpop.f32.mrf.mxu0 }
0x15b5   :  { %10542 = vmatmul.msk.bf16.gmra.mxu2 %vm66_vm1, %v11263_v50  ;;  %v10942_v50 = vld [vmem:[%s13586_s8 + $0x70] sm:$0xff] }
0x15b6   :  { %7293 = vmatpush.bf16.msra.mxu3 %v10942_v50  ;;  %7535 = vmatpush.bf16.msrb.mxu1 %v10952_v37 }
0x15b9   :  { %10484 = vmatmul.msk.bf16.gmra.mxu1 %vm683_vm3, %v7328_v45 }
0x15ba   :  { %7294 = vmatpush.bf16.msra.mxu3 %v10941_v29  ;;  %7692 = vmatpush.bf16.msra.mxu1 %v10963_v28  ;;  %v7638_v57 = vpop.f32.mrf.mxu0 }
0x15be   :  { %7295 = vmatpush.bf16.msra.mxu3 %v10940_v30  ;;  %7693 = vmatpush.bf16.msra.mxu1 %v10962_v49 }
0x15c2   :  { %7452 = vmatpush.bf16.msrb.mxu3 %v10951_v4  ;;  %7694 = vmatpush.bf16.msra.mxu1 %v10961_v14  ;;  %v7640_v15 = vpop.f32.mrf.mxu0 }
0x15c3   :  { %v7647_v44 = vpack.c.bf16 %v7640_v15, %v7638_v57 }
0x15c6   :  { %7453 = vmatpush.bf16.msrb.mxu3 %v10950_v18  ;;  %7695 = vmatpush.bf16.msra.mxu1 %v10960_v61 }
0x15c8   :  { %v7092_v3 = vpop.f32.mrf.mxu2  ;;  %v7140_v10 = vpop.f32.mrf.mxu3 }
0x15c9   :  { %v7141_v16 = vadd.f32 %v7140_v10, %v7092_v3  ;;  %10539 = vmatmul.msk.bf16.vlgmr.msrb.gmra.mxu1 %vm683_vm3, %v7487_v47 }
0x15ca   :  { %7454 = vmatpush.bf16.msrb.mxu3 %v10949_v25  ;;  %v7643_v63 = vpop.f32.mrf.mxu0 }
0x15cb   :  { %v7648_v43 = vpack.c.bf16 %v7643_v63, %v7643_v63 }
0x15ce   :  { %7455 = vmatpush.bf16.msrb.mxu3 %v10948_v13 }
0x15d0   :  { %v7094_v26 = vpop.f32.mrf.mxu2  ;;  %v7142_v31 = vpop.f32.mrf.mxu3 }
0x15d1   :  { %v7143_v27 = vadd.f32 %v7142_v31, %v7094_v26 }
0x15d2   :  { %v7645_v10 = vpop.f32.mrf.mxu0 }
0x15d8   :  { %v7097_v34 = vpop.f32.mrf.mxu2  ;;  %v7145_v8 = vpop.f32.mrf.mxu3 }
0x15d9   :  { %v7146_v56 = vadd.f32 %v7145_v8, %v7097_v34  ;;  %10540 = vmatmul.msk.bf16.gmra.mxu1 %vm683_vm3, %v7488_v53 }
0x15e0   :  { %v7099_v9 = vpop.f32.mrf.mxu2  ;;  %v7147_v21 = vpop.f32.mrf.mxu3 }
0x15e2   :  { %v7217_v2 = vpop.f32.mrf.mxu1 }
0x15e3   :  { %v13427_v62 = vadd.f32 %v7217_v2, %v7141_v16 }
0x15e8   :  { %v7238_v20 = vpop.f32.mrf.mxu2 }
0x15e9   :  { %10595 = vmatmul.msk.bf16.vlgmr.msra.gmra.mxu1 %vm683_vm3, %v7647_v44 }
0x15ea   :  { %v7219_v51 = vpop.f32.mrf.mxu1 }
0x15eb   :  { %v13444_v12 = vadd.f32 %v7219_v51, %v7143_v27 }
0x15f0   :  { %v7240_v38 = vpop.f32.mrf.mxu2 }
0x15f1   :  { %v7247_v46 = vpack.c.bf16 %v7240_v38, %v7238_v20 }
0x15f2   :  { %v7222_v60 = vpop.f32.mrf.mxu1 }
0x15f3   :  { %v13450_v48 = vadd.f32 %v7222_v60, %v7146_v56  ;;  %10455 = vmatmul.msk.bf16.vlgmr.msra.gmra.mxu3 %vm683_vm3, %v7247_v46 }
0x15f4   :  { %7612 = vmatpush.bf16.msra.mxu3 %v10959_v40 }
0x15f8   :  { %v7243_v19 = vpop.f32.mrf.mxu2  ;;  %7613 = vmatpush.bf16.msra.mxu3 %v10958_v32 }
0x15f9   :  { %v7248_v17 = vpack.c.bf16 %v7243_v19, %v7243_v19  ;;  %10596 = vmatmul.msk.bf16.gmra.mxu1 %vm683_vm3, %v7648_v43 }
0x15fa   :  { %v7224_v55 = vpop.f32.mrf.mxu1 }
0x15fc   :  { %7614 = vmatpush.bf16.msra.mxu3 %v10957_v0 }
0x1600   :  { %v7245_v54 = vpop.f32.mrf.mxu2  ;;  %7615 = vmatpush.bf16.msra.mxu3 %v10956_v24 }
0x1603   :  { %10456 = vmatmul.msk.bf16.gmra.mxu3 %vm683_vm3, %v7248_v17 }
0x1608   :  { %v7398_v35 = vpop.f32.mrf.mxu2 }
0x1610   :  { %v7400_v5 = vpop.f32.mrf.mxu2 }
0x1611   :  { %v7407_v33 = vpack.c.bf16 %v7400_v5, %v7398_v35 }
0x1613   :  { %10511 = vmatmul.msk.bf16.vlgmr.msrb.gmra.mxu3 %vm683_vm3, %v7407_v33 }
0x1618   :  { %v7403_v59 = vpop.f32.mrf.mxu2 }
0x1619   :  { %v7408_v50 = vpack.c.bf16 %v7403_v59, %v7403_v59 }
0x1620   :  { %v7405_v41 = vpop.f32.mrf.mxu2 }
0x1623   :  { %10512 = vmatmul.msk.bf16.gmra.mxu3 %vm683_vm3, %v7408_v50 }
0x1626   :  { %v7377_v26 = vpop.f32.mrf.mxu1 }
0x1628   :  { %v7558_v3 = vpop.f32.mrf.mxu2 }
0x162e   :  { %v7379_v31 = vpop.f32.mrf.mxu1 }
0x1630   :  { %v7560_v16 = vpop.f32.mrf.mxu2 }
0x1631   :  { %v7567_v22 = vpack.c.bf16 %v7560_v16, %v7558_v3 }
0x1633   :  { %10567 = vmatmul.msk.bf16.vlgmr.msra.gmra.mxu3 %vm683_vm3, %v7567_v22 }
0x1636   :  { %v7382_v27 = vpop.f32.mrf.mxu1 }
0x1638   :  { %v7563_v6 = vpop.f32.mrf.mxu2 }
0x1639   :  { %v7568_v29 = vpack.c.bf16 %v7563_v6, %v7563_v6 }
0x163e   :  { %v7384_v39 = vpop.f32.mrf.mxu1 }
0x1640   :  { %v7565_v30 = vpop.f32.mrf.mxu2 }
0x1643   :  { %10568 = vmatmul.msk.bf16.gmra.mxu3 %vm683_vm3, %v7568_v29 }
0x1646   :  { %v7537_v34 = vpop.f32.mrf.mxu1 }
0x164e   :  { %v7539_v8 = vpop.f32.mrf.mxu1 }
0x1656   :  { %v7542_v42 = vpop.f32.mrf.mxu1 }
0x165e   :  { %v7544_v7 = vpop.f32.mrf.mxu1 }
0x1666   :  { %v7697_v37 = vpop.f32.mrf.mxu1 }
0x166e   :  { %v7699_v25 = vpop.f32.mrf.mxu1 }
0x1676   :  { %v7297_v45 = vpop.f32.mrf.mxu3  ;;  %v7702_v38 = vpop.f32.mrf.mxu1 }
0x1677   :  { %v7306_v56 = vadd.f32 %v7297_v45, %v13427_v62 }
0x1679   :  { %v7386_v1 = vadd.f32 %v7377_v26, %v7306_v56 }
0x167e   :  { %v7299_v23 = vpop.f32.mrf.mxu3 }
0x167f   :  { %v7307_v9 = vadd.f32 %v7299_v23, %v13444_v12  ;;  %v7704_v12 = vpop.f32.mrf.mxu1 }
0x1681   :  { %v7387_v21 = vadd.f32 %v7379_v31, %v7307_v9 }
0x1686   :  { %v7302_v2 = vpop.f32.mrf.mxu3 }
0x1687   :  { %v7308_v4 = vadd.f32 %v7302_v2, %v13450_v48 }
0x1689   :  { %v7388_v36 = vadd.f32 %v7382_v27, %v7308_v4 }
0x168e   :  { %v7304_v18 = vpop.f32.mrf.mxu3 }
0x1696   :  { %v7457_v20 = vpop.f32.mrf.mxu3 }
0x1697   :  { %v7466_v11 = vadd.f32 %v7457_v20, %v7386_v1  ;;  %v10600_v1 = vld [vmem:[%s13589_s12 + $0x8] sm:$0xff]  ;;  %v10982_v20 = vld [vmem:[%s13587_s9] ss:$0 sm:$0xff] }
0x1698   :  { %7841 = vmatpush.msrb.mxu0 %v10600_v1 }
0x1699   :  { %v7546_v51 = vadd.f32 %v7537_v34, %v7466_v11 }
0x169e   :  { %v7459_v47 = vpop.f32.mrf.mxu3 }
0x169f   :  { %v7467_v13 = vadd.f32 %v7459_v47, %v7387_v21 }
0x16a1   :  { %v7547_v62 = vadd.f32 %v7539_v8, %v7467_v13  ;;  %v10983_v13 = vld [vmem:[%s13588_s10] ss:$0 sm:$0xff] }
0x16a6   :  { %v7462_v46 = vpop.f32.mrf.mxu3 }
0x16a7   :  { %v7468_v58 = vadd.f32 %v7462_v46, %v7388_v36 }
0x16a9   :  { %v7548_v60 = vadd.f32 %v7542_v42, %v7468_v58 }
0x16ae   :  { %v7464_v19 = vpop.f32.mrf.mxu3 }
0x16b6   :  { %v7617_v53 = vpop.f32.mrf.mxu3 }
0x16b7   :  { %v7626_v52 = vadd.f32 %v7617_v53, %v7546_v51 }
0x16b9   :  { %v7706_v28 = vadd.f32 %v7697_v37, %v7626_v52 }
0x16bb   :  { %v7721_v49 = vmul.f32 %v7706_v28, %v7706_v28  ;;  %v7709_v17 = vsel %vm138_vm2, %v7706_v28, 0.0 }
0x16bd   :  { %v7724_v32 = vsel %vm138_vm2, %v7721_v49, 0.0  ;;  %v10611_v49 = vld [vmem:[%s13590_s11 + $0x20] sm:$0xff] }
0x16be   :  { %v7619_v48 = vpop.f32.mrf.mxu3 }
0x16bf   :  { %v7627_v55 = vadd.f32 %v7619_v48, %v7547_v62  ;;  %v10598_v48 = vld [vmem:[%s13590_s11 + $0x8] sm:$0xff] }
0x16c1   :  { %v7707_v54 = vadd.f32 %v7699_v25, %v7627_v55  ;;  %v10603_v55 = vld [vmem:[%s13590_s11 + $0x10] sm:$0xff] }
0x16c3   :  { %v7710_v57 = vsel %vm138_vm2, %v7707_v54, 0.0  ;;  %v7722_v40 = vmul.f32 %v7707_v54, %v7707_v54 }
0x16c4   :  { %v7711_v14 = vadd.f32 %v7710_v57, %v7709_v17  ;;  %v10619_v17 = vld [vmem:[%s13590_s11 + $0x30] sm:$0xff] }
0x16c5   :  { %v7725_v61 = vsel %vm138_vm2, %v7722_v40, 0.0  ;;  %v10605_v57 = vld [vmem:[%s13589_s12 + $0x10] sm:$0xff]  ;;  %v10627_v40 = vld [vmem:[%s13590_s11 + $0x40] sm:$0xff] }
0x16c6   :  { %v7726_v35 = vadd.f32 %v7725_v61, %v7724_v32  ;;  %v7622_v15 = vpop.f32.mrf.mxu3  ;;  %v10607_v61 = vld [vmem:[%s13590_s11 + $0x18] sm:$0xff] }
0x16c7   :  { %v7628_v0 = vadd.f32 %v7622_v15, %v7548_v60  ;;  %v10615_v15 = vld [vmem:[%s13590_s11 + $0x28] sm:$0xff] }
0x16c9   :  { %v7708_v44 = vadd.f32 %v7702_v38, %v7628_v0  ;;  %v10623_v0 = vld [vmem:[%s13590_s11 + $0x38] sm:$0xff] }
0x16cb   :  { %v7712_v24 = vsel %vm138_vm2, %v7708_v44, 0.0  ;;  %v7723_v5 = vmul.f32 %v7708_v44, %v7708_v44 }
0x16cc   :  { %v7713_v33 = vadd.f32 %v7712_v24, %v7711_v14  ;;  %v10613_v24 = vld [vmem:[%s13589_s12 + $0x20] sm:$0xff] }
0x16cd   :  { %v7727_v59 = vsel %vm138_vm2, %v7723_v5, 0.0  ;;  %v10609_v5 = vld [vmem:[%s13589_s12 + $0x18] sm:$0xff] }
0x16ce   :  { %v7714_v41 = vrot.slane %v7713_v33, 4  ;;  %v7728_v63 = vadd.f32 %v7727_v59, %v7726_v35  ;;  %v7624_v50 = vpop.f32.mrf.mxu3 }
0x16d0   :  { %v7715_v43 = vadd.f32 %v7714_v41, %v7713_v33  ;;  %v7729_v3 = vrot.slane %v7728_v63, 4  ;;  %v10621_v33 = vld [vmem:[%s13589_s12 + $0x30] sm:$0xff]  ;;  %v10617_v41 = vld [vmem:[%s13589_s12 + $0x28] sm:$0xff] }
0x16d2   :  { %v7716_v10 = vrot.slane %v7715_v43, 2  ;;  %v7730_v16 = vadd.f32 %v7729_v3, %v7728_v63  ;;  %v10629_v63 = vld [vmem:[%s13589_s12 + $0x40] sm:$0xff]  ;;  %v10625_v3 = vld [vmem:[%s13589_s12 + $0x38] sm:$0xff] }
0x16d4   :  { %v7717_v22 = vadd.f32 %v7716_v10, %v7715_v43  ;;  %v7731_v6 = vrot.slane %v7730_v16, 2 }
0x16d6   :  { %v7718_v29 = vrot.slane %v7717_v22, 1  ;;  %v7732_v30 = vadd.f32 %v7731_v6, %v7730_v16 }
0x16d8   :  { %v7719_v26 = vadd.f32 %v7718_v29, %v7717_v22  ;;  %v7733_v31 = vrot.slane %v7732_v30, 1 }
0x16da   :  { %v7720_v27 = vmul.f32 0.055555556, %v7719_v26  ;;  %v7734_v39 = vadd.f32 %v7733_v31, %v7732_v30 }
0x16dc   :  { %v7735_v34 = vmul.f32 0.055555556, %v7734_v39  ;;  %v7736_v8 = vmul.f32 %v7720_v27, %v7720_v27  ;;  %v7739_v45 = vsub.f32 %v7706_v28, %v7720_v27  ;;  %v7740_v56 = vsub.f32 %v7707_v54, %v7720_v27  ;;  %v7771_v28 = vld [vmem:[%s13590_s11] sm:$0xff] }
0x16dd   :  { %v7741_v42 = vsub.f32 %v7708_v44, %v7720_v27  ;;  %v7795_v54 = vld [vmem:[%s13589_s12] sm:$0xff] }
0x16de   :  { %v7737_v23 = vsub.f32 %v7735_v34, %v7736_v8  ;;  %7864 = vmatpush.msrb.mxu1 %v7795_v54 }
0x16e0   :  { %v7738_v9 = vmax.f32 %v7737_v23, 0.0  ;;  %7965 = vmatpush.msra.mxu1 %v10609_v5 }
0x16e2   :  { %v7742_v21 = vadd.f32 1e-05, %v7738_v9 }
0x16e4   :  { %11003 = vrsqrt.f32 %v7742_v21  ;;  %vm7749_vm3 = vweird.f32 %v7742_v21 }
0x16ea   :  { %v11004_v7 = vpop.eup %11003 }
0x16eb   :  { %v7744_v2 = vmul.f32 %v11004_v7, %v7742_v21  ;;  %vm7750_vm0 = vweird.f32 %v11004_v7  ;;  %v10984_v21 = vld [vmem:[%s13591_s13] ss:$0 sm:$0xff] }
0x16ec   :  { %vm7751_vm7 = vmor %vm7749_vm3, %vm7750_vm0 }
0x16ed   :  { %v7745_v4 = vmul.f32 %v11004_v7, %v7744_v2  ;;  %v8231_v2 = vlaneseq }
0x16ef   :  { %v7746_v36 = vmul.f32 0.5, %v7745_v4 }
0x16f1   :  { %v7747_v18 = vsub.f32 1.5, %v7746_v36  ;;  %v8232_v36 = vand.u32 127, %v8231_v2 }
0x16f3   :  { %v7748_v37 = vmul.f32 %v11004_v7, %v7747_v18 }
0x16f5   :  { %v7752_v11 = vsel %vm7751_vm7, %v11004_v7, %v7748_v37 }
0x16f6   :  { %v7753_v25 = vmul.f32 %v7752_v11, %v7739_v45  ;;  %v7754_v51 = vmul.f32 %v7752_v11, %v7740_v56  ;;  %v7755_v47 = vmul.f32 %v7752_v11, %v7741_v42 }
0x16f8   :  { %v7759_v62 = vmul.f32 %v10982_v20, %v7753_v25  ;;  %v7760_v38 = vmul.f32 %v10982_v20, %v7754_v51  ;;  %v7761_v46 = vmul.f32 %v10982_v20, %v7755_v47 }
0x16fa   :  { %v7766_v58 = vadd.f32 %v10983_v13, %v7760_v38  ;;  %v7767_v60 = vadd.f32 %v10983_v13, %v7761_v46  ;;  %v7765_v12 = vadd.f32 %v10983_v13, %v7759_v62 }
0x16fc   :  { %v7770_v19 = vmax.f32 %v7767_v60, 0.0  ;;  %v7769_v53 = vmax.f32 %v7766_v58, 0.0  ;;  %v7768_v52 = vmax.f32 %v7765_v12, 0.0 }
0x16fe   :  { %7788 = vmatpush.msrb.mxu2 %v7770_v19  ;;  %7814 = vmatpush.msrb.mxu3 %v7770_v19 }
0x16ff   :  { %7938 = vmatpush.msra.mxu0 %v7770_v19 }
0x1700   :  { %7789 = vmatpush.msrb.mxu2 %v7769_v53  ;;  %7815 = vmatpush.msrb.mxu3 %v7769_v53 }
0x1701   :  { %7939 = vmatpush.msra.mxu0 %v7769_v53 }
0x1702   :  { %7790 = vmatpush.msrb.mxu2 %v7768_v52  ;;  %7816 = vmatpush.msrb.mxu3 %v7768_v52 }
0x1703   :  { %7940 = vmatpush.msra.mxu0 %v7768_v52  ;;  %10597 = vmatmul.msk.f32.vlgmr.msrb.gmra.mxu2 %vm66_vm1, %v7771_v28 }
0x1704   :  { %10599 = vmatmul.msk.f32.vlgmr.msrb.gmra.mxu3 %vm66_vm1, %v10598_v48  ;;  %7887 = vmatpush.msra.mxu2 %v7770_v19 }
0x1705   :  { %7914 = vmatpush.msra.mxu3 %v10605_v57 }
0x1706   :  { %7888 = vmatpush.msra.mxu2 %v7769_v53 }
0x1707   :  { %8016 = vmatpush.msrb.mxu3 %v10613_v24 }
0x1708   :  { %7889 = vmatpush.msra.mxu2 %v7768_v52 }
0x170a   :  { %7989 = vmatpush.msrb.mxu2 %v7770_v19 }
0x170b   :  { %10604 = vmatmul.msk.f32.vlgmr.msra.gmra.mxu2 %vm66_vm1, %v10603_v55 }
0x170c   :  { %7990 = vmatpush.msrb.mxu2 %v7769_v53 }
0x170e   :  { %7991 = vmatpush.msrb.mxu2 %v7768_v52 }
0x1710   :  { %8091 = vmatpush.msra.mxu2 %v7770_v19 }
0x1712   :  { %8092 = vmatpush.msra.mxu2 %v7769_v53 }
0x1713   :  { %10612 = vmatmul.msk.f32.vlgmr.msrb.gmra.mxu2 %vm66_vm1, %v10611_v49 }
0x1714   :  { %8093 = vmatpush.msra.mxu2 %v7768_v52 }
0x1716   :  { %8193 = vmatpush.msrb.mxu2 %v7770_v19 }
0x1718   :  { %8194 = vmatpush.msrb.mxu2 %v7769_v53 }
0x171a   :  { %8195 = vmatpush.msrb.mxu2 %v7768_v52 }
0x171b   :  { %10620 = vmatmul.msk.f32.vlgmr.msra.gmra.mxu2 %vm66_vm1, %v10619_v17 }
0x1723   :  { %10628 = vmatmul.msk.f32.vlgmr.msrb.gmra.mxu2 %vm66_vm1, %v10627_v40 }
0x1786   :  { %v7792_v14 = vpop.f32.mrf.mxu2 }
0x1787   :  { %v7818_v32 = vpop.f32.mrf.mxu3  ;;  %10602 = vmatmul.msk.f32.vlgmr.msrb.gmra.mxu1 %vm138_vm2, %v7792_v14 }
0x1788   :  { %10601 = vmatmul.msk.f32.vlgmr.msrb.gmra.mxu0 %vm138_vm2, %v7818_v32  ;;  %8067 = vmatpush.msrb.mxu1 %v10617_v41 }
0x1789   :  { %8040 = vmatpush.msrb.mxu0 %v7770_v19 }
0x178b   :  { %8041 = vmatpush.msrb.mxu0 %v7769_v53 }
0x178d   :  { %8042 = vmatpush.msrb.mxu0 %v7768_v52 }
0x178e   :  { %v7891_v35 = vpop.f32.mrf.mxu2 }
0x178f   :  { %10606 = vmatmul.msk.f32.vlgmr.msra.gmra.mxu3 %vm138_vm2, %v7891_v35 }
0x1790   :  { %10608 = vmatmul.msk.f32.vlgmr.msra.gmra.mxu0 %vm66_vm1, %v10607_v61  ;;  %8118 = vmatpush.msra.mxu3 %v10621_v33 }
0x1791   :  { %8142 = vmatpush.msra.mxu0 %v7770_v19 }
0x1793   :  { %8143 = vmatpush.msra.mxu0 %v7769_v53 }
0x1795   :  { %8144 = vmatpush.msra.mxu0 %v7768_v52 }
0x1796   :  { %v7993_v44 = vpop.f32.mrf.mxu2 }
0x1797   :  { %10614 = vmatmul.msk.f32.vlgmr.msrb.gmra.mxu3 %vm138_vm2, %v7993_v44 }
0x1798   :  { %10616 = vmatmul.msk.f32.vlgmr.msrb.gmra.mxu0 %vm66_vm1, %v10615_v15  ;;  %8220 = vmatpush.msrb.mxu3 %v10629_v63 }
0x179e   :  { %v8095_v59 = vpop.f32.mrf.mxu2 }
0x179f   :  { %10622 = vmatmul.msk.f32.vlgmr.msra.gmra.mxu3 %vm138_vm2, %v8095_v59 }
0x17a0   :  { %10624 = vmatmul.msk.f32.vlgmr.msra.gmra.mxu0 %vm66_vm1, %v10623_v0  ;;  %vm8233_vm1 = vcmp.eq.s32.totalorder %v8232_v36, 9 }
0x17a6   :  { %v8197_v50 = vpop.f32.mrf.mxu2 }
0x17a7   :  { %10630 = vmatmul.msk.f32.vlgmr.msrb.gmra.mxu3 %vm138_vm2, %v8197_v50 }
0x1804   :  { %v7866_v29 = vpop.f32.mrf.mxu1 }
0x1805   :  { %v7843_v43 = vpop.f32.mrf.mxu0 }
0x1806   :  { %v7867_v31 = vadd.f32 %v7866_v29, %v7843_v43 }
0x180d   :  { %v7942_v10 = vpop.f32.mrf.mxu0 }
0x180e   :  { %10610 = vmatmul.msk.f32.vlgmr.msra.gmra.mxu1 %vm138_vm2, %v7942_v10 }
0x180f   :  { %8169 = vmatpush.msra.mxu1 %v10625_v3 }
0x1812   :  { %v7916_v6 = vpop.f32.mrf.mxu3 }
0x1813   :  { %v7919_v27 = vadd.f32 %v7916_v6, %v7867_v31 }
0x1815   :  { %v8044_v16 = vpop.f32.mrf.mxu0 }
0x1816   :  { %10618 = vmatmul.msk.f32.vlgmr.msrb.gmra.mxu1 %vm138_vm2, %v8044_v16 }
0x181a   :  { %v8018_v30 = vpop.f32.mrf.mxu3 }
0x181d   :  { %v8146_v22 = vpop.f32.mrf.mxu0 }
0x181e   :  { %10626 = vmatmul.msk.f32.vlgmr.msra.gmra.mxu1 %vm138_vm2, %v8146_v22 }
0x1822   :  { %v8120_v34 = vpop.f32.mrf.mxu3 }
0x182a   :  { %v8222_v23 = vpop.f32.mrf.mxu3 }
0x188b   :  { %v7967_v26 = vpop.f32.mrf.mxu1 }
0x188c   :  { %v7970_v39 = vadd.f32 %v7967_v26, %v7919_v27 }
0x188e   :  { %v8021_v45 = vadd.f32 %v8018_v30, %v7970_v39 }
0x1893   :  { %v8069_v8 = vpop.f32.mrf.mxu1 }
0x1894   :  { %v8072_v56 = vadd.f32 %v8069_v8, %v8021_v45 }
0x1896   :  { %v8123_v1 = vadd.f32 %v8120_v34, %v8072_v56 }
0x189b   :  { %v8171_v42 = vpop.f32.mrf.mxu1 }
0x189c   :  { %v8174_v9 = vadd.f32 %v8171_v42, %v8123_v1 }
0x189e   :  { %v8225_v7 = vadd.f32 %v8222_v23, %v8174_v9 }
0x18a0   :  { %v8230_v4 = vadd.f32 %v10984_v21, %v8225_v7 }
0x18a2   :  { %11005 = vtanh.f32 %v8230_v4 }
0x18a8   :  { %v11006_v18 = vpop.eup %11005 }
0x18a9   :  { %v8235_v37 = vsel %vm8233_vm1, %v11006_v18, %v8230_v4 }
0x18aa   :  { %8236 = vst [vmem:[%s13592_s14] sm:$0xff] %v8235_v37 }

</bundles_post_ra>
